<compile_context>
chip_gen: v7x
topology: tpu7x:2x2x1
jax: 0.10.0
libtpu: 0.0.40
codegen_flags: <defaults>
</compile_context>

<pallas_src>
import functools
import math

import jax
import jax.numpy as jnp
from jax.experimental import pallas as pl
from jax.experimental.pallas import tpu as pltpu


# ----------------------------------------------------------------------------
# Kernel A: per-frame backbone  (im2col matmul + bias + ReLU + global-average-pool)
# Grid is (n_frames,) and marked "parallel" -> pipelined per-frame DMA, v7x megacore-shardable.
# ----------------------------------------------------------------------------
def _backbone_kernel(patches_ref, w_ref, b_ref, out_ref):
    # (hw, 9*Cin) bf16 @ (9*Cin, F) bf16 -> f32 on the MXU.
    conv = jnp.dot(patches_ref[...], w_ref[...], preferred_element_type=jnp.float32)
    conv = jnp.maximum(conv + b_ref[...], 0.0)                   # bias + ReLU (VPU, f32)
    # Global average pool: a single sublane reduction over the hw rows.
    out_ref[...] = jnp.mean(conv, axis=0, keepdims=True)        # (1, F) f32


def _lane_pad(v, width):
    """Zero-pad the last (lane) dim of a value up to `width` (no-op when already that width)."""
    extra = width - v.shape[-1]
    if extra == 0:
        return v
    return jnp.concatenate([v, jnp.zeros(v.shape[:-1] + (extra,), v.dtype)], axis=-1)


# ----------------------------------------------------------------------------
# Kernel B: stacked LSTM over the flattened (time-major, then batch) sequence + dropout + FC.
# Grid-less; the whole (tiny) feature sequence and weights live in VMEM.
# ----------------------------------------------------------------------------
def _lstm_head_kernel(feats_ref, wih_ref, whh_ref, b_ref, mask_ref, fcw_ref, fcb_ref,
                      out_ref, seq_ref, *,
                      n_frames, n_layers, hidden, feat, in_pad, last_bs):
    # Stage the backbone features as the layer-0 input sequence in the VMEM scratch.
    seq_ref[...] = _lane_pad(feats_ref[...], in_pad)             # (L, in_pad) f32

    outs_tail = []                                               # top-layer h at the final timestep
    for layer in range(n_layers):
        base = layer * 4                                         # gate order i, f, g, o
        x_bf = seq_ref[...].astype(jnp.bfloat16)                 # (L, in_pad)

        # Hoisted per-gate input projections (+ combined b_ih + b_hh): off the serial path.
        xp = [jnp.dot(x_bf, wih_ref[base + g], preferred_element_type=jnp.float32)
              + b_ref[base + g]
              for g in range(4)]                                 # 4 x (L, hidden) f32

        # Recurrent weights loaded once per layer; stay resident across the unrolled steps.
        whh = [whh_ref[base + g] for g in range(4)]              # 4 x (hidden, hidden) bf16

        h = jnp.zeros((1, hidden), jnp.float32)
        c = jnp.zeros((1, hidden), jnp.float32)
        for t in range(n_frames):                                # statically unrolled recurrence
            hb = h.astype(jnp.bfloat16)
            i_g = jax.nn.sigmoid(xp[0][t:t + 1, :] +
                                 jnp.dot(hb, whh[0], preferred_element_type=jnp.float32))
            f_g = jax.nn.sigmoid(xp[1][t:t + 1, :] +
                                 jnp.dot(hb, whh[1], preferred_element_type=jnp.float32))
            g_g = jnp.tanh(xp[2][t:t + 1, :] +
                           jnp.dot(hb, whh[2], preferred_element_type=jnp.float32))
            o_g = jax.nn.sigmoid(xp[3][t:t + 1, :] +
                                 jnp.dot(hb, whh[3], preferred_element_type=jnp.float32))
            c = f_g * c + i_g * g_g
            h = o_g * jnp.tanh(c)
            if layer + 1 < n_layers:
                # Next layer's input row goes straight into the VMEM sequence scratch
                # (no Python-list accumulation + 16-way concat).
                seq_ref[t:t + 1, :] = _lane_pad(h, in_pad)
            elif t >= n_frames - last_bs:
                outs_tail.append(h)                              # rows (ts-1)*bs + b, b = 0..bs-1

    # ---- Head: dropout (precomputed inverted mask) + fully-connected classifier ----
    last = outs_tail[0] if last_bs == 1 else jnp.concatenate(outs_tail, axis=0)   # (bs, hidden)
    dropped = (last * mask_ref[...]).astype(jnp.bfloat16)
    logits = (jnp.dot(dropped, fcw_ref[...], preferred_element_type=jnp.float32)
              + fcb_ref[...])
    out_ref[...] = logits.astype(out_ref.dtype)


# ----------------------------------------------------------------------------
# Wrapper: layout plumbing (im2col in bf16) + two pallas_calls
# ----------------------------------------------------------------------------
def lrcn_forward(packed, x, dropout_mask):
    bs, ts, c, h, w = x.shape
    L = ts * bs
    hw = h * w
    feat = packed["conv_w"].shape[1]
    hidden = packed["whh"].shape[2]
    n_layers = packed["whh"].shape[0] // 4
    in_pad = packed["wih"].shape[1]
    n_classes = packed["fc_b"].shape[1]

    # Per-frame im2col (bf16), frame rows ordered time-major then batch (row l = t*bs + b) —
    # exactly the order the PyTorch loop feeds frames through base_model and the LSTM.
    frames = jnp.transpose(x, (1, 0, 2, 3, 4)).reshape(L, c, h, w)
    frames = jnp.transpose(frames, (0, 2, 3, 1)).astype(jnp.bfloat16)        # NHWC bf16
    padded = jnp.pad(frames, ((0, 0), (1, 1), (1, 1), (0, 0)))               # conv padding=1
    taps = [padded[:, dy:dy + h, dx:dx + w, :] for dy in range(3) for dx in range(3)]
    patches = jnp.concatenate(taps, axis=-1).reshape(L, hw, 9 * c)

    # ---- Kernel A: backbone, parallel grid over frames ----
    feats3 = pl.pallas_call(
        _backbone_kernel,
        out_shape=jax.ShapeDtypeStruct((L, 1, feat), jnp.float32),
        grid=(L,),
        in_specs=[pl.BlockSpec((None, hw, 9 * c), lambda f: (f, 0, 0)),
                  pl.BlockSpec((9 * c, feat), lambda f: (0, 0)),
                  pl.BlockSpec((1, feat), lambda f: (0, 0))],
        out_specs=pl.BlockSpec((None, 1, feat), lambda f: (f, 0, 0)),
        compiler_params=pltpu.CompilerParams(
            dimension_semantics=("parallel",),
            vmem_limit_bytes=32 * 1024 * 1024),
    )(patches, packed["conv_w"], packed["conv_b"])
    feats = feats3.reshape(L, feat)

    # ---- Kernel B: stacked LSTM (batch-as-sequence) + dropout + FC ----
    kernel = functools.partial(_lstm_head_kernel, n_frames=L, n_layers=n_layers,
                               hidden=hidden, feat=feat, in_pad=in_pad, last_bs=bs)
    vmem = pl.BlockSpec(memory_space=pltpu.MemorySpace.VMEM)
    return pl.pallas_call(
        kernel,
        out_shape=jax.ShapeDtypeStruct((bs, n_classes), jnp.float32),
        in_specs=[vmem] * 7,
        out_specs=vmem,
        scratch_shapes=[pltpu.VMEM((L, in_pad), jnp.float32)],
        compiler_params=pltpu.CompilerParams(vmem_limit_bytes=32 * 1024 * 1024),
    )(feats, packed["wih"], packed["whh"], packed["lstm_b"],
      dropout_mask.astype(jnp.float32), packed["fc_w"], packed["fc_b"])


# ----------------------------------------------------------------------------
# Parameter init (PyTorch-style shapes) and packing to the per-gate / bf16 kernel layout
# ----------------------------------------------------------------------------
def init_params(key, c, feat, hidden, n_layers, n_classes):
    ks = jax.random.split(key, 9)

    def u(k, shape, bound):
        return jax.random.uniform(k, shape, jnp.float32, -bound, bound)

    kc = 1.0 / math.sqrt(9.0 * c)
    kl = 1.0 / math.sqrt(hidden)
    return {
        "conv_w": u(ks[0], (9 * c, feat), kc),                # stand-in conv3x3 weight (taps*Cin, F)
        "conv_b": u(ks[1], (1, feat), kc),
        "wih0_t": u(ks[2], (feat, 4 * hidden), kl),           # layer-0 W_ih^T, gate order i,f,g,o
        "wihr_t": u(ks[3], (max(n_layers - 1, 1), hidden, 4 * hidden), kl),
        "whh_t": u(ks[4], (n_layers, hidden, 4 * hidden), kl),
        "b_ih": u(ks[5], (n_layers, 1, 4 * hidden), kl),
        "b_hh": u(ks[6], (n_layers, 1, 4 * hidden), kl),
        "fc_w_t": u(ks[7], (hidden, n_classes), kl),
        "fc_b": u(ks[8], (1, n_classes), kl),
    }


def pack_params(params, *, feat, hidden, n_layers):
    """Split weights per gate (i,f,g,o) at native hidden width, zero-pad layer-input rows to a
    common K width, and cast MXU operands to bf16 (accumulation stays f32 in-kernel)."""
    in_pad = max(feat, hidden)

    def split_gates(wm):
        return jnp.split(wm, 4, axis=-1)

    def pad_k(wm, k):
        return jnp.pad(wm, ((0, in_pad - k), (0, 0)))

    wih_blocks, whh_blocks, b_blocks = [], [], []
    for layer in range(n_layers):
        w_ih = params["wih0_t"] if layer == 0 else params["wihr_t"][layer - 1]
        k_in = feat if layer == 0 else hidden
        bias = params["b_ih"][layer] + params["b_hh"][layer]
        for g_ih, g_hh, g_b in zip(split_gates(w_ih),
                                   split_gates(params["whh_t"][layer]),
                                   split_gates(bias)):
            wih_blocks.append(pad_k(g_ih, k_in))
            whh_blocks.append(g_hh)
            b_blocks.append(g_b)

    return {
        "conv_w": params["conv_w"].astype(jnp.bfloat16),
        "conv_b": params["conv_b"],
        "wih": jnp.stack(wih_blocks).astype(jnp.bfloat16),    # (n_layers*4, in_pad, hidden)
        "whh": jnp.stack(whh_blocks).astype(jnp.bfloat16),    # (n_layers*4, hidden, hidden)
        "lstm_b": jnp.stack(b_blocks),                        # (n_layers*4, 1, hidden) f32
        "fc_w": params["fc_w_t"].astype(jnp.bfloat16),        # (hidden, n_classes)
        "fc_b": params["fc_b"],
    }


if __name__ == "__main__":
    bs, ts, c, h, w = 2, 8, 3, 16, 16
    feat, hidden, n_layers, n_classes = 32, 32, 2, 8
    dropout_rate = 0.25

    key = jax.random.PRNGKey(0)
    k_x, k_p, k_d = jax.random.split(key, 3)

    x = jax.random.normal(k_x, (bs, ts, c, h, w), jnp.float32)
    raw_params = init_params(k_p, c, feat, hidden, n_layers, n_classes)
    packed = pack_params(raw_params, feat=feat, hidden=hidden, n_layers=n_layers)

    # Training-mode inverted dropout mask (nn.Dropout), drawn deterministically from jax.random.
    keep = jax.random.bernoulli(k_d, 1.0 - dropout_rate, (bs, hidden))
    dropout_mask = keep.astype(jnp.float32) / (1.0 - dropout_rate)

    logits = jax.jit(lrcn_forward)(packed, x, dropout_mask)
    jax.block_until_ready(logits)
    assert logits.shape == (bs, n_classes), logits.shape
    assert bool(jnp.all(jnp.isfinite(logits)))
    print("KERNEL_OK")
</pallas_src>

<mosaic_0001>
module attributes {stable_mosaic.version = 11 : i64} {
  func.func @_backbone_kernel(%arg0: i32, %arg1: memref<1x256x27xbf16, #tpu.memory_space<vmem>>, %arg2: memref<27x32xbf16, #tpu.memory_space<vmem>>, %arg3: memref<1x32xf32, #tpu.memory_space<vmem>>, %arg4: memref<1x1x32xf32, #tpu.memory_space<vmem>>) attributes {dimension_semantics = [#tpu.dimension_semantics<parallel>], iteration_bounds = array<i64: 16>, scalar_prefetch = 0 : i64, scratch_operands = 0 : i64, tpu.core_type = #tpu.core_type<tc>, window_params = [{transform_indices = @transform_0, window_bounds = array<i64: 1, 256, 27>}, {pipeline_mode = #tpu.pipeline_mode<synchronous>, transform_indices = @transform_1, window_bounds = array<i64: 27, 32>}, {pipeline_mode = #tpu.pipeline_mode<synchronous>, transform_indices = @transform_2, window_bounds = array<i64: 1, 32>}, {transform_indices = @transform_3, window_bounds = array<i64: 1, 1, 32>}]} {
    %c0 = arith.constant 0 : index
    %c0_0 = arith.constant 0 : index
    %c0_1 = arith.constant 0 : index
    %0 = vector.load %arg1[%c0, %c0_0, %c0_1] : memref<1x256x27xbf16, #tpu.memory_space<vmem>>, vector<1x256x27xbf16>
    %1 = vector.shape_cast %0 : vector<1x256x27xbf16> to vector<256x27xbf16>
    %c0_2 = arith.constant 0 : index
    %c0_3 = arith.constant 0 : index
    %2 = vector.load %arg2[%c0_2, %c0_3] : memref<27x32xbf16, #tpu.memory_space<vmem>>, vector<27x32xbf16>
    %cst = arith.constant dense<0.000000e+00> : vector<256x32xf32>
    %3 = tpu.matmul %1, %2, %cst {dimension_numbers = #tpu.dot_dimension_numbers<[1], [0], [0], [1], [0, 0, 1, 1], [], []>} : vector<256x27xbf16>, vector<27x32xbf16>, vector<256x32xf32> -> vector<256x32xf32>
    %c0_4 = arith.constant 0 : index
    %c0_5 = arith.constant 0 : index
    %4 = vector.load %arg3[%c0_4, %c0_5] : memref<1x32xf32, #tpu.memory_space<vmem>>, vector<1x32xf32>
    %5 = vector.broadcast %4 : vector<1x32xf32> to vector<256x32xf32>
    %6 = arith.addf %3, %5 : vector<256x32xf32>
    %cst_6 = arith.constant 0.000000e+00 : f32
    %7 = vector.broadcast %cst_6 : f32 to vector<256x32xf32>
    %8 = arith.maximumf %6, %7 : vector<256x32xf32>
    %cst_7 = arith.constant dense<0.000000e+00> : vector<32xf32>
    %9 = vector.multi_reduction <add>, %8, %cst_7 [0] : vector<256x32xf32> to vector<32xf32>
    %10 = vector.shape_cast %9 : vector<32xf32> to vector<1x32xf32>
    %cst_8 = arith.constant 2.560000e+02 : f32
    %11 = vector.broadcast %cst_8 : f32 to vector<1x32xf32>
    %12 = arith.divf %10, %11 : vector<1x32xf32>
    %c0_9 = arith.constant 0 : index
    %c0_10 = arith.constant 0 : index
    %c0_11 = arith.constant 0 : index
    %13 = vector.load %arg4[%c0_9, %c0_10, %c0_11] : memref<1x1x32xf32, #tpu.memory_space<vmem>>, vector<1x1x32xf32>
    %14 = vector.shape_cast %13 : vector<1x1x32xf32> to vector<1x32xf32>
    %15 = vector.shape_cast %12 : vector<1x32xf32> to vector<1x1x32xf32>
    tpu.vector_store %arg4[%c0_9, %c0_10, %c0_11], %15 {strides = array<i32>} : memref<1x1x32xf32, #tpu.memory_space<vmem>>, vector<1x1x32xf32>,
    return
  }
  func.func @transform_0(%arg0: i32) -> (i32, i32, i32) {
    %c0_i32 = arith.constant 0 : i32
    %c0_i32_0 = arith.constant 0 : i32
    %c0_i32_1 = arith.constant 0 : i32
    return %arg0, %c0_i32, %c0_i32_0 : i32, i32, i32
  }
  func.func @transform_1(%arg0: i32) -> (i32, i32) {
    %c0_i32 = arith.constant 0 : i32
    %c0_i32_0 = arith.constant 0 : i32
    %c0_i32_1 = arith.constant 0 : i32
    return %c0_i32, %c0_i32_0 : i32, i32
  }
  func.func @transform_2(%arg0: i32) -> (i32, i32) {
    %c0_i32 = arith.constant 0 : i32
    %c0_i32_0 = arith.constant 0 : i32
    %c0_i32_1 = arith.constant 0 : i32
    return %c0_i32, %c0_i32_0 : i32, i32
  }
  func.func @transform_3(%arg0: i32) -> (i32, i32, i32) {
    %c0_i32 = arith.constant 0 : i32
    %c0_i32_0 = arith.constant 0 : i32
    %c0_i32_1 = arith.constant 0 : i32
    return %arg0, %c0_i32, %c0_i32_0 : i32, i32, i32
  }
}

module attributes {stable_mosaic.version = 11 : i64} {
  func.func @_lstm_head_kernel(%arg0: memref<16x32xf32, #tpu.memory_space<vmem>>, %arg1: memref<8x32x32xbf16, #tpu.memory_space<vmem>>, %arg2: memref<8x32x32xbf16, #tpu.memory_space<vmem>>, %arg3: memref<8x1x32xf32, #tpu.memory_space<vmem>>, %arg4: memref<2x32xf32, #tpu.memory_space<vmem>>, %arg5: memref<32x8xbf16, #tpu.memory_space<vmem>>, %arg6: memref<1x8xf32, #tpu.memory_space<vmem>>, %arg7: memref<2x8xf32, #tpu.memory_space<vmem>>, %arg8: memref<16x32xf32, #tpu.memory_space<vmem>>) attributes {dimension_semantics = [], scalar_prefetch = 0 : i64, scratch_operands = 1 : i64, tpu.core_type = #tpu.core_type<tc>} {
    %c0 = arith.constant 0 : index
    %c0_0 = arith.constant 0 : index
    %0 = vector.load %arg0[%c0, %c0_0] : memref<16x32xf32, #tpu.memory_space<vmem>>, vector<16x32xf32>
    %c0_1 = arith.constant 0 : index
    %c0_2 = arith.constant 0 : index
    %1 = vector.load %arg8[%c0_1, %c0_2] : memref<16x32xf32, #tpu.memory_space<vmem>>, vector<16x32xf32>
    tpu.vector_store %arg8[%c0_1, %c0_2], %0 {strides = array<i32>} : memref<16x32xf32, #tpu.memory_space<vmem>>, vector<16x32xf32>,
    %c0_3 = arith.constant 0 : index
    %c0_4 = arith.constant 0 : index
    %2 = vector.load %arg8[%c0_3, %c0_4] : memref<16x32xf32, #tpu.memory_space<vmem>>, vector<16x32xf32>
    %3 = arith.truncf %2 : vector<16x32xf32> to vector<16x32xbf16>
    %c0_5 = arith.constant 0 : index
    %c0_6 = arith.constant 0 : index
    %c0_7 = arith.constant 0 : index
    %4 = vector.load %arg1[%c0_5, %c0_6, %c0_7] : memref<8x32x32xbf16, #tpu.memory_space<vmem>>, vector<1x32x32xbf16>
    %5 = vector.shape_cast %4 : vector<1x32x32xbf16> to vector<32x32xbf16>
    %cst = arith.constant dense<0.000000e+00> : vector<16x32xf32>
    %6 = tpu.matmul %3, %5, %cst {dimension_numbers = #tpu.dot_dimension_numbers<[1], [0], [0], [1], [0, 0, 1, 1], [], []>} : vector<16x32xbf16>, vector<32x32xbf16>, vector<16x32xf32> -> vector<16x32xf32>
    %c0_8 = arith.constant 0 : index
    %c0_9 = arith.constant 0 : index
    %c0_10 = arith.constant 0 : index
    %7 = vector.load %arg3[%c0_8, %c0_9, %c0_10] : memref<8x1x32xf32, #tpu.memory_space<vmem>>, vector<1x1x32xf32>
    %8 = vector.shape_cast %7 : vector<1x1x32xf32> to vector<1x32xf32>
    %9 = vector.broadcast %8 : vector<1x32xf32> to vector<16x32xf32>
    %10 = arith.addf %6, %9 : vector<16x32xf32>
    %c1 = arith.constant 1 : index
    %c0_11 = arith.constant 0 : index
    %c0_12 = arith.constant 0 : index
    %11 = vector.load %arg1[%c1, %c0_11, %c0_12] : memref<8x32x32xbf16, #tpu.memory_space<vmem>>, vector<1x32x32xbf16>
    %12 = vector.shape_cast %11 : vector<1x32x32xbf16> to vector<32x32xbf16>
    %cst_13 = arith.constant dense<0.000000e+00> : vector<16x32xf32>
    %13 = tpu.matmul %3, %12, %cst_13 {dimension_numbers = #tpu.dot_dimension_numbers<[1], [0], [0], [1], [0, 0, 1, 1], [], []>} : vector<16x32xbf16>, vector<32x32xbf16>, vector<16x32xf32> -> vector<16x32xf32>
    %c1_14 = arith.constant 1 : index
    %c0_15 = arith.constant 0 : index
    %c0_16 = arith.constant 0 : index
    %14 = vector.load %arg3[%c1_14, %c0_15, %c0_16] : memref<8x1x32xf32, #tpu.memory_space<vmem>>, vector<1x1x32xf32>
    %15 = vector.shape_cast %14 : vector<1x1x32xf32> to vector<1x32xf32>
    %16 = vector.broadcast %15 : vector<1x32xf32> to vector<16x32xf32>
    %17 = arith.addf %13, %16 : vector<16x32xf32>
    %c2 = arith.constant 2 : index
    %c0_17 = arith.constant 0 : index
    %c0_18 = arith.constant 0 : index
    %18 = vector.load %arg1[%c2, %c0_17, %c0_18] : memref<8x32x32xbf16, #tpu.memory_space<vmem>>, vector<1x32x32xbf16>
    %19 = vector.shape_cast %18 : vector<1x32x32xbf16> to vector<32x32xbf16>
    %cst_19 = arith.constant dense<0.000000e+00> : vector<16x32xf32>
    %20 = tpu.matmul %3, %19, %cst_19 {dimension_numbers = #tpu.dot_dimension_numbers<[1], [0], [0], [1], [0, 0, 1, 1], [], []>} : vector<16x32xbf16>, vector<32x32xbf16>, vector<16x32xf32> -> vector<16x32xf32>
    %c2_20 = arith.constant 2 : index
    %c0_21 = arith.constant 0 : index
    %c0_22 = arith.constant 0 : index
    %21 = vector.load %arg3[%c2_20, %c0_21, %c0_22] : memref<8x1x32xf32, #tpu.memory_space<vmem>>, vector<1x1x32xf32>
    %22 = vector.shape_cast %21 : vector<1x1x32xf32> to vector<1x32xf32>
    %23 = vector.broadcast %22 : vector<1x32xf32> to vector<16x32xf32>
    %24 = arith.addf %20, %23 : vector<16x32xf32>
    %c3 = arith.constant 3 : index
    %c0_23 = arith.constant 0 : index
    %c0_24 = arith.constant 0 : index
    %25 = vector.load %arg1[%c3, %c0_23, %c0_24] : memref<8x32x32xbf16, #tpu.memory_space<vmem>>, vector<1x32x32xbf16>
    %26 = vector.shape_cast %25 : vector<1x32x32xbf16> to vector<32x32xbf16>
    %cst_25 = arith.constant dense<0.000000e+00> : vector<16x32xf32>
    %27 = tpu.matmul %3, %26, %cst_25 {dimension_numbers = #tpu.dot_dimension_numbers<[1], [0], [0], [1], [0, 0, 1, 1], [], []>} : vector<16x32xbf16>, vector<32x32xbf16>, vector<16x32xf32> -> vector<16x32xf32>
    %c3_26 = arith.constant 3 : index
    %c0_27 = arith.constant 0 : index
    %c0_28 = arith.constant 0 : index
    %28 = vector.load %arg3[%c3_26, %c0_27, %c0_28] : memref<8x1x32xf32, #tpu.memory_space<vmem>>, vector<1x1x32xf32>
    %29 = vector.shape_cast %28 : vector<1x1x32xf32> to vector<1x32xf32>
    %30 = vector.broadcast %29 : vector<1x32xf32> to vector<16x32xf32>
    %31 = arith.addf %27, %30 : vector<16x32xf32>
    %c0_29 = arith.constant 0 : index
    %c0_30 = arith.constant 0 : index
    %c0_31 = arith.constant 0 : index
    %32 = vector.load %arg2[%c0_29, %c0_30, %c0_31] : memref<8x32x32xbf16, #tpu.memory_space<vmem>>, vector<1x32x32xbf16>
    %33 = vector.shape_cast %32 : vector<1x32x32xbf16> to vector<32x32xbf16>
    %c1_32 = arith.constant 1 : index
    %c0_33 = arith.constant 0 : index
    %c0_34 = arith.constant 0 : index
    %34 = vector.load %arg2[%c1_32, %c0_33, %c0_34] : memref<8x32x32xbf16, #tpu.memory_space<vmem>>, vector<1x32x32xbf16>
    %35 = vector.shape_cast %34 : vector<1x32x32xbf16> to vector<32x32xbf16>
    %c2_35 = arith.constant 2 : index
    %c0_36 = arith.constant 0 : index
    %c0_37 = arith.constant 0 : index
    %36 = vector.load %arg2[%c2_35, %c0_36, %c0_37] : memref<8x32x32xbf16, #tpu.memory_space<vmem>>, vector<1x32x32xbf16>
    %37 = vector.shape_cast %36 : vector<1x32x32xbf16> to vector<32x32xbf16>
    %c3_38 = arith.constant 3 : index
    %c0_39 = arith.constant 0 : index
    %c0_40 = arith.constant 0 : index
    %38 = vector.load %arg2[%c3_38, %c0_39, %c0_40] : memref<8x32x32xbf16, #tpu.memory_space<vmem>>, vector<1x32x32xbf16>
    %39 = vector.shape_cast %38 : vector<1x32x32xbf16> to vector<32x32xbf16>
    %cst_41 = arith.constant 0.000000e+00 : f32
    %40 = vector.broadcast %cst_41 : f32 to vector<1x32xf32>
    %cst_42 = arith.constant 0.000000e+00 : f32
    %41 = vector.broadcast %cst_42 : f32 to vector<1x32xf32>
    %42 = arith.truncf %40 : vector<1x32xf32> to vector<1x32xbf16>
    %43 = vector.extract_strided_slice %10 {offsets = [0, 0], sizes = [1, 32], strides = [1, 1]} : vector<16x32xf32> to vector<1x32xf32>
    %cst_43 = arith.constant dense<0.000000e+00> : vector<1x32xf32>
    %44 = tpu.matmul %42, %33, %cst_43 {dimension_numbers = #tpu.dot_dimension_numbers<[1], [0], [0], [1], [0, 0, 1, 1], [], []>} : vector<1x32xbf16>, vector<32x32xbf16>, vector<1x32xf32> -> vector<1x32xf32>
    %45 = arith.addf %43, %44 : vector<1x32xf32>
    %46 = arith.negf %45 : vector<1x32xf32>
    %47 = math.exp %46 : vector<1x32xf32>
    %cst_44 = arith.constant 1.000000e+00 : f32
    %48 = vector.broadcast %cst_44 : f32 to vector<1x32xf32>
    %49 = arith.addf %48, %47 : vector<1x32xf32>
    %50 = arith.divf %48, %49 : vector<1x32xf32>
    %51 = vector.extract_strided_slice %17 {offsets = [0, 0], sizes = [1, 32], strides = [1, 1]} : vector<16x32xf32> to vector<1x32xf32>
    %cst_45 = arith.constant dense<0.000000e+00> : vector<1x32xf32>
    %52 = tpu.matmul %42, %35, %cst_45 {dimension_numbers = #tpu.dot_dimension_numbers<[1], [0], [0], [1], [0, 0, 1, 1], [], []>} : vector<1x32xbf16>, vector<32x32xbf16>, vector<1x32xf32> -> vector<1x32xf32>
    %53 = arith.addf %51, %52 : vector<1x32xf32>
    %54 = arith.negf %53 : vector<1x32xf32>
    %55 = math.exp %54 : vector<1x32xf32>
    %cst_46 = arith.constant 1.000000e+00 : f32
    %56 = vector.broadcast %cst_46 : f32 to vector<1x32xf32>
    %57 = arith.addf %56, %55 : vector<1x32xf32>
    %58 = arith.divf %56, %57 : vector<1x32xf32>
    %59 = vector.extract_strided_slice %24 {offsets = [0, 0], sizes = [1, 32], strides = [1, 1]} : vector<16x32xf32> to vector<1x32xf32>
    %cst_47 = arith.constant dense<0.000000e+00> : vector<1x32xf32>
    %60 = tpu.matmul %42, %37, %cst_47 {dimension_numbers = #tpu.dot_dimension_numbers<[1], [0], [0], [1], [0, 0, 1, 1], [], []>} : vector<1x32xbf16>, vector<32x32xbf16>, vector<1x32xf32> -> vector<1x32xf32>
    %61 = arith.addf %59, %60 : vector<1x32xf32>
    %62 = math.tanh %61 : vector<1x32xf32>
    %63 = vector.extract_strided_slice %31 {offsets = [0, 0], sizes = [1, 32], strides = [1, 1]} : vector<16x32xf32> to vector<1x32xf32>
    %cst_48 = arith.constant dense<0.000000e+00> : vector<1x32xf32>
    %64 = tpu.matmul %42, %39, %cst_48 {dimension_numbers = #tpu.dot_dimension_numbers<[1], [0], [0], [1], [0, 0, 1, 1], [], []>} : vector<1x32xbf16>, vector<32x32xbf16>, vector<1x32xf32> -> vector<1x32xf32>
    %65 = arith.addf %63, %64 : vector<1x32xf32>
    %66 = arith.negf %65 : vector<1x32xf32>
    %67 = math.exp %66 : vector<1x32xf32>
    %cst_49 = arith.constant 1.000000e+00 : f32
    %68 = vector.broadcast %cst_49 : f32 to vector<1x32xf32>
    %69 = arith.addf %68, %67 : vector<1x32xf32>
    %70 = arith.divf %68, %69 : vector<1x32xf32>
    %71 = arith.mulf %58, %41 : vector<1x32xf32>
    %72 = arith.mulf %50, %62 : vector<1x32xf32>
    %73 = arith.addf %71, %72 : vector<1x32xf32>
    %74 = math.tanh %73 : vector<1x32xf32>
    %75 = arith.mulf %70, %74 : vector<1x32xf32>
    %c0_50 = arith.constant 0 : index
    %c0_51 = arith.constant 0 : index
    %76 = vector.load %arg8[%c0_50, %c0_51] : memref<16x32xf32, #tpu.memory_space<vmem>>, vector<1x32xf32>
    tpu.vector_store %arg8[%c0_50, %c0_51], %75 {strides = array<i32>} : memref<16x32xf32, #tpu.memory_space<vmem>>, vector<1x32xf32>,
    %77 = arith.truncf %75 : vector<1x32xf32> to vector<1x32xbf16>
    %78 = vector.extract_strided_slice %10 {offsets = [1, 0], sizes = [1, 32], strides = [1, 1]} : vector<16x32xf32> to vector<1x32xf32>
    %cst_52 = arith.constant dense<0.000000e+00> : vector<1x32xf32>
    %79 = tpu.matmul %77, %33, %cst_52 {dimension_numbers = #tpu.dot_dimension_numbers<[1], [0], [0], [1], [0, 0, 1, 1], [], []>} : vector<1x32xbf16>, vector<32x32xbf16>, vector<1x32xf32> -> vector<1x32xf32>
    %80 = arith.addf %78, %79 : vector<1x32xf32>
    %81 = arith.negf %80 : vector<1x32xf32>
    %82 = math.exp %81 : vector<1x32xf32>
    %cst_53 = arith.constant 1.000000e+00 : f32
    %83 = vector.broadcast %cst_53 : f32 to vector<1x32xf32>
    %84 = arith.addf %83, %82 : vector<1x32xf32>
    %85 = arith.divf %83, %84 : vector<1x32xf32>
    %86 = vector.extract_strided_slice %17 {offsets = [1, 0], sizes = [1, 32], strides = [1, 1]} : vector<16x32xf32> to vector<1x32xf32>
    %cst_54 = arith.constant dense<0.000000e+00> : vector<1x32xf32>
    %87 = tpu.matmul %77, %35, %cst_54 {dimension_numbers = #tpu.dot_dimension_numbers<[1], [0], [0], [1], [0, 0, 1, 1], [], []>} : vector<1x32xbf16>, vector<32x32xbf16>, vector<1x32xf32> -> vector<1x32xf32>
    %88 = arith.addf %86, %87 : vector<1x32xf32>
    %89 = arith.negf %88 : vector<1x32xf32>
    %90 = math.exp %89 : vector<1x32xf32>
    %cst_55 = arith.constant 1.000000e+00 : f32
    %91 = vector.broadcast %cst_55 : f32 to vector<1x32xf32>
    %92 = arith.addf %91, %90 : vector<1x32xf32>
    %93 = arith.divf %91, %92 : vector<1x32xf32>
    %94 = vector.extract_strided_slice %24 {offsets = [1, 0], sizes = [1, 32], strides = [1, 1]} : vector<16x32xf32> to vector<1x32xf32>
    %cst_56 = arith.constant dense<0.000000e+00> : vector<1x32xf32>
    %95 = tpu.matmul %77, %37, %cst_56 {dimension_numbers = #tpu.dot_dimension_numbers<[1], [0], [0], [1], [0, 0, 1, 1], [], []>} : vector<1x32xbf16>, vector<32x32xbf16>, vector<1x32xf32> -> vector<1x32xf32>
    %96 = arith.addf %94, %95 : vector<1x32xf32>
    %97 = math.tanh %96 : vector<1x32xf32>
    %98 = vector.extract_strided_slice %31 {offsets = [1, 0], sizes = [1, 32], strides = [1, 1]} : vector<16x32xf32> to vector<1x32xf32>
    %cst_57 = arith.constant dense<0.000000e+00> : vector<1x32xf32>
    %99 = tpu.matmul %77, %39, %cst_57 {dimension_numbers = #tpu.dot_dimension_numbers<[1], [0], [0], [1], [0, 0, 1, 1], [], []>} : vector<1x32xbf16>, vector<32x32xbf16>, vector<1x32xf32> -> vector<1x32xf32>
    %100 = arith.addf %98, %99 : vector<1x32xf32>
    %101 = arith.negf %100 : vector<1x32xf32>
    %102 = math.exp %101 : vector<1x32xf32>
    %cst_58 = arith.constant 1.000000e+00 : f32
    %103 = vector.broadcast %cst_58 : f32 to vector<1x32xf32>
    %104 = arith.addf %103, %102 : vector<1x32xf32>
    %105 = arith.divf %103, %104 : vector<1x32xf32>
    %106 = arith.mulf %93, %73 : vector<1x32xf32>
    %107 = arith.mulf %85, %97 : vector<1x32xf32>
    %108 = arith.addf %106, %107 : vector<1x32xf32>
    %109 = math.tanh %108 : vector<1x32xf32>
    %110 = arith.mulf %105, %109 : vector<1x32xf32>
    %c1_59 = arith.constant 1 : index
    %c0_60 = arith.constant 0 : index
    %111 = vector.load %arg8[%c1_59, %c0_60] : memref<16x32xf32, #tpu.memory_space<vmem>>, vector<1x32xf32>
    tpu.vector_store %arg8[%c1_59, %c0_60], %110 {strides = array<i32>} : memref<16x32xf32, #tpu.memory_space<vmem>>, vector<1x32xf32>,
    %112 = arith.truncf %110 : vector<1x32xf32> to vector<1x32xbf16>
    %113 = vector.extract_strided_slice %10 {offsets = [2, 0], sizes = [1, 32], strides = [1, 1]} : vector<16x32xf32> to vector<1x32xf32>
    %cst_61 = arith.constant dense<0.000000e+00> : vector<1x32xf32>
    %114 = tpu.matmul %112, %33, %cst_61 {dimension_numbers = #tpu.dot_dimension_numbers<[1], [0], [0], [1], [0, 0, 1, 1], [], []>} : vector<1x32xbf16>, vector<32x32xbf16>, vector<1x32xf32> -> vector<1x32xf32>
    %115 = arith.addf %113, %114 : vector<1x32xf32>
    %116 = arith.negf %115 : vector<1x32xf32>
    %117 = math.exp %116 : vector<1x32xf32>
    %cst_62 = arith.constant 1.000000e+00 : f32
    %118 = vector.broadcast %cst_62 : f32 to vector<1x32xf32>
    %119 = arith.addf %118, %117 : vector<1x32xf32>
    %120 = arith.divf %118, %119 : vector<1x32xf32>
    %121 = vector.extract_strided_slice %17 {offsets = [2, 0], sizes = [1, 32], strides = [1, 1]} : vector<16x32xf32> to vector<1x32xf32>
    %cst_63 = arith.constant dense<0.000000e+00> : vector<1x32xf32>
    %122 = tpu.matmul %112, %35, %cst_63 {dimension_numbers = #tpu.dot_dimension_numbers<[1], [0], [0], [1], [0, 0, 1, 1], [], []>} : vector<1x32xbf16>, vector<32x32xbf16>, vector<1x32xf32> -> vector<1x32xf32>
    %123 = arith.addf %121, %122 : vector<1x32xf32>
    %124 = arith.negf %123 : vector<1x32xf32>
    %125 = math.exp %124 : vector<1x32xf32>
    %cst_64 = arith.constant 1.000000e+00 : f32
    %126 = vector.broadcast %cst_64 : f32 to vector<1x32xf32>
    %127 = arith.addf %126, %125 : vector<1x32xf32>
    %128 = arith.divf %126, %127 : vector<1x32xf32>
    %129 = vector.extract_strided_slice %24 {offsets = [2, 0], sizes = [1, 32], strides = [1, 1]} : vector<16x32xf32> to vector<1x32xf32>
    %cst_65 = arith.constant dense<0.000000e+00> : vector<1x32xf32>
    %130 = tpu.matmul %112, %37, %cst_65 {dimension_numbers = #tpu.dot_dimension_numbers<[1], [0], [0], [1], [0, 0, 1, 1], [], []>} : vector<1x32xbf16>, vector<32x32xbf16>, vector<1x32xf32> -> vector<1x32xf32>
    %131 = arith.addf %129, %130 : vector<1x32xf32>
    %132 = math.tanh %131 : vector<1x32xf32>
    %133 = vector.extract_strided_slice %31 {offsets = [2, 0], sizes = [1, 32], strides = [1, 1]} : vector<16x32xf32> to vector<1x32xf32>
    %cst_66 = arith.constant dense<0.000000e+00> : vector<1x32xf32>
    %134 = tpu.matmul %112, %39, %cst_66 {dimension_numbers = #tpu.dot_dimension_numbers<[1], [0], [0], [1], [0, 0, 1, 1], [], []>} : vector<1x32xbf16>, vector<32x32xbf16>, vector<1x32xf32> -> vector<1x32xf32>
    %135 = arith.addf %133, %134 : vector<1x32xf32>
    %136 = arith.negf %135 : vector<1x32xf32>
    %137 = math.exp %136 : vector<1x32xf32>
    %cst_67 = arith.constant 1.000000e+00 : f32
    %138 = vector.broadcast %cst_67 : f32 to vector<1x32xf32>
    %139 = arith.addf %138, %137 : vector<1x32xf32>
    %140 = arith.divf %138, %139 : vector<1x32xf32>
    %141 = arith.mulf %128, %108 : vector<1x32xf32>
    %142 = arith.mulf %120, %132 : vector<1x32xf32>
    %143 = arith.addf %141, %142 : vector<1x32xf32>
    %144 = math.tanh %143 : vector<1x32xf32>
    %145 = arith.mulf %140, %144 : vector<1x32xf32>
    %c2_68 = arith.constant 2 : index
    %c0_69 = arith.constant 0 : index
    %146 = vector.load %arg8[%c2_68, %c0_69] : memref<16x32xf32, #tpu.memory_space<vmem>>, vector<1x32xf32>
    tpu.vector_store %arg8[%c2_68, %c0_69], %145 {strides = array<i32>} : memref<16x32xf32, #tpu.memory_space<vmem>>, vector<1x32xf32>,
    %147 = arith.truncf %145 : vector<1x32xf32> to vector<1x32xbf16>
    %148 = vector.extract_strided_slice %10 {offsets = [3, 0], sizes = [1, 32], strides = [1, 1]} : vector<16x32xf32> to vector<1x32xf32>
    %cst_70 = arith.constant dense<0.000000e+00> : vector<1x32xf32>
    %149 = tpu.matmul %147, %33, %cst_70 {dimension_numbers = #tpu.dot_dimension_numbers<[1], [0], [0], [1], [0, 0, 1, 1], [], []>} : vector<1x32xbf16>, vector<32x32xbf16>, vector<1x32xf32> -> vector<1x32xf32>
    %150 = arith.addf %148, %149 : vector<1x32xf32>
    %151 = arith.negf %150 : vector<1x32xf32>
    %152 = math.exp %151 : vector<1x32xf32>
    %cst_71 = arith.constant 1.000000e+00 : f32
    %153 = vector.broadcast %cst_71 : f32 to vector<1x32xf32>
    %154 = arith.addf %153, %152 : vector<1x32xf32>
    %155 = arith.divf %153, %154 : vector<1x32xf32>
    %156 = vector.extract_strided_slice %17 {offsets = [3, 0], sizes = [1, 32], strides = [1, 1]} : vector<16x32xf32> to vector<1x32xf32>
    %cst_72 = arith.constant dense<0.000000e+00> : vector<1x32xf32>
    %157 = tpu.matmul %147, %35, %cst_72 {dimension_numbers = #tpu.dot_dimension_numbers<[1], [0], [0], [1], [0, 0, 1, 1], [], []>} : vector<1x32xbf16>, vector<32x32xbf16>, vector<1x32xf32> -> vector<1x32xf32>
    %158 = arith.addf %156, %157 : vector<1x32xf32>
    %159 = arith.negf %158 : vector<1x32xf32>
    %160 = math.exp %159 : vector<1x32xf32>
    %cst_73 = arith.constant 1.000000e+00 : f32
    %161 = vector.broadcast %cst_73 : f32 to vector<1x32xf32>
    %162 = arith.addf %161, %160 : vector<1x32xf32>
    %163 = arith.divf %161, %162 : vector<1x32xf32>
    %164 = vector.extract_strided_slice %24 {offsets = [3, 0], sizes = [1, 32], strides = [1, 1]} : vector<16x32xf32> to vector<1x32xf32>
    %cst_74 = arith.constant dense<0.000000e+00> : vector<1x32xf32>
    %165 = tpu.matmul %147, %37, %cst_74 {dimension_numbers = #tpu.dot_dimension_numbers<[1], [0], [0], [1], [0, 0, 1, 1], [], []>} : vector<1x32xbf16>, vector<32x32xbf16>, vector<1x32xf32> -> vector<1x32xf32>
    %166 = arith.addf %164, %165 : vector<1x32xf32>
    %167 = math.tanh %166 : vector<1x32xf32>
    %168 = vector.extract_strided_slice %31 {offsets = [3, 0], sizes = [1, 32], strides = [1, 1]} : vector<16x32xf32> to vector<1x32xf32>
    %cst_75 = arith.constant dense<0.000000e+00> : vector<1x32xf32>
    %169 = tpu.matmul %147, %39, %cst_75 {dimension_numbers = #tpu.dot_dimension_numbers<[1], [0], [0], [1], [0, 0, 1, 1], [], []>} : vector<1x32xbf16>, vector<32x32xbf16>, vector<1x32xf32> -> vector<1x32xf32>
    %170 = arith.addf %168, %169 : vector<1x32xf32>
    %171 = arith.negf %170 : vector<1x32xf32>
    %172 = math.exp %171 : vector<1x32xf32>
    %cst_76 = arith.constant 1.000000e+00 : f32
    %173 = vector.broadcast %cst_76 : f32 to vector<1x32xf32>
    %174 = arith.addf %173, %172 : vector<1x32xf32>
    %175 = arith.divf %173, %174 : vector<1x32xf32>
    %176 = arith.mulf %163, %143 : vector<1x32xf32>
    %177 = arith.mulf %155, %167 : vector<1x32xf32>
    %178 = arith.addf %176, %177 : vector<1x32xf32>
    %179 = math.tanh %178 : vector<1x32xf32>
    %180 = arith.mulf %175, %179 : vector<1x32xf32>
    %c3_77 = arith.constant 3 : index
    %c0_78 = arith.constant 0 : index
    %181 = vector.load %arg8[%c3_77, %c0_78] : memref<16x32xf32, #tpu.memory_space<vmem>>, vector<1x32xf32>
    tpu.vector_store %arg8[%c3_77, %c0_78], %180 {strides = array<i32>} : memref<16x32xf32, #tpu.memory_space<vmem>>, vector<1x32xf32>,
    %182 = arith.truncf %180 : vector<1x32xf32> to vector<1x32xbf16>
    %183 = vector.extract_strided_slice %10 {offsets = [4, 0], sizes = [1, 32], strides = [1, 1]} : vector<16x32xf32> to vector<1x32xf32>
    %cst_79 = arith.constant dense<0.000000e+00> : vector<1x32xf32>
    %184 = tpu.matmul %182, %33, %cst_79 {dimension_numbers = #tpu.dot_dimension_numbers<[1], [0], [0], [1], [0, 0, 1, 1], [], []>} : vector<1x32xbf16>, vector<32x32xbf16>, vector<1x32xf32> -> vector<1x32xf32>
    %185 = arith.addf %183, %184 : vector<1x32xf32>
    %186 = arith.negf %185 : vector<1x32xf32>
    %187 = math.exp %186 : vector<1x32xf32>
    %cst_80 = arith.constant 1.000000e+00 : f32
    %188 = vector.broadcast %cst_80 : f32 to vector<1x32xf32>
    %189 = arith.addf %188, %187 : vector<1x32xf32>
    %190 = arith.divf %188, %189 : vector<1x32xf32>
    %191 = vector.extract_strided_slice %17 {offsets = [4, 0], sizes = [1, 32], strides = [1, 1]} : vector<16x32xf32> to vector<1x32xf32>
    %cst_81 = arith.constant dense<0.000000e+00> : vector<1x32xf32>
    %192 = tpu.matmul %182, %35, %cst_81 {dimension_numbers = #tpu.dot_dimension_numbers<[1], [0], [0], [1], [0, 0, 1, 1], [], []>} : vector<1x32xbf16>, vector<32x32xbf16>, vector<1x32xf32> -> vector<1x32xf32>
    %193 = arith.addf %191, %192 : vector<1x32xf32>
    %194 = arith.negf %193 : vector<1x32xf32>
    %195 = math.exp %194 : vector<1x32xf32>
    %cst_82 = arith.constant 1.000000e+00 : f32
    %196 = vector.broadcast %cst_82 : f32 to vector<1x32xf32>
    %197 = arith.addf %196, %195 : vector<1x32xf32>
    %198 = arith.divf %196, %197 : vector<1x32xf32>
    %199 = vector.extract_strided_slice %24 {offsets = [4, 0], sizes = [1, 32], strides = [1, 1]} : vector<16x32xf32> to vector<1x32xf32>
    %cst_83 = arith.constant dense<0.000000e+00> : vector<1x32xf32>
    %200 = tpu.matmul %182, %37, %cst_83 {dimension_numbers = #tpu.dot_dimension_numbers<[1], [0], [0], [1], [0, 0, 1, 1], [], []>} : vector<1x32xbf16>, vector<32x32xbf16>, vector<1x32xf32> -> vector<1x32xf32>
    %201 = arith.addf %199, %200 : vector<1x32xf32>
    %202 = math.tanh %201 : vector<1x32xf32>
    %203 = vector.extract_strided_slice %31 {offsets = [4, 0], sizes = [1, 32], strides = [1, 1]} : vector<16x32xf32> to vector<1x32xf32>
    %cst_84 = arith.constant dense<0.000000e+00> : vector<1x32xf32>
    %204 = tpu.matmul %182, %39, %cst_84 {dimension_numbers = #tpu.dot_dimension_numbers<[1], [0], [0], [1], [0, 0, 1, 1], [], []>} : vector<1x32xbf16>, vector<32x32xbf16>, vector<1x32xf32> -> vector<1x32xf32>
    %205 = arith.addf %203, %204 : vector<1x32xf32>
    %206 = arith.negf %205 : vector<1x32xf32>
    %207 = math.exp %206 : vector<1x32xf32>
    %cst_85 = arith.constant 1.000000e+00 : f32
    %208 = vector.broadcast %cst_85 : f32 to vector<1x32xf32>
    %209 = arith.addf %208, %207 : vector<1x32xf32>
    %210 = arith.divf %208, %209 : vector<1x32xf32>
    %211 = arith.mulf %198, %178 : vector<1x32xf32>
    %212 = arith.mulf %190, %202 : vector<1x32xf32>
    %213 = arith.addf %211, %212 : vector<1x32xf32>
    %214 = math.tanh %213 : vector<1x32xf32>
    %215 = arith.mulf %210, %214 : vector<1x32xf32>
    %c4 = arith.constant 4 : index
    %c0_86 = arith.constant 0 : index
    %216 = vector.load %arg8[%c4, %c0_86] : memref<16x32xf32, #tpu.memory_space<vmem>>, vector<1x32xf32>
    tpu.vector_store %arg8[%c4, %c0_86], %215 {strides = array<i32>} : memref<16x32xf32, #tpu.memory_space<vmem>>, vector<1x32xf32>,
    %217 = arith.truncf %215 : vector<1x32xf32> to vector<1x32xbf16>
    %218 = vector.extract_strided_slice %10 {offsets = [5, 0], sizes = [1, 32], strides = [1, 1]} : vector<16x32xf32> to vector<1x32xf32>
    %cst_87 = arith.constant dense<0.000000e+00> : vector<1x32xf32>
    %219 = tpu.matmul %217, %33, %cst_87 {dimension_numbers = #tpu.dot_dimension_numbers<[1], [0], [0], [1], [0, 0, 1, 1], [], []>} : vector<1x32xbf16>, vector<32x32xbf16>, vector<1x32xf32> -> vector<1x32xf32>
    %220 = arith.addf %218, %219 : vector<1x32xf32>
    %221 = arith.negf %220 : vector<1x32xf32>
    %222 = math.exp %221 : vector<1x32xf32>
    %cst_88 = arith.constant 1.000000e+00 : f32
    %223 = vector.broadcast %cst_88 : f32 to vector<1x32xf32>
    %224 = arith.addf %223, %222 : vector<1x32xf32>
    %225 = arith.divf %223, %224 : vector<1x32xf32>
    %226 = vector.extract_strided_slice %17 {offsets = [5, 0], sizes = [1, 32], strides = [1, 1]} : vector<16x32xf32> to vector<1x32xf32>
    %cst_89 = arith.constant dense<0.000000e+00> : vector<1x32xf32>
    %227 = tpu.matmul %217, %35, %cst_89 {dimension_numbers = #tpu.dot_dimension_numbers<[1], [0], [0], [1], [0, 0, 1, 1], [], []>} : vector<1x32xbf16>, vector<32x32xbf16>, vector<1x32xf32> -> vector<1x32xf32>
    %228 = arith.addf %226, %227 : vector<1x32xf32>
    %229 = arith.negf %228 : vector<1x32xf32>
    %230 = math.exp %229 : vector<1x32xf32>
    %cst_90 = arith.constant 1.000000e+00 : f32
    %231 = vector.broadcast %cst_90 : f32 to vector<1x32xf32>
    %232 = arith.addf %231, %230 : vector<1x32xf32>
    %233 = arith.divf %231, %232 : vector<1x32xf32>
    %234 = vector.extract_strided_slice %24 {offsets = [5, 0], sizes = [1, 32], strides = [1, 1]} : vector<16x32xf32> to vector<1x32xf32>
    %cst_91 = arith.constant dense<0.000000e+00> : vector<1x32xf32>
    %235 = tpu.matmul %217, %37, %cst_91 {dimension_numbers = #tpu.dot_dimension_numbers<[1], [0], [0], [1], [0, 0, 1, 1], [], []>} : vector<1x32xbf16>, vector<32x32xbf16>, vector<1x32xf32> -> vector<1x32xf32>
    %236 = arith.addf %234, %235 : vector<1x32xf32>
    %237 = math.tanh %236 : vector<1x32xf32>
    %238 = vector.extract_strided_slice %31 {offsets = [5, 0], sizes = [1, 32], strides = [1, 1]} : vector<16x32xf32> to vector<1x32xf32>
    %cst_92 = arith.constant dense<0.000000e+00> : vector<1x32xf32>
    %239 = tpu.matmul %217, %39, %cst_92 {dimension_numbers = #tpu.dot_dimension_numbers<[1], [0], [0], [1], [0, 0, 1, 1], [], []>} : vector<1x32xbf16>, vector<32x32xbf16>, vector<1x32xf32> -> vector<1x32xf32>
    %240 = arith.addf %238, %239 : vector<1x32xf32>
    %241 = arith.negf %240 : vector<1x32xf32>
    %242 = math.exp %241 : vector<1x32xf32>
    %cst_93 = arith.constant 1.000000e+00 : f32
    %243 = vector.broadcast %cst_93 : f32 to vector<1x32xf32>
    %244 = arith.addf %243, %242 : vector<1x32xf32>
    %245 = arith.divf %243, %244 : vector<1x32xf32>
    %246 = arith.mulf %233, %213 : vector<1x32xf32>
    %247 = arith.mulf %225, %237 : vector<1x32xf32>
    %248 = arith.addf %246, %247 : vector<1x32xf32>
    %249 = math.tanh %248 : vector<1x32xf32>
    %250 = arith.mulf %245, %249 : vector<1x32xf32>
    %c5 = arith.constant 5 : index
    %c0_94 = arith.constant 0 : index
    %251 = vector.load %arg8[%c5, %c0_94] : memref<16x32xf32, #tpu.memory_space<vmem>>, vector<1x32xf32>
    tpu.vector_store %arg8[%c5, %c0_94], %250 {strides = array<i32>} : memref<16x32xf32, #tpu.memory_space<vmem>>, vector<1x32xf32>,
    %252 = arith.truncf %250 : vector<1x32xf32> to vector<1x32xbf16>
    %253 = vector.extract_strided_slice %10 {offsets = [6, 0], sizes = [1, 32], strides = [1, 1]} : vector<16x32xf32> to vector<1x32xf32>
    %cst_95 = arith.constant dense<0.000000e+00> : vector<1x32xf32>
    %254 = tpu.matmul %252, %33, %cst_95 {dimension_numbers = #tpu.dot_dimension_numbers<[1], [0], [0], [1], [0, 0, 1, 1], [], []>} : vector<1x32xbf16>, vector<32x32xbf16>, vector<1x32xf32> -> vector<1x32xf32>
    %255 = arith.addf %253, %254 : vector<1x32xf32>
    %256 = arith.negf %255 : vector<1x32xf32>
    %257 = math.exp %256 : vector<1x32xf32>
    %cst_96 = arith.constant 1.000000e+00 : f32
    %258 = vector.broadcast %cst_96 : f32 to vector<1x32xf32>
    %259 = arith.addf %258, %257 : vector<1x32xf32>
    %260 = arith.divf %258, %259 : vector<1x32xf32>
    %261 = vector.extract_strided_slice %17 {offsets = [6, 0], sizes = [1, 32], strides = [1, 1]} : vector<16x32xf32> to vector<1x32xf32>
    %cst_97 = arith.constant dense<0.000000e+00> : vector<1x32xf32>
    %262 = tpu.matmul %252, %35, %cst_97 {dimension_numbers = #tpu.dot_dimension_numbers<[1], [0], [0], [1], [0, 0, 1, 1], [], []>} : vector<1x32xbf16>, vector<32x32xbf16>, vector<1x32xf32> -> vector<1x32xf32>
    %263 = arith.addf %261, %262 : vector<1x32xf32>
    %264 = arith.negf %263 : vector<1x32xf32>
    %265 = math.exp %264 : vector<1x32xf32>
    %cst_98 = arith.constant 1.000000e+00 : f32
    %266 = vector.broadcast %cst_98 : f32 to vector<1x32xf32>
    %267 = arith.addf %266, %265 : vector<1x32xf32>
    %268 = arith.divf %266, %267 : vector<1x32xf32>
    %269 = vector.extract_strided_slice %24 {offsets = [6, 0], sizes = [1, 32], strides = [1, 1]} : vector<16x32xf32> to vector<1x32xf32>
    %cst_99 = arith.constant dense<0.000000e+00> : vector<1x32xf32>
    %270 = tpu.matmul %252, %37, %cst_99 {dimension_numbers = #tpu.dot_dimension_numbers<[1], [0], [0], [1], [0, 0, 1, 1], [], []>} : vector<1x32xbf16>, vector<32x32xbf16>, vector<1x32xf32> -> vector<1x32xf32>
    %271 = arith.addf %269, %270 : vector<1x32xf32>
    %272 = math.tanh %271 : vector<1x32xf32>
    %273 = vector.extract_strided_slice %31 {offsets = [6, 0], sizes = [1, 32], strides = [1, 1]} : vector<16x32xf32> to vector<1x32xf32>
    %cst_100 = arith.constant dense<0.000000e+00> : vector<1x32xf32>
    %274 = tpu.matmul %252, %39, %cst_100 {dimension_numbers = #tpu.dot_dimension_numbers<[1], [0], [0], [1], [0, 0, 1, 1], [], []>} : vector<1x32xbf16>, vector<32x32xbf16>, vector<1x32xf32> -> vector<1x32xf32>
    %275 = arith.addf %273, %274 : vector<1x32xf32>
    %276 = arith.negf %275 : vector<1x32xf32>
    %277 = math.exp %276 : vector<1x32xf32>
    %cst_101 = arith.constant 1.000000e+00 : f32
    %278 = vector.broadcast %cst_101 : f32 to vector<1x32xf32>
    %279 = arith.addf %278, %277 : vector<1x32xf32>
    %280 = arith.divf %278, %279 : vector<1x32xf32>
    %281 = arith.mulf %268, %248 : vector<1x32xf32>
    %282 = arith.mulf %260, %272 : vector<1x32xf32>
    %283 = arith.addf %281, %282 : vector<1x32xf32>
    %284 = math.tanh %283 : vector<1x32xf32>
    %285 = arith.mulf %280, %284 : vector<1x32xf32>
    %c6 = arith.constant 6 : index
    %c0_102 = arith.constant 0 : index
    %286 = vector.load %arg8[%c6, %c0_102] : memref<16x32xf32, #tpu.memory_space<vmem>>, vector<1x32xf32>
    tpu.vector_store %arg8[%c6, %c0_102], %285 {strides = array<i32>} : memref<16x32xf32, #tpu.memory_space<vmem>>, vector<1x32xf32>,
    %287 = arith.truncf %285 : vector<1x32xf32> to vector<1x32xbf16>
    %288 = vector.extract_strided_slice %10 {offsets = [7, 0], sizes = [1, 32], strides = [1, 1]} : vector<16x32xf32> to vector<1x32xf32>
    %cst_103 = arith.constant dense<0.000000e+00> : vector<1x32xf32>
    %289 = tpu.matmul %287, %33, %cst_103 {dimension_numbers = #tpu.dot_dimension_numbers<[1], [0], [0], [1], [0, 0, 1, 1], [], []>} : vector<1x32xbf16>, vector<32x32xbf16>, vector<1x32xf32> -> vector<1x32xf32>
    %290 = arith.addf %288, %289 : vector<1x32xf32>
    %291 = arith.negf %290 : vector<1x32xf32>
    %292 = math.exp %291 : vector<1x32xf32>
    %cst_104 = arith.constant 1.000000e+00 : f32
    %293 = vector.broadcast %cst_104 : f32 to vector<1x32xf32>
    %294 = arith.addf %293, %292 : vector<1x32xf32>
    %295 = arith.divf %293, %294 : vector<1x32xf32>
    %296 = vector.extract_strided_slice %17 {offsets = [7, 0], sizes = [1, 32], strides = [1, 1]} : vector<16x32xf32> to vector<1x32xf32>
    %cst_105 = arith.constant dense<0.000000e+00> : vector<1x32xf32>
    %297 = tpu.matmul %287, %35, %cst_105 {dimension_numbers = #tpu.dot_dimension_numbers<[1], [0], [0], [1], [0, 0, 1, 1], [], []>} : vector<1x32xbf16>, vector<32x32xbf16>, vector<1x32xf32> -> vector<1x32xf32>
    %298 = arith.addf %296, %297 : vector<1x32xf32>
    %299 = arith.negf %298 : vector<1x32xf32>
    %300 = math.exp %299 : vector<1x32xf32>
    %cst_106 = arith.constant 1.000000e+00 : f32
    %301 = vector.broadcast %cst_106 : f32 to vector<1x32xf32>
    %302 = arith.addf %301, %300 : vector<1x32xf32>
    %303 = arith.divf %301, %302 : vector<1x32xf32>
    %304 = vector.extract_strided_slice %24 {offsets = [7, 0], sizes = [1, 32], strides = [1, 1]} : vector<16x32xf32> to vector<1x32xf32>
    %cst_107 = arith.constant dense<0.000000e+00> : vector<1x32xf32>
    %305 = tpu.matmul %287, %37, %cst_107 {dimension_numbers = #tpu.dot_dimension_numbers<[1], [0], [0], [1], [0, 0, 1, 1], [], []>} : vector<1x32xbf16>, vector<32x32xbf16>, vector<1x32xf32> -> vector<1x32xf32>
    %306 = arith.addf %304, %305 : vector<1x32xf32>
    %307 = math.tanh %306 : vector<1x32xf32>
    %308 = vector.extract_strided_slice %31 {offsets = [7, 0], sizes = [1, 32], strides = [1, 1]} : vector<16x32xf32> to vector<1x32xf32>
    %cst_108 = arith.constant dense<0.000000e+00> : vector<1x32xf32>
    %309 = tpu.matmul %287, %39, %cst_108 {dimension_numbers = #tpu.dot_dimension_numbers<[1], [0], [0], [1], [0, 0, 1, 1], [], []>} : vector<1x32xbf16>, vector<32x32xbf16>, vector<1x32xf32> -> vector<1x32xf32>
    %310 = arith.addf %308, %309 : vector<1x32xf32>
    %311 = arith.negf %310 : vector<1x32xf32>
    %312 = math.exp %311 : vector<1x32xf32>
    %cst_109 = arith.constant 1.000000e+00 : f32
    %313 = vector.broadcast %cst_109 : f32 to vector<1x32xf32>
    %314 = arith.addf %313, %312 : vector<1x32xf32>
    %315 = arith.divf %313, %314 : vector<1x32xf32>
    %316 = arith.mulf %303, %283 : vector<1x32xf32>
    %317 = arith.mulf %295, %307 : vector<1x32xf32>
    %318 = arith.addf %316, %317 : vector<1x32xf32>
    %319 = math.tanh %318 : vector<1x32xf32>
    %320 = arith.mulf %315, %319 : vector<1x32xf32>
    %c7 = arith.constant 7 : index
    %c0_110 = arith.constant 0 : index
    %321 = vector.load %arg8[%c7, %c0_110] : memref<16x32xf32, #tpu.memory_space<vmem>>, vector<1x32xf32>
    tpu.vector_store %arg8[%c7, %c0_110], %320 {strides = array<i32>} : memref<16x32xf32, #tpu.memory_space<vmem>>, vector<1x32xf32>,
    %322 = arith.truncf %320 : vector<1x32xf32> to vector<1x32xbf16>
    %323 = vector.extract_strided_slice %10 {offsets = [8, 0], sizes = [1, 32], strides = [1, 1]} : vector<16x32xf32> to vector<1x32xf32>
    %cst_111 = arith.constant dense<0.000000e+00> : vector<1x32xf32>
    %324 = tpu.matmul %322, %33, %cst_111 {dimension_numbers = #tpu.dot_dimension_numbers<[1], [0], [0], [1], [0, 0, 1, 1], [], []>} : vector<1x32xbf16>, vector<32x32xbf16>, vector<1x32xf32> -> vector<1x32xf32>
    %325 = arith.addf %323, %324 : vector<1x32xf32>
    %326 = arith.negf %325 : vector<1x32xf32>
    %327 = math.exp %326 : vector<1x32xf32>
    %cst_112 = arith.constant 1.000000e+00 : f32
    %328 = vector.broadcast %cst_112 : f32 to vector<1x32xf32>
    %329 = arith.addf %328, %327 : vector<1x32xf32>
    %330 = arith.divf %328, %329 : vector<1x32xf32>
    %331 = vector.extract_strided_slice %17 {offsets = [8, 0], sizes = [1, 32], strides = [1, 1]} : vector<16x32xf32> to vector<1x32xf32>
    %cst_113 = arith.constant dense<0.000000e+00> : vector<1x32xf32>
    %332 = tpu.matmul %322, %35, %cst_113 {dimension_numbers = #tpu.dot_dimension_numbers<[1], [0], [0], [1], [0, 0, 1, 1], [], []>} : vector<1x32xbf16>, vector<32x32xbf16>, vector<1x32xf32> -> vector<1x32xf32>
    %333 = arith.addf %331, %332 : vector<1x32xf32>
    %334 = arith.negf %333 : vector<1x32xf32>
    %335 = math.exp %334 : vector<1x32xf32>
    %cst_114 = arith.constant 1.000000e+00 : f32
    %336 = vector.broadcast %cst_114 : f32 to vector<1x32xf32>
    %337 = arith.addf %336, %335 : vector<1x32xf32>
    %338 = arith.divf %336, %337 : vector<1x32xf32>
    %339 = vector.extract_strided_slice %24 {offsets = [8, 0], sizes = [1, 32], strides = [1, 1]} : vector<16x32xf32> to vector<1x32xf32>
    %cst_115 = arith.constant dense<0.000000e+00> : vector<1x32xf32>
    %340 = tpu.matmul %322, %37, %cst_115 {dimension_numbers = #tpu.dot_dimension_numbers<[1], [0], [0], [1], [0, 0, 1, 1], [], []>} : vector<1x32xbf16>, vector<32x32xbf16>, vector<1x32xf32> -> vector<1x32xf32>
    %341 = arith.addf %339, %340 : vector<1x32xf32>
    %342 = math.tanh %341 : vector<1x32xf32>
    %343 = vector.extract_strided_slice %31 {offsets = [8, 0], sizes = [1, 32], strides = [1, 1]} : vector<16x32xf32> to vector<1x32xf32>
    %cst_116 = arith.constant dense<0.000000e+00> : vector<1x32xf32>
    %344 = tpu.matmul %322, %39, %cst_116 {dimension_numbers = #tpu.dot_dimension_numbers<[1], [0], [0], [1], [0, 0, 1, 1], [], []>} : vector<1x32xbf16>, vector<32x32xbf16>, vector<1x32xf32> -> vector<1x32xf32>
    %345 = arith.addf %343, %344 : vector<1x32xf32>
    %346 = arith.negf %345 : vector<1x32xf32>
    %347 = math.exp %346 : vector<1x32xf32>
    %cst_117 = arith.constant 1.000000e+00 : f32
    %348 = vector.broadcast %cst_117 : f32 to vector<1x32xf32>
    %349 = arith.addf %348, %347 : vector<1x32xf32>
    %350 = arith.divf %348, %349 : vector<1x32xf32>
    %351 = arith.mulf %338, %318 : vector<1x32xf32>
    %352 = arith.mulf %330, %342 : vector<1x32xf32>
    %353 = arith.addf %351, %352 : vector<1x32xf32>
    %354 = math.tanh %353 : vector<1x32xf32>
    %355 = arith.mulf %350, %354 : vector<1x32xf32>
    %c8 = arith.constant 8 : index
    %c0_118 = arith.constant 0 : index
    %356 = vector.load %arg8[%c8, %c0_118] : memref<16x32xf32, #tpu.memory_space<vmem>>, vector<1x32xf32>
    tpu.vector_store %arg8[%c8, %c0_118], %355 {strides = array<i32>} : memref<16x32xf32, #tpu.memory_space<vmem>>, vector<1x32xf32>,
    %357 = arith.truncf %355 : vector<1x32xf32> to vector<1x32xbf16>
    %358 = vector.extract_strided_slice %10 {offsets = [9, 0], sizes = [1, 32], strides = [1, 1]} : vector<16x32xf32> to vector<1x32xf32>
    %cst_119 = arith.constant dense<0.000000e+00> : vector<1x32xf32>
    %359 = tpu.matmul %357, %33, %cst_119 {dimension_numbers = #tpu.dot_dimension_numbers<[1], [0], [0], [1], [0, 0, 1, 1], [], []>} : vector<1x32xbf16>, vector<32x32xbf16>, vector<1x32xf32> -> vector<1x32xf32>
    %360 = arith.addf %358, %359 : vector<1x32xf32>
    %361 = arith.negf %360 : vector<1x32xf32>
    %362 = math.exp %361 : vector<1x32xf32>
    %cst_120 = arith.constant 1.000000e+00 : f32
    %363 = vector.broadcast %cst_120 : f32 to vector<1x32xf32>
    %364 = arith.addf %363, %362 : vector<1x32xf32>
    %365 = arith.divf %363, %364 : vector<1x32xf32>
    %366 = vector.extract_strided_slice %17 {offsets = [9, 0], sizes = [1, 32], strides = [1, 1]} : vector<16x32xf32> to vector<1x32xf32>
    %cst_121 = arith.constant dense<0.000000e+00> : vector<1x32xf32>
    %367 = tpu.matmul %357, %35, %cst_121 {dimension_numbers = #tpu.dot_dimension_numbers<[1], [0], [0], [1], [0, 0, 1, 1], [], []>} : vector<1x32xbf16>, vector<32x32xbf16>, vector<1x32xf32> -> vector<1x32xf32>
    %368 = arith.addf %366, %367 : vector<1x32xf32>
    %369 = arith.negf %368 : vector<1x32xf32>
    %370 = math.exp %369 : vector<1x32xf32>
    %cst_122 = arith.constant 1.000000e+00 : f32
    %371 = vector.broadcast %cst_122 : f32 to vector<1x32xf32>
    %372 = arith.addf %371, %370 : vector<1x32xf32>
    %373 = arith.divf %371, %372 : vector<1x32xf32>
    %374 = vector.extract_strided_slice %24 {offsets = [9, 0], sizes = [1, 32], strides = [1, 1]} : vector<16x32xf32> to vector<1x32xf32>
    %cst_123 = arith.constant dense<0.000000e+00> : vector<1x32xf32>
    %375 = tpu.matmul %357, %37, %cst_123 {dimension_numbers = #tpu.dot_dimension_numbers<[1], [0], [0], [1], [0, 0, 1, 1], [], []>} : vector<1x32xbf16>, vector<32x32xbf16>, vector<1x32xf32> -> vector<1x32xf32>
    %376 = arith.addf %374, %375 : vector<1x32xf32>
    %377 = math.tanh %376 : vector<1x32xf32>
    %378 = vector.extract_strided_slice %31 {offsets = [9, 0], sizes = [1, 32], strides = [1, 1]} : vector<16x32xf32> to vector<1x32xf32>
    %cst_124 = arith.constant dense<0.000000e+00> : vector<1x32xf32>
    %379 = tpu.matmul %357, %39, %cst_124 {dimension_numbers = #tpu.dot_dimension_numbers<[1], [0], [0], [1], [0, 0, 1, 1], [], []>} : vector<1x32xbf16>, vector<32x32xbf16>, vector<1x32xf32> -> vector<1x32xf32>
    %380 = arith.addf %378, %379 : vector<1x32xf32>
    %381 = arith.negf %380 : vector<1x32xf32>
    %382 = math.exp %381 : vector<1x32xf32>
    %cst_125 = arith.constant 1.000000e+00 : f32
    %383 = vector.broadcast %cst_125 : f32 to vector<1x32xf32>
    %384 = arith.addf %383, %382 : vector<1x32xf32>
    %385 = arith.divf %383, %384 : vector<1x32xf32>
    %386 = arith.mulf %373, %353 : vector<1x32xf32>
    %387 = arith.mulf %365, %377 : vector<1x32xf32>
    %388 = arith.addf %386, %387 : vector<1x32xf32>
    %389 = math.tanh %388 : vector<1x32xf32>
    %390 = arith.mulf %385, %389 : vector<1x32xf32>
    %c9 = arith.constant 9 : index
    %c0_126 = arith.constant 0 : index
    %391 = vector.load %arg8[%c9, %c0_126] : memref<16x32xf32, #tpu.memory_space<vmem>>, vector<1x32xf32>
    tpu.vector_store %arg8[%c9, %c0_126], %390 {strides = array<i32>} : memref<16x32xf32, #tpu.memory_space<vmem>>, vector<1x32xf32>,
    %392 = arith.truncf %390 : vector<1x32xf32> to vector<1x32xbf16>
    %393 = vector.extract_strided_slice %10 {offsets = [10, 0], sizes = [1, 32], strides = [1, 1]} : vector<16x32xf32> to vector<1x32xf32>
    %cst_127 = arith.constant dense<0.000000e+00> : vector<1x32xf32>
    %394 = tpu.matmul %392, %33, %cst_127 {dimension_numbers = #tpu.dot_dimension_numbers<[1], [0], [0], [1], [0, 0, 1, 1], [], []>} : vector<1x32xbf16>, vector<32x32xbf16>, vector<1x32xf32> -> vector<1x32xf32>
    %395 = arith.addf %393, %394 : vector<1x32xf32>
    %396 = arith.negf %395 : vector<1x32xf32>
    %397 = math.exp %396 : vector<1x32xf32>
    %cst_128 = arith.constant 1.000000e+00 : f32
    %398 = vector.broadcast %cst_128 : f32 to vector<1x32xf32>
    %399 = arith.addf %398, %397 : vector<1x32xf32>
    %400 = arith.divf %398, %399 : vector<1x32xf32>
    %401 = vector.extract_strided_slice %17 {offsets = [10, 0], sizes = [1, 32], strides = [1, 1]} : vector<16x32xf32> to vector<1x32xf32>
    %cst_129 = arith.constant dense<0.000000e+00> : vector<1x32xf32>
    %402 = tpu.matmul %392, %35, %cst_129 {dimension_numbers = #tpu.dot_dimension_numbers<[1], [0], [0], [1], [0, 0, 1, 1], [], []>} : vector<1x32xbf16>, vector<32x32xbf16>, vector<1x32xf32> -> vector<1x32xf32>
    %403 = arith.addf %401, %402 : vector<1x32xf32>
    %404 = arith.negf %403 : vector<1x32xf32>
    %405 = math.exp %404 : vector<1x32xf32>
    %cst_130 = arith.constant 1.000000e+00 : f32
    %406 = vector.broadcast %cst_130 : f32 to vector<1x32xf32>
    %407 = arith.addf %406, %405 : vector<1x32xf32>
    %408 = arith.divf %406, %407 : vector<1x32xf32>
    %409 = vector.extract_strided_slice %24 {offsets = [10, 0], sizes = [1, 32], strides = [1, 1]} : vector<16x32xf32> to vector<1x32xf32>
    %cst_131 = arith.constant dense<0.000000e+00> : vector<1x32xf32>
    %410 = tpu.matmul %392, %37, %cst_131 {dimension_numbers = #tpu.dot_dimension_numbers<[1], [0], [0], [1], [0, 0, 1, 1], [], []>} : vector<1x32xbf16>, vector<32x32xbf16>, vector<1x32xf32> -> vector<1x32xf32>
    %411 = arith.addf %409, %410 : vector<1x32xf32>
    %412 = math.tanh %411 : vector<1x32xf32>
    %413 = vector.extract_strided_slice %31 {offsets = [10, 0], sizes = [1, 32], strides = [1, 1]} : vector<16x32xf32> to vector<1x32xf32>
    %cst_132 = arith.constant dense<0.000000e+00> : vector<1x32xf32>
    %414 = tpu.matmul %392, %39, %cst_132 {dimension_numbers = #tpu.dot_dimension_numbers<[1], [0], [0], [1], [0, 0, 1, 1], [], []>} : vector<1x32xbf16>, vector<32x32xbf16>, vector<1x32xf32> -> vector<1x32xf32>
    %415 = arith.addf %413, %414 : vector<1x32xf32>
    %416 = arith.negf %415 : vector<1x32xf32>
    %417 = math.exp %416 : vector<1x32xf32>
    %cst_133 = arith.constant 1.000000e+00 : f32
    %418 = vector.broadcast %cst_133 : f32 to vector<1x32xf32>
    %419 = arith.addf %418, %417 : vector<1x32xf32>
    %420 = arith.divf %418, %419 : vector<1x32xf32>
    %421 = arith.mulf %408, %388 : vector<1x32xf32>
    %422 = arith.mulf %400, %412 : vector<1x32xf32>
    %423 = arith.addf %421, %422 : vector<1x32xf32>
    %424 = math.tanh %423 : vector<1x32xf32>
    %425 = arith.mulf %420, %424 : vector<1x32xf32>
    %c10 = arith.constant 10 : index
    %c0_134 = arith.constant 0 : index
    %426 = vector.load %arg8[%c10, %c0_134] : memref<16x32xf32, #tpu.memory_space<vmem>>, vector<1x32xf32>
    tpu.vector_store %arg8[%c10, %c0_134], %425 {strides = array<i32>} : memref<16x32xf32, #tpu.memory_space<vmem>>, vector<1x32xf32>,
    %427 = arith.truncf %425 : vector<1x32xf32> to vector<1x32xbf16>
    %428 = vector.extract_strided_slice %10 {offsets = [11, 0], sizes = [1, 32], strides = [1, 1]} : vector<16x32xf32> to vector<1x32xf32>
    %cst_135 = arith.constant dense<0.000000e+00> : vector<1x32xf32>
    %429 = tpu.matmul %427, %33, %cst_135 {dimension_numbers = #tpu.dot_dimension_numbers<[1], [0], [0], [1], [0, 0, 1, 1], [], []>} : vector<1x32xbf16>, vector<32x32xbf16>, vector<1x32xf32> -> vector<1x32xf32>
    %430 = arith.addf %428, %429 : vector<1x32xf32>
    %431 = arith.negf %430 : vector<1x32xf32>
    %432 = math.exp %431 : vector<1x32xf32>
    %cst_136 = arith.constant 1.000000e+00 : f32
    %433 = vector.broadcast %cst_136 : f32 to vector<1x32xf32>
    %434 = arith.addf %433, %432 : vector<1x32xf32>
    %435 = arith.divf %433, %434 : vector<1x32xf32>
    %436 = vector.extract_strided_slice %17 {offsets = [11, 0], sizes = [1, 32], strides = [1, 1]} : vector<16x32xf32> to vector<1x32xf32>
    %cst_137 = arith.constant dense<0.000000e+00> : vector<1x32xf32>
    %437 = tpu.matmul %427, %35, %cst_137 {dimension_numbers = #tpu.dot_dimension_numbers<[1], [0], [0], [1], [0, 0, 1, 1], [], []>} : vector<1x32xbf16>, vector<32x32xbf16>, vector<1x32xf32> -> vector<1x32xf32>
    %438 = arith.addf %436, %437 : vector<1x32xf32>
    %439 = arith.negf %438 : vector<1x32xf32>
    %440 = math.exp %439 : vector<1x32xf32>
    %cst_138 = arith.constant 1.000000e+00 : f32
    %441 = vector.broadcast %cst_138 : f32 to vector<1x32xf32>
    %442 = arith.addf %441, %440 : vector<1x32xf32>
    %443 = arith.divf %441, %442 : vector<1x32xf32>
    %444 = vector.extract_strided_slice %24 {offsets = [11, 0], sizes = [1, 32], strides = [1, 1]} : vector<16x32xf32> to vector<1x32xf32>
    %cst_139 = arith.constant dense<0.000000e+00> : vector<1x32xf32>
    %445 = tpu.matmul %427, %37, %cst_139 {dimension_numbers = #tpu.dot_dimension_numbers<[1], [0], [0], [1], [0, 0, 1, 1], [], []>} : vector<1x32xbf16>, vector<32x32xbf16>, vector<1x32xf32> -> vector<1x32xf32>
    %446 = arith.addf %444, %445 : vector<1x32xf32>
    %447 = math.tanh %446 : vector<1x32xf32>
    %448 = vector.extract_strided_slice %31 {offsets = [11, 0], sizes = [1, 32], strides = [1, 1]} : vector<16x32xf32> to vector<1x32xf32>
    %cst_140 = arith.constant dense<0.000000e+00> : vector<1x32xf32>
    %449 = tpu.matmul %427, %39, %cst_140 {dimension_numbers = #tpu.dot_dimension_numbers<[1], [0], [0], [1], [0, 0, 1, 1], [], []>} : vector<1x32xbf16>, vector<32x32xbf16>, vector<1x32xf32> -> vector<1x32xf32>
    %450 = arith.addf %448, %449 : vector<1x32xf32>
    %451 = arith.negf %450 : vector<1x32xf32>
    %452 = math.exp %451 : vector<1x32xf32>
    %cst_141 = arith.constant 1.000000e+00 : f32
    %453 = vector.broadcast %cst_141 : f32 to vector<1x32xf32>
    %454 = arith.addf %453, %452 : vector<1x32xf32>
    %455 = arith.divf %453, %454 : vector<1x32xf32>
    %456 = arith.mulf %443, %423 : vector<1x32xf32>
    %457 = arith.mulf %435, %447 : vector<1x32xf32>
    %458 = arith.addf %456, %457 : vector<1x32xf32>
    %459 = math.tanh %458 : vector<1x32xf32>
    %460 = arith.mulf %455, %459 : vector<1x32xf32>
    %c11 = arith.constant 11 : index
    %c0_142 = arith.constant 0 : index
    %461 = vector.load %arg8[%c11, %c0_142] : memref<16x32xf32, #tpu.memory_space<vmem>>, vector<1x32xf32>
    tpu.vector_store %arg8[%c11, %c0_142], %460 {strides = array<i32>} : memref<16x32xf32, #tpu.memory_space<vmem>>, vector<1x32xf32>,
    %462 = arith.truncf %460 : vector<1x32xf32> to vector<1x32xbf16>
    %463 = vector.extract_strided_slice %10 {offsets = [12, 0], sizes = [1, 32], strides = [1, 1]} : vector<16x32xf32> to vector<1x32xf32>
    %cst_143 = arith.constant dense<0.000000e+00> : vector<1x32xf32>
    %464 = tpu.matmul %462, %33, %cst_143 {dimension_numbers = #tpu.dot_dimension_numbers<[1], [0], [0], [1], [0, 0, 1, 1], [], []>} : vector<1x32xbf16>, vector<32x32xbf16>, vector<1x32xf32> -> vector<1x32xf32>
    %465 = arith.addf %463, %464 : vector<1x32xf32>
    %466 = arith.negf %465 : vector<1x32xf32>
    %467 = math.exp %466 : vector<1x32xf32>
    %cst_144 = arith.constant 1.000000e+00 : f32
    %468 = vector.broadcast %cst_144 : f32 to vector<1x32xf32>
    %469 = arith.addf %468, %467 : vector<1x32xf32>
    %470 = arith.divf %468, %469 : vector<1x32xf32>
    %471 = vector.extract_strided_slice %17 {offsets = [12, 0], sizes = [1, 32], strides = [1, 1]} : vector<16x32xf32> to vector<1x32xf32>
    %cst_145 = arith.constant dense<0.000000e+00> : vector<1x32xf32>
    %472 = tpu.matmul %462, %35, %cst_145 {dimension_numbers = #tpu.dot_dimension_numbers<[1], [0], [0], [1], [0, 0, 1, 1], [], []>} : vector<1x32xbf16>, vector<32x32xbf16>, vector<1x32xf32> -> vector<1x32xf32>
    %473 = arith.addf %471, %472 : vector<1x32xf32>
    %474 = arith.negf %473 : vector<1x32xf32>
    %475 = math.exp %474 : vector<1x32xf32>
    %cst_146 = arith.constant 1.000000e+00 : f32
    %476 = vector.broadcast %cst_146 : f32 to vector<1x32xf32>
    %477 = arith.addf %476, %475 : vector<1x32xf32>
    %478 = arith.divf %476, %477 : vector<1x32xf32>
    %479 = vector.extract_strided_slice %24 {offsets = [12, 0], sizes = [1, 32], strides = [1, 1]} : vector<16x32xf32> to vector<1x32xf32>
    %cst_147 = arith.constant dense<0.000000e+00> : vector<1x32xf32>
    %480 = tpu.matmul %462, %37, %cst_147 {dimension_numbers = #tpu.dot_dimension_numbers<[1], [0], [0], [1], [0, 0, 1, 1], [], []>} : vector<1x32xbf16>, vector<32x32xbf16>, vector<1x32xf32> -> vector<1x32xf32>
    %481 = arith.addf %479, %480 : vector<1x32xf32>
    %482 = math.tanh %481 : vector<1x32xf32>
    %483 = vector.extract_strided_slice %31 {offsets = [12, 0], sizes = [1, 32], strides = [1, 1]} : vector<16x32xf32> to vector<1x32xf32>
    %cst_148 = arith.constant dense<0.000000e+00> : vector<1x32xf32>
    %484 = tpu.matmul %462, %39, %cst_148 {dimension_numbers = #tpu.dot_dimension_numbers<[1], [0], [0], [1], [0, 0, 1, 1], [], []>} : vector<1x32xbf16>, vector<32x32xbf16>, vector<1x32xf32> -> vector<1x32xf32>
    %485 = arith.addf %483, %484 : vector<1x32xf32>
    %486 = arith.negf %485 : vector<1x32xf32>
    %487 = math.exp %486 : vector<1x32xf32>
    %cst_149 = arith.constant 1.000000e+00 : f32
    %488 = vector.broadcast %cst_149 : f32 to vector<1x32xf32>
    %489 = arith.addf %488, %487 : vector<1x32xf32>
    %490 = arith.divf %488, %489 : vector<1x32xf32>
    %491 = arith.mulf %478, %458 : vector<1x32xf32>
    %492 = arith.mulf %470, %482 : vector<1x32xf32>
    %493 = arith.addf %491, %492 : vector<1x32xf32>
    %494 = math.tanh %493 : vector<1x32xf32>
    %495 = arith.mulf %490, %494 : vector<1x32xf32>
    %c12 = arith.constant 12 : index
    %c0_150 = arith.constant 0 : index
    %496 = vector.load %arg8[%c12, %c0_150] : memref<16x32xf32, #tpu.memory_space<vmem>>, vector<1x32xf32>
    tpu.vector_store %arg8[%c12, %c0_150], %495 {strides = array<i32>} : memref<16x32xf32, #tpu.memory_space<vmem>>, vector<1x32xf32>,
    %497 = arith.truncf %495 : vector<1x32xf32> to vector<1x32xbf16>
    %498 = vector.extract_strided_slice %10 {offsets = [13, 0], sizes = [1, 32], strides = [1, 1]} : vector<16x32xf32> to vector<1x32xf32>
    %cst_151 = arith.constant dense<0.000000e+00> : vector<1x32xf32>
    %499 = tpu.matmul %497, %33, %cst_151 {dimension_numbers = #tpu.dot_dimension_numbers<[1], [0], [0], [1], [0, 0, 1, 1], [], []>} : vector<1x32xbf16>, vector<32x32xbf16>, vector<1x32xf32> -> vector<1x32xf32>
    %500 = arith.addf %498, %499 : vector<1x32xf32>
    %501 = arith.negf %500 : vector<1x32xf32>
    %502 = math.exp %501 : vector<1x32xf32>
    %cst_152 = arith.constant 1.000000e+00 : f32
    %503 = vector.broadcast %cst_152 : f32 to vector<1x32xf32>
    %504 = arith.addf %503, %502 : vector<1x32xf32>
    %505 = arith.divf %503, %504 : vector<1x32xf32>
    %506 = vector.extract_strided_slice %17 {offsets = [13, 0], sizes = [1, 32], strides = [1, 1]} : vector<16x32xf32> to vector<1x32xf32>
    %cst_153 = arith.constant dense<0.000000e+00> : vector<1x32xf32>
    %507 = tpu.matmul %497, %35, %cst_153 {dimension_numbers = #tpu.dot_dimension_numbers<[1], [0], [0], [1], [0, 0, 1, 1], [], []>} : vector<1x32xbf16>, vector<32x32xbf16>, vector<1x32xf32> -> vector<1x32xf32>
    %508 = arith.addf %506, %507 : vector<1x32xf32>
    %509 = arith.negf %508 : vector<1x32xf32>
    %510 = math.exp %509 : vector<1x32xf32>
    %cst_154 = arith.constant 1.000000e+00 : f32
    %511 = vector.broadcast %cst_154 : f32 to vector<1x32xf32>
    %512 = arith.addf %511, %510 : vector<1x32xf32>
    %513 = arith.divf %511, %512 : vector<1x32xf32>
    %514 = vector.extract_strided_slice %24 {offsets = [13, 0], sizes = [1, 32], strides = [1, 1]} : vector<16x32xf32> to vector<1x32xf32>
    %cst_155 = arith.constant dense<0.000000e+00> : vector<1x32xf32>
    %515 = tpu.matmul %497, %37, %cst_155 {dimension_numbers = #tpu.dot_dimension_numbers<[1], [0], [0], [1], [0, 0, 1, 1], [], []>} : vector<1x32xbf16>, vector<32x32xbf16>, vector<1x32xf32> -> vector<1x32xf32>
    %516 = arith.addf %514, %515 : vector<1x32xf32>
    %517 = math.tanh %516 : vector<1x32xf32>
    %518 = vector.extract_strided_slice %31 {offsets = [13, 0], sizes = [1, 32], strides = [1, 1]} : vector<16x32xf32> to vector<1x32xf32>
    %cst_156 = arith.constant dense<0.000000e+00> : vector<1x32xf32>
    %519 = tpu.matmul %497, %39, %cst_156 {dimension_numbers = #tpu.dot_dimension_numbers<[1], [0], [0], [1], [0, 0, 1, 1], [], []>} : vector<1x32xbf16>, vector<32x32xbf16>, vector<1x32xf32> -> vector<1x32xf32>
    %520 = arith.addf %518, %519 : vector<1x32xf32>
    %521 = arith.negf %520 : vector<1x32xf32>
    %522 = math.exp %521 : vector<1x32xf32>
    %cst_157 = arith.constant 1.000000e+00 : f32
    %523 = vector.broadcast %cst_157 : f32 to vector<1x32xf32>
    %524 = arith.addf %523, %522 : vector<1x32xf32>
    %525 = arith.divf %523, %524 : vector<1x32xf32>
    %526 = arith.mulf %513, %493 : vector<1x32xf32>
    %527 = arith.mulf %505, %517 : vector<1x32xf32>
    %528 = arith.addf %526, %527 : vector<1x32xf32>
    %529 = math.tanh %528 : vector<1x32xf32>
    %530 = arith.mulf %525, %529 : vector<1x32xf32>
    %c13 = arith.constant 13 : index
    %c0_158 = arith.constant 0 : index
    %531 = vector.load %arg8[%c13, %c0_158] : memref<16x32xf32, #tpu.memory_space<vmem>>, vector<1x32xf32>
    tpu.vector_store %arg8[%c13, %c0_158], %530 {strides = array<i32>} : memref<16x32xf32, #tpu.memory_space<vmem>>, vector<1x32xf32>,
    %532 = arith.truncf %530 : vector<1x32xf32> to vector<1x32xbf16>
    %533 = vector.extract_strided_slice %10 {offsets = [14, 0], sizes = [1, 32], strides = [1, 1]} : vector<16x32xf32> to vector<1x32xf32>
    %cst_159 = arith.constant dense<0.000000e+00> : vector<1x32xf32>
    %534 = tpu.matmul %532, %33, %cst_159 {dimension_numbers = #tpu.dot_dimension_numbers<[1], [0], [0], [1], [0, 0, 1, 1], [], []>} : vector<1x32xbf16>, vector<32x32xbf16>, vector<1x32xf32> -> vector<1x32xf32>
    %535 = arith.addf %533, %534 : vector<1x32xf32>
    %536 = arith.negf %535 : vector<1x32xf32>
    %537 = math.exp %536 : vector<1x32xf32>
    %cst_160 = arith.constant 1.000000e+00 : f32
    %538 = vector.broadcast %cst_160 : f32 to vector<1x32xf32>
    %539 = arith.addf %538, %537 : vector<1x32xf32>
    %540 = arith.divf %538, %539 : vector<1x32xf32>
    %541 = vector.extract_strided_slice %17 {offsets = [14, 0], sizes = [1, 32], strides = [1, 1]} : vector<16x32xf32> to vector<1x32xf32>
    %cst_161 = arith.constant dense<0.000000e+00> : vector<1x32xf32>
    %542 = tpu.matmul %532, %35, %cst_161 {dimension_numbers = #tpu.dot_dimension_numbers<[1], [0], [0], [1], [0, 0, 1, 1], [], []>} : vector<1x32xbf16>, vector<32x32xbf16>, vector<1x32xf32> -> vector<1x32xf32>
    %543 = arith.addf %541, %542 : vector<1x32xf32>
    %544 = arith.negf %543 : vector<1x32xf32>
    %545 = math.exp %544 : vector<1x32xf32>
    %cst_162 = arith.constant 1.000000e+00 : f32
    %546 = vector.broadcast %cst_162 : f32 to vector<1x32xf32>
    %547 = arith.addf %546, %545 : vector<1x32xf32>
    %548 = arith.divf %546, %547 : vector<1x32xf32>
    %549 = vector.extract_strided_slice %24 {offsets = [14, 0], sizes = [1, 32], strides = [1, 1]} : vector<16x32xf32> to vector<1x32xf32>
    %cst_163 = arith.constant dense<0.000000e+00> : vector<1x32xf32>
    %550 = tpu.matmul %532, %37, %cst_163 {dimension_numbers = #tpu.dot_dimension_numbers<[1], [0], [0], [1], [0, 0, 1, 1], [], []>} : vector<1x32xbf16>, vector<32x32xbf16>, vector<1x32xf32> -> vector<1x32xf32>
    %551 = arith.addf %549, %550 : vector<1x32xf32>
    %552 = math.tanh %551 : vector<1x32xf32>
    %553 = vector.extract_strided_slice %31 {offsets = [14, 0], sizes = [1, 32], strides = [1, 1]} : vector<16x32xf32> to vector<1x32xf32>
    %cst_164 = arith.constant dense<0.000000e+00> : vector<1x32xf32>
    %554 = tpu.matmul %532, %39, %cst_164 {dimension_numbers = #tpu.dot_dimension_numbers<[1], [0], [0], [1], [0, 0, 1, 1], [], []>} : vector<1x32xbf16>, vector<32x32xbf16>, vector<1x32xf32> -> vector<1x32xf32>
    %555 = arith.addf %553, %554 : vector<1x32xf32>
    %556 = arith.negf %555 : vector<1x32xf32>
    %557 = math.exp %556 : vector<1x32xf32>
    %cst_165 = arith.constant 1.000000e+00 : f32
    %558 = vector.broadcast %cst_165 : f32 to vector<1x32xf32>
    %559 = arith.addf %558, %557 : vector<1x32xf32>
    %560 = arith.divf %558, %559 : vector<1x32xf32>
    %561 = arith.mulf %548, %528 : vector<1x32xf32>
    %562 = arith.mulf %540, %552 : vector<1x32xf32>
    %563 = arith.addf %561, %562 : vector<1x32xf32>
    %564 = math.tanh %563 : vector<1x32xf32>
    %565 = arith.mulf %560, %564 : vector<1x32xf32>
    %c14 = arith.constant 14 : index
    %c0_166 = arith.constant 0 : index
    %566 = vector.load %arg8[%c14, %c0_166] : memref<16x32xf32, #tpu.memory_space<vmem>>, vector<1x32xf32>
    tpu.vector_store %arg8[%c14, %c0_166], %565 {strides = array<i32>} : memref<16x32xf32, #tpu.memory_space<vmem>>, vector<1x32xf32>,
    %567 = arith.truncf %565 : vector<1x32xf32> to vector<1x32xbf16>
    %568 = vector.extract_strided_slice %10 {offsets = [15, 0], sizes = [1, 32], strides = [1, 1]} : vector<16x32xf32> to vector<1x32xf32>
    %cst_167 = arith.constant dense<0.000000e+00> : vector<1x32xf32>
    %569 = tpu.matmul %567, %33, %cst_167 {dimension_numbers = #tpu.dot_dimension_numbers<[1], [0], [0], [1], [0, 0, 1, 1], [], []>} : vector<1x32xbf16>, vector<32x32xbf16>, vector<1x32xf32> -> vector<1x32xf32>
    %570 = arith.addf %568, %569 : vector<1x32xf32>
    %571 = arith.negf %570 : vector<1x32xf32>
    %572 = math.exp %571 : vector<1x32xf32>
    %cst_168 = arith.constant 1.000000e+00 : f32
    %573 = vector.broadcast %cst_168 : f32 to vector<1x32xf32>
    %574 = arith.addf %573, %572 : vector<1x32xf32>
    %575 = arith.divf %573, %574 : vector<1x32xf32>
    %576 = vector.extract_strided_slice %17 {offsets = [15, 0], sizes = [1, 32], strides = [1, 1]} : vector<16x32xf32> to vector<1x32xf32>
    %cst_169 = arith.constant dense<0.000000e+00> : vector<1x32xf32>
    %577 = tpu.matmul %567, %35, %cst_169 {dimension_numbers = #tpu.dot_dimension_numbers<[1], [0], [0], [1], [0, 0, 1, 1], [], []>} : vector<1x32xbf16>, vector<32x32xbf16>, vector<1x32xf32> -> vector<1x32xf32>
    %578 = arith.addf %576, %577 : vector<1x32xf32>
    %579 = arith.negf %578 : vector<1x32xf32>
    %580 = math.exp %579 : vector<1x32xf32>
    %cst_170 = arith.constant 1.000000e+00 : f32
    %581 = vector.broadcast %cst_170 : f32 to vector<1x32xf32>
    %582 = arith.addf %581, %580 : vector<1x32xf32>
    %583 = arith.divf %581, %582 : vector<1x32xf32>
    %584 = vector.extract_strided_slice %24 {offsets = [15, 0], sizes = [1, 32], strides = [1, 1]} : vector<16x32xf32> to vector<1x32xf32>
    %cst_171 = arith.constant dense<0.000000e+00> : vector<1x32xf32>
    %585 = tpu.matmul %567, %37, %cst_171 {dimension_numbers = #tpu.dot_dimension_numbers<[1], [0], [0], [1], [0, 0, 1, 1], [], []>} : vector<1x32xbf16>, vector<32x32xbf16>, vector<1x32xf32> -> vector<1x32xf32>
    %586 = arith.addf %584, %585 : vector<1x32xf32>
    %587 = math.tanh %586 : vector<1x32xf32>
    %588 = vector.extract_strided_slice %31 {offsets = [15, 0], sizes = [1, 32], strides = [1, 1]} : vector<16x32xf32> to vector<1x32xf32>
    %cst_172 = arith.constant dense<0.000000e+00> : vector<1x32xf32>
    %589 = tpu.matmul %567, %39, %cst_172 {dimension_numbers = #tpu.dot_dimension_numbers<[1], [0], [0], [1], [0, 0, 1, 1], [], []>} : vector<1x32xbf16>, vector<32x32xbf16>, vector<1x32xf32> -> vector<1x32xf32>
    %590 = arith.addf %588, %589 : vector<1x32xf32>
    %591 = arith.negf %590 : vector<1x32xf32>
    %592 = math.exp %591 : vector<1x32xf32>
    %cst_173 = arith.constant 1.000000e+00 : f32
    %593 = vector.broadcast %cst_173 : f32 to vector<1x32xf32>
    %594 = arith.addf %593, %592 : vector<1x32xf32>
    %595 = arith.divf %593, %594 : vector<1x32xf32>
    %596 = arith.mulf %583, %563 : vector<1x32xf32>
    %597 = arith.mulf %575, %587 : vector<1x32xf32>
    %598 = arith.addf %596, %597 : vector<1x32xf32>
    %599 = math.tanh %598 : vector<1x32xf32>
    %600 = arith.mulf %595, %599 : vector<1x32xf32>
    %c15 = arith.constant 15 : index
    %c0_174 = arith.constant 0 : index
    %601 = vector.load %arg8[%c15, %c0_174] : memref<16x32xf32, #tpu.memory_space<vmem>>, vector<1x32xf32>
    tpu.vector_store %arg8[%c15, %c0_174], %600 {strides = array<i32>} : memref<16x32xf32, #tpu.memory_space<vmem>>, vector<1x32xf32>,
    %c0_175 = arith.constant 0 : index
    %c0_176 = arith.constant 0 : index
    %602 = vector.load %arg8[%c0_175, %c0_176] : memref<16x32xf32, #tpu.memory_space<vmem>>, vector<16x32xf32>
    %603 = arith.truncf %602 : vector<16x32xf32> to vector<16x32xbf16>
    %c4_177 = arith.constant 4 : index
    %c0_178 = arith.constant 0 : index
    %c0_179 = arith.constant 0 : index
    %604 = vector.load %arg1[%c4_177, %c0_178, %c0_179] : memref<8x32x32xbf16, #tpu.memory_space<vmem>>, vector<1x32x32xbf16>
    %605 = vector.shape_cast %604 : vector<1x32x32xbf16> to vector<32x32xbf16>
    %cst_180 = arith.constant dense<0.000000e+00> : vector<16x32xf32>
    %606 = tpu.matmul %603, %605, %cst_180 {dimension_numbers = #tpu.dot_dimension_numbers<[1], [0], [0], [1], [0, 0, 1, 1], [], []>} : vector<16x32xbf16>, vector<32x32xbf16>, vector<16x32xf32> -> vector<16x32xf32>
    %c4_181 = arith.constant 4 : index
    %c0_182 = arith.constant 0 : index
    %c0_183 = arith.constant 0 : index
    %607 = vector.load %arg3[%c4_181, %c0_182, %c0_183] : memref<8x1x32xf32, #tpu.memory_space<vmem>>, vector<1x1x32xf32>
    %608 = vector.shape_cast %607 : vector<1x1x32xf32> to vector<1x32xf32>
    %609 = vector.broadcast %608 : vector<1x32xf32> to vector<16x32xf32>
    %610 = arith.addf %606, %609 : vector<16x32xf32>
    %c5_184 = arith.constant 5 : index
    %c0_185 = arith.constant 0 : index
    %c0_186 = arith.constant 0 : index
    %611 = vector.load %arg1[%c5_184, %c0_185, %c0_186] : memref<8x32x32xbf16, #tpu.memory_space<vmem>>, vector<1x32x32xbf16>
    %612 = vector.shape_cast %611 : vector<1x32x32xbf16> to vector<32x32xbf16>
    %cst_187 = arith.constant dense<0.000000e+00> : vector<16x32xf32>
    %613 = tpu.matmul %603, %612, %cst_187 {dimension_numbers = #tpu.dot_dimension_numbers<[1], [0], [0], [1], [0, 0, 1, 1], [], []>} : vector<16x32xbf16>, vector<32x32xbf16>, vector<16x32xf32> -> vector<16x32xf32>
    %c5_188 = arith.constant 5 : index
    %c0_189 = arith.constant 0 : index
    %c0_190 = arith.constant 0 : index
    %614 = vector.load %arg3[%c5_188, %c0_189, %c0_190] : memref<8x1x32xf32, #tpu.memory_space<vmem>>, vector<1x1x32xf32>
    %615 = vector.shape_cast %614 : vector<1x1x32xf32> to vector<1x32xf32>
    %616 = vector.broadcast %615 : vector<1x32xf32> to vector<16x32xf32>
    %617 = arith.addf %613, %616 : vector<16x32xf32>
    %c6_191 = arith.constant 6 : index
    %c0_192 = arith.constant 0 : index
    %c0_193 = arith.constant 0 : index
    %618 = vector.load %arg1[%c6_191, %c0_192, %c0_193] : memref<8x32x32xbf16, #tpu.memory_space<vmem>>, vector<1x32x32xbf16>
    %619 = vector.shape_cast %618 : vector<1x32x32xbf16> to vector<32x32xbf16>
    %cst_194 = arith.constant dense<0.000000e+00> : vector<16x32xf32>
    %620 = tpu.matmul %603, %619, %cst_194 {dimension_numbers = #tpu.dot_dimension_numbers<[1], [0], [0], [1], [0, 0, 1, 1], [], []>} : vector<16x32xbf16>, vector<32x32xbf16>, vector<16x32xf32> -> vector<16x32xf32>
    %c6_195 = arith.constant 6 : index
    %c0_196 = arith.constant 0 : index
    %c0_197 = arith.constant 0 : index
    %621 = vector.load %arg3[%c6_195, %c0_196, %c0_197] : memref<8x1x32xf32, #tpu.memory_space<vmem>>, vector<1x1x32xf32>
    %622 = vector.shape_cast %621 : vector<1x1x32xf32> to vector<1x32xf32>
    %623 = vector.broadcast %622 : vector<1x32xf32> to vector<16x32xf32>
    %624 = arith.addf %620, %623 : vector<16x32xf32>
    %c7_198 = arith.constant 7 : index
    %c0_199 = arith.constant 0 : index
    %c0_200 = arith.constant 0 : index
    %625 = vector.load %arg1[%c7_198, %c0_199, %c0_200] : memref<8x32x32xbf16, #tpu.memory_space<vmem>>, vector<1x32x32xbf16>
    %626 = vector.shape_cast %625 : vector<1x32x32xbf16> to vector<32x32xbf16>
    %cst_201 = arith.constant dense<0.000000e+00> : vector<16x32xf32>
    %627 = tpu.matmul %603, %626, %cst_201 {dimension_numbers = #tpu.dot_dimension_numbers<[1], [0], [0], [1], [0, 0, 1, 1], [], []>} : vector<16x32xbf16>, vector<32x32xbf16>, vector<16x32xf32> -> vector<16x32xf32>
    %c7_202 = arith.constant 7 : index
    %c0_203 = arith.constant 0 : index
    %c0_204 = arith.constant 0 : index
    %628 = vector.load %arg3[%c7_202, %c0_203, %c0_204] : memref<8x1x32xf32, #tpu.memory_space<vmem>>, vector<1x1x32xf32>
    %629 = vector.shape_cast %628 : vector<1x1x32xf32> to vector<1x32xf32>
    %630 = vector.broadcast %629 : vector<1x32xf32> to vector<16x32xf32>
    %631 = arith.addf %627, %630 : vector<16x32xf32>
    %c4_205 = arith.constant 4 : index
    %c0_206 = arith.constant 0 : index
    %c0_207 = arith.constant 0 : index
    %632 = vector.load %arg2[%c4_205, %c0_206, %c0_207] : memref<8x32x32xbf16, #tpu.memory_space<vmem>>, vector<1x32x32xbf16>
    %633 = vector.shape_cast %632 : vector<1x32x32xbf16> to vector<32x32xbf16>
    %c5_208 = arith.constant 5 : index
    %c0_209 = arith.constant 0 : index
    %c0_210 = arith.constant 0 : index
    %634 = vector.load %arg2[%c5_208, %c0_209, %c0_210] : memref<8x32x32xbf16, #tpu.memory_space<vmem>>, vector<1x32x32xbf16>
    %635 = vector.shape_cast %634 : vector<1x32x32xbf16> to vector<32x32xbf16>
    %c6_211 = arith.constant 6 : index
    %c0_212 = arith.constant 0 : index
    %c0_213 = arith.constant 0 : index
    %636 = vector.load %arg2[%c6_211, %c0_212, %c0_213] : memref<8x32x32xbf16, #tpu.memory_space<vmem>>, vector<1x32x32xbf16>
    %637 = vector.shape_cast %636 : vector<1x32x32xbf16> to vector<32x32xbf16>
    %c7_214 = arith.constant 7 : index
    %c0_215 = arith.constant 0 : index
    %c0_216 = arith.constant 0 : index
    %638 = vector.load %arg2[%c7_214, %c0_215, %c0_216] : memref<8x32x32xbf16, #tpu.memory_space<vmem>>, vector<1x32x32xbf16>
    %639 = vector.shape_cast %638 : vector<1x32x32xbf16> to vector<32x32xbf16>
    %cst_217 = arith.constant 0.000000e+00 : f32
    %640 = vector.broadcast %cst_217 : f32 to vector<1x32xf32>
    %cst_218 = arith.constant 0.000000e+00 : f32
    %641 = vector.broadcast %cst_218 : f32 to vector<1x32xf32>
    %642 = arith.truncf %640 : vector<1x32xf32> to vector<1x32xbf16>
    %643 = vector.extract_strided_slice %610 {offsets = [0, 0], sizes = [1, 32], strides = [1, 1]} : vector<16x32xf32> to vector<1x32xf32>
    %cst_219 = arith.constant dense<0.000000e+00> : vector<1x32xf32>
    %644 = tpu.matmul %642, %633, %cst_219 {dimension_numbers = #tpu.dot_dimension_numbers<[1], [0], [0], [1], [0, 0, 1, 1], [], []>} : vector<1x32xbf16>, vector<32x32xbf16>, vector<1x32xf32> -> vector<1x32xf32>
    %645 = arith.addf %643, %644 : vector<1x32xf32>
    %646 = arith.negf %645 : vector<1x32xf32>
    %647 = math.exp %646 : vector<1x32xf32>
    %cst_220 = arith.constant 1.000000e+00 : f32
    %648 = vector.broadcast %cst_220 : f32 to vector<1x32xf32>
    %649 = arith.addf %648, %647 : vector<1x32xf32>
    %650 = arith.divf %648, %649 : vector<1x32xf32>
    %651 = vector.extract_strided_slice %617 {offsets = [0, 0], sizes = [1, 32], strides = [1, 1]} : vector<16x32xf32> to vector<1x32xf32>
    %cst_221 = arith.constant dense<0.000000e+00> : vector<1x32xf32>
    %652 = tpu.matmul %642, %635, %cst_221 {dimension_numbers = #tpu.dot_dimension_numbers<[1], [0], [0], [1], [0, 0, 1, 1], [], []>} : vector<1x32xbf16>, vector<32x32xbf16>, vector<1x32xf32> -> vector<1x32xf32>
    %653 = arith.addf %651, %652 : vector<1x32xf32>
    %654 = arith.negf %653 : vector<1x32xf32>
    %655 = math.exp %654 : vector<1x32xf32>
    %cst_222 = arith.constant 1.000000e+00 : f32
    %656 = vector.broadcast %cst_222 : f32 to vector<1x32xf32>
    %657 = arith.addf %656, %655 : vector<1x32xf32>
    %658 = arith.divf %656, %657 : vector<1x32xf32>
    %659 = vector.extract_strided_slice %624 {offsets = [0, 0], sizes = [1, 32], strides = [1, 1]} : vector<16x32xf32> to vector<1x32xf32>
    %cst_223 = arith.constant dense<0.000000e+00> : vector<1x32xf32>
    %660 = tpu.matmul %642, %637, %cst_223 {dimension_numbers = #tpu.dot_dimension_numbers<[1], [0], [0], [1], [0, 0, 1, 1], [], []>} : vector<1x32xbf16>, vector<32x32xbf16>, vector<1x32xf32> -> vector<1x32xf32>
    %661 = arith.addf %659, %660 : vector<1x32xf32>
    %662 = math.tanh %661 : vector<1x32xf32>
    %663 = vector.extract_strided_slice %631 {offsets = [0, 0], sizes = [1, 32], strides = [1, 1]} : vector<16x32xf32> to vector<1x32xf32>
    %cst_224 = arith.constant dense<0.000000e+00> : vector<1x32xf32>
    %664 = tpu.matmul %642, %639, %cst_224 {dimension_numbers = #tpu.dot_dimension_numbers<[1], [0], [0], [1], [0, 0, 1, 1], [], []>} : vector<1x32xbf16>, vector<32x32xbf16>, vector<1x32xf32> -> vector<1x32xf32>
    %665 = arith.addf %663, %664 : vector<1x32xf32>
    %666 = arith.negf %665 : vector<1x32xf32>
    %667 = math.exp %666 : vector<1x32xf32>
    %cst_225 = arith.constant 1.000000e+00 : f32
    %668 = vector.broadcast %cst_225 : f32 to vector<1x32xf32>
    %669 = arith.addf %668, %667 : vector<1x32xf32>
    %670 = arith.divf %668, %669 : vector<1x32xf32>
    %671 = arith.mulf %658, %641 : vector<1x32xf32>
    %672 = arith.mulf %650, %662 : vector<1x32xf32>
    %673 = arith.addf %671, %672 : vector<1x32xf32>
    %674 = math.tanh %673 : vector<1x32xf32>
    %675 = arith.mulf %670, %674 : vector<1x32xf32>
    %676 = arith.truncf %675 : vector<1x32xf32> to vector<1x32xbf16>
    %677 = vector.extract_strided_slice %610 {offsets = [1, 0], sizes = [1, 32], strides = [1, 1]} : vector<16x32xf32> to vector<1x32xf32>
    %cst_226 = arith.constant dense<0.000000e+00> : vector<1x32xf32>
    %678 = tpu.matmul %676, %633, %cst_226 {dimension_numbers = #tpu.dot_dimension_numbers<[1], [0], [0], [1], [0, 0, 1, 1], [], []>} : vector<1x32xbf16>, vector<32x32xbf16>, vector<1x32xf32> -> vector<1x32xf32>
    %679 = arith.addf %677, %678 : vector<1x32xf32>
    %680 = arith.negf %679 : vector<1x32xf32>
    %681 = math.exp %680 : vector<1x32xf32>
    %cst_227 = arith.constant 1.000000e+00 : f32
    %682 = vector.broadcast %cst_227 : f32 to vector<1x32xf32>
    %683 = arith.addf %682, %681 : vector<1x32xf32>
    %684 = arith.divf %682, %683 : vector<1x32xf32>
    %685 = vector.extract_strided_slice %617 {offsets = [1, 0], sizes = [1, 32], strides = [1, 1]} : vector<16x32xf32> to vector<1x32xf32>
    %cst_228 = arith.constant dense<0.000000e+00> : vector<1x32xf32>
    %686 = tpu.matmul %676, %635, %cst_228 {dimension_numbers = #tpu.dot_dimension_numbers<[1], [0], [0], [1], [0, 0, 1, 1], [], []>} : vector<1x32xbf16>, vector<32x32xbf16>, vector<1x32xf32> -> vector<1x32xf32>
    %687 = arith.addf %685, %686 : vector<1x32xf32>
    %688 = arith.negf %687 : vector<1x32xf32>
    %689 = math.exp %688 : vector<1x32xf32>
    %cst_229 = arith.constant 1.000000e+00 : f32
    %690 = vector.broadcast %cst_229 : f32 to vector<1x32xf32>
    %691 = arith.addf %690, %689 : vector<1x32xf32>
    %692 = arith.divf %690, %691 : vector<1x32xf32>
    %693 = vector.extract_strided_slice %624 {offsets = [1, 0], sizes = [1, 32], strides = [1, 1]} : vector<16x32xf32> to vector<1x32xf32>
    %cst_230 = arith.constant dense<0.000000e+00> : vector<1x32xf32>
    %694 = tpu.matmul %676, %637, %cst_230 {dimension_numbers = #tpu.dot_dimension_numbers<[1], [0], [0], [1], [0, 0, 1, 1], [], []>} : vector<1x32xbf16>, vector<32x32xbf16>, vector<1x32xf32> -> vector<1x32xf32>
    %695 = arith.addf %693, %694 : vector<1x32xf32>
    %696 = math.tanh %695 : vector<1x32xf32>
    %697 = vector.extract_strided_slice %631 {offsets = [1, 0], sizes = [1, 32], strides = [1, 1]} : vector<16x32xf32> to vector<1x32xf32>
    %cst_231 = arith.constant dense<0.000000e+00> : vector<1x32xf32>
    %698 = tpu.matmul %676, %639, %cst_231 {dimension_numbers = #tpu.dot_dimension_numbers<[1], [0], [0], [1], [0, 0, 1, 1], [], []>} : vector<1x32xbf16>, vector<32x32xbf16>, vector<1x32xf32> -> vector<1x32xf32>
    %699 = arith.addf %697, %698 : vector<1x32xf32>
    %700 = arith.negf %699 : vector<1x32xf32>
    %701 = math.exp %700 : vector<1x32xf32>
    %cst_232 = arith.constant 1.000000e+00 : f32
    %702 = vector.broadcast %cst_232 : f32 to vector<1x32xf32>
    %703 = arith.addf %702, %701 : vector<1x32xf32>
    %704 = arith.divf %702, %703 : vector<1x32xf32>
    %705 = arith.mulf %692, %673 : vector<1x32xf32>
    %706 = arith.mulf %684, %696 : vector<1x32xf32>
    %707 = arith.addf %705, %706 : vector<1x32xf32>
    %708 = math.tanh %707 : vector<1x32xf32>
    %709 = arith.mulf %704, %708 : vector<1x32xf32>
    %710 = arith.truncf %709 : vector<1x32xf32> to vector<1x32xbf16>
    %711 = vector.extract_strided_slice %610 {offsets = [2, 0], sizes = [1, 32], strides = [1, 1]} : vector<16x32xf32> to vector<1x32xf32>
    %cst_233 = arith.constant dense<0.000000e+00> : vector<1x32xf32>
    %712 = tpu.matmul %710, %633, %cst_233 {dimension_numbers = #tpu.dot_dimension_numbers<[1], [0], [0], [1], [0, 0, 1, 1], [], []>} : vector<1x32xbf16>, vector<32x32xbf16>, vector<1x32xf32> -> vector<1x32xf32>
    %713 = arith.addf %711, %712 : vector<1x32xf32>
    %714 = arith.negf %713 : vector<1x32xf32>
    %715 = math.exp %714 : vector<1x32xf32>
    %cst_234 = arith.constant 1.000000e+00 : f32
    %716 = vector.broadcast %cst_234 : f32 to vector<1x32xf32>
    %717 = arith.addf %716, %715 : vector<1x32xf32>
    %718 = arith.divf %716, %717 : vector<1x32xf32>
    %719 = vector.extract_strided_slice %617 {offsets = [2, 0], sizes = [1, 32], strides = [1, 1]} : vector<16x32xf32> to vector<1x32xf32>
    %cst_235 = arith.constant dense<0.000000e+00> : vector<1x32xf32>
    %720 = tpu.matmul %710, %635, %cst_235 {dimension_numbers = #tpu.dot_dimension_numbers<[1], [0], [0], [1], [0, 0, 1, 1], [], []>} : vector<1x32xbf16>, vector<32x32xbf16>, vector<1x32xf32> -> vector<1x32xf32>
    %721 = arith.addf %719, %720 : vector<1x32xf32>
    %722 = arith.negf %721 : vector<1x32xf32>
    %723 = math.exp %722 : vector<1x32xf32>
    %cst_236 = arith.constant 1.000000e+00 : f32
    %724 = vector.broadcast %cst_236 : f32 to vector<1x32xf32>
    %725 = arith.addf %724, %723 : vector<1x32xf32>
    %726 = arith.divf %724, %725 : vector<1x32xf32>
    %727 = vector.extract_strided_slice %624 {offsets = [2, 0], sizes = [1, 32], strides = [1, 1]} : vector<16x32xf32> to vector<1x32xf32>
    %cst_237 = arith.constant dense<0.000000e+00> : vector<1x32xf32>
    %728 = tpu.matmul %710, %637, %cst_237 {dimension_numbers = #tpu.dot_dimension_numbers<[1], [0], [0], [1], [0, 0, 1, 1], [], []>} : vector<1x32xbf16>, vector<32x32xbf16>, vector<1x32xf32> -> vector<1x32xf32>
    %729 = arith.addf %727, %728 : vector<1x32xf32>
    %730 = math.tanh %729 : vector<1x32xf32>
    %731 = vector.extract_strided_slice %631 {offsets = [2, 0], sizes = [1, 32], strides = [1, 1]} : vector<16x32xf32> to vector<1x32xf32>
    %cst_238 = arith.constant dense<0.000000e+00> : vector<1x32xf32>
    %732 = tpu.matmul %710, %639, %cst_238 {dimension_numbers = #tpu.dot_dimension_numbers<[1], [0], [0], [1], [0, 0, 1, 1], [], []>} : vector<1x32xbf16>, vector<32x32xbf16>, vector<1x32xf32> -> vector<1x32xf32>
    %733 = arith.addf %731, %732 : vector<1x32xf32>
    %734 = arith.negf %733 : vector<1x32xf32>
    %735 = math.exp %734 : vector<1x32xf32>
    %cst_239 = arith.constant 1.000000e+00 : f32
    %736 = vector.broadcast %cst_239 : f32 to vector<1x32xf32>
    %737 = arith.addf %736, %735 : vector<1x32xf32>
    %738 = arith.divf %736, %737 : vector<1x32xf32>
    %739 = arith.mulf %726, %707 : vector<1x32xf32>
    %740 = arith.mulf %718, %730 : vector<1x32xf32>
    %741 = arith.addf %739, %740 : vector<1x32xf32>
    %742 = math.tanh %741 : vector<1x32xf32>
    %743 = arith.mulf %738, %742 : vector<1x32xf32>
    %744 = arith.truncf %743 : vector<1x32xf32> to vector<1x32xbf16>
    %745 = vector.extract_strided_slice %610 {offsets = [3, 0], sizes = [1, 32], strides = [1, 1]} : vector<16x32xf32> to vector<1x32xf32>
    %cst_240 = arith.constant dense<0.000000e+00> : vector<1x32xf32>
    %746 = tpu.matmul %744, %633, %cst_240 {dimension_numbers = #tpu.dot_dimension_numbers<[1], [0], [0], [1], [0, 0, 1, 1], [], []>} : vector<1x32xbf16>, vector<32x32xbf16>, vector<1x32xf32> -> vector<1x32xf32>
    %747 = arith.addf %745, %746 : vector<1x32xf32>
    %748 = arith.negf %747 : vector<1x32xf32>
    %749 = math.exp %748 : vector<1x32xf32>
    %cst_241 = arith.constant 1.000000e+00 : f32
    %750 = vector.broadcast %cst_241 : f32 to vector<1x32xf32>
    %751 = arith.addf %750, %749 : vector<1x32xf32>
    %752 = arith.divf %750, %751 : vector<1x32xf32>
    %753 = vector.extract_strided_slice %617 {offsets = [3, 0], sizes = [1, 32], strides = [1, 1]} : vector<16x32xf32> to vector<1x32xf32>
    %cst_242 = arith.constant dense<0.000000e+00> : vector<1x32xf32>
    %754 = tpu.matmul %744, %635, %cst_242 {dimension_numbers = #tpu.dot_dimension_numbers<[1], [0], [0], [1], [0, 0, 1, 1], [], []>} : vector<1x32xbf16>, vector<32x32xbf16>, vector<1x32xf32> -> vector<1x32xf32>
    %755 = arith.addf %753, %754 : vector<1x32xf32>
    %756 = arith.negf %755 : vector<1x32xf32>
    %757 = math.exp %756 : vector<1x32xf32>
    %cst_243 = arith.constant 1.000000e+00 : f32
    %758 = vector.broadcast %cst_243 : f32 to vector<1x32xf32>
    %759 = arith.addf %758, %757 : vector<1x32xf32>
    %760 = arith.divf %758, %759 : vector<1x32xf32>
    %761 = vector.extract_strided_slice %624 {offsets = [3, 0], sizes = [1, 32], strides = [1, 1]} : vector<16x32xf32> to vector<1x32xf32>
    %cst_244 = arith.constant dense<0.000000e+00> : vector<1x32xf32>
    %762 = tpu.matmul %744, %637, %cst_244 {dimension_numbers = #tpu.dot_dimension_numbers<[1], [0], [0], [1], [0, 0, 1, 1], [], []>} : vector<1x32xbf16>, vector<32x32xbf16>, vector<1x32xf32> -> vector<1x32xf32>
    %763 = arith.addf %761, %762 : vector<1x32xf32>
    %764 = math.tanh %763 : vector<1x32xf32>
    %765 = vector.extract_strided_slice %631 {offsets = [3, 0], sizes = [1, 32], strides = [1, 1]} : vector<16x32xf32> to vector<1x32xf32>
    %cst_245 = arith.constant dense<0.000000e+00> : vector<1x32xf32>
    %766 = tpu.matmul %744, %639, %cst_245 {dimension_numbers = #tpu.dot_dimension_numbers<[1], [0], [0], [1], [0, 0, 1, 1], [], []>} : vector<1x32xbf16>, vector<32x32xbf16>, vector<1x32xf32> -> vector<1x32xf32>
    %767 = arith.addf %765, %766 : vector<1x32xf32>
    %768 = arith.negf %767 : vector<1x32xf32>
    %769 = math.exp %768 : vector<1x32xf32>
    %cst_246 = arith.constant 1.000000e+00 : f32
    %770 = vector.broadcast %cst_246 : f32 to vector<1x32xf32>
    %771 = arith.addf %770, %769 : vector<1x32xf32>
    %772 = arith.divf %770, %771 : vector<1x32xf32>
    %773 = arith.mulf %760, %741 : vector<1x32xf32>
    %774 = arith.mulf %752, %764 : vector<1x32xf32>
    %775 = arith.addf %773, %774 : vector<1x32xf32>
    %776 = math.tanh %775 : vector<1x32xf32>
    %777 = arith.mulf %772, %776 : vector<1x32xf32>
    %778 = arith.truncf %777 : vector<1x32xf32> to vector<1x32xbf16>
    %779 = vector.extract_strided_slice %610 {offsets = [4, 0], sizes = [1, 32], strides = [1, 1]} : vector<16x32xf32> to vector<1x32xf32>
    %cst_247 = arith.constant dense<0.000000e+00> : vector<1x32xf32>
    %780 = tpu.matmul %778, %633, %cst_247 {dimension_numbers = #tpu.dot_dimension_numbers<[1], [0], [0], [1], [0, 0, 1, 1], [], []>} : vector<1x32xbf16>, vector<32x32xbf16>, vector<1x32xf32> -> vector<1x32xf32>
    %781 = arith.addf %779, %780 : vector<1x32xf32>
    %782 = arith.negf %781 : vector<1x32xf32>
    %783 = math.exp %782 : vector<1x32xf32>
    %cst_248 = arith.constant 1.000000e+00 : f32
    %784 = vector.broadcast %cst_248 : f32 to vector<1x32xf32>
    %785 = arith.addf %784, %783 : vector<1x32xf32>
    %786 = arith.divf %784, %785 : vector<1x32xf32>
    %787 = vector.extract_strided_slice %617 {offsets = [4, 0], sizes = [1, 32], strides = [1, 1]} : vector<16x32xf32> to vector<1x32xf32>
    %cst_249 = arith.constant dense<0.000000e+00> : vector<1x32xf32>
    %788 = tpu.matmul %778, %635, %cst_249 {dimension_numbers = #tpu.dot_dimension_numbers<[1], [0], [0], [1], [0, 0, 1, 1], [], []>} : vector<1x32xbf16>, vector<32x32xbf16>, vector<1x32xf32> -> vector<1x32xf32>
    %789 = arith.addf %787, %788 : vector<1x32xf32>
    %790 = arith.negf %789 : vector<1x32xf32>
    %791 = math.exp %790 : vector<1x32xf32>
    %cst_250 = arith.constant 1.000000e+00 : f32
    %792 = vector.broadcast %cst_250 : f32 to vector<1x32xf32>
    %793 = arith.addf %792, %791 : vector<1x32xf32>
    %794 = arith.divf %792, %793 : vector<1x32xf32>
    %795 = vector.extract_strided_slice %624 {offsets = [4, 0], sizes = [1, 32], strides = [1, 1]} : vector<16x32xf32> to vector<1x32xf32>
    %cst_251 = arith.constant dense<0.000000e+00> : vector<1x32xf32>
    %796 = tpu.matmul %778, %637, %cst_251 {dimension_numbers = #tpu.dot_dimension_numbers<[1], [0], [0], [1], [0, 0, 1, 1], [], []>} : vector<1x32xbf16>, vector<32x32xbf16>, vector<1x32xf32> -> vector<1x32xf32>
    %797 = arith.addf %795, %796 : vector<1x32xf32>
    %798 = math.tanh %797 : vector<1x32xf32>
    %799 = vector.extract_strided_slice %631 {offsets = [4, 0], sizes = [1, 32], strides = [1, 1]} : vector<16x32xf32> to vector<1x32xf32>
    %cst_252 = arith.constant dense<0.000000e+00> : vector<1x32xf32>
    %800 = tpu.matmul %778, %639, %cst_252 {dimension_numbers = #tpu.dot_dimension_numbers<[1], [0], [0], [1], [0, 0, 1, 1], [], []>} : vector<1x32xbf16>, vector<32x32xbf16>, vector<1x32xf32> -> vector<1x32xf32>
    %801 = arith.addf %799, %800 : vector<1x32xf32>
    %802 = arith.negf %801 : vector<1x32xf32>
    %803 = math.exp %802 : vector<1x32xf32>
    %cst_253 = arith.constant 1.000000e+00 : f32
    %804 = vector.broadcast %cst_253 : f32 to vector<1x32xf32>
    %805 = arith.addf %804, %803 : vector<1x32xf32>
    %806 = arith.divf %804, %805 : vector<1x32xf32>
    %807 = arith.mulf %794, %775 : vector<1x32xf32>
    %808 = arith.mulf %786, %798 : vector<1x32xf32>
    %809 = arith.addf %807, %808 : vector<1x32xf32>
    %810 = math.tanh %809 : vector<1x32xf32>
    %811 = arith.mulf %806, %810 : vector<1x32xf32>
    %812 = arith.truncf %811 : vector<1x32xf32> to vector<1x32xbf16>
    %813 = vector.extract_strided_slice %610 {offsets = [5, 0], sizes = [1, 32], strides = [1, 1]} : vector<16x32xf32> to vector<1x32xf32>
    %cst_254 = arith.constant dense<0.000000e+00> : vector<1x32xf32>
    %814 = tpu.matmul %812, %633, %cst_254 {dimension_numbers = #tpu.dot_dimension_numbers<[1], [0], [0], [1], [0, 0, 1, 1], [], []>} : vector<1x32xbf16>, vector<32x32xbf16>, vector<1x32xf32> -> vector<1x32xf32>
    %815 = arith.addf %813, %814 : vector<1x32xf32>
    %816 = arith.negf %815 : vector<1x32xf32>
    %817 = math.exp %816 : vector<1x32xf32>
    %cst_255 = arith.constant 1.000000e+00 : f32
    %818 = vector.broadcast %cst_255 : f32 to vector<1x32xf32>
    %819 = arith.addf %818, %817 : vector<1x32xf32>
    %820 = arith.divf %818, %819 : vector<1x32xf32>
    %821 = vector.extract_strided_slice %617 {offsets = [5, 0], sizes = [1, 32], strides = [1, 1]} : vector<16x32xf32> to vector<1x32xf32>
    %cst_256 = arith.constant dense<0.000000e+00> : vector<1x32xf32>
    %822 = tpu.matmul %812, %635, %cst_256 {dimension_numbers = #tpu.dot_dimension_numbers<[1], [0], [0], [1], [0, 0, 1, 1], [], []>} : vector<1x32xbf16>, vector<32x32xbf16>, vector<1x32xf32> -> vector<1x32xf32>
    %823 = arith.addf %821, %822 : vector<1x32xf32>
    %824 = arith.negf %823 : vector<1x32xf32>
    %825 = math.exp %824 : vector<1x32xf32>
    %cst_257 = arith.constant 1.000000e+00 : f32
    %826 = vector.broadcast %cst_257 : f32 to vector<1x32xf32>
    %827 = arith.addf %826, %825 : vector<1x32xf32>
    %828 = arith.divf %826, %827 : vector<1x32xf32>
    %829 = vector.extract_strided_slice %624 {offsets = [5, 0], sizes = [1, 32], strides = [1, 1]} : vector<16x32xf32> to vector<1x32xf32>
    %cst_258 = arith.constant dense<0.000000e+00> : vector<1x32xf32>
    %830 = tpu.matmul %812, %637, %cst_258 {dimension_numbers = #tpu.dot_dimension_numbers<[1], [0], [0], [1], [0, 0, 1, 1], [], []>} : vector<1x32xbf16>, vector<32x32xbf16>, vector<1x32xf32> -> vector<1x32xf32>
    %831 = arith.addf %829, %830 : vector<1x32xf32>
    %832 = math.tanh %831 : vector<1x32xf32>
    %833 = vector.extract_strided_slice %631 {offsets = [5, 0], sizes = [1, 32], strides = [1, 1]} : vector<16x32xf32> to vector<1x32xf32>
    %cst_259 = arith.constant dense<0.000000e+00> : vector<1x32xf32>
    %834 = tpu.matmul %812, %639, %cst_259 {dimension_numbers = #tpu.dot_dimension_numbers<[1], [0], [0], [1], [0, 0, 1, 1], [], []>} : vector<1x32xbf16>, vector<32x32xbf16>, vector<1x32xf32> -> vector<1x32xf32>
    %835 = arith.addf %833, %834 : vector<1x32xf32>
    %836 = arith.negf %835 : vector<1x32xf32>
    %837 = math.exp %836 : vector<1x32xf32>
    %cst_260 = arith.constant 1.000000e+00 : f32
    %838 = vector.broadcast %cst_260 : f32 to vector<1x32xf32>
    %839 = arith.addf %838, %837 : vector<1x32xf32>
    %840 = arith.divf %838, %839 : vector<1x32xf32>
    %841 = arith.mulf %828, %809 : vector<1x32xf32>
    %842 = arith.mulf %820, %832 : vector<1x32xf32>
    %843 = arith.addf %841, %842 : vector<1x32xf32>
    %844 = math.tanh %843 : vector<1x32xf32>
    %845 = arith.mulf %840, %844 : vector<1x32xf32>
    %846 = arith.truncf %845 : vector<1x32xf32> to vector<1x32xbf16>
    %847 = vector.extract_strided_slice %610 {offsets = [6, 0], sizes = [1, 32], strides = [1, 1]} : vector<16x32xf32> to vector<1x32xf32>
    %cst_261 = arith.constant dense<0.000000e+00> : vector<1x32xf32>
    %848 = tpu.matmul %846, %633, %cst_261 {dimension_numbers = #tpu.dot_dimension_numbers<[1], [0], [0], [1], [0, 0, 1, 1], [], []>} : vector<1x32xbf16>, vector<32x32xbf16>, vector<1x32xf32> -> vector<1x32xf32>
    %849 = arith.addf %847, %848 : vector<1x32xf32>
    %850 = arith.negf %849 : vector<1x32xf32>
    %851 = math.exp %850 : vector<1x32xf32>
    %cst_262 = arith.constant 1.000000e+00 : f32
    %852 = vector.broadcast %cst_262 : f32 to vector<1x32xf32>
    %853 = arith.addf %852, %851 : vector<1x32xf32>
    %854 = arith.divf %852, %853 : vector<1x32xf32>
    %855 = vector.extract_strided_slice %617 {offsets = [6, 0], sizes = [1, 32], strides = [1, 1]} : vector<16x32xf32> to vector<1x32xf32>
    %cst_263 = arith.constant dense<0.000000e+00> : vector<1x32xf32>
    %856 = tpu.matmul %846, %635, %cst_263 {dimension_numbers = #tpu.dot_dimension_numbers<[1], [0], [0], [1], [0, 0, 1, 1], [], []>} : vector<1x32xbf16>, vector<32x32xbf16>, vector<1x32xf32> -> vector<1x32xf32>
    %857 = arith.addf %855, %856 : vector<1x32xf32>
    %858 = arith.negf %857 : vector<1x32xf32>
    %859 = math.exp %858 : vector<1x32xf32>
    %cst_264 = arith.constant 1.000000e+00 : f32
    %860 = vector.broadcast %cst_264 : f32 to vector<1x32xf32>
    %861 = arith.addf %860, %859 : vector<1x32xf32>
    %862 = arith.divf %860, %861 : vector<1x32xf32>
    %863 = vector.extract_strided_slice %624 {offsets = [6, 0], sizes = [1, 32], strides = [1, 1]} : vector<16x32xf32> to vector<1x32xf32>
    %cst_265 = arith.constant dense<0.000000e+00> : vector<1x32xf32>
    %864 = tpu.matmul %846, %637, %cst_265 {dimension_numbers = #tpu.dot_dimension_numbers<[1], [0], [0], [1], [0, 0, 1, 1], [], []>} : vector<1x32xbf16>, vector<32x32xbf16>, vector<1x32xf32> -> vector<1x32xf32>
    %865 = arith.addf %863, %864 : vector<1x32xf32>
    %866 = math.tanh %865 : vector<1x32xf32>
    %867 = vector.extract_strided_slice %631 {offsets = [6, 0], sizes = [1, 32], strides = [1, 1]} : vector<16x32xf32> to vector<1x32xf32>
    %cst_266 = arith.constant dense<0.000000e+00> : vector<1x32xf32>
    %868 = tpu.matmul %846, %639, %cst_266 {dimension_numbers = #tpu.dot_dimension_numbers<[1], [0], [0], [1], [0, 0, 1, 1], [], []>} : vector<1x32xbf16>, vector<32x32xbf16>, vector<1x32xf32> -> vector<1x32xf32>
    %869 = arith.addf %867, %868 : vector<1x32xf32>
    %870 = arith.negf %869 : vector<1x32xf32>
    %871 = math.exp %870 : vector<1x32xf32>
    %cst_267 = arith.constant 1.000000e+00 : f32
    %872 = vector.broadcast %cst_267 : f32 to vector<1x32xf32>
    %873 = arith.addf %872, %871 : vector<1x32xf32>
    %874 = arith.divf %872, %873 : vector<1x32xf32>
    %875 = arith.mulf %862, %843 : vector<1x32xf32>
    %876 = arith.mulf %854, %866 : vector<1x32xf32>
    %877 = arith.addf %875, %876 : vector<1x32xf32>
    %878 = math.tanh %877 : vector<1x32xf32>
    %879 = arith.mulf %874, %878 : vector<1x32xf32>
    %880 = arith.truncf %879 : vector<1x32xf32> to vector<1x32xbf16>
    %881 = vector.extract_strided_slice %610 {offsets = [7, 0], sizes = [1, 32], strides = [1, 1]} : vector<16x32xf32> to vector<1x32xf32>
    %cst_268 = arith.constant dense<0.000000e+00> : vector<1x32xf32>
    %882 = tpu.matmul %880, %633, %cst_268 {dimension_numbers = #tpu.dot_dimension_numbers<[1], [0], [0], [1], [0, 0, 1, 1], [], []>} : vector<1x32xbf16>, vector<32x32xbf16>, vector<1x32xf32> -> vector<1x32xf32>
    %883 = arith.addf %881, %882 : vector<1x32xf32>
    %884 = arith.negf %883 : vector<1x32xf32>
    %885 = math.exp %884 : vector<1x32xf32>
    %cst_269 = arith.constant 1.000000e+00 : f32
    %886 = vector.broadcast %cst_269 : f32 to vector<1x32xf32>
    %887 = arith.addf %886, %885 : vector<1x32xf32>
    %888 = arith.divf %886, %887 : vector<1x32xf32>
    %889 = vector.extract_strided_slice %617 {offsets = [7, 0], sizes = [1, 32], strides = [1, 1]} : vector<16x32xf32> to vector<1x32xf32>
    %cst_270 = arith.constant dense<0.000000e+00> : vector<1x32xf32>
    %890 = tpu.matmul %880, %635, %cst_270 {dimension_numbers = #tpu.dot_dimension_numbers<[1], [0], [0], [1], [0, 0, 1, 1], [], []>} : vector<1x32xbf16>, vector<32x32xbf16>, vector<1x32xf32> -> vector<1x32xf32>
    %891 = arith.addf %889, %890 : vector<1x32xf32>
    %892 = arith.negf %891 : vector<1x32xf32>
    %893 = math.exp %892 : vector<1x32xf32>
    %cst_271 = arith.constant 1.000000e+00 : f32
    %894 = vector.broadcast %cst_271 : f32 to vector<1x32xf32>
    %895 = arith.addf %894, %893 : vector<1x32xf32>
    %896 = arith.divf %894, %895 : vector<1x32xf32>
    %897 = vector.extract_strided_slice %624 {offsets = [7, 0], sizes = [1, 32], strides = [1, 1]} : vector<16x32xf32> to vector<1x32xf32>
    %cst_272 = arith.constant dense<0.000000e+00> : vector<1x32xf32>
    %898 = tpu.matmul %880, %637, %cst_272 {dimension_numbers = #tpu.dot_dimension_numbers<[1], [0], [0], [1], [0, 0, 1, 1], [], []>} : vector<1x32xbf16>, vector<32x32xbf16>, vector<1x32xf32> -> vector<1x32xf32>
    %899 = arith.addf %897, %898 : vector<1x32xf32>
    %900 = math.tanh %899 : vector<1x32xf32>
    %901 = vector.extract_strided_slice %631 {offsets = [7, 0], sizes = [1, 32], strides = [1, 1]} : vector<16x32xf32> to vector<1x32xf32>
    %cst_273 = arith.constant dense<0.000000e+00> : vector<1x32xf32>
    %902 = tpu.matmul %880, %639, %cst_273 {dimension_numbers = #tpu.dot_dimension_numbers<[1], [0], [0], [1], [0, 0, 1, 1], [], []>} : vector<1x32xbf16>, vector<32x32xbf16>, vector<1x32xf32> -> vector<1x32xf32>
    %903 = arith.addf %901, %902 : vector<1x32xf32>
    %904 = arith.negf %903 : vector<1x32xf32>
    %905 = math.exp %904 : vector<1x32xf32>
    %cst_274 = arith.constant 1.000000e+00 : f32
    %906 = vector.broadcast %cst_274 : f32 to vector<1x32xf32>
    %907 = arith.addf %906, %905 : vector<1x32xf32>
    %908 = arith.divf %906, %907 : vector<1x32xf32>
    %909 = arith.mulf %896, %877 : vector<1x32xf32>
    %910 = arith.mulf %888, %900 : vector<1x32xf32>
    %911 = arith.addf %909, %910 : vector<1x32xf32>
    %912 = math.tanh %911 : vector<1x32xf32>
    %913 = arith.mulf %908, %912 : vector<1x32xf32>
    %914 = arith.truncf %913 : vector<1x32xf32> to vector<1x32xbf16>
    %915 = vector.extract_strided_slice %610 {offsets = [8, 0], sizes = [1, 32], strides = [1, 1]} : vector<16x32xf32> to vector<1x32xf32>
    %cst_275 = arith.constant dense<0.000000e+00> : vector<1x32xf32>
    %916 = tpu.matmul %914, %633, %cst_275 {dimension_numbers = #tpu.dot_dimension_numbers<[1], [0], [0], [1], [0, 0, 1, 1], [], []>} : vector<1x32xbf16>, vector<32x32xbf16>, vector<1x32xf32> -> vector<1x32xf32>
    %917 = arith.addf %915, %916 : vector<1x32xf32>
    %918 = arith.negf %917 : vector<1x32xf32>
    %919 = math.exp %918 : vector<1x32xf32>
    %cst_276 = arith.constant 1.000000e+00 : f32
    %920 = vector.broadcast %cst_276 : f32 to vector<1x32xf32>
    %921 = arith.addf %920, %919 : vector<1x32xf32>
    %922 = arith.divf %920, %921 : vector<1x32xf32>
    %923 = vector.extract_strided_slice %617 {offsets = [8, 0], sizes = [1, 32], strides = [1, 1]} : vector<16x32xf32> to vector<1x32xf32>
    %cst_277 = arith.constant dense<0.000000e+00> : vector<1x32xf32>
    %924 = tpu.matmul %914, %635, %cst_277 {dimension_numbers = #tpu.dot_dimension_numbers<[1], [0], [0], [1], [0, 0, 1, 1], [], []>} : vector<1x32xbf16>, vector<32x32xbf16>, vector<1x32xf32> -> vector<1x32xf32>
    %925 = arith.addf %923, %924 : vector<1x32xf32>
    %926 = arith.negf %925 : vector<1x32xf32>
    %927 = math.exp %926 : vector<1x32xf32>
    %cst_278 = arith.constant 1.000000e+00 : f32
    %928 = vector.broadcast %cst_278 : f32 to vector<1x32xf32>
    %929 = arith.addf %928, %927 : vector<1x32xf32>
    %930 = arith.divf %928, %929 : vector<1x32xf32>
    %931 = vector.extract_strided_slice %624 {offsets = [8, 0], sizes = [1, 32], strides = [1, 1]} : vector<16x32xf32> to vector<1x32xf32>
    %cst_279 = arith.constant dense<0.000000e+00> : vector<1x32xf32>
    %932 = tpu.matmul %914, %637, %cst_279 {dimension_numbers = #tpu.dot_dimension_numbers<[1], [0], [0], [1], [0, 0, 1, 1], [], []>} : vector<1x32xbf16>, vector<32x32xbf16>, vector<1x32xf32> -> vector<1x32xf32>
    %933 = arith.addf %931, %932 : vector<1x32xf32>
    %934 = math.tanh %933 : vector<1x32xf32>
    %935 = vector.extract_strided_slice %631 {offsets = [8, 0], sizes = [1, 32], strides = [1, 1]} : vector<16x32xf32> to vector<1x32xf32>
    %cst_280 = arith.constant dense<0.000000e+00> : vector<1x32xf32>
    %936 = tpu.matmul %914, %639, %cst_280 {dimension_numbers = #tpu.dot_dimension_numbers<[1], [0], [0], [1], [0, 0, 1, 1], [], []>} : vector<1x32xbf16>, vector<32x32xbf16>, vector<1x32xf32> -> vector<1x32xf32>
    %937 = arith.addf %935, %936 : vector<1x32xf32>
    %938 = arith.negf %937 : vector<1x32xf32>
    %939 = math.exp %938 : vector<1x32xf32>
    %cst_281 = arith.constant 1.000000e+00 : f32
    %940 = vector.broadcast %cst_281 : f32 to vector<1x32xf32>
    %941 = arith.addf %940, %939 : vector<1x32xf32>
    %942 = arith.divf %940, %941 : vector<1x32xf32>
    %943 = arith.mulf %930, %911 : vector<1x32xf32>
    %944 = arith.mulf %922, %934 : vector<1x32xf32>
    %945 = arith.addf %943, %944 : vector<1x32xf32>
    %946 = math.tanh %945 : vector<1x32xf32>
    %947 = arith.mulf %942, %946 : vector<1x32xf32>
    %948 = arith.truncf %947 : vector<1x32xf32> to vector<1x32xbf16>
    %949 = vector.extract_strided_slice %610 {offsets = [9, 0], sizes = [1, 32], strides = [1, 1]} : vector<16x32xf32> to vector<1x32xf32>
    %cst_282 = arith.constant dense<0.000000e+00> : vector<1x32xf32>
    %950 = tpu.matmul %948, %633, %cst_282 {dimension_numbers = #tpu.dot_dimension_numbers<[1], [0], [0], [1], [0, 0, 1, 1], [], []>} : vector<1x32xbf16>, vector<32x32xbf16>, vector<1x32xf32> -> vector<1x32xf32>
    %951 = arith.addf %949, %950 : vector<1x32xf32>
    %952 = arith.negf %951 : vector<1x32xf32>
    %953 = math.exp %952 : vector<1x32xf32>
    %cst_283 = arith.constant 1.000000e+00 : f32
    %954 = vector.broadcast %cst_283 : f32 to vector<1x32xf32>
    %955 = arith.addf %954, %953 : vector<1x32xf32>
    %956 = arith.divf %954, %955 : vector<1x32xf32>
    %957 = vector.extract_strided_slice %617 {offsets = [9, 0], sizes = [1, 32], strides = [1, 1]} : vector<16x32xf32> to vector<1x32xf32>
    %cst_284 = arith.constant dense<0.000000e+00> : vector<1x32xf32>
    %958 = tpu.matmul %948, %635, %cst_284 {dimension_numbers = #tpu.dot_dimension_numbers<[1], [0], [0], [1], [0, 0, 1, 1], [], []>} : vector<1x32xbf16>, vector<32x32xbf16>, vector<1x32xf32> -> vector<1x32xf32>
    %959 = arith.addf %957, %958 : vector<1x32xf32>
    %960 = arith.negf %959 : vector<1x32xf32>
    %961 = math.exp %960 : vector<1x32xf32>
    %cst_285 = arith.constant 1.000000e+00 : f32
    %962 = vector.broadcast %cst_285 : f32 to vector<1x32xf32>
    %963 = arith.addf %962, %961 : vector<1x32xf32>
    %964 = arith.divf %962, %963 : vector<1x32xf32>
    %965 = vector.extract_strided_slice %624 {offsets = [9, 0], sizes = [1, 32], strides = [1, 1]} : vector<16x32xf32> to vector<1x32xf32>
    %cst_286 = arith.constant dense<0.000000e+00> : vector<1x32xf32>
    %966 = tpu.matmul %948, %637, %cst_286 {dimension_numbers = #tpu.dot_dimension_numbers<[1], [0], [0], [1], [0, 0, 1, 1], [], []>} : vector<1x32xbf16>, vector<32x32xbf16>, vector<1x32xf32> -> vector<1x32xf32>
    %967 = arith.addf %965, %966 : vector<1x32xf32>
    %968 = math.tanh %967 : vector<1x32xf32>
    %969 = vector.extract_strided_slice %631 {offsets = [9, 0], sizes = [1, 32], strides = [1, 1]} : vector<16x32xf32> to vector<1x32xf32>
    %cst_287 = arith.constant dense<0.000000e+00> : vector<1x32xf32>
    %970 = tpu.matmul %948, %639, %cst_287 {dimension_numbers = #tpu.dot_dimension_numbers<[1], [0], [0], [1], [0, 0, 1, 1], [], []>} : vector<1x32xbf16>, vector<32x32xbf16>, vector<1x32xf32> -> vector<1x32xf32>
    %971 = arith.addf %969, %970 : vector<1x32xf32>
    %972 = arith.negf %971 : vector<1x32xf32>
    %973 = math.exp %972 : vector<1x32xf32>
    %cst_288 = arith.constant 1.000000e+00 : f32
    %974 = vector.broadcast %cst_288 : f32 to vector<1x32xf32>
    %975 = arith.addf %974, %973 : vector<1x32xf32>
    %976 = arith.divf %974, %975 : vector<1x32xf32>
    %977 = arith.mulf %964, %945 : vector<1x32xf32>
    %978 = arith.mulf %956, %968 : vector<1x32xf32>
    %979 = arith.addf %977, %978 : vector<1x32xf32>
    %980 = math.tanh %979 : vector<1x32xf32>
    %981 = arith.mulf %976, %980 : vector<1x32xf32>
    %982 = arith.truncf %981 : vector<1x32xf32> to vector<1x32xbf16>
    %983 = vector.extract_strided_slice %610 {offsets = [10, 0], sizes = [1, 32], strides = [1, 1]} : vector<16x32xf32> to vector<1x32xf32>
    %cst_289 = arith.constant dense<0.000000e+00> : vector<1x32xf32>
    %984 = tpu.matmul %982, %633, %cst_289 {dimension_numbers = #tpu.dot_dimension_numbers<[1], [0], [0], [1], [0, 0, 1, 1], [], []>} : vector<1x32xbf16>, vector<32x32xbf16>, vector<1x32xf32> -> vector<1x32xf32>
    %985 = arith.addf %983, %984 : vector<1x32xf32>
    %986 = arith.negf %985 : vector<1x32xf32>
    %987 = math.exp %986 : vector<1x32xf32>
    %cst_290 = arith.constant 1.000000e+00 : f32
    %988 = vector.broadcast %cst_290 : f32 to vector<1x32xf32>
    %989 = arith.addf %988, %987 : vector<1x32xf32>
    %990 = arith.divf %988, %989 : vector<1x32xf32>
    %991 = vector.extract_strided_slice %617 {offsets = [10, 0], sizes = [1, 32], strides = [1, 1]} : vector<16x32xf32> to vector<1x32xf32>
    %cst_291 = arith.constant dense<0.000000e+00> : vector<1x32xf32>
    %992 = tpu.matmul %982, %635, %cst_291 {dimension_numbers = #tpu.dot_dimension_numbers<[1], [0], [0], [1], [0, 0, 1, 1], [], []>} : vector<1x32xbf16>, vector<32x32xbf16>, vector<1x32xf32> -> vector<1x32xf32>
    %993 = arith.addf %991, %992 : vector<1x32xf32>
    %994 = arith.negf %993 : vector<1x32xf32>
    %995 = math.exp %994 : vector<1x32xf32>
    %cst_292 = arith.constant 1.000000e+00 : f32
    %996 = vector.broadcast %cst_292 : f32 to vector<1x32xf32>
    %997 = arith.addf %996, %995 : vector<1x32xf32>
    %998 = arith.divf %996, %997 : vector<1x32xf32>
    %999 = vector.extract_strided_slice %624 {offsets = [10, 0], sizes = [1, 32], strides = [1, 1]} : vector<16x32xf32> to vector<1x32xf32>
    %cst_293 = arith.constant dense<0.000000e+00> : vector<1x32xf32>
    %1000 = tpu.matmul %982, %637, %cst_293 {dimension_numbers = #tpu.dot_dimension_numbers<[1], [0], [0], [1], [0, 0, 1, 1], [], []>} : vector<1x32xbf16>, vector<32x32xbf16>, vector<1x32xf32> -> vector<1x32xf32>
    %1001 = arith.addf %999, %1000 : vector<1x32xf32>
    %1002 = math.tanh %1001 : vector<1x32xf32>
    %1003 = vector.extract_strided_slice %631 {offsets = [10, 0], sizes = [1, 32], strides = [1, 1]} : vector<16x32xf32> to vector<1x32xf32>
    %cst_294 = arith.constant dense<0.000000e+00> : vector<1x32xf32>
    %1004 = tpu.matmul %982, %639, %cst_294 {dimension_numbers = #tpu.dot_dimension_numbers<[1], [0], [0], [1], [0, 0, 1, 1], [], []>} : vector<1x32xbf16>, vector<32x32xbf16>, vector<1x32xf32> -> vector<1x32xf32>
    %1005 = arith.addf %1003, %1004 : vector<1x32xf32>
    %1006 = arith.negf %1005 : vector<1x32xf32>
    %1007 = math.exp %1006 : vector<1x32xf32>
    %cst_295 = arith.constant 1.000000e+00 : f32
    %1008 = vector.broadcast %cst_295 : f32 to vector<1x32xf32>
    %1009 = arith.addf %1008, %1007 : vector<1x32xf32>
    %1010 = arith.divf %1008, %1009 : vector<1x32xf32>
    %1011 = arith.mulf %998, %979 : vector<1x32xf32>
    %1012 = arith.mulf %990, %1002 : vector<1x32xf32>
    %1013 = arith.addf %1011, %1012 : vector<1x32xf32>
    %1014 = math.tanh %1013 : vector<1x32xf32>
    %1015 = arith.mulf %1010, %1014 : vector<1x32xf32>
    %1016 = arith.truncf %1015 : vector<1x32xf32> to vector<1x32xbf16>
    %1017 = vector.extract_strided_slice %610 {offsets = [11, 0], sizes = [1, 32], strides = [1, 1]} : vector<16x32xf32> to vector<1x32xf32>
    %cst_296 = arith.constant dense<0.000000e+00> : vector<1x32xf32>
    %1018 = tpu.matmul %1016, %633, %cst_296 {dimension_numbers = #tpu.dot_dimension_numbers<[1], [0], [0], [1], [0, 0, 1, 1], [], []>} : vector<1x32xbf16>, vector<32x32xbf16>, vector<1x32xf32> -> vector<1x32xf32>
    %1019 = arith.addf %1017, %1018 : vector<1x32xf32>
    %1020 = arith.negf %1019 : vector<1x32xf32>
    %1021 = math.exp %1020 : vector<1x32xf32>
    %cst_297 = arith.constant 1.000000e+00 : f32
    %1022 = vector.broadcast %cst_297 : f32 to vector<1x32xf32>
    %1023 = arith.addf %1022, %1021 : vector<1x32xf32>
    %1024 = arith.divf %1022, %1023 : vector<1x32xf32>
    %1025 = vector.extract_strided_slice %617 {offsets = [11, 0], sizes = [1, 32], strides = [1, 1]} : vector<16x32xf32> to vector<1x32xf32>
    %cst_298 = arith.constant dense<0.000000e+00> : vector<1x32xf32>
    %1026 = tpu.matmul %1016, %635, %cst_298 {dimension_numbers = #tpu.dot_dimension_numbers<[1], [0], [0], [1], [0, 0, 1, 1], [], []>} : vector<1x32xbf16>, vector<32x32xbf16>, vector<1x32xf32> -> vector<1x32xf32>
    %1027 = arith.addf %1025, %1026 : vector<1x32xf32>
    %1028 = arith.negf %1027 : vector<1x32xf32>
    %1029 = math.exp %1028 : vector<1x32xf32>
    %cst_299 = arith.constant 1.000000e+00 : f32
    %1030 = vector.broadcast %cst_299 : f32 to vector<1x32xf32>
    %1031 = arith.addf %1030, %1029 : vector<1x32xf32>
    %1032 = arith.divf %1030, %1031 : vector<1x32xf32>
    %1033 = vector.extract_strided_slice %624 {offsets = [11, 0], sizes = [1, 32], strides = [1, 1]} : vector<16x32xf32> to vector<1x32xf32>
    %cst_300 = arith.constant dense<0.000000e+00> : vector<1x32xf32>
    %1034 = tpu.matmul %1016, %637, %cst_300 {dimension_numbers = #tpu.dot_dimension_numbers<[1], [0], [0], [1], [0, 0, 1, 1], [], []>} : vector<1x32xbf16>, vector<32x32xbf16>, vector<1x32xf32> -> vector<1x32xf32>
    %1035 = arith.addf %1033, %1034 : vector<1x32xf32>
    %1036 = math.tanh %1035 : vector<1x32xf32>
    %1037 = vector.extract_strided_slice %631 {offsets = [11, 0], sizes = [1, 32], strides = [1, 1]} : vector<16x32xf32> to vector<1x32xf32>
    %cst_301 = arith.constant dense<0.000000e+00> : vector<1x32xf32>
    %1038 = tpu.matmul %1016, %639, %cst_301 {dimension_numbers = #tpu.dot_dimension_numbers<[1], [0], [0], [1], [0, 0, 1, 1], [], []>} : vector<1x32xbf16>, vector<32x32xbf16>, vector<1x32xf32> -> vector<1x32xf32>
    %1039 = arith.addf %1037, %1038 : vector<1x32xf32>
    %1040 = arith.negf %1039 : vector<1x32xf32>
    %1041 = math.exp %1040 : vector<1x32xf32>
    %cst_302 = arith.constant 1.000000e+00 : f32
    %1042 = vector.broadcast %cst_302 : f32 to vector<1x32xf32>
    %1043 = arith.addf %1042, %1041 : vector<1x32xf32>
    %1044 = arith.divf %1042, %1043 : vector<1x32xf32>
    %1045 = arith.mulf %1032, %1013 : vector<1x32xf32>
    %1046 = arith.mulf %1024, %1036 : vector<1x32xf32>
    %1047 = arith.addf %1045, %1046 : vector<1x32xf32>
    %1048 = math.tanh %1047 : vector<1x32xf32>
    %1049 = arith.mulf %1044, %1048 : vector<1x32xf32>
    %1050 = arith.truncf %1049 : vector<1x32xf32> to vector<1x32xbf16>
    %1051 = vector.extract_strided_slice %610 {offsets = [12, 0], sizes = [1, 32], strides = [1, 1]} : vector<16x32xf32> to vector<1x32xf32>
    %cst_303 = arith.constant dense<0.000000e+00> : vector<1x32xf32>
    %1052 = tpu.matmul %1050, %633, %cst_303 {dimension_numbers = #tpu.dot_dimension_numbers<[1], [0], [0], [1], [0, 0, 1, 1], [], []>} : vector<1x32xbf16>, vector<32x32xbf16>, vector<1x32xf32> -> vector<1x32xf32>
    %1053 = arith.addf %1051, %1052 : vector<1x32xf32>
    %1054 = arith.negf %1053 : vector<1x32xf32>
    %1055 = math.exp %1054 : vector<1x32xf32>
    %cst_304 = arith.constant 1.000000e+00 : f32
    %1056 = vector.broadcast %cst_304 : f32 to vector<1x32xf32>
    %1057 = arith.addf %1056, %1055 : vector<1x32xf32>
    %1058 = arith.divf %1056, %1057 : vector<1x32xf32>
    %1059 = vector.extract_strided_slice %617 {offsets = [12, 0], sizes = [1, 32], strides = [1, 1]} : vector<16x32xf32> to vector<1x32xf32>
    %cst_305 = arith.constant dense<0.000000e+00> : vector<1x32xf32>
    %1060 = tpu.matmul %1050, %635, %cst_305 {dimension_numbers = #tpu.dot_dimension_numbers<[1], [0], [0], [1], [0, 0, 1, 1], [], []>} : vector<1x32xbf16>, vector<32x32xbf16>, vector<1x32xf32> -> vector<1x32xf32>
    %1061 = arith.addf %1059, %1060 : vector<1x32xf32>
    %1062 = arith.negf %1061 : vector<1x32xf32>
    %1063 = math.exp %1062 : vector<1x32xf32>
    %cst_306 = arith.constant 1.000000e+00 : f32
    %1064 = vector.broadcast %cst_306 : f32 to vector<1x32xf32>
    %1065 = arith.addf %1064, %1063 : vector<1x32xf32>
    %1066 = arith.divf %1064, %1065 : vector<1x32xf32>
    %1067 = vector.extract_strided_slice %624 {offsets = [12, 0], sizes = [1, 32], strides = [1, 1]} : vector<16x32xf32> to vector<1x32xf32>
    %cst_307 = arith.constant dense<0.000000e+00> : vector<1x32xf32>
    %1068 = tpu.matmul %1050, %637, %cst_307 {dimension_numbers = #tpu.dot_dimension_numbers<[1], [0], [0], [1], [0, 0, 1, 1], [], []>} : vector<1x32xbf16>, vector<32x32xbf16>, vector<1x32xf32> -> vector<1x32xf32>
    %1069 = arith.addf %1067, %1068 : vector<1x32xf32>
    %1070 = math.tanh %1069 : vector<1x32xf32>
    %1071 = vector.extract_strided_slice %631 {offsets = [12, 0], sizes = [1, 32], strides = [1, 1]} : vector<16x32xf32> to vector<1x32xf32>
    %cst_308 = arith.constant dense<0.000000e+00> : vector<1x32xf32>
    %1072 = tpu.matmul %1050, %639, %cst_308 {dimension_numbers = #tpu.dot_dimension_numbers<[1], [0], [0], [1], [0, 0, 1, 1], [], []>} : vector<1x32xbf16>, vector<32x32xbf16>, vector<1x32xf32> -> vector<1x32xf32>
    %1073 = arith.addf %1071, %1072 : vector<1x32xf32>
    %1074 = arith.negf %1073 : vector<1x32xf32>
    %1075 = math.exp %1074 : vector<1x32xf32>
    %cst_309 = arith.constant 1.000000e+00 : f32
    %1076 = vector.broadcast %cst_309 : f32 to vector<1x32xf32>
    %1077 = arith.addf %1076, %1075 : vector<1x32xf32>
    %1078 = arith.divf %1076, %1077 : vector<1x32xf32>
    %1079 = arith.mulf %1066, %1047 : vector<1x32xf32>
    %1080 = arith.mulf %1058, %1070 : vector<1x32xf32>
    %1081 = arith.addf %1079, %1080 : vector<1x32xf32>
    %1082 = math.tanh %1081 : vector<1x32xf32>
    %1083 = arith.mulf %1078, %1082 : vector<1x32xf32>
    %1084 = arith.truncf %1083 : vector<1x32xf32> to vector<1x32xbf16>
    %1085 = vector.extract_strided_slice %610 {offsets = [13, 0], sizes = [1, 32], strides = [1, 1]} : vector<16x32xf32> to vector<1x32xf32>
    %cst_310 = arith.constant dense<0.000000e+00> : vector<1x32xf32>
    %1086 = tpu.matmul %1084, %633, %cst_310 {dimension_numbers = #tpu.dot_dimension_numbers<[1], [0], [0], [1], [0, 0, 1, 1], [], []>} : vector<1x32xbf16>, vector<32x32xbf16>, vector<1x32xf32> -> vector<1x32xf32>
    %1087 = arith.addf %1085, %1086 : vector<1x32xf32>
    %1088 = arith.negf %1087 : vector<1x32xf32>
    %1089 = math.exp %1088 : vector<1x32xf32>
    %cst_311 = arith.constant 1.000000e+00 : f32
    %1090 = vector.broadcast %cst_311 : f32 to vector<1x32xf32>
    %1091 = arith.addf %1090, %1089 : vector<1x32xf32>
    %1092 = arith.divf %1090, %1091 : vector<1x32xf32>
    %1093 = vector.extract_strided_slice %617 {offsets = [13, 0], sizes = [1, 32], strides = [1, 1]} : vector<16x32xf32> to vector<1x32xf32>
    %cst_312 = arith.constant dense<0.000000e+00> : vector<1x32xf32>
    %1094 = tpu.matmul %1084, %635, %cst_312 {dimension_numbers = #tpu.dot_dimension_numbers<[1], [0], [0], [1], [0, 0, 1, 1], [], []>} : vector<1x32xbf16>, vector<32x32xbf16>, vector<1x32xf32> -> vector<1x32xf32>
    %1095 = arith.addf %1093, %1094 : vector<1x32xf32>
    %1096 = arith.negf %1095 : vector<1x32xf32>
    %1097 = math.exp %1096 : vector<1x32xf32>
    %cst_313 = arith.constant 1.000000e+00 : f32
    %1098 = vector.broadcast %cst_313 : f32 to vector<1x32xf32>
    %1099 = arith.addf %1098, %1097 : vector<1x32xf32>
    %1100 = arith.divf %1098, %1099 : vector<1x32xf32>
    %1101 = vector.extract_strided_slice %624 {offsets = [13, 0], sizes = [1, 32], strides = [1, 1]} : vector<16x32xf32> to vector<1x32xf32>
    %cst_314 = arith.constant dense<0.000000e+00> : vector<1x32xf32>
    %1102 = tpu.matmul %1084, %637, %cst_314 {dimension_numbers = #tpu.dot_dimension_numbers<[1], [0], [0], [1], [0, 0, 1, 1], [], []>} : vector<1x32xbf16>, vector<32x32xbf16>, vector<1x32xf32> -> vector<1x32xf32>
    %1103 = arith.addf %1101, %1102 : vector<1x32xf32>
    %1104 = math.tanh %1103 : vector<1x32xf32>
    %1105 = vector.extract_strided_slice %631 {offsets = [13, 0], sizes = [1, 32], strides = [1, 1]} : vector<16x32xf32> to vector<1x32xf32>
    %cst_315 = arith.constant dense<0.000000e+00> : vector<1x32xf32>
    %1106 = tpu.matmul %1084, %639, %cst_315 {dimension_numbers = #tpu.dot_dimension_numbers<[1], [0], [0], [1], [0, 0, 1, 1], [], []>} : vector<1x32xbf16>, vector<32x32xbf16>, vector<1x32xf32> -> vector<1x32xf32>
    %1107 = arith.addf %1105, %1106 : vector<1x32xf32>
    %1108 = arith.negf %1107 : vector<1x32xf32>
    %1109 = math.exp %1108 : vector<1x32xf32>
    %cst_316 = arith.constant 1.000000e+00 : f32
    %1110 = vector.broadcast %cst_316 : f32 to vector<1x32xf32>
    %1111 = arith.addf %1110, %1109 : vector<1x32xf32>
    %1112 = arith.divf %1110, %1111 : vector<1x32xf32>
    %1113 = arith.mulf %1100, %1081 : vector<1x32xf32>
    %1114 = arith.mulf %1092, %1104 : vector<1x32xf32>
    %1115 = arith.addf %1113, %1114 : vector<1x32xf32>
    %1116 = math.tanh %1115 : vector<1x32xf32>
    %1117 = arith.mulf %1112, %1116 : vector<1x32xf32>
    %1118 = arith.truncf %1117 : vector<1x32xf32> to vector<1x32xbf16>
    %1119 = vector.extract_strided_slice %610 {offsets = [14, 0], sizes = [1, 32], strides = [1, 1]} : vector<16x32xf32> to vector<1x32xf32>
    %cst_317 = arith.constant dense<0.000000e+00> : vector<1x32xf32>
    %1120 = tpu.matmul %1118, %633, %cst_317 {dimension_numbers = #tpu.dot_dimension_numbers<[1], [0], [0], [1], [0, 0, 1, 1], [], []>} : vector<1x32xbf16>, vector<32x32xbf16>, vector<1x32xf32> -> vector<1x32xf32>
    %1121 = arith.addf %1119, %1120 : vector<1x32xf32>
    %1122 = arith.negf %1121 : vector<1x32xf32>
    %1123 = math.exp %1122 : vector<1x32xf32>
    %cst_318 = arith.constant 1.000000e+00 : f32
    %1124 = vector.broadcast %cst_318 : f32 to vector<1x32xf32>
    %1125 = arith.addf %1124, %1123 : vector<1x32xf32>
    %1126 = arith.divf %1124, %1125 : vector<1x32xf32>
    %1127 = vector.extract_strided_slice %617 {offsets = [14, 0], sizes = [1, 32], strides = [1, 1]} : vector<16x32xf32> to vector<1x32xf32>
    %cst_319 = arith.constant dense<0.000000e+00> : vector<1x32xf32>
    %1128 = tpu.matmul %1118, %635, %cst_319 {dimension_numbers = #tpu.dot_dimension_numbers<[1], [0], [0], [1], [0, 0, 1, 1], [], []>} : vector<1x32xbf16>, vector<32x32xbf16>, vector<1x32xf32> -> vector<1x32xf32>
    %1129 = arith.addf %1127, %1128 : vector<1x32xf32>
    %1130 = arith.negf %1129 : vector<1x32xf32>
    %1131 = math.exp %1130 : vector<1x32xf32>
    %cst_320 = arith.constant 1.000000e+00 : f32
    %1132 = vector.broadcast %cst_320 : f32 to vector<1x32xf32>
    %1133 = arith.addf %1132, %1131 : vector<1x32xf32>
    %1134 = arith.divf %1132, %1133 : vector<1x32xf32>
    %1135 = vector.extract_strided_slice %624 {offsets = [14, 0], sizes = [1, 32], strides = [1, 1]} : vector<16x32xf32> to vector<1x32xf32>
    %cst_321 = arith.constant dense<0.000000e+00> : vector<1x32xf32>
    %1136 = tpu.matmul %1118, %637, %cst_321 {dimension_numbers = #tpu.dot_dimension_numbers<[1], [0], [0], [1], [0, 0, 1, 1], [], []>} : vector<1x32xbf16>, vector<32x32xbf16>, vector<1x32xf32> -> vector<1x32xf32>
    %1137 = arith.addf %1135, %1136 : vector<1x32xf32>
    %1138 = math.tanh %1137 : vector<1x32xf32>
    %1139 = vector.extract_strided_slice %631 {offsets = [14, 0], sizes = [1, 32], strides = [1, 1]} : vector<16x32xf32> to vector<1x32xf32>
    %cst_322 = arith.constant dense<0.000000e+00> : vector<1x32xf32>
    %1140 = tpu.matmul %1118, %639, %cst_322 {dimension_numbers = #tpu.dot_dimension_numbers<[1], [0], [0], [1], [0, 0, 1, 1], [], []>} : vector<1x32xbf16>, vector<32x32xbf16>, vector<1x32xf32> -> vector<1x32xf32>
    %1141 = arith.addf %1139, %1140 : vector<1x32xf32>
    %1142 = arith.negf %1141 : vector<1x32xf32>
    %1143 = math.exp %1142 : vector<1x32xf32>
    %cst_323 = arith.constant 1.000000e+00 : f32
    %1144 = vector.broadcast %cst_323 : f32 to vector<1x32xf32>
    %1145 = arith.addf %1144, %1143 : vector<1x32xf32>
    %1146 = arith.divf %1144, %1145 : vector<1x32xf32>
    %1147 = arith.mulf %1134, %1115 : vector<1x32xf32>
    %1148 = arith.mulf %1126, %1138 : vector<1x32xf32>
    %1149 = arith.addf %1147, %1148 : vector<1x32xf32>
    %1150 = math.tanh %1149 : vector<1x32xf32>
    %1151 = arith.mulf %1146, %1150 : vector<1x32xf32>
    %1152 = arith.truncf %1151 : vector<1x32xf32> to vector<1x32xbf16>
    %1153 = vector.extract_strided_slice %610 {offsets = [15, 0], sizes = [1, 32], strides = [1, 1]} : vector<16x32xf32> to vector<1x32xf32>
    %cst_324 = arith.constant dense<0.000000e+00> : vector<1x32xf32>
    %1154 = tpu.matmul %1152, %633, %cst_324 {dimension_numbers = #tpu.dot_dimension_numbers<[1], [0], [0], [1], [0, 0, 1, 1], [], []>} : vector<1x32xbf16>, vector<32x32xbf16>, vector<1x32xf32> -> vector<1x32xf32>
    %1155 = arith.addf %1153, %1154 : vector<1x32xf32>
    %1156 = arith.negf %1155 : vector<1x32xf32>
    %1157 = math.exp %1156 : vector<1x32xf32>
    %cst_325 = arith.constant 1.000000e+00 : f32
    %1158 = vector.broadcast %cst_325 : f32 to vector<1x32xf32>
    %1159 = arith.addf %1158, %1157 : vector<1x32xf32>
    %1160 = arith.divf %1158, %1159 : vector<1x32xf32>
    %1161 = vector.extract_strided_slice %617 {offsets = [15, 0], sizes = [1, 32], strides = [1, 1]} : vector<16x32xf32> to vector<1x32xf32>
    %cst_326 = arith.constant dense<0.000000e+00> : vector<1x32xf32>
    %1162 = tpu.matmul %1152, %635, %cst_326 {dimension_numbers = #tpu.dot_dimension_numbers<[1], [0], [0], [1], [0, 0, 1, 1], [], []>} : vector<1x32xbf16>, vector<32x32xbf16>, vector<1x32xf32> -> vector<1x32xf32>
    %1163 = arith.addf %1161, %1162 : vector<1x32xf32>
    %1164 = arith.negf %1163 : vector<1x32xf32>
    %1165 = math.exp %1164 : vector<1x32xf32>
    %cst_327 = arith.constant 1.000000e+00 : f32
    %1166 = vector.broadcast %cst_327 : f32 to vector<1x32xf32>
    %1167 = arith.addf %1166, %1165 : vector<1x32xf32>
    %1168 = arith.divf %1166, %1167 : vector<1x32xf32>
    %1169 = vector.extract_strided_slice %624 {offsets = [15, 0], sizes = [1, 32], strides = [1, 1]} : vector<16x32xf32> to vector<1x32xf32>
    %cst_328 = arith.constant dense<0.000000e+00> : vector<1x32xf32>
    %1170 = tpu.matmul %1152, %637, %cst_328 {dimension_numbers = #tpu.dot_dimension_numbers<[1], [0], [0], [1], [0, 0, 1, 1], [], []>} : vector<1x32xbf16>, vector<32x32xbf16>, vector<1x32xf32> -> vector<1x32xf32>
    %1171 = arith.addf %1169, %1170 : vector<1x32xf32>
    %1172 = math.tanh %1171 : vector<1x32xf32>
    %1173 = vector.extract_strided_slice %631 {offsets = [15, 0], sizes = [1, 32], strides = [1, 1]} : vector<16x32xf32> to vector<1x32xf32>
    %cst_329 = arith.constant dense<0.000000e+00> : vector<1x32xf32>
    %1174 = tpu.matmul %1152, %639, %cst_329 {dimension_numbers = #tpu.dot_dimension_numbers<[1], [0], [0], [1], [0, 0, 1, 1], [], []>} : vector<1x32xbf16>, vector<32x32xbf16>, vector<1x32xf32> -> vector<1x32xf32>
    %1175 = arith.addf %1173, %1174 : vector<1x32xf32>
    %1176 = arith.negf %1175 : vector<1x32xf32>
    %1177 = math.exp %1176 : vector<1x32xf32>
    %cst_330 = arith.constant 1.000000e+00 : f32
    %1178 = vector.broadcast %cst_330 : f32 to vector<1x32xf32>
    %1179 = arith.addf %1178, %1177 : vector<1x32xf32>
    %1180 = arith.divf %1178, %1179 : vector<1x32xf32>
    %1181 = arith.mulf %1168, %1149 : vector<1x32xf32>
    %1182 = arith.mulf %1160, %1172 : vector<1x32xf32>
    %1183 = arith.addf %1181, %1182 : vector<1x32xf32>
    %1184 = math.tanh %1183 : vector<1x32xf32>
    %1185 = arith.mulf %1180, %1184 : vector<1x32xf32>
    %1186 = tpu.concatenate %1151, %1185 in 0 : vector<1x32xf32>, vector<1x32xf32> -> vector<2x32xf32>
    %c0_331 = arith.constant 0 : index
    %c0_332 = arith.constant 0 : index
    %1187 = vector.load %arg4[%c0_331, %c0_332] : memref<2x32xf32, #tpu.memory_space<vmem>>, vector<2x32xf32>
    %1188 = arith.mulf %1186, %1187 : vector<2x32xf32>
    %1189 = arith.truncf %1188 : vector<2x32xf32> to vector<2x32xbf16>
    %c0_333 = arith.constant 0 : index
    %c0_334 = arith.constant 0 : index
    %1190 = vector.load %arg5[%c0_333, %c0_334] : memref<32x8xbf16, #tpu.memory_space<vmem>>, vector<32x8xbf16>
    %cst_335 = arith.constant dense<0.000000e+00> : vector<2x8xf32>
    %1191 = tpu.matmul %1189, %1190, %cst_335 {dimension_numbers = #tpu.dot_dimension_numbers<[1], [0], [0], [1], [0, 0, 1, 1], [], []>} : vector<2x32xbf16>, vector<32x8xbf16>, vector<2x8xf32> -> vector<2x8xf32>
    %c0_336 = arith.constant 0 : index
    %c0_337 = arith.constant 0 : index
    %1192 = vector.load %arg6[%c0_336, %c0_337] : memref<1x8xf32, #tpu.memory_space<vmem>>, vector<1x8xf32>
    %1193 = vector.broadcast %1192 : vector<1x8xf32> to vector<2x8xf32>
    %1194 = arith.addf %1191, %1193 : vector<2x8xf32>
    %c0_338 = arith.constant 0 : index
    %c0_339 = arith.constant 0 : index
    %1195 = vector.load %arg7[%c0_338, %c0_339] : memref<2x8xf32, #tpu.memory_space<vmem>>, vector<2x8xf32>
    tpu.vector_store %arg7[%c0_338, %c0_339], %1194 {strides = array<i32>} : memref<2x8xf32, #tpu.memory_space<vmem>>, vector<2x8xf32>,
    return
  }
}

</mosaic_0001>

<bundles_post_ra>
// kernel: lrcn_forward.2
= control target key start
LH: loop header
LB: loop body
LE: loop exit
PB: predicated region body
PF: predicated region fallthrough
CT: control target
= control target key end

     0   :  { %s831_s12 = smov 0   ;;  %s976_s0 = inlined_call_operand.vmem [shape: bf16[16,256,27], index: 0, kind: input, shape index: {}]   ;;  %s977_s1 = inlined_call_operand.vmem [shape: bf16[27,32], index: 1, kind: input, shape index: {}]   ;;  %s978_s2 = inlined_call_operand.vmem [shape: f32[1,32], index: 2, kind: input, shape index: {}]   ;;  %s979_s3 = inlined_call_operand.vmem [shape: f32[16,1,32], index: 3, kind: output, shape index: {}]  }
   0x1 LB: > { %s672_s13 = sadd.s32 4294967295, %s808_s12   ;;  %p676_p0 = scmp.ge.s32.totalorder %s808_s12, 1  ;;  %s808_s12 = sphi %s831_s12, %s13_s12  }
   0x2   : > { %p137_p1 = scmp.lt.s32.totalorder %s808_s12, 17 }
   0x4   : > { %p138_p2 = pnand %p676_p0, %p137_p1 }
   0x5   : > { %v784_v0 = vld [vmem:[%s977_s1] sm:$0xff] (!%p138_p2)   ;;  %vm351_vm0 = vcmask (!%p138_p2), 1044480   ;;  %v785_v1 = vld [vmem:[%s977_s1 + $0x8] sm:$0x3f] (!%p138_p2)   ;;  %vm352_vm1 = vcmask (!%p138_p2), 1045504   ;;  %p159_p3 = scmp.lt.s32.totalorder (!%p138_p2), %s672_s13, 15 }
   0x6   : > { %141 = sbr.rel (%p138_p2) target bundleno = 315 (0x13b), region = 32  ;;  %735 = vmatprep.subr.bf16.mxu0 (!%p138_p2), %v784_v0  ;;  %771 = vmatprep.subr.bf16.mxu1 (!%p138_p2), %v784_v0  ;;  %v810_v2 = vmov (!%p138_p2), 65535   ;;  %vm302_vm2 = vcmask (!%p138_p2), 220160   ;;  %v888_v22 = vld [vmem:[%s978_s2] ss:$0 sm:$0xff] (!%p138_p2)  ;;  %vm551_vm3 = vcmask (!%p138_p2), 261120  }
   0x7   : > { %736 = vmatpush3.bf16.msra.mxu0 (!%p138_p2), %v784_v0  ;;  %v353_v3 = vsel (!%p138_p2), %vm351_vm0, 4294967295, %v810_v2  ;;  %773 = vmatpush3.bf16.msra.mxu1 (!%p138_p2), %v784_v0  ;;  %vm623_vm4 = vcmask (!%p138_p2), 253952  }
   0x8   : > { %v354_v4 = vsel (!%p138_p2), %vm352_vm1, %v353_v3, 0 }
   0x9   : > { %v356_v5 = vand.u32 (!%p138_p2), %v785_v1, %v354_v4 }
   0xb   : > { %737 = vmatprep.subr.bf16.mxu0 (!%p138_p2), %v356_v5  ;;  %772 = vmatprep.subr.bf16.mxu1 (!%p138_p2), %v356_v5 }
   0xc   : > { %738 = vmatpush3.bf16.msra.mxu0 (!%p138_p2), %v356_v5  ;;  %774 = vmatpush3.bf16.msra.mxu1 (!%p138_p2), %v356_v5 }
   0xd   : > { %s981_s13 = smov (!%p159_p3, %s672_s13), 15 }
   0xe   : > { %s716_s18 = sshll.u32 %s981_s13, 7  ;;  %s166_s26 = scalar_lea.vmem %s979_s3, %s981_s13 }
   0xf   : > { %s851_s21 = scalar_lea.vmem %s976_s0, %s716_s18 }
  0x10   : > { %v786_v6 = vld [vmem:[%s851_s21] sm:$0xff]   ;;  %v787_v7 = vld [vmem:[%s851_s21 + $0x8] sm:$0xff]   ;;  %v788_v8 = vld [vmem:[%s851_s21 + $0x10] sm:$0xff]  }
  0x11   : > { %739 = vmatprep.mubr.msk.bf16.mxu0 %vm302_vm2, %v786_v6  ;;  %v789_v9 = vld [vmem:[%s851_s21 + $0x18] sm:$0xff]   ;;  %v790_v10 = vld [vmem:[%s851_s21 + $0x20] sm:$0xff]   ;;  %v795_v12 = vld [vmem:[%s851_s21 + $0x48] sm:$0xff]  }
  0x12   : > { %740 = vmatmul.mubr.msk.bf16.vlgmr.msra.gmra.mrb[0].mxu0 %vm302_vm2, %v787_v7  ;;  %v794_v11 = vld [vmem:[%s851_s21 + $0x40] sm:$0xff]   ;;  %v796_v13 = vld [vmem:[%s851_s21 + $0x50] sm:$0xff]   ;;  %v791_v14 = vld [vmem:[%s851_s21 + $0x28] sm:$0xff]  }
  0x13   : > { %743 = vmatprep.mubr.msk.bf16.mxu0 %vm302_vm2, %v788_v8  ;;  %755 = vmatprep.mubr.msk.bf16.mxu1 %vm302_vm2, %v794_v11  ;;  %v797_v15 = vld [vmem:[%s851_s21 + $0x58] sm:$0xff]   ;;  %v792_v16 = vld [vmem:[%s851_s21 + $0x30] sm:$0xff]   ;;  %v798_v17 = vld [vmem:[%s851_s21 + $0x60] sm:$0xff]  }
  0x14   : > { %756 = vmatmul.mubr.msk.bf16.vlgmr.msra.gmra.mrb[0].mxu1 %vm302_vm2, %v795_v12  ;;  %v793_v18 = vld [vmem:[%s851_s21 + $0x38] sm:$0xff]   ;;  %v799_v19 = vld [vmem:[%s851_s21 + $0x68] sm:$0xff]   ;;  %v800_v20 = vld [vmem:[%s851_s21 + $0x70] sm:$0xff]  }
  0x15   : > { %759 = vmatprep.mubr.msk.bf16.mxu1 %vm302_vm2, %v796_v13  ;;  %v801_v21 = vld [vmem:[%s851_s21 + $0x78] sm:$0xff]  }
  0x1a   : > { %744 = vmatmul.mubr.msk.bf16.gmra.mrb[4].mxu0 %vm302_vm2, %v789_v9 }
  0x1b   : > { %747 = vmatprep.mubr.msk.bf16.mxu0 %vm302_vm2, %v790_v10 }
  0x1c   : > { %760 = vmatmul.mubr.msk.bf16.gmra.mrb[4].mxu1 %vm302_vm2, %v797_v15 }
  0x1d   : > { %763 = vmatprep.mubr.msk.bf16.mxu1 %vm302_vm2, %v798_v17 }
  0x22   : > { %748 = vmatmul.mubr.msk.bf16.gmra.mrb[8].mxu0 %vm302_vm2, %v791_v14 }
  0x23   : > { %751 = vmatprep.mubr.msk.bf16.mxu0 %vm302_vm2, %v792_v16 }
  0x24   : > { %764 = vmatmul.mubr.msk.bf16.gmra.mrb[8].mxu1 %vm302_vm2, %v799_v19 }
  0x25   : > { %767 = vmatprep.mubr.msk.bf16.mxu1 %vm302_vm2, %v800_v20 }
  0x2a   : > { %752 = vmatmul.mubr.msk.bf16.gmra.mrb[12].mxu0 %vm302_vm2, %v793_v18 }
  0x2c   : > { %768 = vmatmul.mubr.msk.bf16.gmra.mrb[12].mxu1 %vm302_vm2, %v801_v21 }
  0xe5   : > { %v741_v23 = vpop.f32.mrb[0].mxu0 }
  0xe6   : > { %v392_v24 = vpop.f32.mrb[1].mxu0  ;;  %v401_v25 = vadd.f32 %v741_v23, %v888_v22 }
  0xe7   : > { %v393_v26 = vadd.f32 %v888_v22, %v392_v24  ;;  %v742_v27 = vpop.f32.mrb[2].mxu0  ;;  %v896_v38 = vpop.f32.mrb[0].mxu1 }
  0xe8   : > { %v395_v28 = vpop.f32.mrb[3].mxu0  ;;  %v404_v30 = vadd.f32 %v742_v27, %v888_v22  ;;  %v521_v32 = vmax.f32 %v401_v25, 0.0  ;;  %v456_v41 = vpop.f32.mrb[1].mxu1 }
  0xe9   : > { %v519_v29 = vmax.f32 %v393_v26, 0.0  ;;  %v396_v31 = vadd.f32 %v888_v22, %v395_v28  ;;  %v901_v46 = vpop.f32.mrb[2].mxu1 }
  0xea   : > { %v522_v35 = vmax.f32 %v404_v30, 0.0  ;;  %v555_v42 = vsel %vm551_vm3, %v521_v32, 0.0  ;;  %v459_v49 = vpop.f32.mrb[3].mxu1 }
  0xeb   : > { %v520_v33 = vmax.f32 %v396_v31, 0.0  ;;  %v552_v34 = vsel %vm551_vm3, %v519_v29, 0.0 }
  0xec   : > { %v557_v50 = vsel %vm551_vm3, %v522_v35, 0.0 }
  0xed   : > { %v553_v36 = vsel %vm551_vm3, %v520_v33, 0.0  ;;  %v745_v37 = vpop.f32.mrb[4].mxu0 }
  0xee   : > { %v554_v39 = vadd.f32 %v553_v36, %v552_v34  ;;  %v408_v40 = vpop.f32.mrb[5].mxu0  ;;  %v417_v43 = vadd.f32 %v745_v37, %v888_v22  ;;  %v457_v34 = vadd.f32 %v888_v22, %v456_v41  ;;  %v460_v41 = vadd.f32 %v888_v22, %v459_v49 }
  0xef   : > { %v409_v44 = vadd.f32 %v888_v22, %v408_v40  ;;  %v746_v45 = vpop.f32.mrb[6].mxu0  ;;  %v908_v62 = vpop.f32.mrb[4].mxu1 }
  0xf0   : > { %v556_v47 = vadd.f32 %v555_v42, %v554_v39  ;;  %v411_v48 = vpop.f32.mrb[7].mxu0  ;;  %v420_v52 = vadd.f32 %v746_v45, %v888_v22  ;;  %v525_v55 = vmax.f32 %v417_v43, 0.0  ;;  %v472_v1 = vpop.f32.mrb[5].mxu1 }
  0xf1   : > { %v523_v51 = vmax.f32 %v409_v44, 0.0  ;;  %v412_v53 = vadd.f32 %v888_v22, %v411_v48  ;;  %v913_v6 = vpop.f32.mrb[6].mxu1  ;;  %v473_v49 = vadd.f32 %v888_v22, %v472_v1 }
  0xf2   : > { %v558_v54 = vadd.f32 %v557_v50, %v556_v47  ;;  %v526_v59 = vmax.f32 %v420_v52, 0.0  ;;  %v563_v2 = vsel %vm551_vm3, %v525_v55, 0.0  ;;  %v475_v9 = vpop.f32.mrb[7].mxu1 }
  0xf3   : > { %v559_v56 = vsel %vm551_vm3, %v523_v51, 0.0  ;;  %v524_v57 = vmax.f32 %v412_v53, 0.0  ;;  %v535_v51 = vmax.f32 %v457_v34, 0.0 }
  0xf4   : > { %v560_v58 = vadd.f32 %v559_v56, %v558_v54  ;;  %v565_v10 = vsel %vm551_vm3, %v526_v59, 0.0  ;;  %v465_v56 = vadd.f32 %v896_v38, %v888_v22  ;;  %v468_v59 = vadd.f32 %v901_v46, %v888_v22 }
  0xf5   : > { %v561_v60 = vsel %vm551_vm3, %v524_v57, 0.0  ;;  %v749_v61 = vpop.f32.mrb[8].mxu0  ;;  %v539_v38 = vmax.f32 %v473_v49, 0.0 }
  0xf6   : > { %v562_v63 = vadd.f32 %v561_v60, %v560_v58  ;;  %v424_v0 = vpop.f32.mrb[9].mxu0  ;;  %v433_v3 = vadd.f32 %v749_v61, %v888_v22 }
  0xf7   : > { %v425_v4 = vadd.f32 %v888_v22, %v424_v0  ;;  %v750_v5 = vpop.f32.mrb[10].mxu0  ;;  %v920_v23 = vpop.f32.mrb[8].mxu1  ;;  %v536_v0 = vmax.f32 %v460_v41, 0.0 }
  0xf8   : > { %v564_v7 = vadd.f32 %v563_v2, %v562_v63  ;;  %v427_v8 = vpop.f32.mrb[11].mxu0  ;;  %v436_v12 = vadd.f32 %v750_v5, %v888_v22  ;;  %v529_v15 = vmax.f32 %v433_v3, 0.0  ;;  %v488_v26 = vpop.f32.mrb[9].mxu1  ;;  %v583_v63 = vsel %vm551_vm3, %v535_v51, 0.0 }
  0xf9   : > { %v527_v11 = vmax.f32 %v425_v4, 0.0  ;;  %v428_v13 = vadd.f32 %v888_v22, %v427_v8  ;;  %v766_v31 = vpop.f32.mrb[10].mxu1  ;;  %v537_v3 = vmax.f32 %v465_v56, 0.0  ;;  %v538_v5 = vmax.f32 %v468_v59, 0.0 }
  0xfa   : > { %v566_v14 = vadd.f32 %v565_v10, %v564_v7  ;;  %v530_v19 = vmax.f32 %v436_v12, 0.0  ;;  %v571_v27 = vsel %vm551_vm3, %v529_v15, 0.0  ;;  %v491_v35 = vpop.f32.mrb[11].mxu1  ;;  %v585_v7 = vsel %vm551_vm3, %v536_v0, 0.0 }
  0xfb   : > { %v567_v16 = vsel %vm551_vm3, %v527_v11, 0.0  ;;  %v528_v17 = vmax.f32 %v428_v13, 0.0  ;;  %v476_v8 = vadd.f32 %v888_v22, %v475_v9  ;;  %v587_v46 = vsel %vm551_vm3, %v537_v3, 0.0 }
  0xfc   : > { %v568_v18 = vadd.f32 %v567_v16, %v566_v14  ;;  %v573_v36 = vsel %vm551_vm3, %v530_v19, 0.0  ;;  %v481_v11 = vadd.f32 %v908_v62, %v888_v22  ;;  %v484_v13 = vadd.f32 %v913_v6, %v888_v22 }
  0xfd   : > { %v569_v20 = vsel %vm551_vm3, %v528_v17, 0.0  ;;  %v753_v21 = vpop.f32.mrb[12].mxu0  ;;  %v589_v1 = vsel %vm551_vm3, %v538_v5, 0.0  ;;  %v591_v14 = vsel %vm551_vm3, %v539_v38, 0.0  ;;  %v540_v15 = vmax.f32 %v476_v8, 0.0 }
  0xfe   : > { %v570_v24 = vadd.f32 %v569_v20, %v568_v18  ;;  %v440_v25 = vpop.f32.mrb[13].mxu0  ;;  %v449_v28 = vadd.f32 %v753_v21, %v888_v22  ;;  %v489_v16 = vadd.f32 %v888_v22, %v488_v26  ;;  %v541_v18 = vmax.f32 %v481_v11, 0.0 }
  0xff   : > { %v441_v29 = vadd.f32 %v888_v22, %v440_v25  ;;  %v754_v30 = vpop.f32.mrb[14].mxu0  ;;  %v769_v52 = vpop.f32.mrb[12].mxu1  ;;  %v542_v19 = vmax.f32 %v484_v13, 0.0  ;;  %v593_v20 = vsel %vm551_vm3, %v540_v15, 0.0  ;;  %v492_v62 = vadd.f32 %v888_v22, %v491_v35 }
 0x100   : > { %v572_v32 = vadd.f32 %v571_v27, %v570_v24  ;;  %v443_v33 = vpop.f32.mrb[15].mxu0  ;;  %v452_v39 = vadd.f32 %v754_v30, %v888_v22  ;;  %v533_v43 = vmax.f32 %v449_v28, 0.0  ;;  %v504_v54 = vpop.f32.mrb[13].mxu1  ;;  %v543_v21 = vmax.f32 %v489_v16, 0.0 }
 0x101   : > { %v531_v37 = vmax.f32 %v441_v29, 0.0  ;;  %v444_v40 = vadd.f32 %v888_v22, %v443_v33  ;;  %v770_v57 = vpop.f32.mrb[14].mxu1  ;;  %v595_v25 = vsel %vm551_vm3, %v541_v18, 0.0  ;;  %v497_v6 = vadd.f32 %v920_v23, %v888_v22 }
 0x102   : > { %v574_v42 = vadd.f32 %v573_v36, %v572_v32  ;;  %v534_v48 = vmax.f32 %v452_v39, 0.0  ;;  %v579_v55 = vsel %vm551_vm3, %v533_v43, 0.0  ;;  %v507_v60 = vpop.f32.mrb[15].mxu1  ;;  %v597_v27 = vsel %vm551_vm3, %v542_v19, 0.0 }
 0x103   : > { %v575_v44 = vsel %vm551_vm3, %v531_v37, 0.0  ;;  %v532_v45 = vmax.f32 %v444_v40, 0.0  ;;  %v599_v26 = vsel %vm551_vm3, %v543_v21, 0.0  ;;  %v500_v29 = vadd.f32 %v766_v31, %v888_v22 }
 0x104   : > { %v576_v47 = vadd.f32 %v575_v44, %v574_v42  ;;  %v581_v61 = vsel %vm551_vm3, %v534_v48, 0.0  ;;  %v544_v30 = vmax.f32 %v492_v62, 0.0  ;;  %v505_v32 = vadd.f32 %v888_v22, %v504_v54 }
 0x105   : > { %v577_v50 = vsel %vm551_vm3, %v532_v45, 0.0  ;;  %v545_v34 = vmax.f32 %v497_v6, 0.0  ;;  %v546_v35 = vmax.f32 %v500_v29, 0.0  ;;  %v508_v40 = vadd.f32 %v888_v22, %v507_v60 }
 0x106   : > { %v578_v53 = vadd.f32 %v577_v50, %v576_v47  ;;  %v601_v37 = vsel %vm551_vm3, %v544_v30, 0.0  ;;  %v547_v39 = vmax.f32 %v505_v32, 0.0  ;;  %v513_v43 = vadd.f32 %v769_v52, %v888_v22 }
 0x107   : > { %v603_v42 = vsel %vm551_vm3, %v545_v34, 0.0  ;;  %v605_v31 = vsel %vm551_vm3, %v546_v35, 0.0  ;;  %v516_v47 = vadd.f32 %v770_v57, %v888_v22  ;;  %v548_v48 = vmax.f32 %v508_v40, 0.0 }
 0x108   : > { %v580_v58 = vadd.f32 %v579_v55, %v578_v53  ;;  %v607_v45 = vsel %vm551_vm3, %v547_v39, 0.0  ;;  %v549_v51 = vmax.f32 %v513_v43, 0.0 }
 0x109   : > { %v550_v53 = vmax.f32 %v516_v47, 0.0  ;;  %v609_v54 = vsel %vm551_vm3, %v548_v48, 0.0 }
 0x10a   : > { %v582_v2 = vadd.f32 %v581_v61, %v580_v58  ;;  %v611_v56 = vsel %vm551_vm3, %v549_v51, 0.0 }
 0x10b   : > { %v613_v52 = vsel %vm551_vm3, %v550_v53, 0.0 }
 0x10c   : > { %v584_v4 = vadd.f32 %v583_v63, %v582_v2 }
 0x10e   : > { %v586_v10 = vadd.f32 %v585_v7, %v584_v4 }
 0x110   : > { %v588_v12 = vadd.f32 %v587_v46, %v586_v10 }
 0x112   : > { %v590_v17 = vadd.f32 %v589_v1, %v588_v12 }
 0x114   : > { %v592_v9 = vadd.f32 %v591_v14, %v590_v17 }
 0x116   : > { %v594_v24 = vadd.f32 %v593_v20, %v592_v9 }
 0x118   : > { %v596_v28 = vadd.f32 %v595_v25, %v594_v24 }
 0x11a   : > { %v598_v33 = vadd.f32 %v597_v27, %v596_v28 }
 0x11c   : > { %v600_v36 = vadd.f32 %v599_v26, %v598_v33 }
 0x11e   : > { %v602_v23 = vadd.f32 %v601_v37, %v600_v36 }
 0x120   : > { %v604_v44 = vadd.f32 %v603_v42, %v602_v23 }
 0x122   : > { %v606_v50 = vadd.f32 %v605_v31, %v604_v44 }
 0x124   : > { %v608_v41 = vadd.f32 %v607_v45, %v606_v50 }
 0x126   : > { %v610_v55 = vadd.f32 %v609_v54, %v608_v41 }
 0x128   : > { %v612_v58 = vadd.f32 %v611_v56, %v610_v55 }
 0x12a   : > { %v614_v59 = vadd.f32 %v613_v52, %v612_v58 }
 0x12c   : > { %v615_v60 = vrot.slane %v614_v59, 4 }
 0x12e   : > { %v616_v61 = vadd.f32 %v615_v60, %v614_v59 }
 0x130   : > { %v617_v63 = vrot.slane %v616_v61, 2 }
 0x132   : > { %v618_v0 = vadd.f32 %v617_v63, %v616_v61 }
 0x134   : > { %v619_v22 = vrot.slane %v618_v0, 1 }
 0x136   : > { %v620_v57 = vadd.f32 %v619_v22, %v618_v0 }
 0x138   : > { %v622_v49 = vmul.f32 0.00390625, %v620_v57 }
 0x13a   : > { %624 = vst.msk [vmem:[%s166_s26] sm:$0x1] %vm623_vm4, %v622_v49 }
 0x13b PF: > { %s13_s12 = sadd.s32 1, %s808_s12  }
 0x13c   : > { %p10_p4 = scmp.ge.s32.totalorder %s13_s12, 18  }
 0x13e   :  { %12 = sbr.rel (!%p10_p4) target bundleno = 1 (0x1), region = 62 }

// kernel: lrcn_forward.3
= control target key start
LH: loop header
LB: loop body
LE: loop exit
PB: predicated region body
PF: predicated region fallthrough
CT: control target
= control target key end

     0   :  { %v9908_v1 = vmov 0.0   ;;  %vm9909_vm0 = vmmov 0   ;;  %vm30_vm1 = vcmask 261120   ;;  %s11538_s0 = inlined_call_operand.vmem [shape: f32[16,32], index: 0, kind: input, shape index: {}]   ;;  %s11539_s1 = inlined_call_operand.vmem [shape: bf16[8,32,32], index: 1, kind: input, shape index: {}]   ;;  %s11540_s2 = inlined_call_operand.vmem [shape: bf16[8,32,32], index: 2, kind: input, shape index: {}]   ;;  %s11541_s3 = inlined_call_operand.vmem [shape: f32[8,1,32], index: 3, kind: input, shape index: {}]   ;;  %s11542_s4 = inlined_call_operand.vmem [shape: f32[2,32], index: 4, kind: input, shape index: {}]   ;;  %s11543_s5 = inlined_call_operand.vmem [shape: bf16[32,8], index: 5, kind: input, shape index: {}]   ;;  %s11544_s6 = inlined_call_operand.vmem [shape: f32[1,8], index: 6, kind: input, shape index: {}]   ;;  %s11545_s7 = inlined_call_operand.hbm [shape: f32[2,8], index: 7, kind: output, shape index: {}]  }
   0x1   :  { %v9306_v0 = vld [vmem:[%s11539_s1] sm:$0xff]   ;;  %8206 = vmatprep.subr.bf16.mxu0 %v9908_v1  ;;  %8214 = vmatprep.subr.bf16.mxu1 %v9908_v1  ;;  %v9307_v2 = vld [vmem:[%s11539_s1 + $0x10] sm:$0xff]   ;;  %v9308_v3 = vld [vmem:[%s11539_s1 + $0x8] sm:$0xff]  }
   0x2   :  { %8207 = vmatpush3.bf16.msra.mxu0 %v9306_v0  ;;  %8210 = vmatprep.mubr.msk.bf16.mxu0 %vm9909_vm0, %v9908_v1  ;;  %v9309_v4 = vld [vmem:[%s11539_s1 + $0x18] sm:$0xff]   ;;  %v28_v5 = vld [vmem:[%s11538_s0] sm:$0xff]  ;;  %v29_v6 = vld [vmem:[%s11538_s0 + $0x8] sm:$0xff] }
   0x3   :  { %8215 = vmatpush3.bf16.msra.mxu1 %v9307_v2  ;;  %8208 = vmatprep.subr.bf16.mxu0 %v9908_v1  ;;  %31 = vst.msk [vmem:[#allocation2] sm:$0xff] %vm30_vm1, %v28_v5  ;;  %32 = vst.msk [vmem:[#allocation2 + $0x8] sm:$0xff] %vm30_vm1, %v29_v6  ;;  %v9310_v7 = vld [vmem:[%s11539_s1 + $0x20] sm:$0xff]   ;;  %v9311_v8 = vld [vmem:[%s11539_s1 + $0x30] sm:$0xff]  }
   0x4   :  { %8216 = vmatprep.subr.bf16.mxu1 %v9908_v1  ;;  %8218 = vmatprep.mubr.msk.bf16.mxu1 %vm9909_vm0, %v9908_v1  ;;  %v9312_v12 = vld [vmem:[%s11539_s1 + $0x28] sm:$0xff]   ;;  %v9313_v13 = vld [vmem:[%s11539_s1 + $0x38] sm:$0xff]   ;;  %v10005_v14 = vld [vmem:[%s11540_s2] sm:$0xff]  }
   0x5   :  { %v10010_v15 = vld [vmem:[%s11540_s2 + $0x10] sm:$0xff]   ;;  %v10017_v16 = vld [vmem:[%s11540_s2 + $0x8] sm:$0xff]   ;;  %v10022_v17 = vld [vmem:[%s11540_s2 + $0x18] sm:$0xff]  }
   0x6   :  { %8209 = vmatpush3.bf16.msra.mxu0 %v9308_v3  ;;  %v10037_v18 = vld [vmem:[%s11540_s2 + $0x20] sm:$0xff]   ;;  %v10042_v19 = vld [vmem:[%s11540_s2 + $0x30] sm:$0xff]  }
   0x7   :  { %8217 = vmatpush3.bf16.msra.mxu1 %v9309_v4  ;;  %8222 = vmatprep.subr.bf16.mxu0 %v9908_v1 }
   0x8   :  { %8230 = vmatprep.subr.bf16.mxu1 %v9908_v1 }
   0xa   :  { %v33_v9 = vld [vmem:[#allocation2] sm:$0xff]  ;;  %v34_v10 = vld [vmem:[#allocation2 + $0x8] sm:$0xff] }
   0xb   :  { %v35_v11 = vpack.c.bf16 %v34_v10, %v33_v9 }
   0xd   :  { %8211 = vmatmul.mubr.msk.bf16.vlgmr.msra.gmra.mrb[0].mxu0 %vm30_vm1, %v35_v11  ;;  %8219 = vmatmul.mubr.msk.bf16.vlgmr.msra.gmra.mrb[0].mxu1 %vm30_vm1, %v35_v11 }
   0xe   :  { %8223 = vmatpush3.bf16.msra.mxu0 %v9310_v7  ;;  %8231 = vmatpush3.bf16.msra.mxu1 %v9311_v8 }
   0xf   :  { %8224 = vmatprep.subr.bf16.mxu0 %v9908_v1  ;;  %8232 = vmatprep.subr.bf16.mxu1 %v9908_v1 }
  0x10   :  { %8226 = vmatprep.mubr.msk.bf16.mxu0 %vm9909_vm0, %v9908_v1  ;;  %8234 = vmatprep.mubr.msk.bf16.mxu1 %vm9909_vm0, %v9908_v1 }
  0x12   :  { %8225 = vmatpush3.bf16.msra.mxu0 %v9312_v12  ;;  %8233 = vmatpush3.bf16.msra.mxu1 %v9313_v13 }
  0x13   :  { %8238 = vmatprep.subr.bf16.mxu0 %v9908_v1  ;;  %8246 = vmatprep.subr.bf16.mxu1 %v9908_v1 }
  0x15   :  { %8227 = vmatmul.mubr.msk.bf16.vlgmr.msra.gmra.mrb[4].mxu0 %vm30_vm1, %v35_v11  ;;  %8235 = vmatmul.mubr.msk.bf16.vlgmr.msra.gmra.mrb[4].mxu1 %vm30_vm1, %v35_v11 }
  0x16   :  { %8239 = vmatpush3.bf16.msra.mxu0 %v10005_v14  ;;  %8247 = vmatpush3.bf16.msra.mxu1 %v10010_v15 }
  0x17   :  { %8240 = vmatprep.subr.bf16.mxu0 %v9908_v1  ;;  %8248 = vmatprep.subr.bf16.mxu1 %v9908_v1 }
  0x18   :  { %8242 = vmatprep.mubr.msk.bf16.mxu0 %vm9909_vm0, %v9908_v1  ;;  %8250 = vmatprep.mubr.msk.bf16.mxu1 %vm9909_vm0, %v9908_v1 }
  0x1a   :  { %8241 = vmatpush3.bf16.msra.mxu0 %v10017_v16  ;;  %8249 = vmatpush3.bf16.msra.mxu1 %v10022_v17 }
  0x1b   :  { %8254 = vmatprep.subr.bf16.mxu0 %v9908_v1  ;;  %8262 = vmatprep.subr.bf16.mxu1 %v9908_v1 }
  0x1c   :  { %12 = vsyncpa [#allocation4], 0  ;;  %v9910_v20 = vmov 0   ;;  %v10055_v21 = vld [vmem:[%s11540_s2 + $0x28] sm:$0xff]   ;;  %v10060_v22 = vld [vmem:[%s11540_s2 + $0x38] sm:$0xff]   ;;  %vm559_vm2 = vcmask 253952  }
  0x1d   :  { %8243 = vmatmul.mubr.bf16.vlgmr.msra.gmra.mrb[8].mxu0 %v9910_v20  ;;  %8251 = vmatmul.mubr.bf16.vlgmr.msra.gmra.mrb[8].mxu1 %v9910_v20  ;;  %v7464_v27 = vld [vmem:[%s11541_s3] ss:$0 sm:$0xff]  ;;  %v7473_v28 = vld [vmem:[%s11541_s3 + $0x1] ss:$0 sm:$0xff]  ;;  %v7482_v39 = vld [vmem:[%s11541_s3 + $0x2] ss:$0 sm:$0xff] }
  0x1e   :  { %8255 = vmatpush3.bf16.msra.mxu0 %v10037_v18  ;;  %8263 = vmatpush3.bf16.msra.mxu1 %v10042_v19  ;;  %v7491_v40 = vld [vmem:[%s11541_s3 + $0x3] ss:$0 sm:$0xff]  ;;  %vm768_vm3 = vcmask 254977   ;;  %vm980_vm4 = vcmask 256002   ;;  %vm1191_vm5 = vcmask 257027   ;;  %vm1404_vm6 = vcmask 258052  }
  0x1f   :  { %8256 = vmatprep.subr.bf16.mxu0 %v9908_v1  ;;  %8264 = vmatprep.subr.bf16.mxu1 %v9908_v1  ;;  %vm1615_vm7 = vcmask 259077   ;;  %vm1828_vm8 = vcmask 260102   ;;  %vm2039_vm9 = vcmask 261127   ;;  %vm7377_vm10 = vcmask 1040384   ;;  %s9911_s29 = smov [#allocation3]  }
  0x20   :  { %8258 = vmatprep.mubr.msk.bf16.mxu0 %vm9909_vm0, %v9908_v1  ;;  %8266 = vmatprep.mubr.msk.bf16.mxu1 %vm9909_vm0, %v9908_v1  ;;  %s7456_s30 = sshll.u32 %s9911_s29, 4  ;;  %vm7448_vm11 = vcmask 58368   ;;  %s7457_s30 = int_to_ptr.vmem [resolvable:$true] %s7456_s30 }
  0x21   :  { %p9889_p1 = scmp.lt.s32.totalorder %s7457_s30, %s7457_s30 }
  0x22   :  { %8257 = vmatpush3.bf16.msra.mxu0 %v10055_v21  ;;  %8265 = vmatpush3.bf16.msra.mxu1 %v10060_v22 }
  0x23   :  { %8270 = vmatprep.subr.bf16.mxu0 %v9908_v1  ;;  %8278 = vmatprep.subr.bf16.mxu1 %v9908_v1 }
  0x25   :  { %8259 = vmatmul.mubr.bf16.vlgmr.msra.gmra.mrb[12].mxu0 %v9910_v20  ;;  %8267 = vmatmul.mubr.bf16.vlgmr.msra.gmra.mrb[12].mxu1 %v9910_v20 }
  0x26   :  { %8271 = vmatpush3.bf16.msra.mxu0 %v10005_v14  ;;  %8279 = vmatpush3.bf16.msra.mxu1 %v10010_v15 }
  0x27   :  { %8272 = vmatprep.subr.bf16.mxu0 %v9908_v1  ;;  %8280 = vmatprep.subr.bf16.mxu1 %v9908_v1 }
  0x28   :  { %8274 = vmatprep.mubr.msk.bf16.mxu0 %vm9909_vm0, %v9908_v1  ;;  %8282 = vmatprep.mubr.msk.bf16.mxu1 %vm9909_vm0, %v9908_v1 }
  0x2a   :  { %8273 = vmatpush3.bf16.msra.mxu0 %v10017_v16  ;;  %8281 = vmatpush3.bf16.msra.mxu1 %v10022_v17 }
  0x2b   :  { %8286 = vmatprep.subr.bf16.mxu0 %v9908_v1  ;;  %8294 = vmatprep.subr.bf16.mxu1 %v9908_v1 }
  0xe0   :  { %v96_v23 = vpop.f32.mrb[0].mxu0  ;;  %v162_v24 = vpop.f32.mrb[0].mxu1 }
  0xe1   :  { %v8212_v25 = vpop.f32.mrb[1].mxu0  ;;  %v8220_v26 = vpop.f32.mrb[1].mxu1  ;;  %v10106_v47 = vadd.f32 %v7464_v27, %v96_v23  ;;  %v10108_v48 = vadd.f32 %v7473_v28, %v162_v24 }
  0xe2   :  { %v99_v29 = vpop.f32.mrb[2].mxu0  ;;  %v165_v30 = vpop.f32.mrb[2].mxu1 }
  0xe3   :  { %v10092_v31 = vadd.f32 %v7464_v27, %v99_v29  ;;  %v10094_v32 = vadd.f32 %v7473_v28, %v165_v30  ;;  %v8213_v33 = vpop.f32.mrb[3].mxu0  ;;  %v8221_v34 = vpop.f32.mrb[3].mxu1 }
  0xe8   :  { %v228_v35 = vpop.f32.mrb[4].mxu0  ;;  %v294_v36 = vpop.f32.mrb[4].mxu1 }
  0xe9   :  { %v8228_v37 = vpop.f32.mrb[5].mxu0  ;;  %v8236_v38 = vpop.f32.mrb[5].mxu1  ;;  %v10112_v61 = vadd.f32 %v7491_v40, %v294_v36  ;;  %v10115_v6 = vadd.f32 %v7482_v39, %v228_v35 }
  0xea   :  { %v231_v41 = vpop.f32.mrb[6].mxu0  ;;  %v297_v42 = vpop.f32.mrb[6].mxu1 }
  0xeb   :  { %v10102_v43 = vadd.f32 %v7482_v39, %v231_v41  ;;  %v10104_v44 = vadd.f32 %v7491_v40, %v297_v42  ;;  %v8229_v45 = vpop.f32.mrb[7].mxu0  ;;  %v8237_v46 = vpop.f32.mrb[7].mxu1 }
  0xf0   :  { %v369_v49 = vpop.f32.mrb[8].mxu0  ;;  %v428_v50 = vpop.f32.mrb[8].mxu1 }
  0xf1   :  { %v375_v51 = vadd.f32 %v369_v49, %v10106_v47  ;;  %v434_v52 = vadd.f32 %v428_v50, %v10108_v48  ;;  %v8244_v53 = vpop.f32.mrb[9].mxu0  ;;  %v8252_v54 = vpop.f32.mrb[9].mxu1 }
  0xf2   :  { %v372_v55 = vpop.f32.mrb[10].mxu0  ;;  %v431_v56 = vpop.f32.mrb[10].mxu1 }
  0xf3   :  { %v7509_v57 = vmul.f32 -1.442695, %v375_v51  ;;  %v7512_v58 = vmul.f32 -1.442695, %v434_v52  ;;  %v8245_v59 = vpop.f32.mrb[11].mxu0  ;;  %v8253_v60 = vpop.f32.mrb[11].mxu1 }
  0xf5   :  { %9340 = vpow2.f32 %v7509_v57 }
  0xf6   :  { %9342 = vpow2.f32 %v7512_v58 }
  0xf8   :  { %v487_v62 = vpop.f32.mrb[12].mxu0  ;;  %v541_v63 = vpop.f32.mrb[12].mxu1 }
  0xf9   :  { %v547_v0 = vadd.f32 %v541_v63, %v10112_v61  ;;  %v8260_v2 = vpop.f32.mrb[13].mxu0  ;;  %v8268_v3 = vpop.f32.mrb[13].mxu1  ;;  %v493_v10 = vadd.f32 %v487_v62, %v10115_v6 }
  0xfa   :  { %v490_v4 = vpop.f32.mrb[14].mxu0  ;;  %v544_v5 = vpop.f32.mrb[14].mxu1 }
  0xfb   :  { %v8261_v7 = vpop.f32.mrb[15].mxu0  ;;  %v8269_v8 = vpop.f32.mrb[15].mxu1  ;;  %v7517_v9 = vmul.f32 -1.442695, %v547_v0 }
  0xfd   :  { %9344 = vpow2.f32 %v7517_v9 }
  0xfe   :  { %9346 = vtanh.f32 %v493_v10 }
  0xff   :  { %v9341_v11 = vpop.eup %9340 }
 0x100   :  { %v9343_v12 = vpop.eup %9342  ;;  %v379_v13 = vadd.f32 1.0, %v9341_v11 }
 0x101   :  { %v438_v23 = vadd.f32 1.0, %v9343_v12 }
 0x102   :  { %9348 = vrcp.f32 %v379_v13 }
 0x103   :  { %9350 = vrcp.f32 %v438_v23 }
 0x107   :  { %v9345_v24 = vpop.eup %9344 }
 0x108   :  { %v9347_v25 = vpop.eup %9346  ;;  %v551_v29 = vadd.f32 1.0, %v9345_v24 }
 0x10a   :  { %9352 = vrcp.f32 %v551_v29 }
 0x10c   :  { %v9349_v26 = vpop.eup %9348 }
 0x10d   :  { %v9351_v27 = vpop.eup %9350  ;;  %v555_v28 = vmul.f32 %v9349_v26, %v9347_v25 }
 0x10e   :  { %v554_v30 = vmul.f32 0.0, %v9351_v27 }
 0x110   :  { %v10118_v33 = vadd.f32 %v555_v28, %v554_v30 }
 0x112   :  { %9354 = vtanh.f32 %v10118_v33  ;;  %v761_v24 = vrot.slane %v10118_v33, 7 }
 0x114   :  { %v9353_v34 = vpop.eup %9352 }
 0x11c   :  { %v9355_v35 = vpop.eup %9354 }
 0x11d   :  { %v558_v36 = vmul.f32 %v9355_v35, %v9353_v34 }
 0x11f   :  { %560 = vst.msk [vmem:[#allocation2] sm:$0x1] %vm559_vm2, %v558_v36  ;;  %v561_v37 = vpack.c.bf16 %v558_v36, %v558_v36 }
 0x121   :  { %8275 = vmatmul.mubr.msk.bf16.vlgmr.msra.gmra.mrb[16].mxu0 %vm30_vm1, %v561_v37  ;;  %8283 = vmatmul.mubr.msk.bf16.vlgmr.msra.gmra.mrb[16].mxu1 %vm30_vm1, %v561_v37 }
 0x122   :  { %8287 = vmatpush3.bf16.msra.mxu0 %v10037_v18  ;;  %8295 = vmatpush3.bf16.msra.mxu1 %v10042_v19 }
 0x123   :  { %8288 = vmatprep.subr.bf16.mxu0 %v9908_v1  ;;  %8296 = vmatprep.subr.bf16.mxu1 %v9908_v1 }
 0x124   :  { %8290 = vmatprep.mubr.msk.bf16.mxu0 %vm9909_vm0, %v9908_v1  ;;  %8298 = vmatprep.mubr.msk.bf16.mxu1 %vm9909_vm0, %v9908_v1 }
 0x126   :  { %8289 = vmatpush3.bf16.msra.mxu0 %v10055_v21  ;;  %8297 = vmatpush3.bf16.msra.mxu1 %v10060_v22 }
 0x127   :  { %8302 = vmatprep.subr.bf16.mxu0 %v9908_v1  ;;  %8310 = vmatprep.subr.bf16.mxu1 %v9908_v1 }
 0x129   :  { %8291 = vmatmul.mubr.msk.bf16.vlgmr.msra.gmra.mrb[20].mxu0 %vm30_vm1, %v561_v37  ;;  %8299 = vmatmul.mubr.msk.bf16.vlgmr.msra.gmra.mrb[20].mxu1 %vm30_vm1, %v561_v37 }
 0x12a   :  { %8303 = vmatpush3.bf16.msra.mxu0 %v10005_v14  ;;  %8311 = vmatpush3.bf16.msra.mxu1 %v10010_v15 }
 0x12b   :  { %8304 = vmatprep.subr.bf16.mxu0 %v9908_v1  ;;  %8312 = vmatprep.subr.bf16.mxu1 %v9908_v1 }
 0x12c   :  { %8306 = vmatprep.mubr.msk.bf16.mxu0 %vm9909_vm0, %v9908_v1  ;;  %8314 = vmatprep.mubr.msk.bf16.mxu1 %vm9909_vm0, %v9908_v1 }
 0x12e   :  { %8305 = vmatpush3.bf16.msra.mxu0 %v10017_v16  ;;  %8313 = vmatpush3.bf16.msra.mxu1 %v10022_v17 }
 0x12f   :  { %8318 = vmatprep.subr.bf16.mxu0 %v9908_v1  ;;  %8326 = vmatprep.subr.bf16.mxu1 %v9908_v1 }
 0x1f4   :  { %v599_v38 = vpop.f32.mrb[16].mxu0  ;;  %v649_v39 = vpop.f32.mrb[16].mxu1 }
 0x1f5   :  { %v606_v40 = vrot.slane %v599_v38, 7  ;;  %v656_v41 = vrot.slane %v649_v39, 7  ;;  %v8276_v42 = vpop.f32.mrb[17].mxu0  ;;  %v8284_v45 = vpop.f32.mrb[17].mxu1 }
 0x1f6   :  { %v602_v46 = vpop.f32.mrb[18].mxu0  ;;  %v652_v49 = vpop.f32.mrb[18].mxu1 }
 0x1f7   :  { %v608_v50 = vadd.f32 %v606_v40, %v10106_v47  ;;  %v658_v51 = vadd.f32 %v656_v41, %v10108_v48  ;;  %v8277_v52 = vpop.f32.mrb[19].mxu0  ;;  %v8285_v53 = vpop.f32.mrb[19].mxu1 }
 0x1f9   :  { %v7519_v54 = vmul.f32 -1.442695, %v608_v50  ;;  %v7521_v55 = vmul.f32 -1.442695, %v658_v51 }
 0x1fb   :  { %9356 = vpow2.f32 %v7519_v54 }
 0x1fc   :  { %9358 = vpow2.f32 %v7521_v55  ;;  %v699_v56 = vpop.f32.mrb[20].mxu0  ;;  %v744_v57 = vpop.f32.mrb[20].mxu1 }
 0x1fd   :  { %v751_v58 = vrot.slane %v744_v57, 7  ;;  %v8292_v59 = vpop.f32.mrb[21].mxu0  ;;  %v8300_v60 = vpop.f32.mrb[21].mxu1  ;;  %v706_v0 = vrot.slane %v699_v56, 7 }
 0x1fe   :  { %v702_v62 = vpop.f32.mrb[22].mxu0  ;;  %v747_v63 = vpop.f32.mrb[22].mxu1 }
 0x1ff   :  { %v753_v2 = vadd.f32 %v751_v58, %v10112_v61  ;;  %v8293_v3 = vpop.f32.mrb[23].mxu0  ;;  %v8301_v4 = vpop.f32.mrb[23].mxu1  ;;  %v708_v7 = vadd.f32 %v706_v0, %v10115_v6 }
 0x201   :  { %v7524_v5 = vmul.f32 -1.442695, %v753_v2 }
 0x203   :  { %9360 = vpow2.f32 %v7524_v5 }
 0x204   :  { %9362 = vtanh.f32 %v708_v7 }
 0x205   :  { %v9357_v8 = vpop.eup %9356 }
 0x206   :  { %v9359_v9 = vpop.eup %9358  ;;  %v612_v10 = vadd.f32 1.0, %v9357_v8 }
 0x207   :  { %v662_v11 = vadd.f32 1.0, %v9359_v9 }
 0x208   :  { %9364 = vrcp.f32 %v612_v10 }
 0x209   :  { %9366 = vrcp.f32 %v662_v11 }
 0x20d   :  { %v9361_v12 = vpop.eup %9360 }
 0x20e   :  { %v9363_v13 = vpop.eup %9362  ;;  %v757_v27 = vadd.f32 1.0, %v9361_v12 }
 0x210   :  { %9368 = vrcp.f32 %v757_v27 }
 0x212   :  { %v9365_v23 = vpop.eup %9364 }
 0x213   :  { %v9367_v25 = vpop.eup %9366  ;;  %v764_v26 = vmul.f32 %v9365_v23, %v9363_v13 }
 0x214   :  { %v763_v28 = vmul.f32 %v9367_v25, %v761_v24 }
 0x216   :  { %v10155_v29 = vadd.f32 %v764_v26, %v763_v28 }
 0x218   :  { %9370 = vtanh.f32 %v10155_v29  ;;  %v973_v23 = vrot.slane %v10155_v29, 7 }
 0x21a   :  { %v9369_v30 = vpop.eup %9368 }
 0x222   :  { %v9371_v34 = vpop.eup %9370 }
 0x223   :  { %v767_v35 = vmul.f32 %v9371_v34, %v9369_v30 }
 0x225   :  { %769 = vst.msk [vmem:[#allocation2] sm:$0x2] %vm768_vm3, %v767_v35  ;;  %v770_v36 = vpack.c.bf16 %v767_v35, %v767_v35 }
 0x227   :  { %v772_v37 = vshrl.u32 %v770_v36, 16 }
 0x229   :  { %8307 = vmatmul.mubr.msk.bf16.vlgmr.msra.gmra.mrb[24].mxu0 %vm30_vm1, %v772_v37  ;;  %8315 = vmatmul.mubr.msk.bf16.vlgmr.msra.gmra.mrb[24].mxu1 %vm30_vm1, %v772_v37 }
 0x22a   :  { %8319 = vmatpush3.bf16.msra.mxu0 %v10037_v18  ;;  %8327 = vmatpush3.bf16.msra.mxu1 %v10042_v19 }
 0x22b   :  { %8320 = vmatprep.subr.bf16.mxu0 %v9908_v1  ;;  %8328 = vmatprep.subr.bf16.mxu1 %v9908_v1 }
 0x22c   :  { %8322 = vmatprep.mubr.msk.bf16.mxu0 %vm9909_vm0, %v9908_v1  ;;  %8330 = vmatprep.mubr.msk.bf16.mxu1 %vm9909_vm0, %v9908_v1 }
 0x22e   :  { %8321 = vmatpush3.bf16.msra.mxu0 %v10055_v21  ;;  %8329 = vmatpush3.bf16.msra.mxu1 %v10060_v22 }
 0x22f   :  { %8334 = vmatprep.subr.bf16.mxu0 %v9908_v1  ;;  %8342 = vmatprep.subr.bf16.mxu1 %v9908_v1 }
 0x231   :  { %8323 = vmatmul.mubr.msk.bf16.vlgmr.msra.gmra.mrb[28].mxu0 %vm30_vm1, %v772_v37  ;;  %8331 = vmatmul.mubr.msk.bf16.vlgmr.msra.gmra.mrb[28].mxu1 %vm30_vm1, %v772_v37 }
 0x232   :  { %8335 = vmatpush3.bf16.msra.mxu0 %v10005_v14  ;;  %8343 = vmatpush3.bf16.msra.mxu1 %v10010_v15 }
 0x233   :  { %8336 = vmatprep.subr.bf16.mxu0 %v9908_v1  ;;  %8344 = vmatprep.subr.bf16.mxu1 %v9908_v1 }
 0x234   :  { %8338 = vmatprep.mubr.msk.bf16.mxu0 %vm9909_vm0, %v9908_v1  ;;  %8346 = vmatprep.mubr.msk.bf16.mxu1 %vm9909_vm0, %v9908_v1 }
 0x236   :  { %8337 = vmatpush3.bf16.msra.mxu0 %v10017_v16  ;;  %8345 = vmatpush3.bf16.msra.mxu1 %v10022_v17 }
 0x237   :  { %8350 = vmatprep.subr.bf16.mxu0 %v9908_v1  ;;  %8358 = vmatprep.subr.bf16.mxu1 %v9908_v1 }
 0x2fc   :  { %v811_v33 = vpop.f32.mrb[24].mxu0  ;;  %v861_v38 = vpop.f32.mrb[24].mxu1 }
 0x2fd   :  { %v818_v39 = vrot.slane %v811_v33, 6  ;;  %v868_v40 = vrot.slane %v861_v38, 6  ;;  %v8308_v41 = vpop.f32.mrb[25].mxu0  ;;  %v8316_v42 = vpop.f32.mrb[25].mxu1 }
 0x2fe   :  { %v814_v45 = vpop.f32.mrb[26].mxu0  ;;  %v864_v46 = vpop.f32.mrb[26].mxu1 }
 0x2ff   :  { %v820_v49 = vadd.f32 %v818_v39, %v10106_v47  ;;  %v870_v50 = vadd.f32 %v868_v40, %v10108_v48  ;;  %v8309_v51 = vpop.f32.mrb[27].mxu0  ;;  %v8317_v52 = vpop.f32.mrb[27].mxu1 }
 0x301   :  { %v7526_v53 = vmul.f32 -1.442695, %v820_v49  ;;  %v7528_v54 = vmul.f32 -1.442695, %v870_v50 }
 0x303   :  { %9372 = vpow2.f32 %v7526_v53 }
 0x304   :  { %9374 = vpow2.f32 %v7528_v54  ;;  %v911_v55 = vpop.f32.mrb[28].mxu0  ;;  %v956_v56 = vpop.f32.mrb[28].mxu1 }
 0x305   :  { %v963_v57 = vrot.slane %v956_v56, 6  ;;  %v8324_v58 = vpop.f32.mrb[29].mxu0  ;;  %v8332_v59 = vpop.f32.mrb[29].mxu1  ;;  %v918_v63 = vrot.slane %v911_v55, 6 }
 0x306   :  { %v914_v60 = vpop.f32.mrb[30].mxu0  ;;  %v959_v62 = vpop.f32.mrb[30].mxu1 }
 0x307   :  { %v965_v0 = vadd.f32 %v963_v57, %v10112_v61  ;;  %v8325_v2 = vpop.f32.mrb[31].mxu0  ;;  %v8333_v3 = vpop.f32.mrb[31].mxu1  ;;  %v920_v5 = vadd.f32 %v918_v63, %v10115_v6 }
 0x309   :  { %v7531_v4 = vmul.f32 -1.442695, %v965_v0 }
 0x30b   :  { %9376 = vpow2.f32 %v7531_v4 }
 0x30c   :  { %9378 = vtanh.f32 %v920_v5 }
 0x30d   :  { %v9373_v7 = vpop.eup %9372 }
 0x30e   :  { %v9375_v8 = vpop.eup %9374  ;;  %v824_v9 = vadd.f32 1.0, %v9373_v7 }
 0x30f   :  { %v874_v10 = vadd.f32 1.0, %v9375_v8 }
 0x310   :  { %9380 = vrcp.f32 %v824_v9 }
 0x311   :  { %9382 = vrcp.f32 %v874_v10 }
 0x315   :  { %v9377_v11 = vpop.eup %9376 }
 0x316   :  { %v9379_v12 = vpop.eup %9378  ;;  %v969_v26 = vadd.f32 1.0, %v9377_v11 }
 0x318   :  { %9384 = vrcp.f32 %v969_v26 }
 0x31a   :  { %v9381_v13 = vpop.eup %9380 }
 0x31b   :  { %v9383_v24 = vpop.eup %9382  ;;  %v976_v25 = vmul.f32 %v9381_v13, %v9379_v12 }
 0x31c   :  { %v975_v27 = vmul.f32 %v9383_v24, %v973_v23 }
 0x31e   :  { %v10192_v28 = vadd.f32 %v976_v25, %v975_v27 }
 0x320   :  { %9386 = vtanh.f32 %v10192_v28  ;;  %v1184_v13 = vrot.slane %v10192_v28, 7 }
 0x322   :  { %v9385_v30 = vpop.eup %9384 }
 0x32a   :  { %v9387_v34 = vpop.eup %9386 }
 0x32b   :  { %v979_v35 = vmul.f32 %v9387_v34, %v9385_v30 }
 0x32d   :  { %981 = vst.msk [vmem:[#allocation2] sm:$0x4] %vm980_vm4, %v979_v35  ;;  %v982_v36 = vpack.c.bf16 %v979_v35, %v979_v35 }
 0x32f   :  { %v984_v37 = vrot.slane %v982_v36, 1 }
 0x331   :  { %8339 = vmatmul.mubr.msk.bf16.vlgmr.msra.gmra.mrb[32].mxu0 %vm30_vm1, %v984_v37  ;;  %8347 = vmatmul.mubr.msk.bf16.vlgmr.msra.gmra.mrb[32].mxu1 %vm30_vm1, %v984_v37 }
 0x332   :  { %8351 = vmatpush3.bf16.msra.mxu0 %v10037_v18  ;;  %8359 = vmatpush3.bf16.msra.mxu1 %v10042_v19 }
 0x333   :  { %8352 = vmatprep.subr.bf16.mxu0 %v9908_v1  ;;  %8360 = vmatprep.subr.bf16.mxu1 %v9908_v1 }
 0x334   :  { %8354 = vmatprep.mubr.msk.bf16.mxu0 %vm9909_vm0, %v9908_v1  ;;  %8362 = vmatprep.mubr.msk.bf16.mxu1 %vm9909_vm0, %v9908_v1 }
 0x336   :  { %8353 = vmatpush3.bf16.msra.mxu0 %v10055_v21  ;;  %8361 = vmatpush3.bf16.msra.mxu1 %v10060_v22 }
 0x337   :  { %8366 = vmatprep.subr.bf16.mxu0 %v9908_v1  ;;  %8374 = vmatprep.subr.bf16.mxu1 %v9908_v1 }
 0x339   :  { %8355 = vmatmul.mubr.msk.bf16.vlgmr.msra.gmra.mrb[36].mxu0 %vm30_vm1, %v984_v37  ;;  %8363 = vmatmul.mubr.msk.bf16.vlgmr.msra.gmra.mrb[36].mxu1 %vm30_vm1, %v984_v37 }
 0x33a   :  { %8367 = vmatpush3.bf16.msra.mxu0 %v10005_v14  ;;  %8375 = vmatpush3.bf16.msra.mxu1 %v10010_v15 }
 0x33b   :  { %8368 = vmatprep.subr.bf16.mxu0 %v9908_v1  ;;  %8376 = vmatprep.subr.bf16.mxu1 %v9908_v1 }
 0x33c   :  { %8370 = vmatprep.mubr.msk.bf16.mxu0 %vm9909_vm0, %v9908_v1  ;;  %8378 = vmatprep.mubr.msk.bf16.mxu1 %vm9909_vm0, %v9908_v1 }
 0x33e   :  { %8369 = vmatpush3.bf16.msra.mxu0 %v10017_v16  ;;  %8377 = vmatpush3.bf16.msra.mxu1 %v10022_v17 }
 0x33f   :  { %8382 = vmatprep.subr.bf16.mxu0 %v9908_v1  ;;  %8390 = vmatprep.subr.bf16.mxu1 %v9908_v1 }
 0x404   :  { %v1022_v29 = vpop.f32.mrb[32].mxu0  ;;  %v1072_v33 = vpop.f32.mrb[32].mxu1 }
 0x405   :  { %v1029_v38 = vrot.slane %v1022_v29, 5  ;;  %v1079_v39 = vrot.slane %v1072_v33, 5  ;;  %v8340_v40 = vpop.f32.mrb[33].mxu0  ;;  %v8348_v41 = vpop.f32.mrb[33].mxu1 }
 0x406   :  { %v1025_v42 = vpop.f32.mrb[34].mxu0  ;;  %v1075_v45 = vpop.f32.mrb[34].mxu1 }
 0x407   :  { %v1031_v46 = vadd.f32 %v1029_v38, %v10106_v47  ;;  %v1081_v49 = vadd.f32 %v1079_v39, %v10108_v48  ;;  %v8341_v50 = vpop.f32.mrb[35].mxu0  ;;  %v8349_v51 = vpop.f32.mrb[35].mxu1 }
 0x409   :  { %v7533_v52 = vmul.f32 -1.442695, %v1031_v46  ;;  %v7535_v53 = vmul.f32 -1.442695, %v1081_v49 }
 0x40b   :  { %9388 = vpow2.f32 %v7533_v52 }
 0x40c   :  { %9390 = vpow2.f32 %v7535_v53  ;;  %v1122_v54 = vpop.f32.mrb[36].mxu0  ;;  %v1167_v55 = vpop.f32.mrb[36].mxu1 }
 0x40d   :  { %v1174_v56 = vrot.slane %v1167_v55, 5  ;;  %v8356_v57 = vpop.f32.mrb[37].mxu0  ;;  %v8364_v58 = vpop.f32.mrb[37].mxu1  ;;  %v1129_v62 = vrot.slane %v1122_v54, 5 }
 0x40e   :  { %v1125_v59 = vpop.f32.mrb[38].mxu0  ;;  %v1170_v60 = vpop.f32.mrb[38].mxu1 }
 0x40f   :  { %v1176_v63 = vadd.f32 %v1174_v56, %v10112_v61  ;;  %v8357_v0 = vpop.f32.mrb[39].mxu0  ;;  %v8365_v2 = vpop.f32.mrb[39].mxu1  ;;  %v1131_v4 = vadd.f32 %v1129_v62, %v10115_v6 }
 0x411   :  { %v7538_v3 = vmul.f32 -1.442695, %v1176_v63 }
 0x413   :  { %9392 = vpow2.f32 %v7538_v3 }
 0x414   :  { %9394 = vtanh.f32 %v1131_v4 }
 0x415   :  { %v9389_v5 = vpop.eup %9388 }
 0x416   :  { %v9391_v7 = vpop.eup %9390  ;;  %v1035_v8 = vadd.f32 1.0, %v9389_v5 }
 0x417   :  { %v1085_v9 = vadd.f32 1.0, %v9391_v7 }
 0x418   :  { %9396 = vrcp.f32 %v1035_v8 }
 0x419   :  { %9398 = vrcp.f32 %v1085_v9 }
 0x41d   :  { %v9393_v10 = vpop.eup %9392 }
 0x41e   :  { %v9395_v11 = vpop.eup %9394  ;;  %v1180_v25 = vadd.f32 1.0, %v9393_v10 }
 0x420   :  { %9400 = vrcp.f32 %v1180_v25 }
 0x422   :  { %v9397_v12 = vpop.eup %9396 }
 0x423   :  { %v9399_v23 = vpop.eup %9398  ;;  %v1187_v24 = vmul.f32 %v9397_v12, %v9395_v11 }
 0x424   :  { %v1186_v26 = vmul.f32 %v9399_v23, %v1184_v13 }
 0x426   :  { %v10229_v27 = vadd.f32 %v1187_v24, %v1186_v26 }
 0x428   :  { %9402 = vtanh.f32 %v10229_v27  ;;  %v1397_v13 = vrot.slane %v10229_v27, 7 }
 0x42a   :  { %v9401_v30 = vpop.eup %9400 }
 0x432   :  { %v9403_v34 = vpop.eup %9402 }
 0x433   :  { %v1190_v35 = vmul.f32 %v9403_v34, %v9401_v30 }
 0x435   :  { %1192 = vst.msk [vmem:[#allocation2] sm:$0x8] %vm1191_vm5, %v1190_v35  ;;  %v1193_v36 = vpack.c.bf16 %v1190_v35, %v1190_v35 }
 0x437   :  { %v1195_v37 = vshrl.u32 %v1193_v36, 16 }
 0x439   :  { %v1197_v29 = vrot.slane %v1195_v37, 1 }
 0x43b   :  { %8371 = vmatmul.mubr.msk.bf16.vlgmr.msra.gmra.mrb[40].mxu0 %vm30_vm1, %v1197_v29  ;;  %8379 = vmatmul.mubr.msk.bf16.vlgmr.msra.gmra.mrb[40].mxu1 %vm30_vm1, %v1197_v29 }
 0x43c   :  { %8383 = vmatpush3.bf16.msra.mxu0 %v10037_v18  ;;  %8391 = vmatpush3.bf16.msra.mxu1 %v10042_v19 }
 0x43d   :  { %8384 = vmatprep.subr.bf16.mxu0 %v9908_v1  ;;  %8392 = vmatprep.subr.bf16.mxu1 %v9908_v1 }
 0x43e   :  { %8386 = vmatprep.mubr.msk.bf16.mxu0 %vm9909_vm0, %v9908_v1  ;;  %8394 = vmatprep.mubr.msk.bf16.mxu1 %vm9909_vm0, %v9908_v1 }
 0x440   :  { %8385 = vmatpush3.bf16.msra.mxu0 %v10055_v21  ;;  %8393 = vmatpush3.bf16.msra.mxu1 %v10060_v22 }
 0x441   :  { %8398 = vmatprep.subr.bf16.mxu0 %v9908_v1  ;;  %8406 = vmatprep.subr.bf16.mxu1 %v9908_v1 }
 0x443   :  { %8387 = vmatmul.mubr.msk.bf16.vlgmr.msra.gmra.mrb[44].mxu0 %vm30_vm1, %v1197_v29  ;;  %8395 = vmatmul.mubr.msk.bf16.vlgmr.msra.gmra.mrb[44].mxu1 %vm30_vm1, %v1197_v29 }
 0x444   :  { %8399 = vmatpush3.bf16.msra.mxu0 %v10005_v14  ;;  %8407 = vmatpush3.bf16.msra.mxu1 %v10010_v15 }
 0x445   :  { %8400 = vmatprep.subr.bf16.mxu0 %v9908_v1  ;;  %8408 = vmatprep.subr.bf16.mxu1 %v9908_v1 }
 0x446   :  { %8402 = vmatprep.mubr.msk.bf16.mxu0 %vm9909_vm0, %v9908_v1  ;;  %8410 = vmatprep.mubr.msk.bf16.mxu1 %vm9909_vm0, %v9908_v1 }
 0x448   :  { %8401 = vmatpush3.bf16.msra.mxu0 %v10017_v16  ;;  %8409 = vmatpush3.bf16.msra.mxu1 %v10022_v17 }
 0x449   :  { %8414 = vmatprep.subr.bf16.mxu0 %v9908_v1  ;;  %8422 = vmatprep.subr.bf16.mxu1 %v9908_v1 }
 0x50e   :  { %v1235_v28 = vpop.f32.mrb[40].mxu0  ;;  %v1285_v33 = vpop.f32.mrb[40].mxu1 }
 0x50f   :  { %v1242_v38 = vrot.slane %v1235_v28, 4  ;;  %v1292_v39 = vrot.slane %v1285_v33, 4  ;;  %v8372_v40 = vpop.f32.mrb[41].mxu0  ;;  %v8380_v41 = vpop.f32.mrb[41].mxu1 }
 0x510   :  { %v1238_v42 = vpop.f32.mrb[42].mxu0  ;;  %v1288_v45 = vpop.f32.mrb[42].mxu1 }
 0x511   :  { %v1244_v46 = vadd.f32 %v1242_v38, %v10106_v47  ;;  %v1294_v49 = vadd.f32 %v1292_v39, %v10108_v48  ;;  %v8373_v50 = vpop.f32.mrb[43].mxu0  ;;  %v8381_v51 = vpop.f32.mrb[43].mxu1 }
 0x513   :  { %v7540_v52 = vmul.f32 -1.442695, %v1244_v46  ;;  %v7542_v53 = vmul.f32 -1.442695, %v1294_v49 }
 0x515   :  { %9404 = vpow2.f32 %v7540_v52 }
 0x516   :  { %9406 = vpow2.f32 %v7542_v53  ;;  %v1335_v54 = vpop.f32.mrb[44].mxu0  ;;  %v1380_v55 = vpop.f32.mrb[44].mxu1 }
 0x517   :  { %v1387_v56 = vrot.slane %v1380_v55, 4  ;;  %v8388_v57 = vpop.f32.mrb[45].mxu0  ;;  %v8396_v58 = vpop.f32.mrb[45].mxu1  ;;  %v1342_v62 = vrot.slane %v1335_v54, 4 }
 0x518   :  { %v1338_v59 = vpop.f32.mrb[46].mxu0  ;;  %v1383_v60 = vpop.f32.mrb[46].mxu1 }
 0x519   :  { %v1389_v63 = vadd.f32 %v1387_v56, %v10112_v61  ;;  %v8389_v0 = vpop.f32.mrb[47].mxu0  ;;  %v8397_v2 = vpop.f32.mrb[47].mxu1  ;;  %v1344_v4 = vadd.f32 %v1342_v62, %v10115_v6 }
 0x51b   :  { %v7545_v3 = vmul.f32 -1.442695, %v1389_v63 }
 0x51d   :  { %9408 = vpow2.f32 %v7545_v3 }
 0x51e   :  { %9410 = vtanh.f32 %v1344_v4 }
 0x51f   :  { %v9405_v5 = vpop.eup %9404 }
 0x520   :  { %v9407_v7 = vpop.eup %9406  ;;  %v1248_v8 = vadd.f32 1.0, %v9405_v5 }
 0x521   :  { %v1298_v9 = vadd.f32 1.0, %v9407_v7 }
 0x522   :  { %9412 = vrcp.f32 %v1248_v8 }
 0x523   :  { %9414 = vrcp.f32 %v1298_v9 }
 0x527   :  { %v9409_v10 = vpop.eup %9408 }
 0x528   :  { %v9411_v11 = vpop.eup %9410  ;;  %v1393_v25 = vadd.f32 1.0, %v9409_v10 }
 0x52a   :  { %9416 = vrcp.f32 %v1393_v25 }
 0x52c   :  { %v9413_v12 = vpop.eup %9412 }
 0x52d   :  { %v9415_v23 = vpop.eup %9414  ;;  %v1400_v24 = vmul.f32 %v9413_v12, %v9411_v11 }
 0x52e   :  { %v1399_v26 = vmul.f32 %v9415_v23, %v1397_v13 }
 0x530   :  { %v10266_v30 = vadd.f32 %v1400_v24, %v1399_v26 }
 0x532   :  { %9418 = vtanh.f32 %v10266_v30  ;;  %v1608_v5 = vrot.slane %v10266_v30, 7  ;;  %v10312_v30 = vld [vmem:[%s11540_s2 + $0x20] sm:$0xff]  }
 0x534   :  { %v9417_v34 = vpop.eup %9416 }
 0x53c   :  { %v9419_v35 = vpop.eup %9418 }
 0x53d   :  { %v1403_v36 = vmul.f32 %v9419_v35, %v9417_v34  ;;  %v10318_v34 = vld [vmem:[%s11540_s2 + $0x30] sm:$0xff]   ;;  %v10336_v35 = vld [vmem:[%s11540_s2] sm:$0xff]  }
 0x53f   :  { %1405 = vst.msk [vmem:[#allocation2] sm:$0x10] %vm1404_vm6, %v1403_v36  ;;  %v1406_v37 = vpack.c.bf16 %v1403_v36, %v1403_v36  ;;  %v10360_v36 = vld [vmem:[%s11540_s2 + $0x18] sm:$0xff]  }
 0x541   :  { %v1408_v29 = vrot.slane %v1406_v37, 2 }
 0x543   :  { %8403 = vmatmul.mubr.msk.bf16.vlgmr.msra.gmra.mrb[48].mxu0 %vm30_vm1, %v1408_v29  ;;  %8411 = vmatmul.mubr.msk.bf16.vlgmr.msra.gmra.mrb[48].mxu1 %vm30_vm1, %v1408_v29 }
 0x544   :  { %8415 = vmatpush3.bf16.msra.mxu0 %v10037_v18  ;;  %8423 = vmatpush3.bf16.msra.mxu1 %v10042_v19 }
 0x545   :  { %8416 = vmatprep.subr.bf16.mxu0 %v9908_v1  ;;  %8424 = vmatprep.subr.bf16.mxu1 %v9908_v1 }
 0x546   :  { %8418 = vmatprep.mubr.msk.bf16.mxu0 %vm9909_vm0, %v9908_v1  ;;  %8426 = vmatprep.mubr.msk.bf16.mxu1 %vm9909_vm0, %v9908_v1 }
 0x548   :  { %8417 = vmatpush3.bf16.msra.mxu0 %v10055_v21  ;;  %8425 = vmatpush3.bf16.msra.mxu1 %v10060_v22 }
 0x549   :  { %8430 = vmatprep.subr.bf16.mxu0 %v9908_v1  ;;  %8438 = vmatprep.subr.bf16.mxu1 %v9908_v1 }
 0x54b   :  { %8419 = vmatmul.mubr.msk.bf16.vlgmr.msra.gmra.mrb[52].mxu0 %vm30_vm1, %v1408_v29  ;;  %8427 = vmatmul.mubr.msk.bf16.vlgmr.msra.gmra.mrb[52].mxu1 %vm30_vm1, %v1408_v29 }
 0x54c   :  { %8431 = vmatpush3.bf16.msra.mxu0 %v10005_v14  ;;  %8439 = vmatpush3.bf16.msra.mxu1 %v10010_v15 }
 0x54d   :  { %8432 = vmatprep.subr.bf16.mxu0 %v9908_v1  ;;  %8440 = vmatprep.subr.bf16.mxu1 %v9908_v1 }
 0x54e   :  { %8434 = vmatprep.mubr.msk.bf16.mxu0 %vm9909_vm0, %v9908_v1  ;;  %8442 = vmatprep.mubr.msk.bf16.mxu1 %vm9909_vm0, %v9908_v1 }
 0x550   :  { %8433 = vmatpush3.bf16.msra.mxu0 %v10017_v16  ;;  %8441 = vmatpush3.bf16.msra.mxu1 %v10022_v17 }
 0x551   :  { %8446 = vmatprep.subr.bf16.mxu0 %v9908_v1  ;;  %8454 = vmatprep.subr.bf16.mxu1 %v9908_v1 }
 0x616   :  { %v1446_v14 = vpop.f32.mrb[48].mxu0  ;;  %v1496_v15 = vpop.f32.mrb[48].mxu1 }
 0x617   :  { %v1453_v18 = vrot.slane %v1446_v14, 3  ;;  %v1503_v19 = vrot.slane %v1496_v15, 3  ;;  %v8404_v27 = vpop.f32.mrb[49].mxu0  ;;  %v8412_v28 = vpop.f32.mrb[49].mxu1 }
 0x618   :  { %v1449_v33 = vpop.f32.mrb[50].mxu0  ;;  %v1499_v38 = vpop.f32.mrb[50].mxu1 }
 0x619   :  { %v1455_v39 = vadd.f32 %v1453_v18, %v10106_v47  ;;  %v1505_v40 = vadd.f32 %v1503_v19, %v10108_v48  ;;  %v8405_v41 = vpop.f32.mrb[51].mxu0  ;;  %v8413_v16 = vpop.f32.mrb[51].mxu1 }
 0x61b   :  { %v7547_v42 = vmul.f32 -1.442695, %v1455_v39  ;;  %v7549_v17 = vmul.f32 -1.442695, %v1505_v40 }
 0x61d   :  { %9420 = vpow2.f32 %v7547_v42 }
 0x61e   :  { %9422 = vpow2.f32 %v7549_v17  ;;  %v1546_v45 = vpop.f32.mrb[52].mxu0  ;;  %v1591_v46 = vpop.f32.mrb[52].mxu1 }
 0x61f   :  { %v1598_v49 = vrot.slane %v1591_v46, 3  ;;  %v8420_v50 = vpop.f32.mrb[53].mxu0  ;;  %v8428_v51 = vpop.f32.mrb[53].mxu1  ;;  %v1553_v54 = vrot.slane %v1546_v45, 3 }
 0x620   :  { %v1549_v52 = vpop.f32.mrb[54].mxu0  ;;  %v1594_v53 = vpop.f32.mrb[54].mxu1 }
 0x621   :  { %v1600_v55 = vadd.f32 %v1598_v49, %v10112_v61  ;;  %v8421_v56 = vpop.f32.mrb[55].mxu0  ;;  %v8429_v57 = vpop.f32.mrb[55].mxu1  ;;  %v1555_v59 = vadd.f32 %v1553_v54, %v10115_v6 }
 0x623   :  { %v7552_v58 = vmul.f32 -1.442695, %v1600_v55 }
 0x625   :  { %9424 = vpow2.f32 %v7552_v58 }
 0x626   :  { %9426 = vtanh.f32 %v1555_v59 }
 0x627   :  { %v9421_v60 = vpop.eup %9420 }
 0x628   :  { %v9423_v62 = vpop.eup %9422  ;;  %v1459_v63 = vadd.f32 1.0, %v9421_v60 }
 0x629   :  { %v1509_v0 = vadd.f32 1.0, %v9423_v62 }
 0x62a   :  { %9428 = vrcp.f32 %v1459_v63 }
 0x62b   :  { %9430 = vrcp.f32 %v1509_v0 }
 0x62f   :  { %v9425_v2 = vpop.eup %9424 }
 0x630   :  { %v9427_v3 = vpop.eup %9426  ;;  %v1604_v9 = vadd.f32 1.0, %v9425_v2 }
 0x632   :  { %9432 = vrcp.f32 %v1604_v9 }
 0x634   :  { %v9429_v4 = vpop.eup %9428 }
 0x635   :  { %v9431_v7 = vpop.eup %9430  ;;  %v1611_v8 = vmul.f32 %v9429_v4, %v9427_v3 }
 0x636   :  { %v1610_v10 = vmul.f32 %v9431_v7, %v1608_v5 }
 0x638   :  { %v10303_v11 = vadd.f32 %v1611_v8, %v1610_v10 }
 0x63a   :  { %9434 = vtanh.f32 %v10303_v11  ;;  %v1821_v3 = vrot.slane %v10303_v11, 7  ;;  %v10387_v11 = vld [vmem:[%s11540_s2 + $0x28] sm:$0xff]  }
 0x63c   :  { %v9433_v12 = vpop.eup %9432 }
 0x644   :  { %v9435_v13 = vpop.eup %9434 }
 0x645   :  { %v1614_v23 = vmul.f32 %v9435_v13, %v9433_v12 }
 0x647   :  { %1616 = vst.msk [vmem:[#allocation2] sm:$0x20] %vm1615_vm7, %v1614_v23  ;;  %v1617_v24 = vpack.c.bf16 %v1614_v23, %v1614_v23 }
 0x649   :  { %v1619_v25 = vshrl.u32 %v1617_v24, 16 }
 0x64b   :  { %v1621_v26 = vrot.slane %v1619_v25, 2  ;;  %v10393_v25 = vld [vmem:[%s11540_s2 + $0x38] sm:$0xff]  }
 0x64d   :  { %8435 = vmatmul.mubr.msk.bf16.vlgmr.msra.gmra.mrb[56].mxu0 %vm30_vm1, %v1621_v26  ;;  %8443 = vmatmul.mubr.msk.bf16.vlgmr.msra.gmra.mrb[56].mxu1 %vm30_vm1, %v1621_v26 }
 0x64e   :  { %8447 = vmatpush3.bf16.msra.mxu0 %v10312_v30  ;;  %8455 = vmatpush3.bf16.msra.mxu1 %v10318_v34 }
 0x64f   :  { %8448 = vmatprep.subr.bf16.mxu0 %v9908_v1  ;;  %8456 = vmatprep.subr.bf16.mxu1 %v9908_v1 }
 0x650   :  { %8450 = vmatprep.mubr.msk.bf16.mxu0 %vm9909_vm0, %v9908_v1  ;;  %8458 = vmatprep.mubr.msk.bf16.mxu1 %vm9909_vm0, %v9908_v1 }
 0x652   :  { %8449 = vmatpush3.bf16.msra.mxu0 %v10055_v21  ;;  %8457 = vmatpush3.bf16.msra.mxu1 %v10060_v22  ;;  %v10342_v21 = vld [vmem:[%s11540_s2 + $0x10] sm:$0xff]   ;;  %v10354_v22 = vld [vmem:[%s11540_s2 + $0x8] sm:$0xff]  }
 0x653   :  { %8462 = vmatprep.subr.bf16.mxu0 %v9908_v1  ;;  %8470 = vmatprep.subr.bf16.mxu1 %v9908_v1 }
 0x655   :  { %8451 = vmatmul.mubr.msk.bf16.vlgmr.msra.gmra.mrb[60].mxu0 %vm30_vm1, %v1621_v26  ;;  %8459 = vmatmul.mubr.msk.bf16.vlgmr.msra.gmra.mrb[60].mxu1 %vm30_vm1, %v1621_v26 }
 0x656   :  { %8463 = vmatpush3.bf16.msra.mxu0 %v10336_v35  ;;  %8471 = vmatpush3.bf16.msra.mxu1 %v10342_v21 }
 0x657   :  { %8464 = vmatprep.subr.bf16.mxu0 %v9908_v1  ;;  %8472 = vmatprep.subr.bf16.mxu1 %v9908_v1 }
 0x658   :  { %8466 = vmatprep.mubr.msk.bf16.mxu0 %vm9909_vm0, %v9908_v1  ;;  %8474 = vmatprep.mubr.msk.bf16.mxu1 %vm9909_vm0, %v9908_v1 }
 0x65a   :  { %8465 = vmatpush3.bf16.msra.mxu0 %v10354_v22  ;;  %8473 = vmatpush3.bf16.msra.mxu1 %v10360_v36 }
 0x65b   :  { %8478 = vmatprep.subr.bf16.mxu0 %v9908_v1  ;;  %8486 = vmatprep.subr.bf16.mxu1 %v9908_v1 }
 0x720   :  { %v1659_v37 = vpop.f32.mrb[56].mxu0  ;;  %v1709_v29 = vpop.f32.mrb[56].mxu1 }
 0x721   :  { %v1666_v14 = vrot.slane %v1659_v37, 2  ;;  %v1716_v15 = vrot.slane %v1709_v29, 2  ;;  %v8436_v18 = vpop.f32.mrb[57].mxu0  ;;  %v8444_v19 = vpop.f32.mrb[57].mxu1 }
 0x722   :  { %v1662_v27 = vpop.f32.mrb[58].mxu0  ;;  %v1712_v28 = vpop.f32.mrb[58].mxu1 }
 0x723   :  { %v1668_v33 = vadd.f32 %v1666_v14, %v10106_v47  ;;  %v1718_v38 = vadd.f32 %v1716_v15, %v10108_v48  ;;  %v8437_v39 = vpop.f32.mrb[59].mxu0  ;;  %v8445_v40 = vpop.f32.mrb[59].mxu1 }
 0x725   :  { %v7554_v41 = vmul.f32 -1.442695, %v1668_v33  ;;  %v7556_v16 = vmul.f32 -1.442695, %v1718_v38 }
 0x727   :  { %9436 = vpow2.f32 %v7554_v41 }
 0x728   :  { %9438 = vpow2.f32 %v7556_v16  ;;  %v1759_v42 = vpop.f32.mrb[60].mxu0  ;;  %v1804_v17 = vpop.f32.mrb[60].mxu1 }
 0x729   :  { %v1811_v45 = vrot.slane %v1804_v17, 2  ;;  %v8452_v46 = vpop.f32.mrb[61].mxu0  ;;  %v8460_v49 = vpop.f32.mrb[61].mxu1  ;;  %v1766_v52 = vrot.slane %v1759_v42, 2 }
 0x72a   :  { %v1762_v50 = vpop.f32.mrb[62].mxu0  ;;  %v1807_v51 = vpop.f32.mrb[62].mxu1 }
 0x72b   :  { %v1813_v53 = vadd.f32 %v1811_v45, %v10112_v61  ;;  %v8453_v54 = vpop.f32.mrb[63].mxu0  ;;  %v8461_v55 = vpop.f32.mrb[63].mxu1  ;;  %v1768_v57 = vadd.f32 %v1766_v52, %v10115_v6 }
 0x72d   :  { %v7559_v56 = vmul.f32 -1.442695, %v1813_v53 }
 0x72f   :  { %9440 = vpow2.f32 %v7559_v56 }
 0x730   :  { %9442 = vtanh.f32 %v1768_v57 }
 0x731   :  { %v9437_v58 = vpop.eup %9436 }
 0x732   :  { %v9439_v59 = vpop.eup %9438  ;;  %v1672_v60 = vadd.f32 1.0, %v9437_v58 }
 0x733   :  { %v1722_v62 = vadd.f32 1.0, %v9439_v59 }
 0x734   :  { %9444 = vrcp.f32 %v1672_v60 }
 0x735   :  { %9446 = vrcp.f32 %v1722_v62 }
 0x739   :  { %v9441_v63 = vpop.eup %9440 }
 0x73a   :  { %v9443_v0 = vpop.eup %9442  ;;  %v1817_v7 = vadd.f32 1.0, %v9441_v63 }
 0x73c   :  { %9448 = vrcp.f32 %v1817_v7 }
 0x73e   :  { %v9445_v2 = vpop.eup %9444 }
 0x73f   :  { %v9447_v4 = vpop.eup %9446  ;;  %v1824_v5 = vmul.f32 %v9445_v2, %v9443_v0 }
 0x740   :  { %v1823_v8 = vmul.f32 %v9447_v4, %v1821_v3 }
 0x742   :  { %v10370_v9 = vadd.f32 %v1824_v5, %v1823_v8 }
 0x744   :  { %9450 = vtanh.f32 %v10370_v9  ;;  %v2032_v63 = vrot.slane %v10370_v9, 7 }
 0x746   :  { %v9449_v10 = vpop.eup %9448 }
 0x74e   :  { %v9451_v12 = vpop.eup %9450 }
 0x74f   :  { %v1827_v13 = vmul.f32 %v9451_v12, %v9449_v10 }
 0x751   :  { %1829 = vst.msk [vmem:[#allocation2] sm:$0x40] %vm1828_vm8, %v1827_v13  ;;  %v1830_v23 = vpack.c.bf16 %v1827_v13, %v1827_v13 }
 0x753   :  { %v1832_v24 = vrot.slane %v1830_v23, 3 }
 0x755   :  { %8467 = vmatmul.mubr.msk.bf16.vlgmr.msra.gmra.mrb[64].mxu0 %vm30_vm1, %v1832_v24  ;;  %8475 = vmatmul.mubr.msk.bf16.vlgmr.msra.gmra.mrb[64].mxu1 %vm30_vm1, %v1832_v24 }
 0x756   :  { %8479 = vmatpush3.bf16.msra.mxu0 %v10312_v30  ;;  %8487 = vmatpush3.bf16.msra.mxu1 %v10318_v34 }
 0x757   :  { %8480 = vmatprep.subr.bf16.mxu0 %v9908_v1  ;;  %8488 = vmatprep.subr.bf16.mxu1 %v9908_v1 }
 0x758   :  { %8482 = vmatprep.mubr.msk.bf16.mxu0 %vm9909_vm0, %v9908_v1  ;;  %8490 = vmatprep.mubr.msk.bf16.mxu1 %vm9909_vm0, %v9908_v1 }
 0x75a   :  { %8481 = vmatpush3.bf16.msra.mxu0 %v10387_v11  ;;  %8489 = vmatpush3.bf16.msra.mxu1 %v10393_v25 }
 0x75b   :  { %8494 = vmatprep.subr.bf16.mxu0 %v9908_v1  ;;  %8502 = vmatprep.subr.bf16.mxu1 %v9908_v1 }
 0x75d   :  { %8483 = vmatmul.mubr.msk.bf16.vlgmr.msra.gmra.mrb[68].mxu0 %vm30_vm1, %v1832_v24  ;;  %8491 = vmatmul.mubr.msk.bf16.vlgmr.msra.gmra.mrb[68].mxu1 %vm30_vm1, %v1832_v24 }
 0x75e   :  { %8495 = vmatpush3.bf16.msra.mxu0 %v10336_v35  ;;  %8503 = vmatpush3.bf16.msra.mxu1 %v10342_v21 }
 0x75f   :  { %8496 = vmatprep.subr.bf16.mxu0 %v9908_v1  ;;  %8504 = vmatprep.subr.bf16.mxu1 %v9908_v1 }
 0x760   :  { %8498 = vmatprep.mubr.msk.bf16.mxu0 %vm9909_vm0, %v9908_v1  ;;  %8506 = vmatprep.mubr.msk.bf16.mxu1 %vm9909_vm0, %v9908_v1 }
 0x762   :  { %8497 = vmatpush3.bf16.msra.mxu0 %v10354_v22  ;;  %8505 = vmatpush3.bf16.msra.mxu1 %v10360_v36 }
 0x763   :  { %8510 = vmatprep.subr.bf16.mxu0 %v9908_v1  ;;  %8518 = vmatprep.subr.bf16.mxu1 %v9908_v1 }
 0x828   :  { %v1870_v26 = vpop.f32.mrb[64].mxu0  ;;  %v1920_v37 = vpop.f32.mrb[64].mxu1 }
 0x829   :  { %v1877_v29 = vrot.slane %v1870_v26, 1  ;;  %v1927_v14 = vrot.slane %v1920_v37, 1  ;;  %v8468_v15 = vpop.f32.mrb[65].mxu0  ;;  %v8476_v18 = vpop.f32.mrb[65].mxu1 }
 0x82a   :  { %v1873_v19 = vpop.f32.mrb[66].mxu0  ;;  %v1923_v27 = vpop.f32.mrb[66].mxu1 }
 0x82b   :  { %v1879_v28 = vadd.f32 %v1877_v29, %v10106_v47  ;;  %v1929_v33 = vadd.f32 %v1927_v14, %v10108_v48  ;;  %v8469_v38 = vpop.f32.mrb[67].mxu0  ;;  %v8477_v39 = vpop.f32.mrb[67].mxu1 }
 0x82d   :  { %v7561_v40 = vmul.f32 -1.442695, %v1879_v28  ;;  %v7563_v41 = vmul.f32 -1.442695, %v1929_v33 }
 0x82f   :  { %9452 = vpow2.f32 %v7561_v40 }
 0x830   :  { %9454 = vpow2.f32 %v7563_v41  ;;  %v1970_v16 = vpop.f32.mrb[68].mxu0  ;;  %v2015_v42 = vpop.f32.mrb[68].mxu1 }
 0x831   :  { %v2022_v17 = vrot.slane %v2015_v42, 1  ;;  %v8484_v45 = vpop.f32.mrb[69].mxu0  ;;  %v8492_v46 = vpop.f32.mrb[69].mxu1  ;;  %v1977_v51 = vrot.slane %v1970_v16, 1 }
 0x832   :  { %v1973_v49 = vpop.f32.mrb[70].mxu0  ;;  %v2018_v50 = vpop.f32.mrb[70].mxu1 }
 0x833   :  { %v2024_v52 = vadd.f32 %v2022_v17, %v10112_v61  ;;  %v8485_v53 = vpop.f32.mrb[71].mxu0  ;;  %v8493_v47 = vpop.f32.mrb[71].mxu1  ;;  %v1979_v48 = vadd.f32 %v1977_v51, %v10115_v6 }
 0x835   :  { %v7566_v54 = vmul.f32 -1.442695, %v2024_v52 }
 0x837   :  { %9456 = vpow2.f32 %v7566_v54 }
 0x838   :  { %9458 = vtanh.f32 %v1979_v48 }
 0x839   :  { %v9453_v55 = vpop.eup %9452 }
 0x83a   :  { %v9455_v56 = vpop.eup %9454  ;;  %v1883_v57 = vadd.f32 1.0, %v9453_v55 }
 0x83b   :  { %v1933_v58 = vadd.f32 1.0, %v9455_v56 }
 0x83c   :  { %9460 = vrcp.f32 %v1883_v57 }
 0x83d   :  { %9462 = vrcp.f32 %v1933_v58 }
 0x841   :  { %v9457_v59 = vpop.eup %9456 }
 0x842   :  { %v9459_v60 = vpop.eup %9458  ;;  %v2028_v2 = vadd.f32 1.0, %v9457_v59 }
 0x844   :  { %9464 = vrcp.f32 %v2028_v2 }
 0x846   :  { %v9461_v62 = vpop.eup %9460 }
 0x847   :  { %v9463_v0 = vpop.eup %9462  ;;  %v2035_v61 = vmul.f32 %v9461_v62, %v9459_v60 }
 0x848   :  { %v2034_v3 = vmul.f32 %v9463_v0, %v2032_v63 }
 0x84a   :  { %v10417_v4 = vadd.f32 %v2035_v61, %v2034_v3 }
 0x84c   :  { %9466 = vtanh.f32 %v10417_v4  ;;  %v2233_v48 = vrot.slane %v10417_v4, 7 }
 0x84e   :  { %v9465_v6 = vpop.eup %9464 }
 0x856   :  { %v9467_v5 = vpop.eup %9466 }
 0x857   :  { %v2038_v7 = vmul.f32 %v9467_v5, %v9465_v6 }
 0x859   :  { %2040 = vst.msk [vmem:[#allocation2] sm:$0x80] %vm2039_vm9, %v2038_v7  ;;  %v2041_v8 = vpack.c.bf16 %v2038_v7, %v2038_v7 }
 0x85b   :  { %v2043_v10 = vshrl.u32 %v2041_v8, 16 }
 0x85d   :  { %v2045_v12 = vrot.slane %v2043_v10, 3 }
 0x85f   :  { %8499 = vmatmul.mubr.msk.bf16.vlgmr.msra.gmra.mrb[72].mxu0 %vm30_vm1, %v2045_v12  ;;  %8507 = vmatmul.mubr.msk.bf16.vlgmr.msra.gmra.mrb[72].mxu1 %vm30_vm1, %v2045_v12 }
 0x860   :  { %8511 = vmatpush3.bf16.msra.mxu0 %v10312_v30  ;;  %8519 = vmatpush3.bf16.msra.mxu1 %v10318_v34 }
 0x861   :  { %8512 = vmatprep.subr.bf16.mxu0 %v9908_v1  ;;  %8520 = vmatprep.subr.bf16.mxu1 %v9908_v1 }
 0x862   :  { %8514 = vmatprep.mubr.msk.bf16.mxu0 %vm9909_vm0, %v9908_v1  ;;  %8522 = vmatprep.mubr.msk.bf16.mxu1 %vm9909_vm0, %v9908_v1 }
 0x864   :  { %8513 = vmatpush3.bf16.msra.mxu0 %v10387_v11  ;;  %8521 = vmatpush3.bf16.msra.mxu1 %v10393_v25 }
 0x865   :  { %8526 = vmatprep.subr.bf16.mxu0 %v9908_v1  ;;  %8534 = vmatprep.subr.bf16.mxu1 %v9908_v1 }
 0x867   :  { %8515 = vmatmul.mubr.msk.bf16.vlgmr.msra.gmra.mrb[76].mxu0 %vm30_vm1, %v2045_v12  ;;  %8523 = vmatmul.mubr.msk.bf16.vlgmr.msra.gmra.mrb[76].mxu1 %vm30_vm1, %v2045_v12 }
 0x868   :  { %8527 = vmatpush3.bf16.msra.mxu0 %v10336_v35  ;;  %8535 = vmatpush3.bf16.msra.mxu1 %v10342_v21 }
 0x869   :  { %8528 = vmatprep.subr.bf16.mxu0 %v9908_v1  ;;  %8536 = vmatprep.subr.bf16.mxu1 %v9908_v1 }
 0x86a   :  { %8530 = vmatprep.mubr.msk.bf16.mxu0 %vm9909_vm0, %v9908_v1  ;;  %8538 = vmatprep.mubr.msk.bf16.mxu1 %vm9909_vm0, %v9908_v1 }
 0x86c   :  { %8529 = vmatpush3.bf16.msra.mxu0 %v10354_v22  ;;  %8537 = vmatpush3.bf16.msra.mxu1 %v10360_v36 }
 0x86d   :  { %8542 = vmatprep.subr.bf16.mxu0 %v9908_v1  ;;  %8550 = vmatprep.subr.bf16.mxu1 %v9908_v1 }
 0x932   :  { %v2083_v9 = vpop.f32.mrb[72].mxu0  ;;  %v2130_v13 = vpop.f32.mrb[72].mxu1 }
 0x933   :  { %v2089_v23 = vadd.f32 %v2083_v9, %v10092_v31  ;;  %v2136_v24 = vadd.f32 %v2130_v13, %v10094_v32  ;;  %v8500_v26 = vpop.f32.mrb[73].mxu0  ;;  %v8508_v37 = vpop.f32.mrb[73].mxu1 }
 0x934   :  { %v2086_v29 = vpop.f32.mrb[74].mxu0  ;;  %v2133_v14 = vpop.f32.mrb[74].mxu1 }
 0x935   :  { %v7568_v15 = vmul.f32 -1.442695, %v2089_v23  ;;  %v7570_v18 = vmul.f32 -1.442695, %v2136_v24  ;;  %v8501_v19 = vpop.f32.mrb[75].mxu0  ;;  %v8509_v27 = vpop.f32.mrb[75].mxu1 }
 0x937   :  { %9468 = vpow2.f32 %v7568_v15 }
 0x938   :  { %9470 = vpow2.f32 %v7570_v18 }
 0x93a   :  { %v2177_v28 = vpop.f32.mrb[76].mxu0  ;;  %v2219_v33 = vpop.f32.mrb[76].mxu1 }
 0x93b   :  { %v2225_v38 = vadd.f32 %v2219_v33, %v10104_v44  ;;  %v8516_v39 = vpop.f32.mrb[77].mxu0  ;;  %v8524_v40 = vpop.f32.mrb[77].mxu1  ;;  %v2183_v46 = vadd.f32 %v2177_v28, %v10102_v43 }
 0x93c   :  { %v2180_v41 = vpop.f32.mrb[78].mxu0  ;;  %v2222_v16 = vpop.f32.mrb[78].mxu1 }
 0x93d   :  { %v8517_v42 = vpop.f32.mrb[79].mxu0  ;;  %v8525_v17 = vpop.f32.mrb[79].mxu1  ;;  %v7573_v45 = vmul.f32 -1.442695, %v2225_v38 }
 0x93f   :  { %9472 = vpow2.f32 %v7573_v45 }
 0x940   :  { %9474 = vtanh.f32 %v2183_v46 }
 0x941   :  { %v9469_v49 = vpop.eup %9468 }
 0x942   :  { %v9471_v50 = vpop.eup %9470  ;;  %v2093_v51 = vadd.f32 1.0, %v9469_v49 }
 0x943   :  { %v2140_v52 = vadd.f32 1.0, %v9471_v50 }
 0x944   :  { %9476 = vrcp.f32 %v2093_v51 }
 0x945   :  { %9478 = vrcp.f32 %v2140_v52 }
 0x949   :  { %v9473_v53 = vpop.eup %9472 }
 0x94a   :  { %v9475_v47 = vpop.eup %9474  ;;  %v2229_v57 = vadd.f32 1.0, %v9473_v53 }
 0x94c   :  { %9480 = vrcp.f32 %v2229_v57 }
 0x94e   :  { %v9477_v54 = vpop.eup %9476 }
 0x94f   :  { %v9479_v55 = vpop.eup %9478  ;;  %v2236_v56 = vmul.f32 %v9477_v54, %v9475_v47 }
 0x950   :  { %v2235_v58 = vmul.f32 %v9479_v55, %v2233_v48 }
 0x952   :  { %v10454_v59 = vadd.f32 %v2236_v56, %v2235_v58 }
 0x954   :  { %9482 = vtanh.f32 %v10454_v59  ;;  %v2441_v50 = vrot.slane %v10454_v59, 7 }
 0x956   :  { %v9481_v60 = vpop.eup %9480 }
 0x95e   :  { %v9483_v62 = vpop.eup %9482 }
 0x95f   :  { %v2239_v63 = vmul.f32 %v9483_v62, %v9481_v60 }
 0x961   :  { %2240 = vst.msk [vmem:[#allocation2 + $0x8] sm:$0x1] %vm559_vm2, %v2239_v63  ;;  %v2241_v0 = vpack.c.bf16 %v2239_v63, %v2239_v63 }
 0x963   :  { %8531 = vmatmul.mubr.msk.bf16.vlgmr.msra.gmra.mrb[80].mxu0 %vm30_vm1, %v2241_v0  ;;  %8539 = vmatmul.mubr.msk.bf16.vlgmr.msra.gmra.mrb[80].mxu1 %vm30_vm1, %v2241_v0 }
 0x964   :  { %8543 = vmatpush3.bf16.msra.mxu0 %v10312_v30  ;;  %8551 = vmatpush3.bf16.msra.mxu1 %v10318_v34 }
 0x965   :  { %8544 = vmatprep.subr.bf16.mxu0 %v9908_v1  ;;  %8552 = vmatprep.subr.bf16.mxu1 %v9908_v1 }
 0x966   :  { %8546 = vmatprep.mubr.msk.bf16.mxu0 %vm9909_vm0, %v9908_v1  ;;  %8554 = vmatprep.mubr.msk.bf16.mxu1 %vm9909_vm0, %v9908_v1 }
 0x968   :  { %8545 = vmatpush3.bf16.msra.mxu0 %v10387_v11  ;;  %8553 = vmatpush3.bf16.msra.mxu1 %v10393_v25 }
 0x969   :  { %8558 = vmatprep.subr.bf16.mxu0 %v9908_v1  ;;  %8566 = vmatprep.subr.bf16.mxu1 %v9908_v1 }
 0x96b   :  { %8547 = vmatmul.mubr.msk.bf16.vlgmr.msra.gmra.mrb[84].mxu0 %vm30_vm1, %v2241_v0  ;;  %8555 = vmatmul.mubr.msk.bf16.vlgmr.msra.gmra.mrb[84].mxu1 %vm30_vm1, %v2241_v0 }
 0x96c   :  { %8559 = vmatpush3.bf16.msra.mxu0 %v10336_v35  ;;  %8567 = vmatpush3.bf16.msra.mxu1 %v10342_v21 }
 0x96d   :  { %8560 = vmatprep.subr.bf16.mxu0 %v9908_v1  ;;  %8568 = vmatprep.subr.bf16.mxu1 %v9908_v1 }
 0x96e   :  { %8562 = vmatprep.mubr.msk.bf16.mxu0 %vm9909_vm0, %v9908_v1  ;;  %8570 = vmatprep.mubr.msk.bf16.mxu1 %vm9909_vm0, %v9908_v1 }
 0x970   :  { %8561 = vmatpush3.bf16.msra.mxu0 %v10354_v22  ;;  %8569 = vmatpush3.bf16.msra.mxu1 %v10360_v36 }
 0x971   :  { %8574 = vmatprep.subr.bf16.mxu0 %v9908_v1  ;;  %8582 = vmatprep.subr.bf16.mxu1 %v9908_v1 }
 0xa36   :  { %v2279_v61 = vpop.f32.mrb[80].mxu0  ;;  %v2329_v2 = vpop.f32.mrb[80].mxu1 }
 0xa37   :  { %v2286_v3 = vrot.slane %v2279_v61, 7  ;;  %v2336_v4 = vrot.slane %v2329_v2, 7  ;;  %v8532_v6 = vpop.f32.mrb[81].mxu0  ;;  %v8540_v5 = vpop.f32.mrb[81].mxu1 }
 0xa38   :  { %v2282_v7 = vpop.f32.mrb[82].mxu0  ;;  %v2332_v8 = vpop.f32.mrb[82].mxu1 }
 0xa39   :  { %v2288_v10 = vadd.f32 %v2286_v3, %v10092_v31  ;;  %v2338_v12 = vadd.f32 %v2336_v4, %v10094_v32  ;;  %v8533_v9 = vpop.f32.mrb[83].mxu0  ;;  %v8541_v13 = vpop.f32.mrb[83].mxu1 }
 0xa3b   :  { %v7575_v23 = vmul.f32 -1.442695, %v2288_v10  ;;  %v7577_v24 = vmul.f32 -1.442695, %v2338_v12 }
 0xa3d   :  { %9484 = vpow2.f32 %v7575_v23 }
 0xa3e   :  { %9486 = vpow2.f32 %v7577_v24  ;;  %v2379_v26 = vpop.f32.mrb[84].mxu0  ;;  %v2424_v37 = vpop.f32.mrb[84].mxu1 }
 0xa3f   :  { %v2431_v29 = vrot.slane %v2424_v37, 7  ;;  %v8548_v14 = vpop.f32.mrb[85].mxu0  ;;  %v8556_v15 = vpop.f32.mrb[85].mxu1  ;;  %v2386_v27 = vrot.slane %v2379_v26, 7 }
 0xa40   :  { %v2382_v18 = vpop.f32.mrb[86].mxu0  ;;  %v2427_v19 = vpop.f32.mrb[86].mxu1 }
 0xa41   :  { %v2433_v28 = vadd.f32 %v2431_v29, %v10104_v44  ;;  %v8549_v33 = vpop.f32.mrb[87].mxu0  ;;  %v8557_v38 = vpop.f32.mrb[87].mxu1  ;;  %v2388_v40 = vadd.f32 %v2386_v27, %v10102_v43 }
 0xa43   :  { %v7580_v39 = vmul.f32 -1.442695, %v2433_v28 }
 0xa45   :  { %9488 = vpow2.f32 %v7580_v39 }
 0xa46   :  { %9490 = vtanh.f32 %v2388_v40 }
 0xa47   :  { %v9485_v41 = vpop.eup %9484 }
 0xa48   :  { %v9487_v16 = vpop.eup %9486  ;;  %v2292_v42 = vadd.f32 1.0, %v9485_v41 }
 0xa49   :  { %v2342_v17 = vadd.f32 1.0, %v9487_v16 }
 0xa4a   :  { %9492 = vrcp.f32 %v2292_v42 }
 0xa4b   :  { %9494 = vrcp.f32 %v2342_v17 }
 0xa4f   :  { %v9489_v45 = vpop.eup %9488 }
 0xa50   :  { %v9491_v46 = vpop.eup %9490  ;;  %v2437_v53 = vadd.f32 1.0, %v9489_v45 }
 0xa52   :  { %9496 = vrcp.f32 %v2437_v53 }
 0xa54   :  { %v9493_v49 = vpop.eup %9492 }
 0xa55   :  { %v9495_v51 = vpop.eup %9494  ;;  %v2444_v52 = vmul.f32 %v9493_v49, %v9491_v46 }
 0xa56   :  { %v2443_v47 = vmul.f32 %v9495_v51, %v2441_v50 }
 0xa58   :  { %v10491_v54 = vadd.f32 %v2444_v52, %v2443_v47 }
 0xa5a   :  { %9498 = vtanh.f32 %v10491_v54  ;;  %v2652_v42 = vrot.slane %v10491_v54, 7 }
 0xa5c   :  { %v9497_v48 = vpop.eup %9496 }
 0xa64   :  { %v9499_v55 = vpop.eup %9498 }
 0xa65   :  { %v2447_v56 = vmul.f32 %v9499_v55, %v9497_v48 }
 0xa67   :  { %2448 = vst.msk [vmem:[#allocation2 + $0x8] sm:$0x2] %vm768_vm3, %v2447_v56  ;;  %v2449_v57 = vpack.c.bf16 %v2447_v56, %v2447_v56 }
 0xa69   :  { %v2451_v58 = vshrl.u32 %v2449_v57, 16 }
 0xa6b   :  { %8563 = vmatmul.mubr.msk.bf16.vlgmr.msra.gmra.mrb[88].mxu0 %vm30_vm1, %v2451_v58  ;;  %8571 = vmatmul.mubr.msk.bf16.vlgmr.msra.gmra.mrb[88].mxu1 %vm30_vm1, %v2451_v58 }
 0xa6c   :  { %8575 = vmatpush3.bf16.msra.mxu0 %v10312_v30  ;;  %8583 = vmatpush3.bf16.msra.mxu1 %v10318_v34 }
 0xa6d   :  { %8576 = vmatprep.subr.bf16.mxu0 %v9908_v1  ;;  %8584 = vmatprep.subr.bf16.mxu1 %v9908_v1 }
 0xa6e   :  { %8578 = vmatprep.mubr.msk.bf16.mxu0 %vm9909_vm0, %v9908_v1  ;;  %8586 = vmatprep.mubr.msk.bf16.mxu1 %vm9909_vm0, %v9908_v1 }
 0xa70   :  { %8577 = vmatpush3.bf16.msra.mxu0 %v10387_v11  ;;  %8585 = vmatpush3.bf16.msra.mxu1 %v10393_v25 }
 0xa71   :  { %8590 = vmatprep.subr.bf16.mxu0 %v9908_v1  ;;  %8598 = vmatprep.subr.bf16.mxu1 %v9908_v1 }
 0xa73   :  { %8579 = vmatmul.mubr.msk.bf16.vlgmr.msra.gmra.mrb[92].mxu0 %vm30_vm1, %v2451_v58  ;;  %8587 = vmatmul.mubr.msk.bf16.vlgmr.msra.gmra.mrb[92].mxu1 %vm30_vm1, %v2451_v58 }
 0xa74   :  { %8591 = vmatpush3.bf16.msra.mxu0 %v10336_v35  ;;  %8599 = vmatpush3.bf16.msra.mxu1 %v10342_v21 }
 0xa75   :  { %8592 = vmatprep.subr.bf16.mxu0 %v9908_v1  ;;  %8600 = vmatprep.subr.bf16.mxu1 %v9908_v1 }
 0xa76   :  { %8594 = vmatprep.mubr.msk.bf16.mxu0 %vm9909_vm0, %v9908_v1  ;;  %8602 = vmatprep.mubr.msk.bf16.mxu1 %vm9909_vm0, %v9908_v1 }
 0xa78   :  { %8593 = vmatpush3.bf16.msra.mxu0 %v10354_v22  ;;  %8601 = vmatpush3.bf16.msra.mxu1 %v10360_v36 }
 0xa79   :  { %8606 = vmatprep.subr.bf16.mxu0 %v9908_v1  ;;  %8614 = vmatprep.subr.bf16.mxu1 %v9908_v1 }
 0xb3e   :  { %v2490_v59 = vpop.f32.mrb[88].mxu0  ;;  %v2540_v60 = vpop.f32.mrb[88].mxu1 }
 0xb3f   :  { %v2497_v62 = vrot.slane %v2490_v59, 6  ;;  %v2547_v63 = vrot.slane %v2540_v60, 6  ;;  %v8564_v0 = vpop.f32.mrb[89].mxu0  ;;  %v8572_v61 = vpop.f32.mrb[89].mxu1 }
 0xb40   :  { %v2493_v2 = vpop.f32.mrb[90].mxu0  ;;  %v2543_v3 = vpop.f32.mrb[90].mxu1 }
 0xb41   :  { %v2499_v4 = vadd.f32 %v2497_v62, %v10092_v31  ;;  %v2549_v6 = vadd.f32 %v2547_v63, %v10094_v32  ;;  %v8565_v5 = vpop.f32.mrb[91].mxu0  ;;  %v8573_v7 = vpop.f32.mrb[91].mxu1 }
 0xb43   :  { %v7582_v8 = vmul.f32 -1.442695, %v2499_v4  ;;  %v7584_v10 = vmul.f32 -1.442695, %v2549_v6 }
 0xb45   :  { %9500 = vpow2.f32 %v7582_v8 }
 0xb46   :  { %9502 = vpow2.f32 %v7584_v10  ;;  %v2590_v12 = vpop.f32.mrb[92].mxu0  ;;  %v2635_v9 = vpop.f32.mrb[92].mxu1 }
 0xb47   :  { %v2642_v13 = vrot.slane %v2635_v9, 6  ;;  %v8580_v23 = vpop.f32.mrb[93].mxu0  ;;  %v8588_v24 = vpop.f32.mrb[93].mxu1  ;;  %v2597_v29 = vrot.slane %v2590_v12, 6 }
 0xb48   :  { %v2593_v26 = vpop.f32.mrb[94].mxu0  ;;  %v2638_v37 = vpop.f32.mrb[94].mxu1 }
 0xb49   :  { %v2644_v14 = vadd.f32 %v2642_v13, %v10104_v44  ;;  %v8581_v15 = vpop.f32.mrb[95].mxu0  ;;  %v8589_v18 = vpop.f32.mrb[95].mxu1  ;;  %v2599_v27 = vadd.f32 %v2597_v29, %v10102_v43 }
 0xb4b   :  { %v7587_v19 = vmul.f32 -1.442695, %v2644_v14 }
 0xb4d   :  { %9504 = vpow2.f32 %v7587_v19 }
 0xb4e   :  { %9506 = vtanh.f32 %v2599_v27 }
 0xb4f   :  { %v9501_v28 = vpop.eup %9500 }
 0xb50   :  { %v9503_v33 = vpop.eup %9502  ;;  %v2503_v38 = vadd.f32 1.0, %v9501_v28 }
 0xb51   :  { %v2553_v39 = vadd.f32 1.0, %v9503_v33 }
 0xb52   :  { %9508 = vrcp.f32 %v2503_v38 }
 0xb53   :  { %9510 = vrcp.f32 %v2553_v39 }
 0xb57   :  { %v9505_v40 = vpop.eup %9504 }
 0xb58   :  { %v9507_v41 = vpop.eup %9506  ;;  %v2648_v46 = vadd.f32 1.0, %v9505_v40 }
 0xb5a   :  { %9512 = vrcp.f32 %v2648_v46 }
 0xb5c   :  { %v9509_v16 = vpop.eup %9508 }
 0xb5d   :  { %v9511_v17 = vpop.eup %9510  ;;  %v2655_v45 = vmul.f32 %v9509_v16, %v9507_v41 }
 0xb5e   :  { %v2654_v49 = vmul.f32 %v9511_v17, %v2652_v42 }
 0xb60   :  { %v10528_v50 = vadd.f32 %v2655_v45, %v2654_v49 }
 0xb62   :  { %9514 = vtanh.f32 %v10528_v50  ;;  %v2862_v38 = vrot.slane %v10528_v50, 7 }
 0xb64   :  { %v9513_v51 = vpop.eup %9512 }
 0xb6c   :  { %v9515_v52 = vpop.eup %9514 }
 0xb6d   :  { %v2658_v53 = vmul.f32 %v9515_v52, %v9513_v51 }
 0xb6f   :  { %2659 = vst.msk [vmem:[#allocation2 + $0x8] sm:$0x4] %vm980_vm4, %v2658_v53  ;;  %v2660_v47 = vpack.c.bf16 %v2658_v53, %v2658_v53 }
 0xb71   :  { %v2662_v48 = vrot.slane %v2660_v47, 1 }
 0xb73   :  { %8595 = vmatmul.mubr.msk.bf16.vlgmr.msra.gmra.mrb[96].mxu0 %vm30_vm1, %v2662_v48  ;;  %8603 = vmatmul.mubr.msk.bf16.vlgmr.msra.gmra.mrb[96].mxu1 %vm30_vm1, %v2662_v48 }
 0xb74   :  { %8607 = vmatpush3.bf16.msra.mxu0 %v10312_v30  ;;  %8615 = vmatpush3.bf16.msra.mxu1 %v10318_v34 }
 0xb75   :  { %8608 = vmatprep.subr.bf16.mxu0 %v9908_v1  ;;  %8616 = vmatprep.subr.bf16.mxu1 %v9908_v1 }
 0xb76   :  { %8610 = vmatprep.mubr.msk.bf16.mxu0 %vm9909_vm0, %v9908_v1  ;;  %8618 = vmatprep.mubr.msk.bf16.mxu1 %vm9909_vm0, %v9908_v1 }
 0xb78   :  { %8609 = vmatpush3.bf16.msra.mxu0 %v10387_v11  ;;  %8617 = vmatpush3.bf16.msra.mxu1 %v10393_v25 }
 0xb79   :  { %8622 = vmatprep.subr.bf16.mxu0 %v9908_v1  ;;  %8630 = vmatprep.subr.bf16.mxu1 %v9908_v1 }
 0xb7b   :  { %8611 = vmatmul.mubr.msk.bf16.vlgmr.msra.gmra.mrb[100].mxu0 %vm30_vm1, %v2662_v48  ;;  %8619 = vmatmul.mubr.msk.bf16.vlgmr.msra.gmra.mrb[100].mxu1 %vm30_vm1, %v2662_v48 }
 0xb7c   :  { %8623 = vmatpush3.bf16.msra.mxu0 %v10336_v35  ;;  %8631 = vmatpush3.bf16.msra.mxu1 %v10342_v21 }
 0xb7d   :  { %8624 = vmatprep.subr.bf16.mxu0 %v9908_v1  ;;  %8632 = vmatprep.subr.bf16.mxu1 %v9908_v1 }
 0xb7e   :  { %8626 = vmatprep.mubr.msk.bf16.mxu0 %vm9909_vm0, %v9908_v1  ;;  %8634 = vmatprep.mubr.msk.bf16.mxu1 %vm9909_vm0, %v9908_v1 }
 0xb80   :  { %8625 = vmatpush3.bf16.msra.mxu0 %v10354_v22  ;;  %8633 = vmatpush3.bf16.msra.mxu1 %v10360_v36 }
 0xb81   :  { %8638 = vmatprep.subr.bf16.mxu0 %v9908_v1  ;;  %8646 = vmatprep.subr.bf16.mxu1 %v9908_v1 }
 0xc46   :  { %v2700_v54 = vpop.f32.mrb[96].mxu0  ;;  %v2750_v55 = vpop.f32.mrb[96].mxu1 }
 0xc47   :  { %v2707_v56 = vrot.slane %v2700_v54, 5  ;;  %v2757_v57 = vrot.slane %v2750_v55, 5  ;;  %v8596_v58 = vpop.f32.mrb[97].mxu0  ;;  %v8604_v59 = vpop.f32.mrb[97].mxu1 }
 0xc48   :  { %v2703_v60 = vpop.f32.mrb[98].mxu0  ;;  %v2753_v62 = vpop.f32.mrb[98].mxu1 }
 0xc49   :  { %v2709_v63 = vadd.f32 %v2707_v56, %v10092_v31  ;;  %v2759_v0 = vadd.f32 %v2757_v57, %v10094_v32  ;;  %v8597_v61 = vpop.f32.mrb[99].mxu0  ;;  %v8605_v2 = vpop.f32.mrb[99].mxu1 }
 0xc4b   :  { %v7589_v3 = vmul.f32 -1.442695, %v2709_v63  ;;  %v7591_v4 = vmul.f32 -1.442695, %v2759_v0 }
 0xc4d   :  { %9516 = vpow2.f32 %v7589_v3 }
 0xc4e   :  { %9518 = vpow2.f32 %v7591_v4  ;;  %v2800_v6 = vpop.f32.mrb[100].mxu0  ;;  %v2845_v5 = vpop.f32.mrb[100].mxu1 }
 0xc4f   :  { %v2852_v7 = vrot.slane %v2845_v5, 5  ;;  %v8612_v8 = vpop.f32.mrb[101].mxu0  ;;  %v8620_v10 = vpop.f32.mrb[101].mxu1  ;;  %v2807_v13 = vrot.slane %v2800_v6, 5 }
 0xc50   :  { %v2803_v12 = vpop.f32.mrb[102].mxu0  ;;  %v2848_v9 = vpop.f32.mrb[102].mxu1 }
 0xc51   :  { %v2854_v23 = vadd.f32 %v2852_v7, %v10104_v44  ;;  %v8613_v24 = vpop.f32.mrb[103].mxu0  ;;  %v8621_v26 = vpop.f32.mrb[103].mxu1  ;;  %v2809_v29 = vadd.f32 %v2807_v13, %v10102_v43 }
 0xc53   :  { %v7594_v37 = vmul.f32 -1.442695, %v2854_v23 }
 0xc55   :  { %9520 = vpow2.f32 %v7594_v37 }
 0xc56   :  { %9522 = vtanh.f32 %v2809_v29 }
 0xc57   :  { %v9517_v14 = vpop.eup %9516 }
 0xc58   :  { %v9519_v15 = vpop.eup %9518  ;;  %v2713_v18 = vadd.f32 1.0, %v9517_v14 }
 0xc59   :  { %v2763_v19 = vadd.f32 1.0, %v9519_v15 }
 0xc5a   :  { %9524 = vrcp.f32 %v2713_v18 }
 0xc5b   :  { %9526 = vrcp.f32 %v2763_v19 }
 0xc5f   :  { %v9521_v27 = vpop.eup %9520 }
 0xc60   :  { %v9523_v28 = vpop.eup %9522  ;;  %v2858_v41 = vadd.f32 1.0, %v9521_v27 }
 0xc62   :  { %9528 = vrcp.f32 %v2858_v41  ;;  %v10635_v41 = vld [vmem:[%s11540_s2] sm:$0xff]  }
 0xc64   :  { %v9525_v33 = vpop.eup %9524 }
 0xc65   :  { %v9527_v39 = vpop.eup %9526  ;;  %v2865_v40 = vmul.f32 %v9525_v33, %v9523_v28 }
 0xc66   :  { %v2864_v16 = vmul.f32 %v9527_v39, %v2862_v38  ;;  %v10611_v39 = vld [vmem:[%s11540_s2 + $0x20] sm:$0xff]  }
 0xc68   :  { %v10565_v42 = vadd.f32 %v2865_v40, %v2864_v16  ;;  %v10617_v40 = vld [vmem:[%s11540_s2 + $0x30] sm:$0xff]   ;;  %v10659_v16 = vld [vmem:[%s11540_s2 + $0x18] sm:$0xff]  }
 0xc6a   :  { %9530 = vtanh.f32 %v10565_v42  ;;  %v3074_v26 = vrot.slane %v10565_v42, 7 }
 0xc6c   :  { %v9529_v17 = vpop.eup %9528 }
 0xc74   :  { %v9531_v45 = vpop.eup %9530 }
 0xc75   :  { %v2868_v46 = vmul.f32 %v9531_v45, %v9529_v17 }
 0xc77   :  { %2869 = vst.msk [vmem:[#allocation2 + $0x8] sm:$0x8] %vm1191_vm5, %v2868_v46  ;;  %v2870_v49 = vpack.c.bf16 %v2868_v46, %v2868_v46 }
 0xc79   :  { %v2872_v51 = vshrl.u32 %v2870_v49, 16 }
 0xc7b   :  { %v2874_v52 = vrot.slane %v2872_v51, 1 }
 0xc7d   :  { %8627 = vmatmul.mubr.msk.bf16.vlgmr.msra.gmra.mrb[104].mxu0 %vm30_vm1, %v2874_v52  ;;  %8635 = vmatmul.mubr.msk.bf16.vlgmr.msra.gmra.mrb[104].mxu1 %vm30_vm1, %v2874_v52 }
 0xc7e   :  { %8639 = vmatpush3.bf16.msra.mxu0 %v10312_v30  ;;  %8647 = vmatpush3.bf16.msra.mxu1 %v10318_v34 }
 0xc7f   :  { %8640 = vmatprep.subr.bf16.mxu0 %v9908_v1  ;;  %8648 = vmatprep.subr.bf16.mxu1 %v9908_v1 }
 0xc80   :  { %8642 = vmatprep.mubr.msk.bf16.mxu0 %vm9909_vm0, %v9908_v1  ;;  %8650 = vmatprep.mubr.msk.bf16.mxu1 %vm9909_vm0, %v9908_v1 }
 0xc82   :  { %8641 = vmatpush3.bf16.msra.mxu0 %v10387_v11  ;;  %8649 = vmatpush3.bf16.msra.mxu1 %v10393_v25 }
 0xc83   :  { %8654 = vmatprep.subr.bf16.mxu0 %v9908_v1  ;;  %8662 = vmatprep.subr.bf16.mxu1 %v9908_v1 }
 0xc85   :  { %8643 = vmatmul.mubr.msk.bf16.vlgmr.msra.gmra.mrb[108].mxu0 %vm30_vm1, %v2874_v52  ;;  %8651 = vmatmul.mubr.msk.bf16.vlgmr.msra.gmra.mrb[108].mxu1 %vm30_vm1, %v2874_v52 }
 0xc86   :  { %8655 = vmatpush3.bf16.msra.mxu0 %v10336_v35  ;;  %8663 = vmatpush3.bf16.msra.mxu1 %v10342_v21 }
 0xc87   :  { %8656 = vmatprep.subr.bf16.mxu0 %v9908_v1  ;;  %8664 = vmatprep.subr.bf16.mxu1 %v9908_v1 }
 0xc88   :  { %8658 = vmatprep.mubr.msk.bf16.mxu0 %vm9909_vm0, %v9908_v1  ;;  %8666 = vmatprep.mubr.msk.bf16.mxu1 %vm9909_vm0, %v9908_v1 }
 0xc8a   :  { %8657 = vmatpush3.bf16.msra.mxu0 %v10354_v22  ;;  %8665 = vmatpush3.bf16.msra.mxu1 %v10360_v36 }
 0xc8b   :  { %8670 = vmatprep.subr.bf16.mxu0 %v9908_v1  ;;  %8678 = vmatprep.subr.bf16.mxu1 %v9908_v1 }
 0xd50   :  { %v2912_v30 = vpop.f32.mrb[104].mxu0  ;;  %v2962_v34 = vpop.f32.mrb[104].mxu1 }
 0xd51   :  { %v2919_v35 = vrot.slane %v2912_v30, 4  ;;  %v2969_v21 = vrot.slane %v2962_v34, 4  ;;  %v8628_v50 = vpop.f32.mrb[105].mxu0  ;;  %v8636_v53 = vpop.f32.mrb[105].mxu1 }
 0xd52   :  { %v2915_v47 = vpop.f32.mrb[106].mxu0  ;;  %v2965_v48 = vpop.f32.mrb[106].mxu1 }
 0xd53   :  { %v2921_v54 = vadd.f32 %v2919_v35, %v10092_v31  ;;  %v2971_v55 = vadd.f32 %v2969_v21, %v10094_v32  ;;  %v8629_v56 = vpop.f32.mrb[107].mxu0  ;;  %v8637_v22 = vpop.f32.mrb[107].mxu1 }
 0xd55   :  { %v7596_v57 = vmul.f32 -1.442695, %v2921_v54  ;;  %v7598_v36 = vmul.f32 -1.442695, %v2971_v55 }
 0xd57   :  { %9532 = vpow2.f32 %v7596_v57 }
 0xd58   :  { %9534 = vpow2.f32 %v7598_v36  ;;  %v3012_v58 = vpop.f32.mrb[108].mxu0  ;;  %v3057_v59 = vpop.f32.mrb[108].mxu1 }
 0xd59   :  { %v3064_v60 = vrot.slane %v3057_v59, 4  ;;  %v8644_v62 = vpop.f32.mrb[109].mxu0  ;;  %v8652_v63 = vpop.f32.mrb[109].mxu1  ;;  %v3019_v2 = vrot.slane %v3012_v58, 4 }
 0xd5a   :  { %v3015_v0 = vpop.f32.mrb[110].mxu0  ;;  %v3060_v61 = vpop.f32.mrb[110].mxu1 }
 0xd5b   :  { %v3066_v3 = vadd.f32 %v3064_v60, %v10104_v44  ;;  %v8645_v4 = vpop.f32.mrb[111].mxu0  ;;  %v8653_v6 = vpop.f32.mrb[111].mxu1  ;;  %v3021_v7 = vadd.f32 %v3019_v2, %v10102_v43 }
 0xd5d   :  { %v7601_v5 = vmul.f32 -1.442695, %v3066_v3 }
 0xd5f   :  { %9536 = vpow2.f32 %v7601_v5 }
 0xd60   :  { %9538 = vtanh.f32 %v3021_v7 }
 0xd61   :  { %v9533_v8 = vpop.eup %9532 }
 0xd62   :  { %v9535_v10 = vpop.eup %9534  ;;  %v2925_v12 = vadd.f32 1.0, %v9533_v8 }
 0xd63   :  { %v2975_v9 = vadd.f32 1.0, %v9535_v10 }
 0xd64   :  { %9540 = vrcp.f32 %v2925_v12 }
 0xd65   :  { %9542 = vrcp.f32 %v2975_v9 }
 0xd69   :  { %v9537_v13 = vpop.eup %9536 }
 0xd6a   :  { %v9539_v23 = vpop.eup %9538  ;;  %v3070_v14 = vadd.f32 1.0, %v9537_v13 }
 0xd6c   :  { %9544 = vrcp.f32 %v3070_v14 }
 0xd6e   :  { %v9541_v24 = vpop.eup %9540 }
 0xd6f   :  { %v9543_v37 = vpop.eup %9542  ;;  %v3077_v29 = vmul.f32 %v9541_v24, %v9539_v23 }
 0xd70   :  { %v3076_v15 = vmul.f32 %v9543_v37, %v3074_v26 }
 0xd72   :  { %v10602_v18 = vadd.f32 %v3077_v29, %v3076_v15 }
 0xd74   :  { %9546 = vtanh.f32 %v10602_v18  ;;  %v3284_v8 = vrot.slane %v10602_v18, 7  ;;  %v10686_v18 = vld [vmem:[%s11540_s2 + $0x28] sm:$0xff]  }
 0xd76   :  { %v9545_v19 = vpop.eup %9544 }
 0xd7e   :  { %v9547_v27 = vpop.eup %9546 }
 0xd7f   :  { %v3080_v28 = vmul.f32 %v9547_v27, %v9545_v19  ;;  %v10692_v19 = vld [vmem:[%s11540_s2 + $0x38] sm:$0xff]  }
 0xd81   :  { %3081 = vst.msk [vmem:[#allocation2 + $0x8] sm:$0x10] %vm1404_vm6, %v3080_v28  ;;  %v3082_v33 = vpack.c.bf16 %v3080_v28, %v3080_v28 }
 0xd83   :  { %v3084_v38 = vrot.slane %v3082_v33, 2 }
 0xd85   :  { %8659 = vmatmul.mubr.msk.bf16.vlgmr.msra.gmra.mrb[112].mxu0 %vm30_vm1, %v3084_v38  ;;  %8667 = vmatmul.mubr.msk.bf16.vlgmr.msra.gmra.mrb[112].mxu1 %vm30_vm1, %v3084_v38 }
 0xd86   :  { %8671 = vmatpush3.bf16.msra.mxu0 %v10611_v39  ;;  %8679 = vmatpush3.bf16.msra.mxu1 %v10617_v40 }
 0xd87   :  { %8672 = vmatprep.subr.bf16.mxu0 %v9908_v1  ;;  %8680 = vmatprep.subr.bf16.mxu1 %v9908_v1 }
 0xd88   :  { %8674 = vmatprep.mubr.msk.bf16.mxu0 %vm9909_vm0, %v9908_v1  ;;  %8682 = vmatprep.mubr.msk.bf16.mxu1 %vm9909_vm0, %v9908_v1 }
 0xd8a   :  { %8673 = vmatpush3.bf16.msra.mxu0 %v10387_v11  ;;  %8681 = vmatpush3.bf16.msra.mxu1 %v10393_v25  ;;  %v10641_v11 = vld [vmem:[%s11540_s2 + $0x10] sm:$0xff]   ;;  %v10653_v25 = vld [vmem:[%s11540_s2 + $0x8] sm:$0xff]  }
 0xd8b   :  { %8686 = vmatprep.subr.bf16.mxu0 %v9908_v1  ;;  %8694 = vmatprep.subr.bf16.mxu1 %v9908_v1 }
 0xd8d   :  { %8675 = vmatmul.mubr.msk.bf16.vlgmr.msra.gmra.mrb[116].mxu0 %vm30_vm1, %v3084_v38  ;;  %8683 = vmatmul.mubr.msk.bf16.vlgmr.msra.gmra.mrb[116].mxu1 %vm30_vm1, %v3084_v38 }
 0xd8e   :  { %8687 = vmatpush3.bf16.msra.mxu0 %v10635_v41  ;;  %8695 = vmatpush3.bf16.msra.mxu1 %v10641_v11 }
 0xd8f   :  { %8688 = vmatprep.subr.bf16.mxu0 %v9908_v1  ;;  %8696 = vmatprep.subr.bf16.mxu1 %v9908_v1 }
 0xd90   :  { %8690 = vmatprep.mubr.msk.bf16.mxu0 %vm9909_vm0, %v9908_v1  ;;  %8698 = vmatprep.mubr.msk.bf16.mxu1 %vm9909_vm0, %v9908_v1 }
 0xd92   :  { %8689 = vmatpush3.bf16.msra.mxu0 %v10653_v25  ;;  %8697 = vmatpush3.bf16.msra.mxu1 %v10659_v16 }
 0xd93   :  { %8702 = vmatprep.subr.bf16.mxu0 %v9908_v1  ;;  %8710 = vmatprep.subr.bf16.mxu1 %v9908_v1 }
 0xe58   :  { %v3122_v42 = vpop.f32.mrb[112].mxu0  ;;  %v3172_v17 = vpop.f32.mrb[112].mxu1 }
 0xe59   :  { %v3129_v45 = vrot.slane %v3122_v42, 3  ;;  %v3179_v46 = vrot.slane %v3172_v17, 3  ;;  %v8660_v49 = vpop.f32.mrb[113].mxu0  ;;  %v8668_v51 = vpop.f32.mrb[113].mxu1 }
 0xe5a   :  { %v3125_v52 = vpop.f32.mrb[114].mxu0  ;;  %v3175_v30 = vpop.f32.mrb[114].mxu1 }
 0xe5b   :  { %v3131_v34 = vadd.f32 %v3129_v45, %v10092_v31  ;;  %v3181_v35 = vadd.f32 %v3179_v46, %v10094_v32  ;;  %v8661_v21 = vpop.f32.mrb[115].mxu0  ;;  %v8669_v50 = vpop.f32.mrb[115].mxu1 }
 0xe5d   :  { %v7603_v53 = vmul.f32 -1.442695, %v3131_v34  ;;  %v7605_v47 = vmul.f32 -1.442695, %v3181_v35 }
 0xe5f   :  { %9548 = vpow2.f32 %v7603_v53 }
 0xe60   :  { %9550 = vpow2.f32 %v7605_v47  ;;  %v3222_v48 = vpop.f32.mrb[116].mxu0  ;;  %v3267_v54 = vpop.f32.mrb[116].mxu1 }
 0xe61   :  { %v3274_v55 = vrot.slane %v3267_v54, 3  ;;  %v8676_v56 = vpop.f32.mrb[117].mxu0  ;;  %v8684_v22 = vpop.f32.mrb[117].mxu1  ;;  %v3229_v58 = vrot.slane %v3222_v48, 3 }
 0xe62   :  { %v3225_v57 = vpop.f32.mrb[118].mxu0  ;;  %v3270_v36 = vpop.f32.mrb[118].mxu1 }
 0xe63   :  { %v3276_v59 = vadd.f32 %v3274_v55, %v10104_v44  ;;  %v8677_v60 = vpop.f32.mrb[119].mxu0  ;;  %v8685_v62 = vpop.f32.mrb[119].mxu1  ;;  %v3231_v0 = vadd.f32 %v3229_v58, %v10102_v43 }
 0xe65   :  { %v7608_v63 = vmul.f32 -1.442695, %v3276_v59 }
 0xe67   :  { %9552 = vpow2.f32 %v7608_v63 }
 0xe68   :  { %9554 = vtanh.f32 %v3231_v0 }
 0xe69   :  { %v9549_v61 = vpop.eup %9548 }
 0xe6a   :  { %v9551_v2 = vpop.eup %9550  ;;  %v3135_v3 = vadd.f32 1.0, %v9549_v61 }
 0xe6b   :  { %v3185_v4 = vadd.f32 1.0, %v9551_v2 }
 0xe6c   :  { %9556 = vrcp.f32 %v3135_v3 }
 0xe6d   :  { %9558 = vrcp.f32 %v3185_v4 }
 0xe71   :  { %v9553_v6 = vpop.eup %9552 }
 0xe72   :  { %v9555_v5 = vpop.eup %9554  ;;  %v3280_v9 = vadd.f32 1.0, %v9553_v6 }
 0xe74   :  { %9560 = vrcp.f32 %v3280_v9  ;;  %v9324_v9 = vld [vmem:[%s11539_s1 + $0x48] sm:$0xff]  }
 0xe76   :  { %v9557_v7 = vpop.eup %9556 }
 0xe77   :  { %v9559_v10 = vpop.eup %9558  ;;  %v3287_v12 = vmul.f32 %v9557_v7, %v9555_v5 }
 0xe78   :  { %v3286_v13 = vmul.f32 %v9559_v10, %v3284_v8 }
 0xe7a   :  { %v10669_v23 = vadd.f32 %v3287_v12, %v3286_v13  ;;  %v9325_v13 = vld [vmem:[%s11539_s1 + $0x58] sm:$0xff]  }
 0xe7c   :  { %9562 = vtanh.f32 %v10669_v23  ;;  %v3496_v0 = vrot.slane %v10669_v23, 7 }
 0xe7e   :  { %v9561_v24 = vpop.eup %9560 }
 0xe86   :  { %v9563_v26 = vpop.eup %9562 }
 0xe87   :  { %v3290_v37 = vmul.f32 %v9563_v26, %v9561_v24 }
 0xe89   :  { %3291 = vst.msk [vmem:[#allocation2 + $0x8] sm:$0x20] %vm1615_vm7, %v3290_v37  ;;  %v3292_v29 = vpack.c.bf16 %v3290_v37, %v3290_v37 }
 0xe8b   :  { %v3294_v14 = vshrl.u32 %v3292_v29, 16 }
 0xe8d   :  { %v3296_v15 = vrot.slane %v3294_v14, 2 }
 0xe8f   :  { %8691 = vmatmul.mubr.msk.bf16.vlgmr.msra.gmra.mrb[120].mxu0 %vm30_vm1, %v3296_v15  ;;  %8699 = vmatmul.mubr.msk.bf16.vlgmr.msra.gmra.mrb[120].mxu1 %vm30_vm1, %v3296_v15 }
 0xe90   :  { %8703 = vmatpush3.bf16.msra.mxu0 %v10611_v39  ;;  %8711 = vmatpush3.bf16.msra.mxu1 %v10617_v40 }
 0xe91   :  { %8704 = vmatprep.subr.bf16.mxu0 %v9908_v1  ;;  %8712 = vmatprep.subr.bf16.mxu1 %v9908_v1 }
 0xe92   :  { %8706 = vmatprep.mubr.msk.bf16.mxu0 %vm9909_vm0, %v9908_v1  ;;  %8714 = vmatprep.mubr.msk.bf16.mxu1 %vm9909_vm0, %v9908_v1 }
 0xe94   :  { %8705 = vmatpush3.bf16.msra.mxu0 %v10686_v18  ;;  %8713 = vmatpush3.bf16.msra.mxu1 %v10692_v19 }
 0xe95   :  { %8718 = vmatprep.subr.bf16.mxu0 %v9908_v1  ;;  %8726 = vmatprep.subr.bf16.mxu1 %v9908_v1 }
 0xe97   :  { %8707 = vmatmul.mubr.msk.bf16.vlgmr.msra.gmra.mrb[124].mxu0 %vm30_vm1, %v3296_v15  ;;  %8715 = vmatmul.mubr.msk.bf16.vlgmr.msra.gmra.mrb[124].mxu1 %vm30_vm1, %v3296_v15 }
 0xe98   :  { %8719 = vmatpush3.bf16.msra.mxu0 %v10635_v41  ;;  %8727 = vmatpush3.bf16.msra.mxu1 %v10641_v11 }
 0xe99   :  { %8720 = vmatprep.subr.bf16.mxu0 %v9908_v1  ;;  %8728 = vmatprep.subr.bf16.mxu1 %v9908_v1 }
 0xe9a   :  { %8722 = vmatprep.mubr.msk.bf16.mxu0 %vm9909_vm0, %v9908_v1  ;;  %8730 = vmatprep.mubr.msk.bf16.mxu1 %vm9909_vm0, %v9908_v1 }
 0xe9c   :  { %8721 = vmatpush3.bf16.msra.mxu0 %v10653_v25  ;;  %8729 = vmatpush3.bf16.msra.mxu1 %v10659_v16 }
 0xe9d   :  { %8734 = vmatprep.subr.bf16.mxu0 %v9908_v1  ;;  %8742 = vmatprep.subr.bf16.mxu1 %v9908_v1 }
 0xf62   :  { %v3334_v27 = vpop.f32.mrb[120].mxu0  ;;  %v3384_v28 = vpop.f32.mrb[120].mxu1 }
 0xf63   :  { %v3341_v33 = vrot.slane %v3334_v27, 2  ;;  %v3391_v38 = vrot.slane %v3384_v28, 2  ;;  %v8692_v41 = vpop.f32.mrb[121].mxu0  ;;  %v8700_v11 = vpop.f32.mrb[121].mxu1 }
 0xf64   :  { %v3337_v42 = vpop.f32.mrb[122].mxu0  ;;  %v3387_v17 = vpop.f32.mrb[122].mxu1 }
 0xf65   :  { %v3343_v45 = vadd.f32 %v3341_v33, %v10092_v31  ;;  %v3393_v46 = vadd.f32 %v3391_v38, %v10094_v32  ;;  %v8693_v49 = vpop.f32.mrb[123].mxu0  ;;  %v8701_v25 = vpop.f32.mrb[123].mxu1 }
 0xf67   :  { %v7610_v51 = vmul.f32 -1.442695, %v3343_v45  ;;  %v7612_v16 = vmul.f32 -1.442695, %v3393_v46 }
 0xf69   :  { %9564 = vpow2.f32 %v7610_v51 }
 0xf6a   :  { %9566 = vpow2.f32 %v7612_v16  ;;  %v3434_v52 = vpop.f32.mrb[124].mxu0  ;;  %v3479_v30 = vpop.f32.mrb[124].mxu1 }
 0xf6b   :  { %v3486_v34 = vrot.slane %v3479_v30, 2  ;;  %v8708_v35 = vpop.f32.mrb[125].mxu0  ;;  %v8716_v21 = vpop.f32.mrb[125].mxu1  ;;  %v3441_v47 = vrot.slane %v3434_v52, 2 }
 0xf6c   :  { %v3437_v50 = vpop.f32.mrb[126].mxu0  ;;  %v3482_v53 = vpop.f32.mrb[126].mxu1 }
 0xf6d   :  { %v3488_v48 = vadd.f32 %v3486_v34, %v10104_v44  ;;  %v8709_v54 = vpop.f32.mrb[127].mxu0  ;;  %v8717_v55 = vpop.f32.mrb[127].mxu1  ;;  %v3443_v22 = vadd.f32 %v3441_v47, %v10102_v43 }
 0xf6f   :  { %v7615_v56 = vmul.f32 -1.442695, %v3488_v48 }
 0xf71   :  { %9568 = vpow2.f32 %v7615_v56 }
 0xf72   :  { %9570 = vtanh.f32 %v3443_v22 }
 0xf73   :  { %v9565_v57 = vpop.eup %9564 }
 0xf74   :  { %v9567_v36 = vpop.eup %9566  ;;  %v3347_v58 = vadd.f32 1.0, %v9565_v57 }
 0xf75   :  { %v3397_v59 = vadd.f32 1.0, %v9567_v36 }
 0xf76   :  { %9572 = vrcp.f32 %v3347_v58 }
 0xf77   :  { %9574 = vrcp.f32 %v3397_v59  ;;  %v3714_v59 = vld [vmem:[#allocation2] sm:$0xff] }
 0xf7b   :  { %v9569_v60 = vpop.eup %9568 }
 0xf7c   :  { %v9571_v62 = vpop.eup %9570  ;;  %v3492_v3 = vadd.f32 1.0, %v9569_v60 }
 0xf7e   :  { %9576 = vrcp.f32 %v3492_v3  ;;  %v10785_v3 = vld [vmem:[%s11540_s2 + $0x40] sm:$0xff]  }
 0xf80   :  { %v9573_v63 = vpop.eup %9572 }
 0xf81   :  { %v9575_v61 = vpop.eup %9574  ;;  %v3499_v2 = vmul.f32 %v9573_v63, %v9571_v62  ;;  %v9326_v62 = vld [vmem:[%s11539_s1 + $0x60] sm:$0xff]   ;;  %v9327_v63 = vld [vmem:[%s11539_s1 + $0x70] sm:$0xff]  }
 0xf82   :  { %v3498_v4 = vmul.f32 %v9575_v61, %v3496_v0  ;;  %v9328_v61 = vld [vmem:[%s11539_s1 + $0x68] sm:$0xff]  }
 0xf84   :  { %v10716_v6 = vadd.f32 %v3499_v2, %v3498_v4  ;;  %v9329_v2 = vld [vmem:[%s11539_s1 + $0x78] sm:$0xff]   ;;  %v10790_v4 = vld [vmem:[%s11540_s2 + $0x50] sm:$0xff]  }
 0xf86   :  { %9578 = vtanh.f32 %v10716_v6  ;;  %v3706_v54 = vrot.slane %v10716_v6, 7  ;;  %v10801_v6 = vld [vmem:[%s11540_s2 + $0x48] sm:$0xff]  }
 0xf88   :  { %v9577_v5 = vpop.eup %9576 }
 0xf90   :  { %v9579_v7 = vpop.eup %9578 }
 0xf91   :  { %v3502_v8 = vmul.f32 %v9579_v7, %v9577_v5  ;;  %v10806_v5 = vld [vmem:[%s11540_s2 + $0x58] sm:$0xff]   ;;  %v10819_v7 = vld [vmem:[%s11540_s2 + $0x60] sm:$0xff]  }
 0xf93   :  { %3503 = vst.msk [vmem:[#allocation2 + $0x8] sm:$0x40] %vm1828_vm8, %v3502_v8  ;;  %v3504_v10 = vpack.c.bf16 %v3502_v8, %v3502_v8  ;;  %v10824_v8 = vld [vmem:[%s11540_s2 + $0x70] sm:$0xff]  }
 0xf95   :  { %v3506_v12 = vrot.slane %v3504_v10, 3  ;;  %v10835_v10 = vld [vmem:[%s11540_s2 + $0x68] sm:$0xff]  }
 0xf97   :  { %8723 = vmatmul.mubr.msk.bf16.vlgmr.msra.gmra.mrb[128].mxu0 %vm30_vm1, %v3506_v12  ;;  %8731 = vmatmul.mubr.msk.bf16.vlgmr.msra.gmra.mrb[128].mxu1 %vm30_vm1, %v3506_v12 }
 0xf98   :  { %8735 = vmatpush3.bf16.msra.mxu0 %v10611_v39  ;;  %8743 = vmatpush3.bf16.msra.mxu1 %v10617_v40  ;;  %v9322_v39 = vld [vmem:[%s11539_s1 + $0x40] sm:$0xff]   ;;  %v9323_v40 = vld [vmem:[%s11539_s1 + $0x50] sm:$0xff]  }
 0xf99   :  { %8736 = vmatprep.subr.bf16.mxu0 %v9908_v1  ;;  %8744 = vmatprep.subr.bf16.mxu1 %v9908_v1 }
 0xf9a   :  { %8738 = vmatprep.mubr.msk.bf16.mxu0 %vm9909_vm0, %v9908_v1  ;;  %8746 = vmatprep.mubr.msk.bf16.mxu1 %vm9909_vm0, %v9908_v1 }
 0xf9c   :  { %8737 = vmatpush3.bf16.msra.mxu0 %v10686_v18  ;;  %8745 = vmatpush3.bf16.msra.mxu1 %v10692_v19 }
 0xf9d   :  { %8750 = vmatprep.subr.bf16.mxu0 %v9908_v1  ;;  %8758 = vmatprep.subr.bf16.mxu1 %v9908_v1 }
 0xf9f   :  { %8739 = vmatmul.mubr.msk.bf16.vlgmr.msra.gmra.mrb[132].mxu0 %vm30_vm1, %v3506_v12  ;;  %8747 = vmatmul.mubr.msk.bf16.vlgmr.msra.gmra.mrb[132].mxu1 %vm30_vm1, %v3506_v12  ;;  %v10840_v12 = vld [vmem:[%s11540_s2 + $0x78] sm:$0xff]  }
 0xfa0   :  { %8754 = vmatprep.mubr.msk.bf16.mxu0 %vm9909_vm0, %v9908_v1  ;;  %8762 = vmatprep.mubr.msk.bf16.mxu1 %vm9909_vm0, %v9908_v1 }
 0xfa1   :  { %8751 = vmatpush3.bf16.msra.mxu0 %v9322_v39  ;;  %8759 = vmatpush3.bf16.msra.mxu1 %v9323_v40 }
 0xfa2   :  { %8752 = vmatprep.subr.bf16.mxu0 %v9908_v1  ;;  %8760 = vmatprep.subr.bf16.mxu1 %v9908_v1 }
 0xfa5   :  { %8753 = vmatpush3.bf16.msra.mxu0 %v9324_v9  ;;  %8761 = vmatpush3.bf16.msra.mxu1 %v9325_v13  ;;  %v7628_v13 = vld [vmem:[%s11541_s3 + $0x4] ss:$0 sm:$0xff] }
 0xfa6   :  { %8766 = vmatprep.subr.bf16.mxu0 %v9908_v1  ;;  %8774 = vmatprep.subr.bf16.mxu1 %v9908_v1 }
0x106a   :  { %v3544_v23 = vpop.f32.mrb[128].mxu0  ;;  %v3594_v24 = vpop.f32.mrb[128].mxu1 }
0x106b   :  { %v3551_v26 = vrot.slane %v3544_v23, 1  ;;  %v3601_v37 = vrot.slane %v3594_v24, 1  ;;  %v8724_v29 = vpop.f32.mrb[129].mxu0  ;;  %v8732_v14 = vpop.f32.mrb[129].mxu1  ;;  %v7637_v23 = vld [vmem:[%s11541_s3 + $0x5] ss:$0 sm:$0xff] }
0x106c   :  { %v3547_v15 = vpop.f32.mrb[130].mxu0  ;;  %v3597_v18 = vpop.f32.mrb[130].mxu1 }
0x106d   :  { %v3553_v19 = vadd.f32 %v3551_v26, %v10092_v31  ;;  %v3603_v27 = vadd.f32 %v3601_v37, %v10094_v32  ;;  %v8725_v28 = vpop.f32.mrb[131].mxu0  ;;  %v8733_v33 = vpop.f32.mrb[131].mxu1 }
0x106e   :  { %v7646_v33 = vld [vmem:[%s11541_s3 + $0x6] ss:$0 sm:$0xff] }
0x106f   :  { %v7617_v38 = vmul.f32 -1.442695, %v3553_v19  ;;  %v7619_v41 = vmul.f32 -1.442695, %v3603_v27 }
0x1071   :  { %9580 = vpow2.f32 %v7617_v38  ;;  %v7655_v38 = vld [vmem:[%s11541_s3 + $0x7] ss:$0 sm:$0xff] }
0x1072   :  { %9582 = vpow2.f32 %v7619_v41  ;;  %v3644_v11 = vpop.f32.mrb[132].mxu0  ;;  %v3689_v42 = vpop.f32.mrb[132].mxu1 }
0x1073   :  { %v3696_v17 = vrot.slane %v3689_v42, 1  ;;  %v8740_v45 = vpop.f32.mrb[133].mxu0  ;;  %v8748_v46 = vpop.f32.mrb[133].mxu1  ;;  %v3651_v51 = vrot.slane %v3644_v11, 1 }
0x1074   :  { %v3647_v49 = vpop.f32.mrb[134].mxu0  ;;  %v3692_v25 = vpop.f32.mrb[134].mxu1 }
0x1075   :  { %v3698_v16 = vadd.f32 %v3696_v17, %v10104_v44  ;;  %v8741_v52 = vpop.f32.mrb[135].mxu0  ;;  %v8749_v31 = vpop.f32.mrb[135].mxu1  ;;  %v3653_v32 = vadd.f32 %v3651_v51, %v10102_v43 }
0x1077   :  { %v7622_v30 = vmul.f32 -1.442695, %v3698_v16 }
0x1079   :  { %9584 = vpow2.f32 %v7622_v30 }
0x107a   :  { %9586 = vtanh.f32 %v3653_v32 }
0x107b   :  { %v9581_v34 = vpop.eup %9580 }
0x107c   :  { %v9583_v35 = vpop.eup %9582  ;;  %v3557_v21 = vadd.f32 1.0, %v9581_v34 }
0x107d   :  { %v3607_v50 = vadd.f32 1.0, %v9583_v35 }
0x107e   :  { %9588 = vrcp.f32 %v3557_v21 }
0x107f   :  { %9590 = vrcp.f32 %v3607_v50 }
0x1083   :  { %v9585_v53 = vpop.eup %9584 }
0x1084   :  { %v9587_v47 = vpop.eup %9586  ;;  %v3702_v56 = vadd.f32 1.0, %v9585_v53 }
0x1086   :  { %9592 = vrcp.f32 %v3702_v56 }
0x1088   :  { %v9589_v48 = vpop.eup %9588 }
0x1089   :  { %v9591_v55 = vpop.eup %9590  ;;  %v3709_v44 = vmul.f32 %v9589_v48, %v9587_v47 }
0x108a   :  { %v3708_v22 = vmul.f32 %v9591_v55, %v3706_v54 }
0x108c   :  { %v3710_v57 = vadd.f32 %v3709_v44, %v3708_v22 }
0x108e   :  { %9594 = vtanh.f32 %v3710_v57 }
0x1090   :  { %v9593_v43 = vpop.eup %9592 }
0x1098   :  { %v9595_v36 = vpop.eup %9594 }
0x1099   :  { %v3712_v58 = vmul.f32 %v9595_v36, %v9593_v43 }
0x109b   :  { %3713 = vst.msk [vmem:[#allocation2 + $0x8] sm:$0x80] %vm2039_vm9, %v3712_v58 }
0x10a2   :  { %v3715_v60 = vld [vmem:[#allocation2 + $0x8] sm:$0xff] }
0x10a3   :  { %v3716_v0 = vpack.c.bf16 %v3715_v60, %v3714_v59 }
0x10a5   :  { %8755 = vmatmul.mubr.msk.bf16.vlgmr.msra.gmra.mrb[136].mxu0 %vm30_vm1, %v3716_v0  ;;  %8763 = vmatmul.mubr.msk.bf16.vlgmr.msra.gmra.mrb[136].mxu1 %vm30_vm1, %v3716_v0 }
0x10a6   :  { %8767 = vmatpush3.bf16.msra.mxu0 %v9326_v62  ;;  %8775 = vmatpush3.bf16.msra.mxu1 %v9327_v63 }
0x10a7   :  { %8768 = vmatprep.subr.bf16.mxu0 %v9908_v1  ;;  %8776 = vmatprep.subr.bf16.mxu1 %v9908_v1 }
0x10a8   :  { %8770 = vmatprep.mubr.msk.bf16.mxu0 %vm9909_vm0, %v9908_v1  ;;  %8778 = vmatprep.mubr.msk.bf16.mxu1 %vm9909_vm0, %v9908_v1 }
0x10aa   :  { %8769 = vmatpush3.bf16.msra.mxu0 %v9328_v61  ;;  %8777 = vmatpush3.bf16.msra.mxu1 %v9329_v2 }
0x10ab   :  { %8782 = vmatprep.subr.bf16.mxu0 %v9908_v1  ;;  %8790 = vmatprep.subr.bf16.mxu1 %v9908_v1 }
0x10ad   :  { %8771 = vmatmul.mubr.msk.bf16.vlgmr.msra.gmra.mrb[140].mxu0 %vm30_vm1, %v3716_v0  ;;  %8779 = vmatmul.mubr.msk.bf16.vlgmr.msra.gmra.mrb[140].mxu1 %vm30_vm1, %v3716_v0 }
0x10ae   :  { %8783 = vmatpush3.bf16.msra.mxu0 %v10785_v3  ;;  %8791 = vmatpush3.bf16.msra.mxu1 %v10790_v4 }
0x10af   :  { %8784 = vmatprep.subr.bf16.mxu0 %v9908_v1  ;;  %8792 = vmatprep.subr.bf16.mxu1 %v9908_v1 }
0x10b0   :  { %8786 = vmatprep.mubr.msk.bf16.mxu0 %vm9909_vm0, %v9908_v1  ;;  %8794 = vmatprep.mubr.msk.bf16.mxu1 %vm9909_vm0, %v9908_v1 }
0x10b2   :  { %8785 = vmatpush3.bf16.msra.mxu0 %v10801_v6  ;;  %8793 = vmatpush3.bf16.msra.mxu1 %v10806_v5 }
0x10b3   :  { %8798 = vmatprep.subr.bf16.mxu0 %v9908_v1  ;;  %8806 = vmatprep.subr.bf16.mxu1 %v9908_v1 }
0x10b5   :  { %8787 = vmatmul.mubr.bf16.vlgmr.msra.gmra.mrb[144].mxu0 %v9910_v20  ;;  %8795 = vmatmul.mubr.bf16.vlgmr.msra.gmra.mrb[144].mxu1 %v9910_v20 }
0x10b6   :  { %8799 = vmatpush3.bf16.msra.mxu0 %v10819_v7  ;;  %8807 = vmatpush3.bf16.msra.mxu1 %v10824_v8 }
0x10b7   :  { %8800 = vmatprep.subr.bf16.mxu0 %v9908_v1  ;;  %8808 = vmatprep.subr.bf16.mxu1 %v9908_v1 }
0x10b8   :  { %8802 = vmatprep.mubr.msk.bf16.mxu0 %vm9909_vm0, %v9908_v1  ;;  %8810 = vmatprep.mubr.msk.bf16.mxu1 %vm9909_vm0, %v9908_v1 }
0x10ba   :  { %8801 = vmatpush3.bf16.msra.mxu0 %v10835_v10  ;;  %8809 = vmatpush3.bf16.msra.mxu1 %v10840_v12 }
0x10bb   :  { %8814 = vmatprep.subr.bf16.mxu0 %v9908_v1  ;;  %8822 = vmatprep.subr.bf16.mxu1 %v9908_v1 }
0x10bd   :  { %8803 = vmatmul.mubr.bf16.vlgmr.msra.gmra.mrb[148].mxu0 %v9910_v20  ;;  %8811 = vmatmul.mubr.bf16.vlgmr.msra.gmra.mrb[148].mxu1 %v9910_v20 }
0x10be   :  { %8815 = vmatpush3.bf16.msra.mxu0 %v10785_v3  ;;  %8823 = vmatpush3.bf16.msra.mxu1 %v10790_v4 }
0x10bf   :  { %8816 = vmatprep.subr.bf16.mxu0 %v9908_v1  ;;  %8824 = vmatprep.subr.bf16.mxu1 %v9908_v1 }
0x10c0   :  { %8818 = vmatprep.mubr.msk.bf16.mxu0 %vm9909_vm0, %v9908_v1  ;;  %8826 = vmatprep.mubr.msk.bf16.mxu1 %vm9909_vm0, %v9908_v1 }
0x10c2   :  { %8817 = vmatpush3.bf16.msra.mxu0 %v10801_v6  ;;  %8825 = vmatpush3.bf16.msra.mxu1 %v10806_v5 }
0x10c3   :  { %8830 = vmatprep.subr.bf16.mxu0 %v9908_v1  ;;  %8838 = vmatprep.subr.bf16.mxu1 %v9908_v1 }
0x1178   :  { %v3779_v20 = vpop.f32.mrb[136].mxu0  ;;  %v3845_v39 = vpop.f32.mrb[136].mxu1 }
0x1179   :  { %v8756_v40 = vpop.f32.mrb[137].mxu0  ;;  %v8764_v9 = vpop.f32.mrb[137].mxu1  ;;  %v10886_v49 = vadd.f32 %v7628_v13, %v3779_v20  ;;  %v10888_v25 = vadd.f32 %v7637_v23, %v3845_v39 }
0x117a   :  { %v3782_v24 = vpop.f32.mrb[138].mxu0  ;;  %v3848_v26 = vpop.f32.mrb[138].mxu1 }
0x117b   :  { %v10872_v37 = vadd.f32 %v7628_v13, %v3782_v24  ;;  %v10874_v29 = vadd.f32 %v7637_v23, %v3848_v26  ;;  %v8757_v14 = vpop.f32.mrb[139].mxu0  ;;  %v8765_v15 = vpop.f32.mrb[139].mxu1 }
0x1180   :  { %v3911_v18 = vpop.f32.mrb[140].mxu0  ;;  %v3977_v19 = vpop.f32.mrb[140].mxu1 }
0x1181   :  { %v8772_v27 = vpop.f32.mrb[141].mxu0  ;;  %v8780_v28 = vpop.f32.mrb[141].mxu1  ;;  %v10892_v48 = vadd.f32 %v7655_v38, %v3977_v19  ;;  %v10895_v36 = vadd.f32 %v7646_v33, %v3911_v18 }
0x1182   :  { %v3914_v41 = vpop.f32.mrb[142].mxu0  ;;  %v3980_v11 = vpop.f32.mrb[142].mxu1 }
0x1183   :  { %v10882_v42 = vadd.f32 %v7646_v33, %v3914_v41  ;;  %v10884_v17 = vadd.f32 %v7655_v38, %v3980_v11  ;;  %v8773_v45 = vpop.f32.mrb[143].mxu0  ;;  %v8781_v46 = vpop.f32.mrb[143].mxu1 }
0x1188   :  { %v4050_v51 = vpop.f32.mrb[144].mxu0  ;;  %v4109_v16 = vpop.f32.mrb[144].mxu1 }
0x1189   :  { %v4056_v52 = vadd.f32 %v4050_v51, %v10886_v49  ;;  %v4115_v31 = vadd.f32 %v4109_v16, %v10888_v25  ;;  %v8788_v30 = vpop.f32.mrb[145].mxu0  ;;  %v8796_v32 = vpop.f32.mrb[145].mxu1 }
0x118a   :  { %v4053_v34 = vpop.f32.mrb[146].mxu0  ;;  %v4112_v35 = vpop.f32.mrb[146].mxu1 }
0x118b   :  { %v7677_v21 = vmul.f32 -1.442695, %v4056_v52  ;;  %v7680_v50 = vmul.f32 -1.442695, %v4115_v31  ;;  %v8789_v53 = vpop.f32.mrb[147].mxu0  ;;  %v8797_v47 = vpop.f32.mrb[147].mxu1 }
0x118d   :  { %9596 = vpow2.f32 %v7677_v21 }
0x118e   :  { %9598 = vpow2.f32 %v7680_v50 }
0x1190   :  { %v4168_v54 = vpop.f32.mrb[148].mxu0  ;;  %v4222_v55 = vpop.f32.mrb[148].mxu1 }
0x1191   :  { %v4228_v44 = vadd.f32 %v4222_v55, %v10892_v48  ;;  %v8804_v56 = vpop.f32.mrb[149].mxu0  ;;  %v8812_v22 = vpop.f32.mrb[149].mxu1  ;;  %v4174_v62 = vadd.f32 %v4168_v54, %v10895_v36 }
0x1192   :  { %v4171_v57 = vpop.f32.mrb[150].mxu0  ;;  %v4225_v43 = vpop.f32.mrb[150].mxu1 }
0x1193   :  { %v8805_v58 = vpop.f32.mrb[151].mxu0  ;;  %v8813_v59 = vpop.f32.mrb[151].mxu1  ;;  %v7685_v60 = vmul.f32 -1.442695, %v4228_v44 }
0x1195   :  { %9600 = vpow2.f32 %v7685_v60 }
0x1196   :  { %9602 = vtanh.f32 %v4174_v62 }
0x1197   :  { %v9597_v63 = vpop.eup %9596 }
0x1198   :  { %v9599_v0 = vpop.eup %9598  ;;  %v4060_v61 = vadd.f32 1.0, %v9597_v63 }
0x1199   :  { %v4119_v2 = vadd.f32 1.0, %v9599_v0 }
0x119a   :  { %9604 = vrcp.f32 %v4060_v61 }
0x119b   :  { %9606 = vrcp.f32 %v4119_v2 }
0x119f   :  { %v9601_v20 = vpop.eup %9600 }
0x11a0   :  { %v9603_v39 = vpop.eup %9602  ;;  %v4232_v23 = vadd.f32 1.0, %v9601_v20 }
0x11a2   :  { %9608 = vrcp.f32 %v4232_v23 }
0x11a4   :  { %v9605_v40 = vpop.eup %9604 }
0x11a5   :  { %v9607_v9 = vpop.eup %9606  ;;  %v4236_v13 = vmul.f32 %v9605_v40, %v9603_v39 }
0x11a6   :  { %v4235_v24 = vmul.f32 0.0, %v9607_v9 }
0x11a8   :  { %v10898_v26 = vadd.f32 %v4236_v13, %v4235_v24 }
0x11aa   :  { %9610 = vtanh.f32 %v10898_v26  ;;  %v4440_v2 = vrot.slane %v10898_v26, 7 }
0x11ac   :  { %v9609_v14 = vpop.eup %9608 }
0x11b4   :  { %v9611_v15 = vpop.eup %9610 }
0x11b5   :  { %v4239_v18 = vmul.f32 %v9611_v15, %v9609_v14 }
0x11b7   :  { %v4240_v19 = vpack.c.bf16 %v4239_v18, %v4239_v18 }
0x11b9   :  { %8819 = vmatmul.mubr.msk.bf16.vlgmr.msra.gmra.mrb[152].mxu0 %vm30_vm1, %v4240_v19  ;;  %8827 = vmatmul.mubr.msk.bf16.vlgmr.msra.gmra.mrb[152].mxu1 %vm30_vm1, %v4240_v19 }
0x11ba   :  { %8831 = vmatpush3.bf16.msra.mxu0 %v10819_v7  ;;  %8839 = vmatpush3.bf16.msra.mxu1 %v10824_v8 }
0x11bb   :  { %8832 = vmatprep.subr.bf16.mxu0 %v9908_v1  ;;  %8840 = vmatprep.subr.bf16.mxu1 %v9908_v1 }
0x11bc   :  { %8834 = vmatprep.mubr.msk.bf16.mxu0 %vm9909_vm0, %v9908_v1  ;;  %8842 = vmatprep.mubr.msk.bf16.mxu1 %vm9909_vm0, %v9908_v1 }
0x11be   :  { %8833 = vmatpush3.bf16.msra.mxu0 %v10835_v10  ;;  %8841 = vmatpush3.bf16.msra.mxu1 %v10840_v12 }
0x11bf   :  { %8846 = vmatprep.subr.bf16.mxu0 %v9908_v1  ;;  %8854 = vmatprep.subr.bf16.mxu1 %v9908_v1 }
0x11c1   :  { %8835 = vmatmul.mubr.msk.bf16.vlgmr.msra.gmra.mrb[156].mxu0 %vm30_vm1, %v4240_v19  ;;  %8843 = vmatmul.mubr.msk.bf16.vlgmr.msra.gmra.mrb[156].mxu1 %vm30_vm1, %v4240_v19 }
0x11c2   :  { %8847 = vmatpush3.bf16.msra.mxu0 %v10785_v3  ;;  %8855 = vmatpush3.bf16.msra.mxu1 %v10790_v4 }
0x11c3   :  { %8848 = vmatprep.subr.bf16.mxu0 %v9908_v1  ;;  %8856 = vmatprep.subr.bf16.mxu1 %v9908_v1 }
0x11c4   :  { %8850 = vmatprep.mubr.msk.bf16.mxu0 %vm9909_vm0, %v9908_v1  ;;  %8858 = vmatprep.mubr.msk.bf16.mxu1 %vm9909_vm0, %v9908_v1 }
0x11c6   :  { %8849 = vmatpush3.bf16.msra.mxu0 %v10801_v6  ;;  %8857 = vmatpush3.bf16.msra.mxu1 %v10806_v5 }
0x11c7   :  { %8862 = vmatprep.subr.bf16.mxu0 %v9908_v1  ;;  %8870 = vmatprep.subr.bf16.mxu1 %v9908_v1 }
0x128c   :  { %v4278_v27 = vpop.f32.mrb[152].mxu0  ;;  %v4328_v28 = vpop.f32.mrb[152].mxu1 }
0x128d   :  { %v4285_v33 = vrot.slane %v4278_v27, 7  ;;  %v4335_v38 = vrot.slane %v4328_v28, 7  ;;  %v8820_v41 = vpop.f32.mrb[153].mxu0  ;;  %v8828_v11 = vpop.f32.mrb[153].mxu1 }
0x128e   :  { %v4281_v45 = vpop.f32.mrb[154].mxu0  ;;  %v4331_v46 = vpop.f32.mrb[154].mxu1 }
0x128f   :  { %v4287_v51 = vadd.f32 %v4285_v33, %v10886_v49  ;;  %v4337_v16 = vadd.f32 %v4335_v38, %v10888_v25  ;;  %v8821_v52 = vpop.f32.mrb[155].mxu0  ;;  %v8829_v31 = vpop.f32.mrb[155].mxu1 }
0x1291   :  { %v7687_v30 = vmul.f32 -1.442695, %v4287_v51  ;;  %v7689_v32 = vmul.f32 -1.442695, %v4337_v16 }
0x1293   :  { %9612 = vpow2.f32 %v7687_v30 }
0x1294   :  { %9614 = vpow2.f32 %v7689_v32  ;;  %v4378_v34 = vpop.f32.mrb[156].mxu0  ;;  %v4423_v35 = vpop.f32.mrb[156].mxu1 }
0x1295   :  { %v4430_v21 = vrot.slane %v4423_v35, 7  ;;  %v8836_v50 = vpop.f32.mrb[157].mxu0  ;;  %v8844_v53 = vpop.f32.mrb[157].mxu1  ;;  %v4385_v55 = vrot.slane %v4378_v34, 7 }
0x1296   :  { %v4381_v47 = vpop.f32.mrb[158].mxu0  ;;  %v4426_v54 = vpop.f32.mrb[158].mxu1 }
0x1297   :  { %v4432_v44 = vadd.f32 %v4430_v21, %v10892_v48  ;;  %v8837_v56 = vpop.f32.mrb[159].mxu0  ;;  %v8845_v22 = vpop.f32.mrb[159].mxu1  ;;  %v4387_v43 = vadd.f32 %v4385_v55, %v10895_v36 }
0x1299   :  { %v7692_v57 = vmul.f32 -1.442695, %v4432_v44 }
0x129b   :  { %9616 = vpow2.f32 %v7692_v57 }
0x129c   :  { %9618 = vtanh.f32 %v4387_v43 }
0x129d   :  { %v9613_v58 = vpop.eup %9612 }
0x129e   :  { %v9615_v59 = vpop.eup %9614  ;;  %v4291_v60 = vadd.f32 1.0, %v9613_v58 }
0x129f   :  { %v4341_v62 = vadd.f32 1.0, %v9615_v59 }
0x12a0   :  { %9620 = vrcp.f32 %v4291_v60 }
0x12a1   :  { %9622 = vrcp.f32 %v4341_v62 }
0x12a5   :  { %v9617_v63 = vpop.eup %9616 }
0x12a6   :  { %v9619_v0 = vpop.eup %9618  ;;  %v4436_v40 = vadd.f32 1.0, %v9617_v63 }
0x12a8   :  { %9624 = vrcp.f32 %v4436_v40 }
0x12aa   :  { %v9621_v61 = vpop.eup %9620 }
0x12ab   :  { %v9623_v20 = vpop.eup %9622  ;;  %v4443_v39 = vmul.f32 %v9621_v61, %v9619_v0 }
0x12ac   :  { %v4442_v9 = vmul.f32 %v9623_v20, %v4440_v2 }
0x12ae   :  { %v10934_v13 = vadd.f32 %v4443_v39, %v4442_v9 }
0x12b0   :  { %9626 = vtanh.f32 %v10934_v13  ;;  %v4650_v0 = vrot.slane %v10934_v13, 7 }
0x12b2   :  { %v9625_v23 = vpop.eup %9624 }
0x12ba   :  { %v9627_v24 = vpop.eup %9626 }
0x12bb   :  { %v4446_v14 = vmul.f32 %v9627_v24, %v9625_v23 }
0x12bd   :  { %v4447_v15 = vpack.c.bf16 %v4446_v14, %v4446_v14 }
0x12bf   :  { %v4449_v18 = vshrl.u32 %v4447_v15, 16 }
0x12c1   :  { %8851 = vmatmul.mubr.msk.bf16.vlgmr.msra.gmra.mrb[160].mxu0 %vm30_vm1, %v4449_v18  ;;  %8859 = vmatmul.mubr.msk.bf16.vlgmr.msra.gmra.mrb[160].mxu1 %vm30_vm1, %v4449_v18 }
0x12c2   :  { %8863 = vmatpush3.bf16.msra.mxu0 %v10819_v7  ;;  %8871 = vmatpush3.bf16.msra.mxu1 %v10824_v8 }
0x12c3   :  { %8864 = vmatprep.subr.bf16.mxu0 %v9908_v1  ;;  %8872 = vmatprep.subr.bf16.mxu1 %v9908_v1 }
0x12c4   :  { %8866 = vmatprep.mubr.msk.bf16.mxu0 %vm9909_vm0, %v9908_v1  ;;  %8874 = vmatprep.mubr.msk.bf16.mxu1 %vm9909_vm0, %v9908_v1 }
0x12c6   :  { %8865 = vmatpush3.bf16.msra.mxu0 %v10835_v10  ;;  %8873 = vmatpush3.bf16.msra.mxu1 %v10840_v12 }
0x12c7   :  { %8878 = vmatprep.subr.bf16.mxu0 %v9908_v1  ;;  %8886 = vmatprep.subr.bf16.mxu1 %v9908_v1 }
0x12c9   :  { %8867 = vmatmul.mubr.msk.bf16.vlgmr.msra.gmra.mrb[164].mxu0 %vm30_vm1, %v4449_v18  ;;  %8875 = vmatmul.mubr.msk.bf16.vlgmr.msra.gmra.mrb[164].mxu1 %vm30_vm1, %v4449_v18 }
0x12ca   :  { %8879 = vmatpush3.bf16.msra.mxu0 %v10785_v3  ;;  %8887 = vmatpush3.bf16.msra.mxu1 %v10790_v4 }
0x12cb   :  { %8880 = vmatprep.subr.bf16.mxu0 %v9908_v1  ;;  %8888 = vmatprep.subr.bf16.mxu1 %v9908_v1 }
0x12cc   :  { %8882 = vmatprep.mubr.msk.bf16.mxu0 %vm9909_vm0, %v9908_v1  ;;  %8890 = vmatprep.mubr.msk.bf16.mxu1 %vm9909_vm0, %v9908_v1 }
0x12ce   :  { %8881 = vmatpush3.bf16.msra.mxu0 %v10801_v6  ;;  %8889 = vmatpush3.bf16.msra.mxu1 %v10806_v5 }
0x12cf   :  { %8894 = vmatprep.subr.bf16.mxu0 %v9908_v1  ;;  %8902 = vmatprep.subr.bf16.mxu1 %v9908_v1 }
0x1394   :  { %v4488_v26 = vpop.f32.mrb[160].mxu0  ;;  %v4538_v19 = vpop.f32.mrb[160].mxu1 }
0x1395   :  { %v4495_v27 = vrot.slane %v4488_v26, 6  ;;  %v4545_v28 = vrot.slane %v4538_v19, 6  ;;  %v8852_v33 = vpop.f32.mrb[161].mxu0  ;;  %v8860_v38 = vpop.f32.mrb[161].mxu1 }
0x1396   :  { %v4491_v41 = vpop.f32.mrb[162].mxu0  ;;  %v4541_v11 = vpop.f32.mrb[162].mxu1 }
0x1397   :  { %v4497_v45 = vadd.f32 %v4495_v27, %v10886_v49  ;;  %v4547_v46 = vadd.f32 %v4545_v28, %v10888_v25  ;;  %v8853_v51 = vpop.f32.mrb[163].mxu0  ;;  %v8861_v16 = vpop.f32.mrb[163].mxu1 }
0x1399   :  { %v7694_v52 = vmul.f32 -1.442695, %v4497_v45  ;;  %v7696_v31 = vmul.f32 -1.442695, %v4547_v46 }
0x139b   :  { %9628 = vpow2.f32 %v7694_v52 }
0x139c   :  { %9630 = vpow2.f32 %v7696_v31  ;;  %v4588_v30 = vpop.f32.mrb[164].mxu0  ;;  %v4633_v32 = vpop.f32.mrb[164].mxu1 }
0x139d   :  { %v4640_v34 = vrot.slane %v4633_v32, 6  ;;  %v8868_v35 = vpop.f32.mrb[165].mxu0  ;;  %v8876_v21 = vpop.f32.mrb[165].mxu1  ;;  %v4595_v47 = vrot.slane %v4588_v30, 6 }
0x139e   :  { %v4591_v50 = vpop.f32.mrb[166].mxu0  ;;  %v4636_v53 = vpop.f32.mrb[166].mxu1 }
0x139f   :  { %v4642_v54 = vadd.f32 %v4640_v34, %v10892_v48  ;;  %v8869_v55 = vpop.f32.mrb[167].mxu0  ;;  %v8877_v44 = vpop.f32.mrb[167].mxu1  ;;  %v4597_v22 = vadd.f32 %v4595_v47, %v10895_v36 }
0x13a1   :  { %v7699_v56 = vmul.f32 -1.442695, %v4642_v54 }
0x13a3   :  { %9632 = vpow2.f32 %v7699_v56 }
0x13a4   :  { %9634 = vtanh.f32 %v4597_v22 }
0x13a5   :  { %v9629_v57 = vpop.eup %9628 }
0x13a6   :  { %v9631_v43 = vpop.eup %9630  ;;  %v4501_v58 = vadd.f32 1.0, %v9629_v57 }
0x13a7   :  { %v4551_v59 = vadd.f32 1.0, %v9631_v43 }
0x13a8   :  { %9636 = vrcp.f32 %v4501_v58 }
0x13a9   :  { %9638 = vrcp.f32 %v4551_v59 }
0x13ad   :  { %v9633_v60 = vpop.eup %9632 }
0x13ae   :  { %v9635_v62 = vpop.eup %9634  ;;  %v4646_v20 = vadd.f32 1.0, %v9633_v60 }
0x13b0   :  { %9640 = vrcp.f32 %v4646_v20 }
0x13b2   :  { %v9637_v63 = vpop.eup %9636 }
0x13b3   :  { %v9639_v61 = vpop.eup %9638  ;;  %v4653_v2 = vmul.f32 %v9637_v63, %v9635_v62 }
0x13b4   :  { %v4652_v39 = vmul.f32 %v9639_v61, %v4650_v0 }
0x13b6   :  { %v10970_v40 = vadd.f32 %v4653_v2, %v4652_v39 }
0x13b8   :  { %9642 = vtanh.f32 %v10970_v40  ;;  %v4859_v62 = vrot.slane %v10970_v40, 7 }
0x13ba   :  { %v9641_v9 = vpop.eup %9640 }
0x13c2   :  { %v9643_v23 = vpop.eup %9642 }
0x13c3   :  { %v4656_v24 = vmul.f32 %v9643_v23, %v9641_v9 }
0x13c5   :  { %v4657_v14 = vpack.c.bf16 %v4656_v24, %v4656_v24 }
0x13c7   :  { %v4659_v15 = vrot.slane %v4657_v14, 1 }
0x13c9   :  { %8883 = vmatmul.mubr.msk.bf16.vlgmr.msra.gmra.mrb[168].mxu0 %vm30_vm1, %v4659_v15  ;;  %8891 = vmatmul.mubr.msk.bf16.vlgmr.msra.gmra.mrb[168].mxu1 %vm30_vm1, %v4659_v15 }
0x13ca   :  { %8895 = vmatpush3.bf16.msra.mxu0 %v10819_v7  ;;  %8903 = vmatpush3.bf16.msra.mxu1 %v10824_v8 }
0x13cb   :  { %8896 = vmatprep.subr.bf16.mxu0 %v9908_v1  ;;  %8904 = vmatprep.subr.bf16.mxu1 %v9908_v1 }
0x13cc   :  { %8898 = vmatprep.mubr.msk.bf16.mxu0 %vm9909_vm0, %v9908_v1  ;;  %8906 = vmatprep.mubr.msk.bf16.mxu1 %vm9909_vm0, %v9908_v1 }
0x13ce   :  { %8897 = vmatpush3.bf16.msra.mxu0 %v10835_v10  ;;  %8905 = vmatpush3.bf16.msra.mxu1 %v10840_v12 }
0x13cf   :  { %8910 = vmatprep.subr.bf16.mxu0 %v9908_v1  ;;  %8918 = vmatprep.subr.bf16.mxu1 %v9908_v1 }
0x13d1   :  { %8899 = vmatmul.mubr.msk.bf16.vlgmr.msra.gmra.mrb[172].mxu0 %vm30_vm1, %v4659_v15  ;;  %8907 = vmatmul.mubr.msk.bf16.vlgmr.msra.gmra.mrb[172].mxu1 %vm30_vm1, %v4659_v15 }
0x13d2   :  { %8911 = vmatpush3.bf16.msra.mxu0 %v10785_v3  ;;  %8919 = vmatpush3.bf16.msra.mxu1 %v10790_v4 }
0x13d3   :  { %8912 = vmatprep.subr.bf16.mxu0 %v9908_v1  ;;  %8920 = vmatprep.subr.bf16.mxu1 %v9908_v1 }
0x13d4   :  { %8914 = vmatprep.mubr.msk.bf16.mxu0 %vm9909_vm0, %v9908_v1  ;;  %8922 = vmatprep.mubr.msk.bf16.mxu1 %vm9909_vm0, %v9908_v1 }
0x13d6   :  { %8913 = vmatpush3.bf16.msra.mxu0 %v10801_v6  ;;  %8921 = vmatpush3.bf16.msra.mxu1 %v10806_v5 }
0x13d7   :  { %8926 = vmatprep.subr.bf16.mxu0 %v9908_v1  ;;  %8934 = vmatprep.subr.bf16.mxu1 %v9908_v1 }
0x149c   :  { %v4697_v13 = vpop.f32.mrb[168].mxu0  ;;  %v4747_v18 = vpop.f32.mrb[168].mxu1 }
0x149d   :  { %v4704_v26 = vrot.slane %v4697_v13, 5  ;;  %v4754_v19 = vrot.slane %v4747_v18, 5  ;;  %v8884_v27 = vpop.f32.mrb[169].mxu0  ;;  %v8892_v28 = vpop.f32.mrb[169].mxu1 }
0x149e   :  { %v4700_v33 = vpop.f32.mrb[170].mxu0  ;;  %v4750_v38 = vpop.f32.mrb[170].mxu1 }
0x149f   :  { %v4706_v41 = vadd.f32 %v4704_v26, %v10886_v49  ;;  %v4756_v11 = vadd.f32 %v4754_v19, %v10888_v25  ;;  %v8885_v45 = vpop.f32.mrb[171].mxu0  ;;  %v8893_v46 = vpop.f32.mrb[171].mxu1 }
0x14a1   :  { %v7701_v51 = vmul.f32 -1.442695, %v4706_v41  ;;  %v7703_v16 = vmul.f32 -1.442695, %v4756_v11 }
0x14a3   :  { %9644 = vpow2.f32 %v7701_v51 }
0x14a4   :  { %9646 = vpow2.f32 %v7703_v16  ;;  %v4797_v52 = vpop.f32.mrb[172].mxu0  ;;  %v4842_v31 = vpop.f32.mrb[172].mxu1 }
0x14a5   :  { %v4849_v30 = vrot.slane %v4842_v31, 5  ;;  %v8900_v32 = vpop.f32.mrb[173].mxu0  ;;  %v8908_v34 = vpop.f32.mrb[173].mxu1  ;;  %v4804_v50 = vrot.slane %v4797_v52, 5 }
0x14a6   :  { %v4800_v35 = vpop.f32.mrb[174].mxu0  ;;  %v4845_v21 = vpop.f32.mrb[174].mxu1 }
0x14a7   :  { %v4851_v53 = vadd.f32 %v4849_v30, %v10892_v48  ;;  %v8901_v47 = vpop.f32.mrb[175].mxu0  ;;  %v8909_v54 = vpop.f32.mrb[175].mxu1  ;;  %v4806_v44 = vadd.f32 %v4804_v50, %v10895_v36 }
0x14a9   :  { %v7706_v55 = vmul.f32 -1.442695, %v4851_v53 }
0x14ab   :  { %9648 = vpow2.f32 %v7706_v55 }
0x14ac   :  { %9650 = vtanh.f32 %v4806_v44 }
0x14ad   :  { %v9645_v56 = vpop.eup %9644 }
0x14ae   :  { %v9647_v22 = vpop.eup %9646  ;;  %v4710_v57 = vadd.f32 1.0, %v9645_v56 }
0x14af   :  { %v4760_v43 = vadd.f32 1.0, %v9647_v22 }
0x14b0   :  { %9652 = vrcp.f32 %v4710_v57 }
0x14b1   :  { %9654 = vrcp.f32 %v4760_v43 }
0x14b5   :  { %v9649_v58 = vpop.eup %9648 }
0x14b6   :  { %v9651_v59 = vpop.eup %9650  ;;  %v4855_v61 = vadd.f32 1.0, %v9649_v58 }
0x14b8   :  { %9656 = vrcp.f32 %v4855_v61 }
0x14ba   :  { %v9653_v60 = vpop.eup %9652 }
0x14bb   :  { %v9655_v63 = vpop.eup %9654  ;;  %v4862_v0 = vmul.f32 %v9653_v60, %v9651_v59 }
0x14bc   :  { %v4861_v2 = vmul.f32 %v9655_v63, %v4859_v62 }
0x14be   :  { %v11006_v20 = vadd.f32 %v4862_v0, %v4861_v2 }
0x14c0   :  { %9658 = vtanh.f32 %v11006_v20  ;;  %v5070_v60 = vrot.slane %v11006_v20, 7 }
0x14c2   :  { %v9657_v39 = vpop.eup %9656 }
0x14ca   :  { %v9659_v9 = vpop.eup %9658 }
0x14cb   :  { %v4865_v23 = vmul.f32 %v9659_v9, %v9657_v39 }
0x14cd   :  { %v4866_v24 = vpack.c.bf16 %v4865_v23, %v4865_v23 }
0x14cf   :  { %v4868_v14 = vshrl.u32 %v4866_v24, 16 }
0x14d1   :  { %v4870_v15 = vrot.slane %v4868_v14, 1 }
0x14d3   :  { %8915 = vmatmul.mubr.msk.bf16.vlgmr.msra.gmra.mrb[176].mxu0 %vm30_vm1, %v4870_v15  ;;  %8923 = vmatmul.mubr.msk.bf16.vlgmr.msra.gmra.mrb[176].mxu1 %vm30_vm1, %v4870_v15 }
0x14d4   :  { %8927 = vmatpush3.bf16.msra.mxu0 %v10819_v7  ;;  %8935 = vmatpush3.bf16.msra.mxu1 %v10824_v8 }
0x14d5   :  { %8928 = vmatprep.subr.bf16.mxu0 %v9908_v1  ;;  %8936 = vmatprep.subr.bf16.mxu1 %v9908_v1 }
0x14d6   :  { %8930 = vmatprep.mubr.msk.bf16.mxu0 %vm9909_vm0, %v9908_v1  ;;  %8938 = vmatprep.mubr.msk.bf16.mxu1 %vm9909_vm0, %v9908_v1 }
0x14d8   :  { %8929 = vmatpush3.bf16.msra.mxu0 %v10835_v10  ;;  %8937 = vmatpush3.bf16.msra.mxu1 %v10840_v12 }
0x14d9   :  { %8942 = vmatprep.subr.bf16.mxu0 %v9908_v1  ;;  %8950 = vmatprep.subr.bf16.mxu1 %v9908_v1 }
0x14db   :  { %8931 = vmatmul.mubr.msk.bf16.vlgmr.msra.gmra.mrb[180].mxu0 %vm30_vm1, %v4870_v15  ;;  %8939 = vmatmul.mubr.msk.bf16.vlgmr.msra.gmra.mrb[180].mxu1 %vm30_vm1, %v4870_v15 }
0x14dc   :  { %8943 = vmatpush3.bf16.msra.mxu0 %v10785_v3  ;;  %8951 = vmatpush3.bf16.msra.mxu1 %v10790_v4 }
0x14dd   :  { %8944 = vmatprep.subr.bf16.mxu0 %v9908_v1  ;;  %8952 = vmatprep.subr.bf16.mxu1 %v9908_v1 }
0x14de   :  { %8946 = vmatprep.mubr.msk.bf16.mxu0 %vm9909_vm0, %v9908_v1  ;;  %8954 = vmatprep.mubr.msk.bf16.mxu1 %vm9909_vm0, %v9908_v1 }
0x14e0   :  { %8945 = vmatpush3.bf16.msra.mxu0 %v10801_v6  ;;  %8953 = vmatpush3.bf16.msra.mxu1 %v10806_v5 }
0x14e1   :  { %8958 = vmatprep.subr.bf16.mxu0 %v9908_v1  ;;  %8966 = vmatprep.subr.bf16.mxu1 %v9908_v1 }
0x15a6   :  { %v4908_v40 = vpop.f32.mrb[176].mxu0  ;;  %v4958_v13 = vpop.f32.mrb[176].mxu1 }
0x15a7   :  { %v4915_v18 = vrot.slane %v4908_v40, 4  ;;  %v4965_v26 = vrot.slane %v4958_v13, 4  ;;  %v8916_v19 = vpop.f32.mrb[177].mxu0  ;;  %v8924_v27 = vpop.f32.mrb[177].mxu1 }
0x15a8   :  { %v4911_v28 = vpop.f32.mrb[178].mxu0  ;;  %v4961_v33 = vpop.f32.mrb[178].mxu1 }
0x15a9   :  { %v4917_v38 = vadd.f32 %v4915_v18, %v10886_v49  ;;  %v4967_v41 = vadd.f32 %v4965_v26, %v10888_v25  ;;  %v8917_v11 = vpop.f32.mrb[179].mxu0  ;;  %v8925_v45 = vpop.f32.mrb[179].mxu1 }
0x15ab   :  { %v7708_v46 = vmul.f32 -1.442695, %v4917_v38  ;;  %v7710_v51 = vmul.f32 -1.442695, %v4967_v41 }
0x15ad   :  { %9660 = vpow2.f32 %v7708_v46 }
0x15ae   :  { %9662 = vpow2.f32 %v7710_v51  ;;  %v5008_v16 = vpop.f32.mrb[180].mxu0  ;;  %v5053_v52 = vpop.f32.mrb[180].mxu1 }
0x15af   :  { %v5060_v31 = vrot.slane %v5053_v52, 4  ;;  %v8932_v30 = vpop.f32.mrb[181].mxu0  ;;  %v8940_v32 = vpop.f32.mrb[181].mxu1  ;;  %v5015_v21 = vrot.slane %v5008_v16, 4 }
0x15b0   :  { %v5011_v34 = vpop.f32.mrb[182].mxu0  ;;  %v5056_v35 = vpop.f32.mrb[182].mxu1 }
0x15b1   :  { %v5062_v50 = vadd.f32 %v5060_v31, %v10892_v48  ;;  %v8933_v53 = vpop.f32.mrb[183].mxu0  ;;  %v8941_v47 = vpop.f32.mrb[183].mxu1  ;;  %v5017_v55 = vadd.f32 %v5015_v21, %v10895_v36 }
0x15b3   :  { %v7713_v54 = vmul.f32 -1.442695, %v5062_v50 }
0x15b5   :  { %9664 = vpow2.f32 %v7713_v54 }
0x15b6   :  { %9666 = vtanh.f32 %v5017_v55 }
0x15b7   :  { %v9661_v44 = vpop.eup %9660 }
0x15b8   :  { %v9663_v56 = vpop.eup %9662  ;;  %v4921_v22 = vadd.f32 1.0, %v9661_v44 }
0x15b9   :  { %v4971_v57 = vadd.f32 1.0, %v9663_v56 }
0x15ba   :  { %9668 = vrcp.f32 %v4921_v22 }
0x15bb   :  { %9670 = vrcp.f32 %v4971_v57 }
0x15bf   :  { %v9665_v43 = vpop.eup %9664 }
0x15c0   :  { %v9667_v58 = vpop.eup %9666  ;;  %v5066_v0 = vadd.f32 1.0, %v9665_v43 }
0x15c2   :  { %9672 = vrcp.f32 %v5066_v0 }
0x15c4   :  { %v9669_v59 = vpop.eup %9668 }
0x15c5   :  { %v9671_v62 = vpop.eup %9670  ;;  %v5073_v63 = vmul.f32 %v9669_v59, %v9667_v58 }
0x15c6   :  { %v5072_v61 = vmul.f32 %v9671_v62, %v5070_v60 }
0x15c8   :  { %v11042_v2 = vadd.f32 %v5073_v63, %v5072_v61 }
0x15ca   :  { %9674 = vtanh.f32 %v11042_v2  ;;  %v5279_v56 = vrot.slane %v11042_v2, 7 }
0x15cc   :  { %v9673_v39 = vpop.eup %9672 }
0x15d4   :  { %v9675_v9 = vpop.eup %9674 }
0x15d5   :  { %v5076_v23 = vmul.f32 %v9675_v9, %v9673_v39 }
0x15d7   :  { %v5077_v24 = vpack.c.bf16 %v5076_v23, %v5076_v23 }
0x15d9   :  { %v5079_v14 = vrot.slane %v5077_v24, 2 }
0x15db   :  { %8947 = vmatmul.mubr.msk.bf16.vlgmr.msra.gmra.mrb[184].mxu0 %vm30_vm1, %v5079_v14  ;;  %8955 = vmatmul.mubr.msk.bf16.vlgmr.msra.gmra.mrb[184].mxu1 %vm30_vm1, %v5079_v14 }
0x15dc   :  { %8959 = vmatpush3.bf16.msra.mxu0 %v10819_v7  ;;  %8967 = vmatpush3.bf16.msra.mxu1 %v10824_v8 }
0x15dd   :  { %8960 = vmatprep.subr.bf16.mxu0 %v9908_v1  ;;  %8968 = vmatprep.subr.bf16.mxu1 %v9908_v1 }
0x15de   :  { %8962 = vmatprep.mubr.msk.bf16.mxu0 %vm9909_vm0, %v9908_v1  ;;  %8970 = vmatprep.mubr.msk.bf16.mxu1 %vm9909_vm0, %v9908_v1 }
0x15e0   :  { %8961 = vmatpush3.bf16.msra.mxu0 %v10835_v10  ;;  %8969 = vmatpush3.bf16.msra.mxu1 %v10840_v12 }
0x15e1   :  { %8974 = vmatprep.subr.bf16.mxu0 %v9908_v1  ;;  %8982 = vmatprep.subr.bf16.mxu1 %v9908_v1 }
0x15e3   :  { %8963 = vmatmul.mubr.msk.bf16.vlgmr.msra.gmra.mrb[188].mxu0 %vm30_vm1, %v5079_v14  ;;  %8971 = vmatmul.mubr.msk.bf16.vlgmr.msra.gmra.mrb[188].mxu1 %vm30_vm1, %v5079_v14 }
0x15e4   :  { %8975 = vmatpush3.bf16.msra.mxu0 %v10785_v3  ;;  %8983 = vmatpush3.bf16.msra.mxu1 %v10790_v4 }
0x15e5   :  { %8976 = vmatprep.subr.bf16.mxu0 %v9908_v1  ;;  %8984 = vmatprep.subr.bf16.mxu1 %v9908_v1 }
0x15e6   :  { %8978 = vmatprep.mubr.msk.bf16.mxu0 %vm9909_vm0, %v9908_v1  ;;  %8986 = vmatprep.mubr.msk.bf16.mxu1 %vm9909_vm0, %v9908_v1 }
0x15e8   :  { %8977 = vmatpush3.bf16.msra.mxu0 %v10801_v6  ;;  %8985 = vmatpush3.bf16.msra.mxu1 %v10806_v5 }
0x15e9   :  { %8990 = vmatprep.subr.bf16.mxu0 %v9908_v1  ;;  %8998 = vmatprep.subr.bf16.mxu1 %v9908_v1 }
0x16ae   :  { %v5117_v3 = vpop.f32.mrb[184].mxu0  ;;  %v5167_v4 = vpop.f32.mrb[184].mxu1 }
0x16af   :  { %v5124_v20 = vrot.slane %v5117_v3, 3  ;;  %v5174_v15 = vrot.slane %v5167_v4, 3  ;;  %v8948_v40 = vpop.f32.mrb[185].mxu0  ;;  %v8956_v13 = vpop.f32.mrb[185].mxu1 }
0x16b0   :  { %v5120_v18 = vpop.f32.mrb[186].mxu0  ;;  %v5170_v26 = vpop.f32.mrb[186].mxu1 }
0x16b1   :  { %v5126_v19 = vadd.f32 %v5124_v20, %v10886_v49  ;;  %v5176_v27 = vadd.f32 %v5174_v15, %v10888_v25  ;;  %v8949_v28 = vpop.f32.mrb[187].mxu0  ;;  %v8957_v6 = vpop.f32.mrb[187].mxu1 }
0x16b3   :  { %v7715_v33 = vmul.f32 -1.442695, %v5126_v19  ;;  %v7717_v5 = vmul.f32 -1.442695, %v5176_v27 }
0x16b5   :  { %9676 = vpow2.f32 %v7715_v33 }
0x16b6   :  { %9678 = vpow2.f32 %v7717_v5  ;;  %v5217_v38 = vpop.f32.mrb[188].mxu0  ;;  %v5262_v41 = vpop.f32.mrb[188].mxu1 }
0x16b7   :  { %v5269_v11 = vrot.slane %v5262_v41, 3  ;;  %v8964_v45 = vpop.f32.mrb[189].mxu0  ;;  %v8972_v46 = vpop.f32.mrb[189].mxu1  ;;  %v5224_v52 = vrot.slane %v5217_v38, 3 }
0x16b8   :  { %v5220_v51 = vpop.f32.mrb[190].mxu0  ;;  %v5265_v16 = vpop.f32.mrb[190].mxu1 }
0x16b9   :  { %v5271_v31 = vadd.f32 %v5269_v11, %v10892_v48  ;;  %v8965_v30 = vpop.f32.mrb[191].mxu0  ;;  %v8973_v32 = vpop.f32.mrb[191].mxu1  ;;  %v5226_v35 = vadd.f32 %v5224_v52, %v10895_v36 }
0x16bb   :  { %v7720_v34 = vmul.f32 -1.442695, %v5271_v31 }
0x16bd   :  { %9680 = vpow2.f32 %v7720_v34 }
0x16be   :  { %9682 = vtanh.f32 %v5226_v35 }
0x16bf   :  { %v9677_v21 = vpop.eup %9676 }
0x16c0   :  { %v9679_v50 = vpop.eup %9678  ;;  %v5130_v53 = vadd.f32 1.0, %v9677_v21 }
0x16c1   :  { %v5180_v47 = vadd.f32 1.0, %v9679_v50 }
0x16c2   :  { %9684 = vrcp.f32 %v5130_v53 }
0x16c3   :  { %9686 = vrcp.f32 %v5180_v47 }
0x16c7   :  { %v9681_v54 = vpop.eup %9680 }
0x16c8   :  { %v9683_v55 = vpop.eup %9682  ;;  %v5275_v43 = vadd.f32 1.0, %v9681_v54 }
0x16ca   :  { %9688 = vrcp.f32 %v5275_v43 }
0x16cc   :  { %v9685_v44 = vpop.eup %9684 }
0x16cd   :  { %v9687_v22 = vpop.eup %9686  ;;  %v5282_v57 = vmul.f32 %v9685_v44, %v9683_v55 }
0x16ce   :  { %v5281_v58 = vmul.f32 %v9687_v22, %v5279_v56 }
0x16d0   :  { %v11078_v59 = vadd.f32 %v5282_v57, %v5281_v58 }
0x16d2   :  { %9690 = vtanh.f32 %v11078_v59  ;;  %v5490_v53 = vrot.slane %v11078_v59, 7  ;;  %v11142_v59 = vld [vmem:[%s11540_s2 + $0x60] sm:$0xff]  }
0x16d4   :  { %v9689_v60 = vpop.eup %9688 }
0x16dc   :  { %v9691_v62 = vpop.eup %9690 }
0x16dd   :  { %v5285_v63 = vmul.f32 %v9691_v62, %v9689_v60  ;;  %v11148_v62 = vld [vmem:[%s11540_s2 + $0x70] sm:$0xff]  }
0x16df   :  { %v5286_v0 = vpack.c.bf16 %v5285_v63, %v5285_v63  ;;  %v11160_v63 = vld [vmem:[%s11540_s2 + $0x68] sm:$0xff]  }
0x16e1   :  { %v5288_v61 = vshrl.u32 %v5286_v0, 16  ;;  %v11166_v0 = vld [vmem:[%s11540_s2 + $0x78] sm:$0xff]  }
0x16e3   :  { %v5290_v39 = vrot.slane %v5288_v61, 2 }
0x16e5   :  { %8979 = vmatmul.mubr.msk.bf16.vlgmr.msra.gmra.mrb[192].mxu0 %vm30_vm1, %v5290_v39  ;;  %8987 = vmatmul.mubr.msk.bf16.vlgmr.msra.gmra.mrb[192].mxu1 %vm30_vm1, %v5290_v39 }
0x16e6   :  { %8991 = vmatpush3.bf16.msra.mxu0 %v10819_v7  ;;  %8999 = vmatpush3.bf16.msra.mxu1 %v10824_v8  ;;  %v11100_v7 = vld [vmem:[%s11540_s2 + $0x40] sm:$0xff]   ;;  %v11106_v8 = vld [vmem:[%s11540_s2 + $0x50] sm:$0xff]  }
0x16e7   :  { %8992 = vmatprep.subr.bf16.mxu0 %v9908_v1  ;;  %9000 = vmatprep.subr.bf16.mxu1 %v9908_v1 }
0x16e8   :  { %8994 = vmatprep.mubr.msk.bf16.mxu0 %vm9909_vm0, %v9908_v1  ;;  %9002 = vmatprep.mubr.msk.bf16.mxu1 %vm9909_vm0, %v9908_v1 }
0x16ea   :  { %8993 = vmatpush3.bf16.msra.mxu0 %v10835_v10  ;;  %9001 = vmatpush3.bf16.msra.mxu1 %v10840_v12  ;;  %v11118_v10 = vld [vmem:[%s11540_s2 + $0x48] sm:$0xff]   ;;  %v11124_v12 = vld [vmem:[%s11540_s2 + $0x58] sm:$0xff]  }
0x16eb   :  { %9006 = vmatprep.subr.bf16.mxu0 %v9908_v1  ;;  %9014 = vmatprep.subr.bf16.mxu1 %v9908_v1 }
0x16ed   :  { %8995 = vmatmul.mubr.msk.bf16.vlgmr.msra.gmra.mrb[196].mxu0 %vm30_vm1, %v5290_v39  ;;  %9003 = vmatmul.mubr.msk.bf16.vlgmr.msra.gmra.mrb[196].mxu1 %vm30_vm1, %v5290_v39 }
0x16ee   :  { %9007 = vmatpush3.bf16.msra.mxu0 %v11100_v7  ;;  %9015 = vmatpush3.bf16.msra.mxu1 %v11106_v8 }
0x16ef   :  { %9008 = vmatprep.subr.bf16.mxu0 %v9908_v1  ;;  %9016 = vmatprep.subr.bf16.mxu1 %v9908_v1 }
0x16f0   :  { %9010 = vmatprep.mubr.msk.bf16.mxu0 %vm9909_vm0, %v9908_v1  ;;  %9018 = vmatprep.mubr.msk.bf16.mxu1 %vm9909_vm0, %v9908_v1 }
0x16f2   :  { %9009 = vmatpush3.bf16.msra.mxu0 %v11118_v10  ;;  %9017 = vmatpush3.bf16.msra.mxu1 %v11124_v12 }
0x16f3   :  { %9022 = vmatprep.subr.bf16.mxu0 %v9908_v1  ;;  %9030 = vmatprep.subr.bf16.mxu1 %v9908_v1 }
0x17b8   :  { %v5328_v2 = vpop.f32.mrb[192].mxu0  ;;  %v5378_v9 = vpop.f32.mrb[192].mxu1 }
0x17b9   :  { %v5335_v23 = vrot.slane %v5328_v2, 2  ;;  %v5385_v24 = vrot.slane %v5378_v9, 2  ;;  %v8980_v14 = vpop.f32.mrb[193].mxu0  ;;  %v8988_v3 = vpop.f32.mrb[193].mxu1 }
0x17ba   :  { %v5331_v4 = vpop.f32.mrb[194].mxu0  ;;  %v5381_v20 = vpop.f32.mrb[194].mxu1 }
0x17bb   :  { %v5337_v15 = vadd.f32 %v5335_v23, %v10886_v49  ;;  %v5387_v40 = vadd.f32 %v5385_v24, %v10888_v25  ;;  %v8981_v13 = vpop.f32.mrb[195].mxu0  ;;  %v8989_v18 = vpop.f32.mrb[195].mxu1 }
0x17bd   :  { %v7722_v26 = vmul.f32 -1.442695, %v5337_v15  ;;  %v7724_v19 = vmul.f32 -1.442695, %v5387_v40 }
0x17bf   :  { %9692 = vpow2.f32 %v7722_v26 }
0x17c0   :  { %9694 = vpow2.f32 %v7724_v19  ;;  %v5428_v27 = vpop.f32.mrb[196].mxu0  ;;  %v5473_v28 = vpop.f32.mrb[196].mxu1 }
0x17c1   :  { %v5480_v6 = vrot.slane %v5473_v28, 2  ;;  %v8996_v33 = vpop.f32.mrb[197].mxu0  ;;  %v9004_v5 = vpop.f32.mrb[197].mxu1  ;;  %v5435_v11 = vrot.slane %v5428_v27, 2 }
0x17c2   :  { %v5431_v38 = vpop.f32.mrb[198].mxu0  ;;  %v5476_v41 = vpop.f32.mrb[198].mxu1 }
0x17c3   :  { %v5482_v45 = vadd.f32 %v5480_v6, %v10892_v48  ;;  %v8997_v46 = vpop.f32.mrb[199].mxu0  ;;  %v9005_v51 = vpop.f32.mrb[199].mxu1  ;;  %v5437_v52 = vadd.f32 %v5435_v11, %v10895_v36 }
0x17c5   :  { %v7727_v16 = vmul.f32 -1.442695, %v5482_v45 }
0x17c7   :  { %9696 = vpow2.f32 %v7727_v16 }
0x17c8   :  { %9698 = vtanh.f32 %v5437_v52 }
0x17c9   :  { %v9693_v31 = vpop.eup %9692 }
0x17ca   :  { %v9695_v30 = vpop.eup %9694  ;;  %v5341_v32 = vadd.f32 1.0, %v9693_v31 }
0x17cb   :  { %v5391_v34 = vadd.f32 1.0, %v9695_v30 }
0x17cc   :  { %9700 = vrcp.f32 %v5341_v32 }
0x17cd   :  { %9702 = vrcp.f32 %v5391_v34 }
0x17d1   :  { %v9697_v35 = vpop.eup %9696 }
0x17d2   :  { %v9699_v21 = vpop.eup %9698  ;;  %v5486_v55 = vadd.f32 1.0, %v9697_v35 }
0x17d4   :  { %9704 = vrcp.f32 %v5486_v55 }
0x17d6   :  { %v9701_v50 = vpop.eup %9700 }
0x17d7   :  { %v9703_v47 = vpop.eup %9702  ;;  %v5493_v54 = vmul.f32 %v9701_v50, %v9699_v21 }
0x17d8   :  { %v5492_v44 = vmul.f32 %v9703_v47, %v5490_v53 }
0x17da   :  { %v11134_v56 = vadd.f32 %v5493_v54, %v5492_v44 }
0x17dc   :  { %9706 = vtanh.f32 %v11134_v56  ;;  %v5699_v34 = vrot.slane %v11134_v56, 7 }
0x17de   :  { %v9705_v22 = vpop.eup %9704 }
0x17e6   :  { %v9707_v57 = vpop.eup %9706 }
0x17e7   :  { %v5496_v43 = vmul.f32 %v9707_v57, %v9705_v22 }
0x17e9   :  { %v5497_v58 = vpack.c.bf16 %v5496_v43, %v5496_v43 }
0x17eb   :  { %v5499_v60 = vrot.slane %v5497_v58, 3 }
0x17ed   :  { %9011 = vmatmul.mubr.msk.bf16.vlgmr.msra.gmra.mrb[200].mxu0 %vm30_vm1, %v5499_v60  ;;  %9019 = vmatmul.mubr.msk.bf16.vlgmr.msra.gmra.mrb[200].mxu1 %vm30_vm1, %v5499_v60 }
0x17ee   :  { %9023 = vmatpush3.bf16.msra.mxu0 %v11142_v59  ;;  %9031 = vmatpush3.bf16.msra.mxu1 %v11148_v62 }
0x17ef   :  { %9024 = vmatprep.subr.bf16.mxu0 %v9908_v1  ;;  %9032 = vmatprep.subr.bf16.mxu1 %v9908_v1 }
0x17f0   :  { %9026 = vmatprep.mubr.msk.bf16.mxu0 %vm9909_vm0, %v9908_v1  ;;  %9034 = vmatprep.mubr.msk.bf16.mxu1 %vm9909_vm0, %v9908_v1 }
0x17f2   :  { %9025 = vmatpush3.bf16.msra.mxu0 %v11160_v63  ;;  %9033 = vmatpush3.bf16.msra.mxu1 %v11166_v0 }
0x17f3   :  { %9038 = vmatprep.subr.bf16.mxu0 %v9908_v1  ;;  %9046 = vmatprep.subr.bf16.mxu1 %v9908_v1 }
0x17f5   :  { %9027 = vmatmul.mubr.msk.bf16.vlgmr.msra.gmra.mrb[204].mxu0 %vm30_vm1, %v5499_v60  ;;  %9035 = vmatmul.mubr.msk.bf16.vlgmr.msra.gmra.mrb[204].mxu1 %vm30_vm1, %v5499_v60 }
0x17f6   :  { %9039 = vmatpush3.bf16.msra.mxu0 %v11100_v7  ;;  %9047 = vmatpush3.bf16.msra.mxu1 %v11106_v8 }
0x17f7   :  { %9040 = vmatprep.subr.bf16.mxu0 %v9908_v1  ;;  %9048 = vmatprep.subr.bf16.mxu1 %v9908_v1 }
0x17f8   :  { %9042 = vmatprep.mubr.msk.bf16.mxu0 %vm9909_vm0, %v9908_v1  ;;  %9050 = vmatprep.mubr.msk.bf16.mxu1 %vm9909_vm0, %v9908_v1 }
0x17fa   :  { %9041 = vmatpush3.bf16.msra.mxu0 %v11118_v10  ;;  %9049 = vmatpush3.bf16.msra.mxu1 %v11124_v12 }
0x17fb   :  { %9054 = vmatprep.subr.bf16.mxu0 %v9908_v1  ;;  %9062 = vmatprep.subr.bf16.mxu1 %v9908_v1 }
0x18c0   :  { %v5537_v61 = vpop.f32.mrb[200].mxu0  ;;  %v5587_v39 = vpop.f32.mrb[200].mxu1 }
0x18c1   :  { %v5544_v2 = vrot.slane %v5537_v61, 1  ;;  %v5594_v9 = vrot.slane %v5587_v39, 1  ;;  %v9012_v23 = vpop.f32.mrb[201].mxu0  ;;  %v9020_v24 = vpop.f32.mrb[201].mxu1 }
0x18c2   :  { %v5540_v14 = vpop.f32.mrb[202].mxu0  ;;  %v5590_v3 = vpop.f32.mrb[202].mxu1 }
0x18c3   :  { %v5546_v4 = vadd.f32 %v5544_v2, %v10886_v49  ;;  %v5596_v20 = vadd.f32 %v5594_v9, %v10888_v25  ;;  %v9013_v15 = vpop.f32.mrb[203].mxu0  ;;  %v9021_v40 = vpop.f32.mrb[203].mxu1 }
0x18c5   :  { %v7729_v13 = vmul.f32 -1.442695, %v5546_v4  ;;  %v7731_v18 = vmul.f32 -1.442695, %v5596_v20 }
0x18c7   :  { %9708 = vpow2.f32 %v7729_v13 }
0x18c8   :  { %9710 = vpow2.f32 %v7731_v18  ;;  %v5637_v26 = vpop.f32.mrb[204].mxu0  ;;  %v5682_v19 = vpop.f32.mrb[204].mxu1 }
0x18c9   :  { %v5689_v27 = vrot.slane %v5682_v19, 1  ;;  %v9028_v28 = vpop.f32.mrb[205].mxu0  ;;  %v9036_v6 = vpop.f32.mrb[205].mxu1  ;;  %v5644_v38 = vrot.slane %v5637_v26, 1 }
0x18ca   :  { %v5640_v33 = vpop.f32.mrb[206].mxu0  ;;  %v5685_v5 = vpop.f32.mrb[206].mxu1 }
0x18cb   :  { %v5691_v41 = vadd.f32 %v5689_v27, %v10892_v48  ;;  %v9029_v11 = vpop.f32.mrb[207].mxu0  ;;  %v9037_v49 = vpop.f32.mrb[207].mxu1  ;;  %v5646_v25 = vadd.f32 %v5644_v38, %v10895_v36 }
0x18cd   :  { %v7734_v45 = vmul.f32 -1.442695, %v5691_v41 }
0x18cf   :  { %9712 = vpow2.f32 %v7734_v45 }
0x18d0   :  { %9714 = vtanh.f32 %v5646_v25 }
0x18d1   :  { %v9709_v46 = vpop.eup %9708 }
0x18d2   :  { %v9711_v51 = vpop.eup %9710  ;;  %v5550_v16 = vadd.f32 1.0, %v9709_v46 }
0x18d3   :  { %v5600_v52 = vadd.f32 1.0, %v9711_v51 }
0x18d4   :  { %9716 = vrcp.f32 %v5550_v16 }
0x18d5   :  { %9718 = vrcp.f32 %v5600_v52 }
0x18d9   :  { %v9713_v31 = vpop.eup %9712 }
0x18da   :  { %v9715_v30 = vpop.eup %9714  ;;  %v5695_v21 = vadd.f32 1.0, %v9713_v31 }
0x18dc   :  { %9720 = vrcp.f32 %v5695_v21 }
0x18de   :  { %v9717_v32 = vpop.eup %9716 }
0x18df   :  { %v9719_v35 = vpop.eup %9718  ;;  %v5702_v48 = vmul.f32 %v9717_v32, %v9715_v30 }
0x18e0   :  { %v5701_v50 = vmul.f32 %v9719_v35, %v5699_v34 }
0x18e2   :  { %v11190_v53 = vadd.f32 %v5702_v48, %v5701_v50 }
0x18e4   :  { %9722 = vtanh.f32 %v11190_v53  ;;  %v5898_v45 = vrot.slane %v11190_v53, 7 }
0x18e6   :  { %v9721_v36 = vpop.eup %9720 }
0x18ee   :  { %v9723_v47 = vpop.eup %9722 }
0x18ef   :  { %v5705_v54 = vmul.f32 %v9723_v47, %v9721_v36 }
0x18f1   :  { %v5706_v55 = vpack.c.bf16 %v5705_v54, %v5705_v54 }
0x18f3   :  { %v5708_v44 = vshrl.u32 %v5706_v55, 16 }
0x18f5   :  { %v5710_v22 = vrot.slane %v5708_v44, 3 }
0x18f7   :  { %9043 = vmatmul.mubr.msk.bf16.vlgmr.msra.gmra.mrb[208].mxu0 %vm30_vm1, %v5710_v22  ;;  %9051 = vmatmul.mubr.msk.bf16.vlgmr.msra.gmra.mrb[208].mxu1 %vm30_vm1, %v5710_v22 }
0x18f8   :  { %9055 = vmatpush3.bf16.msra.mxu0 %v11142_v59  ;;  %9063 = vmatpush3.bf16.msra.mxu1 %v11148_v62 }
0x18f9   :  { %9056 = vmatprep.subr.bf16.mxu0 %v9908_v1  ;;  %9064 = vmatprep.subr.bf16.mxu1 %v9908_v1 }
0x18fa   :  { %9058 = vmatprep.mubr.msk.bf16.mxu0 %vm9909_vm0, %v9908_v1  ;;  %9066 = vmatprep.mubr.msk.bf16.mxu1 %vm9909_vm0, %v9908_v1 }
0x18fc   :  { %9057 = vmatpush3.bf16.msra.mxu0 %v11160_v63  ;;  %9065 = vmatpush3.bf16.msra.mxu1 %v11166_v0 }
0x18fd   :  { %9070 = vmatprep.subr.bf16.mxu0 %v9908_v1  ;;  %9078 = vmatprep.subr.bf16.mxu1 %v9908_v1 }
0x18ff   :  { %9059 = vmatmul.mubr.msk.bf16.vlgmr.msra.gmra.mrb[212].mxu0 %vm30_vm1, %v5710_v22  ;;  %9067 = vmatmul.mubr.msk.bf16.vlgmr.msra.gmra.mrb[212].mxu1 %vm30_vm1, %v5710_v22 }
0x1900   :  { %9071 = vmatpush3.bf16.msra.mxu0 %v11100_v7  ;;  %9079 = vmatpush3.bf16.msra.mxu1 %v11106_v8 }
0x1901   :  { %9072 = vmatprep.subr.bf16.mxu0 %v9908_v1  ;;  %9080 = vmatprep.subr.bf16.mxu1 %v9908_v1 }
0x1902   :  { %9074 = vmatprep.mubr.msk.bf16.mxu0 %vm9909_vm0, %v9908_v1  ;;  %9082 = vmatprep.mubr.msk.bf16.mxu1 %vm9909_vm0, %v9908_v1 }
0x1904   :  { %9073 = vmatpush3.bf16.msra.mxu0 %v11118_v10  ;;  %9081 = vmatpush3.bf16.msra.mxu1 %v11124_v12 }
0x1905   :  { %9086 = vmatprep.subr.bf16.mxu0 %v9908_v1  ;;  %9094 = vmatprep.subr.bf16.mxu1 %v9908_v1 }
0x19ca   :  { %v5748_v56 = vpop.f32.mrb[208].mxu0  ;;  %v5795_v57 = vpop.f32.mrb[208].mxu1 }
0x19cb   :  { %v5754_v43 = vadd.f32 %v5748_v56, %v10872_v37  ;;  %v5801_v58 = vadd.f32 %v5795_v57, %v10874_v29  ;;  %v9044_v60 = vpop.f32.mrb[209].mxu0  ;;  %v9052_v61 = vpop.f32.mrb[209].mxu1 }
0x19cc   :  { %v5751_v39 = vpop.f32.mrb[210].mxu0  ;;  %v5798_v2 = vpop.f32.mrb[210].mxu1 }
0x19cd   :  { %v7736_v9 = vmul.f32 -1.442695, %v5754_v43  ;;  %v7738_v23 = vmul.f32 -1.442695, %v5801_v58  ;;  %v9045_v24 = vpop.f32.mrb[211].mxu0  ;;  %v9053_v14 = vpop.f32.mrb[211].mxu1 }
0x19cf   :  { %9724 = vpow2.f32 %v7736_v9 }
0x19d0   :  { %9726 = vpow2.f32 %v7738_v23 }
0x19d2   :  { %v5842_v3 = vpop.f32.mrb[212].mxu0  ;;  %v5884_v4 = vpop.f32.mrb[212].mxu1 }
0x19d3   :  { %v5890_v20 = vadd.f32 %v5884_v4, %v10884_v17  ;;  %v9060_v15 = vpop.f32.mrb[213].mxu0  ;;  %v9068_v40 = vpop.f32.mrb[213].mxu1  ;;  %v5848_v28 = vadd.f32 %v5842_v3, %v10882_v42 }
0x19d4   :  { %v5845_v13 = vpop.f32.mrb[214].mxu0  ;;  %v5887_v18 = vpop.f32.mrb[214].mxu1 }
0x19d5   :  { %v9061_v26 = vpop.f32.mrb[215].mxu0  ;;  %v9069_v19 = vpop.f32.mrb[215].mxu1  ;;  %v7741_v27 = vmul.f32 -1.442695, %v5890_v20 }
0x19d7   :  { %9728 = vpow2.f32 %v7741_v27 }
0x19d8   :  { %9730 = vtanh.f32 %v5848_v28 }
0x19d9   :  { %v9725_v6 = vpop.eup %9724 }
0x19da   :  { %v9727_v33 = vpop.eup %9726  ;;  %v5758_v5 = vadd.f32 1.0, %v9725_v6 }
0x19db   :  { %v5805_v38 = vadd.f32 1.0, %v9727_v33 }
0x19dc   :  { %9732 = vrcp.f32 %v5758_v5 }
0x19dd   :  { %9734 = vrcp.f32 %v5805_v38 }
0x19e1   :  { %v9729_v41 = vpop.eup %9728 }
0x19e2   :  { %v9731_v11 = vpop.eup %9730  ;;  %v5894_v51 = vadd.f32 1.0, %v9729_v41 }
0x19e4   :  { %9736 = vrcp.f32 %v5894_v51 }
0x19e6   :  { %v9733_v49 = vpop.eup %9732 }
0x19e7   :  { %v9735_v25 = vpop.eup %9734  ;;  %v5901_v46 = vmul.f32 %v9733_v49, %v9731_v11 }
0x19e8   :  { %v5900_v16 = vmul.f32 %v9735_v25, %v5898_v45 }
0x19ea   :  { %v11226_v52 = vadd.f32 %v5901_v46, %v5900_v16 }
0x19ec   :  { %9738 = vtanh.f32 %v11226_v52  ;;  %v6105_v6 = vrot.slane %v11226_v52, 7 }
0x19ee   :  { %v9737_v31 = vpop.eup %9736 }
0x19f6   :  { %v9739_v30 = vpop.eup %9738 }
0x19f7   :  { %v5904_v32 = vmul.f32 %v9739_v30, %v9737_v31 }
0x19f9   :  { %v5905_v34 = vpack.c.bf16 %v5904_v32, %v5904_v32 }
0x19fb   :  { %9075 = vmatmul.mubr.msk.bf16.vlgmr.msra.gmra.mrb[216].mxu0 %vm30_vm1, %v5905_v34  ;;  %9083 = vmatmul.mubr.msk.bf16.vlgmr.msra.gmra.mrb[216].mxu1 %vm30_vm1, %v5905_v34 }
0x19fc   :  { %9087 = vmatpush3.bf16.msra.mxu0 %v11142_v59  ;;  %9095 = vmatpush3.bf16.msra.mxu1 %v11148_v62 }
0x19fd   :  { %9088 = vmatprep.subr.bf16.mxu0 %v9908_v1  ;;  %9096 = vmatprep.subr.bf16.mxu1 %v9908_v1 }
0x19fe   :  { %9090 = vmatprep.mubr.msk.bf16.mxu0 %vm9909_vm0, %v9908_v1  ;;  %9098 = vmatprep.mubr.msk.bf16.mxu1 %vm9909_vm0, %v9908_v1 }
0x1a00   :  { %9089 = vmatpush3.bf16.msra.mxu0 %v11160_v63  ;;  %9097 = vmatpush3.bf16.msra.mxu1 %v11166_v0 }
0x1a01   :  { %9102 = vmatprep.subr.bf16.mxu0 %v9908_v1  ;;  %9110 = vmatprep.subr.bf16.mxu1 %v9908_v1 }
0x1a03   :  { %9091 = vmatmul.mubr.msk.bf16.vlgmr.msra.gmra.mrb[220].mxu0 %vm30_vm1, %v5905_v34  ;;  %9099 = vmatmul.mubr.msk.bf16.vlgmr.msra.gmra.mrb[220].mxu1 %vm30_vm1, %v5905_v34 }
0x1a04   :  { %9103 = vmatpush3.bf16.msra.mxu0 %v11100_v7  ;;  %9111 = vmatpush3.bf16.msra.mxu1 %v11106_v8 }
0x1a05   :  { %9104 = vmatprep.subr.bf16.mxu0 %v9908_v1  ;;  %9112 = vmatprep.subr.bf16.mxu1 %v9908_v1 }
0x1a06   :  { %9106 = vmatprep.mubr.msk.bf16.mxu0 %vm9909_vm0, %v9908_v1  ;;  %9114 = vmatprep.mubr.msk.bf16.mxu1 %vm9909_vm0, %v9908_v1 }
0x1a08   :  { %9105 = vmatpush3.bf16.msra.mxu0 %v11118_v10  ;;  %9113 = vmatpush3.bf16.msra.mxu1 %v11124_v12 }
0x1a09   :  { %9118 = vmatprep.subr.bf16.mxu0 %v9908_v1  ;;  %9126 = vmatprep.subr.bf16.mxu1 %v9908_v1 }
0x1ace   :  { %v5943_v35 = vpop.f32.mrb[216].mxu0  ;;  %v5993_v48 = vpop.f32.mrb[216].mxu1 }
0x1acf   :  { %v5950_v21 = vrot.slane %v5943_v35, 7  ;;  %v6000_v50 = vrot.slane %v5993_v48, 7  ;;  %v9076_v53 = vpop.f32.mrb[217].mxu0  ;;  %v9084_v36 = vpop.f32.mrb[217].mxu1 }
0x1ad0   :  { %v5946_v47 = vpop.f32.mrb[218].mxu0  ;;  %v5996_v54 = vpop.f32.mrb[218].mxu1 }
0x1ad1   :  { %v5952_v55 = vadd.f32 %v5950_v21, %v10872_v37  ;;  %v6002_v44 = vadd.f32 %v6000_v50, %v10874_v29  ;;  %v9077_v22 = vpop.f32.mrb[219].mxu0  ;;  %v9085_v56 = vpop.f32.mrb[219].mxu1 }
0x1ad3   :  { %v7743_v57 = vmul.f32 -1.442695, %v5952_v55  ;;  %v7745_v43 = vmul.f32 -1.442695, %v6002_v44 }
0x1ad5   :  { %9740 = vpow2.f32 %v7743_v57 }
0x1ad6   :  { %9742 = vpow2.f32 %v7745_v43  ;;  %v6043_v58 = vpop.f32.mrb[220].mxu0  ;;  %v6088_v60 = vpop.f32.mrb[220].mxu1 }
0x1ad7   :  { %v6095_v61 = vrot.slane %v6088_v60, 7  ;;  %v9092_v39 = vpop.f32.mrb[221].mxu0  ;;  %v9100_v2 = vpop.f32.mrb[221].mxu1  ;;  %v6050_v24 = vrot.slane %v6043_v58, 7 }
0x1ad8   :  { %v6046_v9 = vpop.f32.mrb[222].mxu0  ;;  %v6091_v23 = vpop.f32.mrb[222].mxu1 }
0x1ad9   :  { %v6097_v14 = vadd.f32 %v6095_v61, %v10884_v17  ;;  %v9093_v3 = vpop.f32.mrb[223].mxu0  ;;  %v9101_v4 = vpop.f32.mrb[223].mxu1  ;;  %v6052_v15 = vadd.f32 %v6050_v24, %v10882_v42 }
0x1adb   :  { %v7748_v20 = vmul.f32 -1.442695, %v6097_v14 }
0x1add   :  { %9744 = vpow2.f32 %v7748_v20 }
0x1ade   :  { %9746 = vtanh.f32 %v6052_v15 }
0x1adf   :  { %v9741_v40 = vpop.eup %9740 }
0x1ae0   :  { %v9743_v13 = vpop.eup %9742  ;;  %v5956_v18 = vadd.f32 1.0, %v9741_v40 }
0x1ae1   :  { %v6006_v26 = vadd.f32 1.0, %v9743_v13 }
0x1ae2   :  { %9748 = vrcp.f32 %v5956_v18 }
0x1ae3   :  { %9750 = vrcp.f32 %v6006_v26 }
0x1ae7   :  { %v9745_v19 = vpop.eup %9744 }
0x1ae8   :  { %v9747_v27 = vpop.eup %9746  ;;  %v6101_v38 = vadd.f32 1.0, %v9745_v19 }
0x1aea   :  { %9752 = vrcp.f32 %v6101_v38 }
0x1aec   :  { %v9749_v28 = vpop.eup %9748 }
0x1aed   :  { %v9751_v33 = vpop.eup %9750  ;;  %v6108_v5 = vmul.f32 %v9749_v28, %v9747_v27 }
0x1aee   :  { %v6107_v41 = vmul.f32 %v9751_v33, %v6105_v6 }
0x1af0   :  { %v11262_v11 = vadd.f32 %v6108_v5, %v6107_v41 }
0x1af2   :  { %9754 = vtanh.f32 %v11262_v11  ;;  %v6315_v13 = vrot.slane %v11262_v11, 7 }
0x1af4   :  { %v9753_v49 = vpop.eup %9752 }
0x1afc   :  { %v9755_v45 = vpop.eup %9754 }
0x1afd   :  { %v6111_v25 = vmul.f32 %v9755_v45, %v9753_v49 }
0x1aff   :  { %v6112_v46 = vpack.c.bf16 %v6111_v25, %v6111_v25 }
0x1b01   :  { %v6114_v51 = vshrl.u32 %v6112_v46, 16 }
0x1b03   :  { %9107 = vmatmul.mubr.msk.bf16.vlgmr.msra.gmra.mrb[224].mxu0 %vm30_vm1, %v6114_v51  ;;  %9115 = vmatmul.mubr.msk.bf16.vlgmr.msra.gmra.mrb[224].mxu1 %vm30_vm1, %v6114_v51 }
0x1b04   :  { %9119 = vmatpush3.bf16.msra.mxu0 %v11142_v59  ;;  %9127 = vmatpush3.bf16.msra.mxu1 %v11148_v62 }
0x1b05   :  { %9120 = vmatprep.subr.bf16.mxu0 %v9908_v1  ;;  %9128 = vmatprep.subr.bf16.mxu1 %v9908_v1 }
0x1b06   :  { %9122 = vmatprep.mubr.msk.bf16.mxu0 %vm9909_vm0, %v9908_v1  ;;  %9130 = vmatprep.mubr.msk.bf16.mxu1 %vm9909_vm0, %v9908_v1 }
0x1b08   :  { %9121 = vmatpush3.bf16.msra.mxu0 %v11160_v63  ;;  %9129 = vmatpush3.bf16.msra.mxu1 %v11166_v0 }
0x1b09   :  { %9134 = vmatprep.subr.bf16.mxu0 %v9908_v1  ;;  %9142 = vmatprep.subr.bf16.mxu1 %v9908_v1 }
0x1b0b   :  { %9123 = vmatmul.mubr.msk.bf16.vlgmr.msra.gmra.mrb[228].mxu0 %vm30_vm1, %v6114_v51  ;;  %9131 = vmatmul.mubr.msk.bf16.vlgmr.msra.gmra.mrb[228].mxu1 %vm30_vm1, %v6114_v51 }
0x1b0c   :  { %9135 = vmatpush3.bf16.msra.mxu0 %v11100_v7  ;;  %9143 = vmatpush3.bf16.msra.mxu1 %v11106_v8 }
0x1b0d   :  { %9136 = vmatprep.subr.bf16.mxu0 %v9908_v1  ;;  %9144 = vmatprep.subr.bf16.mxu1 %v9908_v1 }
0x1b0e   :  { %9138 = vmatprep.mubr.msk.bf16.mxu0 %vm9909_vm0, %v9908_v1  ;;  %9146 = vmatprep.mubr.msk.bf16.mxu1 %vm9909_vm0, %v9908_v1 }
0x1b10   :  { %9137 = vmatpush3.bf16.msra.mxu0 %v11118_v10  ;;  %9145 = vmatpush3.bf16.msra.mxu1 %v11124_v12 }
0x1b11   :  { %9150 = vmatprep.subr.bf16.mxu0 %v9908_v1  ;;  %9158 = vmatprep.subr.bf16.mxu1 %v9908_v1 }
0x1bd6   :  { %v6153_v16 = vpop.f32.mrb[224].mxu0  ;;  %v6203_v52 = vpop.f32.mrb[224].mxu1 }
0x1bd7   :  { %v6160_v31 = vrot.slane %v6153_v16, 6  ;;  %v6210_v30 = vrot.slane %v6203_v52, 6  ;;  %v9108_v32 = vpop.f32.mrb[225].mxu0  ;;  %v9116_v34 = vpop.f32.mrb[225].mxu1 }
0x1bd8   :  { %v6156_v35 = vpop.f32.mrb[226].mxu0  ;;  %v6206_v48 = vpop.f32.mrb[226].mxu1 }
0x1bd9   :  { %v6162_v21 = vadd.f32 %v6160_v31, %v10872_v37  ;;  %v6212_v50 = vadd.f32 %v6210_v30, %v10874_v29  ;;  %v9109_v53 = vpop.f32.mrb[227].mxu0  ;;  %v9117_v36 = vpop.f32.mrb[227].mxu1 }
0x1bdb   :  { %v7750_v47 = vmul.f32 -1.442695, %v6162_v21  ;;  %v7752_v54 = vmul.f32 -1.442695, %v6212_v50 }
0x1bdd   :  { %9756 = vpow2.f32 %v7750_v47 }
0x1bde   :  { %9758 = vpow2.f32 %v7752_v54  ;;  %v6253_v55 = vpop.f32.mrb[228].mxu0  ;;  %v6298_v44 = vpop.f32.mrb[228].mxu1 }
0x1bdf   :  { %v6305_v22 = vrot.slane %v6298_v44, 6  ;;  %v9124_v56 = vpop.f32.mrb[229].mxu0  ;;  %v9132_v57 = vpop.f32.mrb[229].mxu1  ;;  %v6260_v60 = vrot.slane %v6253_v55, 6 }
0x1be0   :  { %v6256_v43 = vpop.f32.mrb[230].mxu0  ;;  %v6301_v58 = vpop.f32.mrb[230].mxu1 }
0x1be1   :  { %v6307_v61 = vadd.f32 %v6305_v22, %v10884_v17  ;;  %v9125_v39 = vpop.f32.mrb[231].mxu0  ;;  %v9133_v2 = vpop.f32.mrb[231].mxu1  ;;  %v6262_v23 = vadd.f32 %v6260_v60, %v10882_v42 }
0x1be3   :  { %v7755_v9 = vmul.f32 -1.442695, %v6307_v61 }
0x1be5   :  { %9760 = vpow2.f32 %v7755_v9 }
0x1be6   :  { %9762 = vtanh.f32 %v6262_v23 }
0x1be7   :  { %v9757_v24 = vpop.eup %9756 }
0x1be8   :  { %v9759_v14 = vpop.eup %9758  ;;  %v6166_v3 = vadd.f32 1.0, %v9757_v24 }
0x1be9   :  { %v6216_v4 = vadd.f32 1.0, %v9759_v14 }
0x1bea   :  { %9764 = vrcp.f32 %v6166_v3 }
0x1beb   :  { %9766 = vrcp.f32 %v6216_v4 }
0x1bef   :  { %v9761_v20 = vpop.eup %9760 }
0x1bf0   :  { %v9763_v15 = vpop.eup %9762  ;;  %v6311_v19 = vadd.f32 1.0, %v9761_v20 }
0x1bf2   :  { %9768 = vrcp.f32 %v6311_v19 }
0x1bf4   :  { %v9765_v40 = vpop.eup %9764 }
0x1bf5   :  { %v9767_v18 = vpop.eup %9766  ;;  %v6318_v26 = vmul.f32 %v9765_v40, %v9763_v15 }
0x1bf6   :  { %v6317_v27 = vmul.f32 %v9767_v18, %v6315_v13 }
0x1bf8   :  { %v11298_v28 = vadd.f32 %v6318_v26, %v6317_v27 }
0x1bfa   :  { %9770 = vtanh.f32 %v11298_v28  ;;  %v6524_v14 = vrot.slane %v11298_v28, 7 }
0x1bfc   :  { %v9769_v6 = vpop.eup %9768 }
0x1c04   :  { %v9771_v33 = vpop.eup %9770 }
0x1c05   :  { %v6321_v5 = vmul.f32 %v9771_v33, %v9769_v6 }
0x1c07   :  { %v6322_v38 = vpack.c.bf16 %v6321_v5, %v6321_v5 }
0x1c09   :  { %v6324_v41 = vrot.slane %v6322_v38, 1 }
0x1c0b   :  { %9139 = vmatmul.mubr.msk.bf16.vlgmr.msra.gmra.mrb[232].mxu0 %vm30_vm1, %v6324_v41  ;;  %9147 = vmatmul.mubr.msk.bf16.vlgmr.msra.gmra.mrb[232].mxu1 %vm30_vm1, %v6324_v41 }
0x1c0c   :  { %9151 = vmatpush3.bf16.msra.mxu0 %v11142_v59  ;;  %9159 = vmatpush3.bf16.msra.mxu1 %v11148_v62 }
0x1c0d   :  { %9152 = vmatprep.subr.bf16.mxu0 %v9908_v1  ;;  %9160 = vmatprep.subr.bf16.mxu1 %v9908_v1 }
0x1c0e   :  { %9154 = vmatprep.mubr.msk.bf16.mxu0 %vm9909_vm0, %v9908_v1  ;;  %9162 = vmatprep.mubr.msk.bf16.mxu1 %vm9909_vm0, %v9908_v1 }
0x1c10   :  { %9153 = vmatpush3.bf16.msra.mxu0 %v11160_v63  ;;  %9161 = vmatpush3.bf16.msra.mxu1 %v11166_v0 }
0x1c11   :  { %9166 = vmatprep.subr.bf16.mxu0 %v9908_v1  ;;  %9174 = vmatprep.subr.bf16.mxu1 %v9908_v1 }
0x1c13   :  { %9155 = vmatmul.mubr.msk.bf16.vlgmr.msra.gmra.mrb[236].mxu0 %vm30_vm1, %v6324_v41  ;;  %9163 = vmatmul.mubr.msk.bf16.vlgmr.msra.gmra.mrb[236].mxu1 %vm30_vm1, %v6324_v41 }
0x1c14   :  { %9167 = vmatpush3.bf16.msra.mxu0 %v11100_v7  ;;  %9175 = vmatpush3.bf16.msra.mxu1 %v11106_v8 }
0x1c15   :  { %9168 = vmatprep.subr.bf16.mxu0 %v9908_v1  ;;  %9176 = vmatprep.subr.bf16.mxu1 %v9908_v1 }
0x1c16   :  { %9170 = vmatprep.mubr.msk.bf16.mxu0 %vm9909_vm0, %v9908_v1  ;;  %9178 = vmatprep.mubr.msk.bf16.mxu1 %vm9909_vm0, %v9908_v1 }
0x1c18   :  { %9169 = vmatpush3.bf16.msra.mxu0 %v11118_v10  ;;  %9177 = vmatpush3.bf16.msra.mxu1 %v11124_v12 }
0x1c19   :  { %9182 = vmatprep.subr.bf16.mxu0 %v9908_v1  ;;  %9190 = vmatprep.subr.bf16.mxu1 %v9908_v1 }
0x1cde   :  { %v6362_v11 = vpop.f32.mrb[232].mxu0  ;;  %v6412_v49 = vpop.f32.mrb[232].mxu1 }
0x1cdf   :  { %v6369_v45 = vrot.slane %v6362_v11, 5  ;;  %v6419_v25 = vrot.slane %v6412_v49, 5  ;;  %v9140_v46 = vpop.f32.mrb[233].mxu0  ;;  %v9148_v51 = vpop.f32.mrb[233].mxu1 }
0x1ce0   :  { %v6365_v16 = vpop.f32.mrb[234].mxu0  ;;  %v6415_v52 = vpop.f32.mrb[234].mxu1 }
0x1ce1   :  { %v6371_v31 = vadd.f32 %v6369_v45, %v10872_v37  ;;  %v6421_v30 = vadd.f32 %v6419_v25, %v10874_v29  ;;  %v9141_v32 = vpop.f32.mrb[235].mxu0  ;;  %v9149_v34 = vpop.f32.mrb[235].mxu1 }
0x1ce3   :  { %v7757_v35 = vmul.f32 -1.442695, %v6371_v31  ;;  %v7759_v48 = vmul.f32 -1.442695, %v6421_v30 }
0x1ce5   :  { %9772 = vpow2.f32 %v7757_v35 }
0x1ce6   :  { %9774 = vpow2.f32 %v7759_v48  ;;  %v6462_v21 = vpop.f32.mrb[236].mxu0  ;;  %v6507_v50 = vpop.f32.mrb[236].mxu1 }
0x1ce7   :  { %v6514_v53 = vrot.slane %v6507_v50, 5  ;;  %v9156_v36 = vpop.f32.mrb[237].mxu0  ;;  %v9164_v47 = vpop.f32.mrb[237].mxu1  ;;  %v6469_v44 = vrot.slane %v6462_v21, 5 }
0x1ce8   :  { %v6465_v54 = vpop.f32.mrb[238].mxu0  ;;  %v6510_v55 = vpop.f32.mrb[238].mxu1 }
0x1ce9   :  { %v6516_v22 = vadd.f32 %v6514_v53, %v10884_v17  ;;  %v9157_v56 = vpop.f32.mrb[239].mxu0  ;;  %v9165_v57 = vpop.f32.mrb[239].mxu1  ;;  %v6471_v58 = vadd.f32 %v6469_v44, %v10882_v42 }
0x1ceb   :  { %v7762_v43 = vmul.f32 -1.442695, %v6516_v22 }
0x1ced   :  { %9776 = vpow2.f32 %v7762_v43 }
0x1cee   :  { %9778 = vtanh.f32 %v6471_v58 }
0x1cef   :  { %v9773_v60 = vpop.eup %9772 }
0x1cf0   :  { %v9775_v61 = vpop.eup %9774  ;;  %v6375_v39 = vadd.f32 1.0, %v9773_v60 }
0x1cf1   :  { %v6425_v2 = vadd.f32 1.0, %v9775_v61 }
0x1cf2   :  { %9780 = vrcp.f32 %v6375_v39 }
0x1cf3   :  { %9782 = vrcp.f32 %v6425_v2 }
0x1cf7   :  { %v9777_v9 = vpop.eup %9776 }
0x1cf8   :  { %v9779_v23 = vpop.eup %9778  ;;  %v6520_v20 = vadd.f32 1.0, %v9777_v9 }
0x1cfa   :  { %9784 = vrcp.f32 %v6520_v20 }
0x1cfc   :  { %v9781_v24 = vpop.eup %9780 }
0x1cfd   :  { %v9783_v3 = vpop.eup %9782  ;;  %v6527_v4 = vmul.f32 %v9781_v24, %v9779_v23 }
0x1cfe   :  { %v6526_v15 = vmul.f32 %v9783_v3, %v6524_v14 }
0x1d00   :  { %v11334_v40 = vadd.f32 %v6527_v4, %v6526_v15 }
0x1d02   :  { %9786 = vtanh.f32 %v11334_v40  ;;  %v6735_v43 = vrot.slane %v11334_v40, 7 }
0x1d04   :  { %v9785_v13 = vpop.eup %9784 }
0x1d0c   :  { %v9787_v18 = vpop.eup %9786 }
0x1d0d   :  { %v6530_v26 = vmul.f32 %v9787_v18, %v9785_v13 }
0x1d0f   :  { %v6531_v19 = vpack.c.bf16 %v6530_v26, %v6530_v26 }
0x1d11   :  { %v6533_v27 = vshrl.u32 %v6531_v19, 16 }
0x1d13   :  { %v6535_v6 = vrot.slane %v6533_v27, 1 }
0x1d15   :  { %9171 = vmatmul.mubr.msk.bf16.vlgmr.msra.gmra.mrb[240].mxu0 %vm30_vm1, %v6535_v6  ;;  %9179 = vmatmul.mubr.msk.bf16.vlgmr.msra.gmra.mrb[240].mxu1 %vm30_vm1, %v6535_v6 }
0x1d16   :  { %9183 = vmatpush3.bf16.msra.mxu0 %v11142_v59  ;;  %9191 = vmatpush3.bf16.msra.mxu1 %v11148_v62 }
0x1d17   :  { %9184 = vmatprep.subr.bf16.mxu0 %v9908_v1  ;;  %9192 = vmatprep.subr.bf16.mxu1 %v9908_v1 }
0x1d18   :  { %9186 = vmatprep.mubr.msk.bf16.mxu0 %vm9909_vm0, %v9908_v1  ;;  %9194 = vmatprep.mubr.msk.bf16.mxu1 %vm9909_vm0, %v9908_v1 }
0x1d1a   :  { %9185 = vmatpush3.bf16.msra.mxu0 %v11160_v63  ;;  %9193 = vmatpush3.bf16.msra.mxu1 %v11166_v0 }
0x1d1b   :  { %9198 = vmatprep.subr.bf16.mxu0 %v9908_v1  ;;  %9206 = vmatprep.subr.bf16.mxu1 %v9908_v1 }
0x1d1d   :  { %9187 = vmatmul.mubr.msk.bf16.vlgmr.msra.gmra.mrb[244].mxu0 %vm30_vm1, %v6535_v6  ;;  %9195 = vmatmul.mubr.msk.bf16.vlgmr.msra.gmra.mrb[244].mxu1 %vm30_vm1, %v6535_v6 }
0x1d1e   :  { %9199 = vmatpush3.bf16.msra.mxu0 %v11100_v7  ;;  %9207 = vmatpush3.bf16.msra.mxu1 %v11106_v8 }
0x1d1f   :  { %9200 = vmatprep.subr.bf16.mxu0 %v9908_v1  ;;  %9208 = vmatprep.subr.bf16.mxu1 %v9908_v1 }
0x1d20   :  { %9202 = vmatprep.mubr.msk.bf16.mxu0 %vm9909_vm0, %v9908_v1  ;;  %9210 = vmatprep.mubr.msk.bf16.mxu1 %vm9909_vm0, %v9908_v1 }
0x1d22   :  { %9201 = vmatpush3.bf16.msra.mxu0 %v11118_v10  ;;  %9209 = vmatpush3.bf16.msra.mxu1 %v11124_v12 }
0x1d23   :  { %9214 = vmatprep.subr.bf16.mxu0 %v9908_v1  ;;  %9222 = vmatprep.subr.bf16.mxu1 %v9908_v1 }
0x1de8   :  { %v6573_v7 = vpop.f32.mrb[240].mxu0  ;;  %v6623_v8 = vpop.f32.mrb[240].mxu1 }
0x1de9   :  { %v6580_v28 = vrot.slane %v6573_v7, 4  ;;  %v6630_v33 = vrot.slane %v6623_v8, 4  ;;  %v9172_v5 = vpop.f32.mrb[241].mxu0  ;;  %v9180_v38 = vpop.f32.mrb[241].mxu1 }
0x1dea   :  { %v6576_v41 = vpop.f32.mrb[242].mxu0  ;;  %v6626_v11 = vpop.f32.mrb[242].mxu1 }
0x1deb   :  { %v6582_v49 = vadd.f32 %v6580_v28, %v10872_v37  ;;  %v6632_v45 = vadd.f32 %v6630_v33, %v10874_v29  ;;  %v9173_v25 = vpop.f32.mrb[243].mxu0  ;;  %v9181_v10 = vpop.f32.mrb[243].mxu1 }
0x1ded   :  { %v7764_v46 = vmul.f32 -1.442695, %v6582_v49  ;;  %v7766_v12 = vmul.f32 -1.442695, %v6632_v45 }
0x1def   :  { %9788 = vpow2.f32 %v7764_v46 }
0x1df0   :  { %9790 = vpow2.f32 %v7766_v12  ;;  %v6673_v51 = vpop.f32.mrb[244].mxu0  ;;  %v6718_v16 = vpop.f32.mrb[244].mxu1 }
0x1df1   :  { %v6725_v52 = vrot.slane %v6718_v16, 4  ;;  %v9188_v31 = vpop.f32.mrb[245].mxu0  ;;  %v9196_v30 = vpop.f32.mrb[245].mxu1  ;;  %v6680_v35 = vrot.slane %v6673_v51, 4 }
0x1df2   :  { %v6676_v32 = vpop.f32.mrb[246].mxu0  ;;  %v6721_v34 = vpop.f32.mrb[246].mxu1 }
0x1df3   :  { %v6727_v48 = vadd.f32 %v6725_v52, %v10884_v17  ;;  %v9189_v21 = vpop.f32.mrb[247].mxu0  ;;  %v9197_v50 = vpop.f32.mrb[247].mxu1  ;;  %v6682_v36 = vadd.f32 %v6680_v35, %v10882_v42 }
0x1df5   :  { %v7769_v53 = vmul.f32 -1.442695, %v6727_v48 }
0x1df7   :  { %9792 = vpow2.f32 %v7769_v53 }
0x1df8   :  { %9794 = vtanh.f32 %v6682_v36 }
0x1df9   :  { %v9789_v47 = vpop.eup %9788 }
0x1dfa   :  { %v9791_v54 = vpop.eup %9790  ;;  %v6586_v55 = vadd.f32 1.0, %v9789_v47 }
0x1dfb   :  { %v6636_v44 = vadd.f32 1.0, %v9791_v54 }
0x1dfc   :  { %9796 = vrcp.f32 %v6586_v55 }
0x1dfd   :  { %9798 = vrcp.f32 %v6636_v44 }
0x1e01   :  { %v9793_v22 = vpop.eup %9792 }
0x1e02   :  { %v9795_v56 = vpop.eup %9794  ;;  %v6731_v61 = vadd.f32 1.0, %v9793_v22 }
0x1e04   :  { %9800 = vrcp.f32 %v6731_v61  ;;  %v11440_v61 = vld [vmem:[%s11540_s2 + $0x70] sm:$0xff]  }
0x1e06   :  { %v9797_v57 = vpop.eup %9796 }
0x1e07   :  { %v9799_v58 = vpop.eup %9798  ;;  %v6738_v60 = vmul.f32 %v9797_v57, %v9795_v56 }
0x1e08   :  { %v6737_v39 = vmul.f32 %v9799_v58, %v6735_v43 }
0x1e0a   :  { %v11370_v2 = vadd.f32 %v6738_v60, %v6737_v39  ;;  %v11434_v60 = vld [vmem:[%s11540_s2 + $0x60] sm:$0xff]   ;;  %v11452_v39 = vld [vmem:[%s11540_s2 + $0x68] sm:$0xff]  }
0x1e0c   :  { %9802 = vtanh.f32 %v11370_v2  ;;  %v6944_v50 = vrot.slane %v11370_v2, 7  ;;  %v11458_v2 = vld [vmem:[%s11540_s2 + $0x78] sm:$0xff]  }
0x1e0e   :  { %v9801_v9 = vpop.eup %9800 }
0x1e16   :  { %v9803_v23 = vpop.eup %9802 }
0x1e17   :  { %v6741_v24 = vmul.f32 %v9803_v23, %v9801_v9 }
0x1e19   :  { %v6742_v14 = vpack.c.bf16 %v6741_v24, %v6741_v24 }
0x1e1b   :  { %v6744_v3 = vrot.slane %v6742_v14, 2 }
0x1e1d   :  { %9203 = vmatmul.mubr.msk.bf16.vlgmr.msra.gmra.mrb[248].mxu0 %vm30_vm1, %v6744_v3  ;;  %9211 = vmatmul.mubr.msk.bf16.vlgmr.msra.gmra.mrb[248].mxu1 %vm30_vm1, %v6744_v3 }
0x1e1e   :  { %9215 = vmatpush3.bf16.msra.mxu0 %v11142_v59  ;;  %9223 = vmatpush3.bf16.msra.mxu1 %v11148_v62  ;;  %v11392_v59 = vld [vmem:[%s11540_s2 + $0x40] sm:$0xff]   ;;  %v11398_v62 = vld [vmem:[%s11540_s2 + $0x50] sm:$0xff]  }
0x1e1f   :  { %9216 = vmatprep.subr.bf16.mxu0 %v9908_v1  ;;  %9224 = vmatprep.subr.bf16.mxu1 %v9908_v1 }
0x1e20   :  { %9218 = vmatprep.mubr.msk.bf16.mxu0 %vm9909_vm0, %v9908_v1  ;;  %9226 = vmatprep.mubr.msk.bf16.mxu1 %vm9909_vm0, %v9908_v1 }
0x1e22   :  { %9217 = vmatpush3.bf16.msra.mxu0 %v11160_v63  ;;  %9225 = vmatpush3.bf16.msra.mxu1 %v11166_v0  ;;  %v11410_v63 = vld [vmem:[%s11540_s2 + $0x48] sm:$0xff]   ;;  %v11416_v0 = vld [vmem:[%s11540_s2 + $0x58] sm:$0xff]  }
0x1e23   :  { %9230 = vmatprep.subr.bf16.mxu0 %v9908_v1  ;;  %9238 = vmatprep.subr.bf16.mxu1 %v9908_v1 }
0x1e25   :  { %9219 = vmatmul.mubr.msk.bf16.vlgmr.msra.gmra.mrb[252].mxu0 %vm30_vm1, %v6744_v3  ;;  %9227 = vmatmul.mubr.msk.bf16.vlgmr.msra.gmra.mrb[252].mxu1 %vm30_vm1, %v6744_v3 }
0x1e26   :  { %9231 = vmatpush3.bf16.msra.mxu0 %v11392_v59  ;;  %9239 = vmatpush3.bf16.msra.mxu1 %v11398_v62 }
0x1e27   :  { %9232 = vmatprep.subr.bf16.mxu0 %v9908_v1  ;;  %9240 = vmatprep.subr.bf16.mxu1 %v9908_v1 }
0x1e28   :  { %9234 = vmatprep.mubr.msk.bf16.mxu0 %vm9909_vm0, %v9908_v1  ;;  %9242 = vmatprep.mubr.msk.bf16.mxu1 %vm9909_vm0, %v9908_v1 }
0x1e2a   :  { %9233 = vmatpush3.bf16.msra.mxu0 %v11410_v63  ;;  %9241 = vmatpush3.bf16.msra.mxu1 %v11416_v0 }
0x1e2b   :  { %9246 = vmatprep.subr.bf16.mxu0 %v9908_v1  ;;  %9254 = vmatprep.subr.bf16.mxu1 %v9908_v1 }
0x1ef0   :  { %v6782_v4 = vpop.f32.mrb[248].mxu0  ;;  %v6832_v20 = vpop.f32.mrb[248].mxu1 }
0x1ef1   :  { %v6789_v15 = vrot.slane %v6782_v4, 3  ;;  %v6839_v40 = vrot.slane %v6832_v20, 3  ;;  %v9204_v13 = vpop.f32.mrb[249].mxu0  ;;  %v9212_v18 = vpop.f32.mrb[249].mxu1 }
0x1ef2   :  { %v6785_v26 = vpop.f32.mrb[250].mxu0  ;;  %v6835_v19 = vpop.f32.mrb[250].mxu1 }
0x1ef3   :  { %v6791_v27 = vadd.f32 %v6789_v15, %v10872_v37  ;;  %v6841_v6 = vadd.f32 %v6839_v40, %v10874_v29  ;;  %v9205_v7 = vpop.f32.mrb[251].mxu0  ;;  %v9213_v8 = vpop.f32.mrb[251].mxu1 }
0x1ef5   :  { %v7771_v28 = vmul.f32 -1.442695, %v6791_v27  ;;  %v7773_v33 = vmul.f32 -1.442695, %v6841_v6 }
0x1ef7   :  { %9804 = vpow2.f32 %v7771_v28 }
0x1ef8   :  { %9806 = vpow2.f32 %v7773_v33  ;;  %v6882_v5 = vpop.f32.mrb[252].mxu0  ;;  %v6927_v38 = vpop.f32.mrb[252].mxu1 }
0x1ef9   :  { %v6934_v41 = vrot.slane %v6927_v38, 3  ;;  %v9220_v11 = vpop.f32.mrb[253].mxu0  ;;  %v9228_v49 = vpop.f32.mrb[253].mxu1  ;;  %v6889_v10 = vrot.slane %v6882_v5, 3 }
0x1efa   :  { %v6885_v45 = vpop.f32.mrb[254].mxu0  ;;  %v6930_v25 = vpop.f32.mrb[254].mxu1 }
0x1efb   :  { %v6936_v46 = vadd.f32 %v6934_v41, %v10884_v17  ;;  %v9221_v12 = vpop.f32.mrb[255].mxu0  ;;  %v9229_v51 = vpop.f32.mrb[255].mxu1  ;;  %v6891_v52 = vadd.f32 %v6889_v10, %v10882_v42 }
0x1efd   :  { %v7776_v16 = vmul.f32 -1.442695, %v6936_v46 }
0x1eff   :  { %9808 = vpow2.f32 %v7776_v16 }
0x1f00   :  { %9810 = vtanh.f32 %v6891_v52 }
0x1f01   :  { %v9805_v31 = vpop.eup %9804 }
0x1f02   :  { %v9807_v30 = vpop.eup %9806  ;;  %v6795_v32 = vadd.f32 1.0, %v9805_v31 }
0x1f03   :  { %v6845_v34 = vadd.f32 1.0, %v9807_v30 }
0x1f04   :  { %9812 = vrcp.f32 %v6795_v32 }
0x1f05   :  { %9814 = vrcp.f32 %v6845_v34 }
0x1f09   :  { %v9809_v35 = vpop.eup %9808 }
0x1f0a   :  { %v9811_v48 = vpop.eup %9810  ;;  %v6940_v47 = vadd.f32 1.0, %v9809_v35 }
0x1f0c   :  { %9816 = vrcp.f32 %v6940_v47  ;;  %v9339_v47 = vld [vmem:[%s11543_s5 + $0x8] sm:$0xff]  }
0x1f0e   :  { %v9813_v21 = vpop.eup %9812 }
0x1f0f   :  { %v9815_v53 = vpop.eup %9814  ;;  %v6947_v36 = vmul.f32 %v9813_v21, %v9811_v48 }
0x1f10   :  { %v6946_v54 = vmul.f32 %v9815_v53, %v6944_v50 }
0x1f12   :  { %v11426_v55 = vadd.f32 %v6947_v36, %v6946_v54  ;;  %v9338_v36 = vld [vmem:[%s11543_s5] sm:$0xff]  }
0x1f14   :  { %9818 = vtanh.f32 %v11426_v55  ;;  %v7155_v16 = vrot.slane %v11426_v55, 7 }
0x1f16   :  { %v9817_v44 = vpop.eup %9816 }
0x1f1e   :  { %v9819_v22 = vpop.eup %9818 }
0x1f1f   :  { %v6950_v56 = vmul.f32 %v9819_v22, %v9817_v44 }
0x1f21   :  { %v6951_v57 = vpack.c.bf16 %v6950_v56, %v6950_v56 }
0x1f23   :  { %v6953_v43 = vshrl.u32 %v6951_v57, 16 }
0x1f25   :  { %v6955_v58 = vrot.slane %v6953_v43, 2 }
0x1f27   :  { %9235 = vmatmul.mubr.msk.bf16.vlgmr.msra.gmra.mrb[0].mxu0 %vm30_vm1, %v6955_v58  ;;  %9243 = vmatmul.mubr.msk.bf16.vlgmr.msra.gmra.mrb[0].mxu1 %vm30_vm1, %v6955_v58 }
0x1f28   :  { %9247 = vmatpush3.bf16.msra.mxu0 %v11434_v60  ;;  %9255 = vmatpush3.bf16.msra.mxu1 %v11440_v61 }
0x1f29   :  { %9248 = vmatprep.subr.bf16.mxu0 %v9908_v1  ;;  %9256 = vmatprep.subr.bf16.mxu1 %v9908_v1 }
0x1f2a   :  { %9250 = vmatprep.mubr.msk.bf16.mxu0 %vm9909_vm0, %v9908_v1  ;;  %9258 = vmatprep.mubr.msk.bf16.mxu1 %vm9909_vm0, %v9908_v1 }
0x1f2c   :  { %9249 = vmatpush3.bf16.msra.mxu0 %v11452_v39  ;;  %9257 = vmatpush3.bf16.msra.mxu1 %v11458_v2 }
0x1f2d   :  { %9262 = vmatprep.subr.bf16.mxu0 %v9908_v1  ;;  %9270 = vmatprep.subr.bf16.mxu1 %v9908_v1 }
0x1f2f   :  { %9251 = vmatmul.mubr.msk.bf16.vlgmr.msra.gmra.mrb[4].mxu0 %vm30_vm1, %v6955_v58  ;;  %9259 = vmatmul.mubr.msk.bf16.vlgmr.msra.gmra.mrb[4].mxu1 %vm30_vm1, %v6955_v58 }
0x1f30   :  { %9263 = vmatpush3.bf16.msra.mxu0 %v11392_v59  ;;  %9271 = vmatpush3.bf16.msra.mxu1 %v11398_v62 }
0x1f31   :  { %9264 = vmatprep.subr.bf16.mxu0 %v9908_v1  ;;  %9272 = vmatprep.subr.bf16.mxu1 %v9908_v1 }
0x1f32   :  { %9266 = vmatprep.mubr.msk.bf16.mxu0 %vm9909_vm0, %v9908_v1  ;;  %9274 = vmatprep.mubr.msk.bf16.mxu1 %vm9909_vm0, %v9908_v1 }
0x1f34   :  { %9265 = vmatpush3.bf16.msra.mxu0 %v11410_v63  ;;  %9273 = vmatpush3.bf16.msra.mxu1 %v11416_v0 }
0x1f35   :  { %9278 = vmatprep.subr.bf16.mxu0 %v9908_v1  ;;  %9286 = vmatprep.subr.bf16.mxu1 %v9908_v1 }
0x1ffa   :  { %v6993_v9 = vpop.f32.mrb[0].mxu0  ;;  %v7043_v23 = vpop.f32.mrb[0].mxu1 }
0x1ffb   :  { %v7000_v24 = vrot.slane %v6993_v9, 2  ;;  %v7050_v14 = vrot.slane %v7043_v23, 2  ;;  %v9236_v3 = vpop.f32.mrb[1].mxu0  ;;  %v9244_v59 = vpop.f32.mrb[1].mxu1 }
0x1ffc   :  { %v6996_v62 = vpop.f32.mrb[2].mxu0  ;;  %v7046_v4 = vpop.f32.mrb[2].mxu1 }
0x1ffd   :  { %v7002_v20 = vadd.f32 %v7000_v24, %v10872_v37  ;;  %v7052_v15 = vadd.f32 %v7050_v14, %v10874_v29  ;;  %v9237_v40 = vpop.f32.mrb[3].mxu0  ;;  %v9245_v63 = vpop.f32.mrb[3].mxu1 }
0x1fff   :  { %v7778_v13 = vmul.f32 -1.442695, %v7002_v20  ;;  %v7780_v0 = vmul.f32 -1.442695, %v7052_v15 }
0x2001   :  { %9820 = vpow2.f32 %v7778_v13 }
0x2002   :  { %9822 = vpow2.f32 %v7780_v0  ;;  %v7093_v18 = vpop.f32.mrb[4].mxu0  ;;  %v7138_v26 = vpop.f32.mrb[4].mxu1 }
0x2003   :  { %v7145_v19 = vrot.slane %v7138_v26, 2  ;;  %v9252_v27 = vpop.f32.mrb[5].mxu0  ;;  %v9260_v6 = vpop.f32.mrb[5].mxu1  ;;  %v7100_v28 = vrot.slane %v7093_v18, 2 }
0x2004   :  { %v7096_v7 = vpop.f32.mrb[6].mxu0  ;;  %v7141_v8 = vpop.f32.mrb[6].mxu1 }
0x2005   :  { %v7147_v33 = vadd.f32 %v7145_v19, %v10884_v17  ;;  %v9253_v5 = vpop.f32.mrb[7].mxu0  ;;  %v9261_v38 = vpop.f32.mrb[7].mxu1  ;;  %v7102_v11 = vadd.f32 %v7100_v28, %v10882_v42 }
0x2007   :  { %v7783_v41 = vmul.f32 -1.442695, %v7147_v33 }
0x2009   :  { %9824 = vpow2.f32 %v7783_v41 }
0x200a   :  { %9826 = vtanh.f32 %v7102_v11 }
0x200b   :  { %v9821_v49 = vpop.eup %9820 }
0x200c   :  { %v9823_v45 = vpop.eup %9822  ;;  %v7006_v25 = vadd.f32 1.0, %v9821_v49 }
0x200d   :  { %v7056_v10 = vadd.f32 1.0, %v9823_v45  ;;  %v7379_v45 = vld [vmem:[%s11542_s4] sm:$0x3]  ;;  %s9884_s4 = scalar_lea.vmem %s7457_s30, 32 }
0x200e   :  { %9828 = vrcp.f32 %v7006_v25  ;;  %p9885_p0 = scmp.ne.s32.totalorder %s7457_s30, %s9884_s4  ;;  %p9890_p2 = scmp.lt.s32.totalorder %s9884_s4, %s9884_s4 }
0x200f   :  { %9830 = vrcp.f32 %v7056_v10 }
0x2010   :  { %p9891_p3 = por %p9890_p2, %p9889_p1 }
0x2012   :  { %p9892_p4 = pnand %p9891_p3, %p9885_p0 }
0x2013   :  { %v9825_v46 = vpop.eup %9824 }
0x2014   :  { %v9827_v12 = vpop.eup %9826  ;;  %v7151_v30 = vadd.f32 1.0, %v9825_v46 }
0x2016   :  { %9832 = vrcp.f32 %v7151_v30 }
0x2018   :  { %v9829_v51 = vpop.eup %9828 }
0x2019   :  { %v9831_v52 = vpop.eup %9830  ;;  %v7158_v31 = vmul.f32 %v9829_v51, %v9827_v12  ;;  %v7791_v12 = vld [vmem:[%s11544_s6] ss:$0 sm:$0xff] }
0x201a   :  { %v7157_v32 = vmul.f32 %v9831_v52, %v7155_v16 }
0x201c   :  { %v11482_v34 = vadd.f32 %v7158_v31, %v7157_v32 }
0x201e   :  { %9834 = vtanh.f32 %v11482_v34  ;;  %v7364_v7 = vrot.slane %v11482_v34, 7 }
0x2020   :  { %v9833_v35 = vpop.eup %9832 }
0x2028   :  { %v9835_v48 = vpop.eup %9834 }
0x2029   :  { %v11485_v21 = vmul.f32 %v9835_v48, %v9833_v35 }
0x202b   :  { %v7162_v50 = vpack.c.bf16 %v11485_v21, %v11485_v21  ;;  %v7372_v11 = vrot.slane %v11485_v21, 6 }
0x202d   :  { %v7164_v53 = vrot.slane %v7162_v50, 3 }
0x202f   :  { %9267 = vmatmul.mubr.msk.bf16.vlgmr.msra.gmra.mrb[8].mxu0 %vm30_vm1, %v7164_v53  ;;  %9275 = vmatmul.mubr.msk.bf16.vlgmr.msra.gmra.mrb[8].mxu1 %vm30_vm1, %v7164_v53 }
0x2030   :  { %9279 = vmatpush3.bf16.msra.mxu0 %v11434_v60  ;;  %9287 = vmatpush3.bf16.msra.mxu1 %v11440_v61 }
0x2031   :  { %9280 = vmatprep.subr.bf16.mxu0 %v9908_v1  ;;  %9288 = vmatprep.subr.bf16.mxu1 %v9908_v1 }
0x2032   :  { %9282 = vmatprep.mubr.msk.bf16.mxu0 %vm9909_vm0, %v9908_v1  ;;  %9290 = vmatprep.mubr.msk.bf16.mxu1 %vm9909_vm0, %v9908_v1 }
0x2034   :  { %9281 = vmatpush3.bf16.msra.mxu0 %v11452_v39  ;;  %9289 = vmatpush3.bf16.msra.mxu1 %v11458_v2 }
0x2035   :  { %9294 = vmatprep.subr.bf16.mxu0 %v9908_v1 }
0x2037   :  { %9283 = vmatmul.mubr.msk.bf16.vlgmr.msra.gmra.mrb[12].mxu0 %vm30_vm1, %v7164_v53  ;;  %9291 = vmatmul.mubr.msk.bf16.vlgmr.msra.gmra.mrb[12].mxu1 %vm30_vm1, %v7164_v53 }
0x2038   :  { %9298 = vmatprep.mubr.msk.bf16.mxu0 %vm9909_vm0, %v9908_v1  ;;  %9295 = vmatpush3.bf16.msra.mxu0 %v9338_v36 }
0x2039   :  { %9296 = vmatprep.subr.bf16.mxu0 %v9908_v1 }
0x203c   :  { %9297 = vmatpush3.bf16.msra.mxu0 %v9339_v47 }
0x2102   :  { %v7202_v54 = vpop.f32.mrb[8].mxu0  ;;  %v7252_v55 = vpop.f32.mrb[8].mxu1 }
0x2103   :  { %v7209_v44 = vrot.slane %v7202_v54, 1  ;;  %v7259_v22 = vrot.slane %v7252_v55, 1  ;;  %v9268_v56 = vpop.f32.mrb[9].mxu0  ;;  %v9276_v57 = vpop.f32.mrb[9].mxu1 }
0x2104   :  { %v7205_v43 = vpop.f32.mrb[10].mxu0  ;;  %v7255_v58 = vpop.f32.mrb[10].mxu1 }
0x2105   :  { %v7211_v60 = vadd.f32 %v7209_v44, %v10872_v37  ;;  %v7261_v61 = vadd.f32 %v7259_v22, %v10874_v29  ;;  %v9269_v39 = vpop.f32.mrb[11].mxu0  ;;  %v9277_v2 = vpop.f32.mrb[11].mxu1 }
0x2107   :  { %v7785_v1 = vmul.f32 -1.442695, %v7211_v60  ;;  %v7787_v9 = vmul.f32 -1.442695, %v7261_v61 }
0x2109   :  { %9836 = vpow2.f32 %v7785_v1 }
0x210a   :  { %9838 = vpow2.f32 %v7787_v9  ;;  %v7302_v23 = vpop.f32.mrb[12].mxu0  ;;  %v7347_v24 = vpop.f32.mrb[12].mxu1 }
0x210b   :  { %v7354_v14 = vrot.slane %v7347_v24, 1  ;;  %v9284_v3 = vpop.f32.mrb[13].mxu0  ;;  %v9292_v59 = vpop.f32.mrb[13].mxu1  ;;  %v7309_v20 = vrot.slane %v7302_v23, 1 }
0x210c   :  { %v7305_v62 = vpop.f32.mrb[14].mxu0  ;;  %v7350_v4 = vpop.f32.mrb[14].mxu1 }
0x210d   :  { %v7356_v15 = vadd.f32 %v7354_v14, %v10884_v17  ;;  %v9285_v40 = vpop.f32.mrb[15].mxu0  ;;  %v9293_v37 = vpop.f32.mrb[15].mxu1  ;;  %v7311_v29 = vadd.f32 %v7309_v20, %v10882_v42 }
0x210f   :  { %v7790_v63 = vmul.f32 -1.442695, %v7356_v15 }
0x2111   :  { %9840 = vpow2.f32 %v7790_v63 }
0x2112   :  { %9842 = vtanh.f32 %v7311_v29 }
0x2113   :  { %v9837_v13 = vpop.eup %9836 }
0x2114   :  { %v9839_v0 = vpop.eup %9838  ;;  %v7215_v18 = vadd.f32 1.0, %v9837_v13 }
0x2115   :  { %v7265_v26 = vadd.f32 1.0, %v9839_v0 }
0x2116   :  { %9844 = vrcp.f32 %v7215_v18 }
0x2117   :  { %9846 = vrcp.f32 %v7265_v26 }
0x211b   :  { %v9841_v19 = vpop.eup %9840 }
0x211c   :  { %v9843_v27 = vpop.eup %9842  ;;  %v7360_v28 = vadd.f32 1.0, %v9841_v19 }
0x211e   :  { %9848 = vrcp.f32 %v7360_v28 }
0x2120   :  { %v9845_v6 = vpop.eup %9844 }
0x2121   :  { %v9847_v8 = vpop.eup %9846  ;;  %v7367_v17 = vmul.f32 %v9845_v6, %v9843_v27 }
0x2122   :  { %v7366_v33 = vmul.f32 %v9847_v8, %v7364_v7 }
0x2124   :  { %v7368_v5 = vadd.f32 %v7367_v17, %v7366_v33 }
0x2126   :  { %9850 = vtanh.f32 %v7368_v5 }
0x2128   :  { %v9849_v42 = vpop.eup %9848 }
0x2130   :  { %v9851_v38 = vpop.eup %9850 }
0x2131   :  { %v7370_v41 = vmul.f32 %v9851_v38, %v9849_v42 }
0x2133   :  { %v7375_v49 = vrot.slane %v7370_v41, 6 }
0x2135   :  { %v7378_v25 = vsel %vm7377_vm10, %v7372_v11, %v7375_v49 }
0x2136   :  { %v7380_v10 = vmul.f32 %v7379_v45, %v7378_v25 }
0x2138   :  { %v7381_v46 = vpack.c.bf16 %v7380_v10, %v7380_v10 }
0x213a   :  { %9299 = vmatmul.mubr.msk.bf16.vlgmr.msra.gmra.mrb[16].mxu0 %vm30_vm1, %v7381_v46 }
0x220d   :  { %v7442_v51 = vpop.f32.mrb[16].mxu0 }
0x220e   :  { %v7443_v16 = vadd.f32 %v7791_v12, %v7442_v51  ;;  %v9300_v52 = vpop.f32.mrb[17].mxu0 }
0x220f   :  { %v7445_v31 = vpop.f32.mrb[18].mxu0 }
0x2210   :  { %v9301_v30 = vpop.f32.mrb[19].mxu0  ;;  %7449 = vst.msk [vmem:[#allocation3] sm:$0x3] %vm7448_vm11, %v7443_v16 }
0x2211   :  { %9895 = shalt.err (!%p9892_p4)
}
0x2212   :  { %s9896_s6 = scalar_lea.hbm %s11545_s7, 32 }
0x2213   :  { %p9897_p5 = scmp.ne.s32.totalorder %s11545_s7, %s9896_s6  ;;  %p9900_p6 = scmp.lt.u32.totalorder %s9896_s6, %s11545_s7 }
0x2215   :  { %p9902_p7 = pnand %p9900_p6, %p9897_p5 }
0x2217   :  { %9905 = shalt.err (!%p9902_p7)
}
0x2218   :  { %7459 = dma.vmem_to_hbm [thread:$0]  %s7457_s30, 32, %s11545_s7, [#allocation4]  }
0x2219   :  { %9906 = dma.done.wait [#allocation4], 32  }
0x221a   :  { %9907 = vsyncadd [#allocation4], 4294967264 }
0x221b   :  { %7463 = vsyncpa [#allocation4], 1 }

</bundles_post_ra>
